<compile_context>
chip_gen: v6e
topology: v6e:2x2x1
jax: 0.10.0
libtpu: 0.0.40
codegen_flags: <defaults>
</compile_context>

<pallas_src>
import functools

import jax
import jax.numpy as jnp
from jax.experimental import pallas as pl
from jax.experimental.pallas import tpu as pltpu

# Stay within v7x's 64 MiB VMEM per TensorCore (v5e/v6e have 128 MiB).
_VMEM_LIMIT = 48 * 1024 * 1024

# (C_out, C_in) per conv layer of Dis: 3->64, 64->128, 128->256, 256->512, 512->1
_DIS_CHANNELS = [(64, 3), (128, 64), (256, 128), (512, 256), (1, 512)]


def _round_up(x, m):
    return (x + m - 1) // m * m


# ----------------------------- Pallas kernels ------------------------------

def _matmul_bias_act_kernel(a_ref, b_ref, bias_ref, o_ref, acc_ref, *, leaky_slope):
    """One (tm, tn) output tile of one sample; K is the last ('arbitrary') axis."""
    k = pl.program_id(3)

    @pl.when(k == 0)
    def _():
        acc_ref[...] = jnp.zeros_like(acc_ref)

    # bf16 x bf16 -> f32 accumulation on the MXU.
    acc_ref[...] += jnp.dot(a_ref[0], b_ref[...],
                            preferred_element_type=jnp.float32)

    @pl.when(k == pl.num_programs(3) - 1)
    def _():
        out = acc_ref[...] + bias_ref[...]          # f32 epilogue on the VPU
        if leaky_slope is not None:
            out = jnp.where(out >= 0, out, leaky_slope * out)
        o_ref[0] = out.astype(o_ref.dtype)          # single f32 -> out-dtype cast


def matmul_bias_act(a, b2d, bias2d, leaky_slope=None, out_dtype=jnp.bfloat16):
    """a: (B, M, K) bf16, b2d: (K, Np) bf16, bias2d: (1, Np) f32.

    Returns (B, Mp, Np) where Mp == M unless M > 512 and needed padding.
    """
    B, M, K = a.shape
    K2, Np = b2d.shape
    assert K == K2 and Np % 128 == 0

    # tn covers all of Np (<= 512 for every Dis layer) so the N axis collapses.
    tn = Np if Np <= 512 else 512
    while Np % tn:
        tn -= 128
    # tm covers the whole per-sample row count when it fits (a block equal to
    # the full array dim is always legal, even when M is not a multiple of 8).
    tm = M if M <= 512 else 512
    Mp = _round_up(M, tm)

    # K tile: as deep as keeping each double-buffered bf16 operand stream at or
    # under ~8 MiB allows.  At these layer shapes this yields a single K step.
    tk_cap = max(512, min((4 << 20) // (tm * 2), (4 << 20) // (tn * 2)))
    if K <= tk_cap:
        tk = K                      # single step; legal even when K % 128 != 0
    else:
        tk = (tk_cap // 128) * 128
        while tk > 128 and K % tk:
            tk -= 128

    if Mp != M:
        a = jnp.pad(a, ((0, 0), (0, Mp - M), (0, 0)))

    kernel = functools.partial(_matmul_bias_act_kernel, leaky_slope=leaky_slope)
    out = pl.pallas_call(
        kernel,
        out_shape=jax.ShapeDtypeStruct((B, Mp, Np), out_dtype),
        grid=(B, Mp // tm, Np // tn, K // tk),
        in_specs=[
            pl.BlockSpec((1, tm, tk), lambda n, i, j, k: (n, i, k)),
            pl.BlockSpec((tk, tn), lambda n, i, j, k: (k, j)),
            pl.BlockSpec((1, tn), lambda n, i, j, k: (0, j)),
        ],
        out_specs=pl.BlockSpec((1, tm, tn), lambda n, i, j, k: (n, i, j)),
        scratch_shapes=[pltpu.VMEM((tm, tn), jnp.float32)],
        compiler_params=pltpu.CompilerParams(
            dimension_semantics=("parallel", "parallel", "parallel", "arbitrary"),
            vmem_limit_bytes=_VMEM_LIMIT),
    )(a, b2d, bias2d)
    return out


def _inorm_lrelu_kernel(x_ref, o_ref, *, eps, leaky_slope, inv_hw):
    # x: (1, H*W, ct) -- per-(sample, channel) normalization over the spatial
    # axis, biased variance, no affine (torch.nn.InstanceNorm2d defaults).
    # Single pass over the block: sum and sum-of-squares in f32.
    x = x_ref[...].astype(jnp.float32)
    mean = jnp.sum(x, axis=1, keepdims=True) * inv_hw
    ex2 = jnp.sum(x * x, axis=1, keepdims=True) * inv_hw
    var = jnp.maximum(ex2 - mean * mean, 0.0)
    y = (x - mean) * jax.lax.rsqrt(var + eps)
    o_ref[...] = jnp.where(y >= 0, y, leaky_slope * y).astype(o_ref.dtype)


def instance_norm_lrelu(x_nhwc, eps=1e-5, leaky_slope=0.2, out_dtype=jnp.bfloat16):
    N, H, W, C = x_nhwc.shape
    HW = H * W
    # Full channel width per block (grid is just (batch, 1)) unless the f32
    # working set would get large; C is a power-of-two multiple of 128 here.
    ct = C
    while HW * ct * 4 > (8 << 20) and ct > 128 and ct % 2 == 0:
        ct //= 2
    x3 = x_nhwc.reshape(N, HW, C)
    kernel = functools.partial(_inorm_lrelu_kernel, eps=eps,
                               leaky_slope=leaky_slope, inv_hw=1.0 / HW)
    y = pl.pallas_call(
        kernel,
        out_shape=jax.ShapeDtypeStruct((N, HW, C), out_dtype),
        grid=(N, C // ct),
        in_specs=[pl.BlockSpec((1, HW, ct), lambda n, c: (n, 0, c))],
        out_specs=pl.BlockSpec((1, HW, ct), lambda n, c: (n, 0, c)),
        compiler_params=pltpu.CompilerParams(
            dimension_semantics=("parallel", "parallel"),
            vmem_limit_bytes=_VMEM_LIMIT),
    )(x3)
    return y.reshape(N, H, W, C)


# ------------------------------- glue (JAX) --------------------------------

def _im2col(x, k, stride):
    """x: (N, H, W, C) already padded, bf16. Returns (N, Ho*Wo, k*k*C), Ho, Wo."""
    N, H, W, C = x.shape
    Ho = (H - k) // stride + 1
    Wo = (W - k) // stride + 1
    patches = []
    for di in range(k):
        for dj in range(k):
            patches.append(
                x[:, di:di + stride * (Ho - 1) + 1:stride,
                     dj:dj + stride * (Wo - 1) + 1:stride, :])
    cols = jnp.stack(patches, axis=3)  # (N, Ho, Wo, k*k, C)
    return cols.reshape(N, Ho * Wo, k * k * C), Ho, Wo


def conv2d(x_nhwc, w2d, bias2d, c_out, ksize, stride, leaky_slope=None,
           out_dtype=jnp.bfloat16):
    """Conv on pre-padded NHWC input; weights are pre-prepared (K, Np) bf16."""
    # TODO(synk): stream shifted/strided 4x4 windows of the raw activation from
    # HBM inside the matmul kernel instead of materializing im2col.
    B = x_nhwc.shape[0]
    a, Ho, Wo = _im2col(x_nhwc, ksize, stride)
    y = matmul_bias_act(a, w2d, bias2d, leaky_slope=leaky_slope,
                        out_dtype=out_dtype)
    M = Ho * Wo
    if y.shape[1] != M or y.shape[2] != c_out:
        y = y[:, :M, :c_out]
    return y.reshape(B, Ho, Wo, c_out)


def init_params(key):
    params = []
    for co, ci in _DIS_CHANNELS:
        key, k1, k2 = jax.random.split(key, 3)
        w = jax.random.normal(k1, (co, ci, 4, 4), jnp.float32) * 0.02
        b = jax.random.normal(k2, (co,), jnp.float32) * 0.02
        params.append((w, b))
    return params


def prepare_params(params):
    """Hoisted (once-per-model) weight prep: PyTorch (Cout,Cin,kH,kW) ->
    (kH*kW*Cin, Np) bf16 with lane-padded N, plus a padded f32 bias row."""
    prepped = []
    for w, b in params:
        c_out, c_in, kh, kw = w.shape
        n_pad = _round_up(c_out, 128)
        w2d = jnp.transpose(w, (2, 3, 1, 0)).reshape(kh * kw * c_in, c_out)
        w2d = jnp.pad(w2d, ((0, 0), (0, n_pad - c_out))).astype(jnp.bfloat16)
        b2d = jnp.pad(b.astype(jnp.float32).reshape(1, c_out),
                      ((0, 0), (0, n_pad - c_out)))
        prepped.append((w2d, b2d))
    return prepped


def dis_forward(x_nchw, prepped):
    x = jnp.transpose(x_nchw, (0, 2, 3, 1)).astype(jnp.bfloat16)  # -> NHWC

    # Block 1: ReflectionPad2d(1) -> Conv2d(3, 64, 4, stride=2) -> LeakyReLU(0.2)
    x = jnp.pad(x, ((0, 0), (1, 1), (1, 1), (0, 0)), mode="reflect")
    x = conv2d(x, prepped[0][0], prepped[0][1], _DIS_CHANNELS[0][0],
               4, stride=2, leaky_slope=0.2)

    # Blocks 2-4: ReflectionPad2d(1) -> Conv(s=2) -> InstanceNorm2d -> LeakyReLU(0.2)
    for i in range(1, 4):
        x = jnp.pad(x, ((0, 0), (1, 1), (1, 1), (0, 0)), mode="reflect")
        x = conv2d(x, prepped[i][0], prepped[i][1], _DIS_CHANNELS[i][0],
                   4, stride=2, leaky_slope=None)
        x = instance_norm_lrelu(x)

    # Final: ZeroPad2d((1,0,1,0)) -> Conv2d(512, 1, 4, padding=1)
    # combined zero padding: top/left = 1+1 = 2, bottom/right = 0+1 = 1
    x = jnp.pad(x, ((0, 0), (2, 1), (2, 1), (0, 0)))
    x = conv2d(x, prepped[4][0], prepped[4][1], _DIS_CHANNELS[4][0],
               4, stride=1, leaky_slope=None, out_dtype=jnp.float32)

    return jnp.transpose(x, (0, 3, 1, 2))  # -> NCHW


if __name__ == "__main__":
    key = jax.random.PRNGKey(0)
    kx, kp = jax.random.split(key)
    x = jax.random.normal(kx, (2, 3, 32, 32), jnp.float32)
    params = init_params(kp)
    prepped = prepare_params(params)   # weight transpose/pad/cast done once

    out = jax.jit(dis_forward)(x, prepped)
    out = jax.block_until_ready(out)
    assert out.shape == (2, 1, 2, 2), out.shape
    assert out.dtype == jnp.float32
    print("KERNEL_OK")
</pallas_src>

<mosaic_0001>
module attributes {stable_mosaic.version = 11 : i64} {
  func.func @_matmul_bias_act_kernel(%arg0: i32, %arg1: i32, %arg2: i32, %arg3: i32, %arg4: memref<1x256x48xbf16, #tpu.memory_space<vmem>>, %arg5: memref<48x128xbf16, #tpu.memory_space<vmem>>, %arg6: memref<1x128xf32, #tpu.memory_space<vmem>>, %arg7: memref<1x256x128xbf16, #tpu.memory_space<vmem>>, %arg8: memref<256x128xf32, #tpu.memory_space<vmem>>) attributes {dimension_semantics = [#tpu.dimension_semantics<parallel>, #tpu.dimension_semantics<parallel>, #tpu.dimension_semantics<parallel>, #tpu.dimension_semantics<arbitrary>], iteration_bounds = array<i64: 2, 1, 1, 1>, scalar_prefetch = 0 : i64, scratch_operands = 1 : i64, tpu.core_type = #tpu.core_type<tc>, window_params = [{transform_indices = @transform_0, window_bounds = array<i64: 1, 256, 48>}, {transform_indices = @transform_1, window_bounds = array<i64: 48, 128>}, {transform_indices = @transform_2, window_bounds = array<i64: 1, 128>}, {transform_indices = @transform_3, window_bounds = array<i64: 1, 256, 128>}]} {
    %c0_i32 = arith.constant 0 : i32
    %0 = arith.cmpi eq, %arg3, %c0_i32 : i32
    %1 = arith.extui %0 : i1 to i32
    %c0_i32_0 = arith.constant 0 : i32
    %2 = arith.cmpi ne, %1, %c0_i32_0 : i32
    scf.if %2 {
      %cst_11 = arith.constant 0.000000e+00 : f32
      %13 = vector.broadcast %cst_11 : f32 to vector<256x128xf32>
      %c0_12 = arith.constant 0 : index
      %c0_13 = arith.constant 0 : index
      %14 = vector.load %arg8[%c0_12, %c0_13] : memref<256x128xf32, #tpu.memory_space<vmem>>, vector<256x128xf32>
      tpu.vector_store %arg8[%c0_12, %c0_13], %13 {strides = array<i32>} : memref<256x128xf32, #tpu.memory_space<vmem>>, vector<256x128xf32>,
    } else {
    }
    %c0 = arith.constant 0 : index
    %c0_1 = arith.constant 0 : index
    %3 = vector.load %arg8[%c0, %c0_1] : memref<256x128xf32, #tpu.memory_space<vmem>>, vector<256x128xf32>
    %c0_2 = arith.constant 0 : index
    %c0_3 = arith.constant 0 : index
    %c0_4 = arith.constant 0 : index
    %4 = vector.load %arg4[%c0_2, %c0_3, %c0_4] : memref<1x256x48xbf16, #tpu.memory_space<vmem>>, vector<1x256x48xbf16>
    %5 = vector.shape_cast %4 : vector<1x256x48xbf16> to vector<256x48xbf16>
    %c0_5 = arith.constant 0 : index
    %c0_6 = arith.constant 0 : index
    %6 = vector.load %arg5[%c0_5, %c0_6] : memref<48x128xbf16, #tpu.memory_space<vmem>>, vector<48x128xbf16>
    %cst = arith.constant dense<0.000000e+00> : vector<256x128xf32>
    %7 = tpu.matmul %5, %6, %cst {dimension_numbers = #tpu.dot_dimension_numbers<[1], [0], [0], [1], [0, 0, 1, 1], [], []>} : vector<256x48xbf16>, vector<48x128xbf16>, vector<256x128xf32> -> vector<256x128xf32>
    %8 = arith.addf %3, %7 : vector<256x128xf32>
    %c0_7 = arith.constant 0 : index
    %c0_8 = arith.constant 0 : index
    %9 = vector.load %arg8[%c0_7, %c0_8] : memref<256x128xf32, #tpu.memory_space<vmem>>, vector<256x128xf32>
    tpu.vector_store %arg8[%c0_7, %c0_8], %8 {strides = array<i32>} : memref<256x128xf32, #tpu.memory_space<vmem>>, vector<256x128xf32>,
    %c0_i32_9 = arith.constant 0 : i32
    %10 = arith.cmpi eq, %arg3, %c0_i32_9 : i32
    %11 = arith.extui %10 : i1 to i32
    %c0_i32_10 = arith.constant 0 : i32
    %12 = arith.cmpi ne, %11, %c0_i32_10 : i32
    scf.if %12 {
      %c0_11 = arith.constant 0 : index
      %c0_12 = arith.constant 0 : index
      %13 = vector.load %arg8[%c0_11, %c0_12] : memref<256x128xf32, #tpu.memory_space<vmem>>, vector<256x128xf32>
      %c0_13 = arith.constant 0 : index
      %c0_14 = arith.constant 0 : index
      %14 = vector.load %arg6[%c0_13, %c0_14] : memref<1x128xf32, #tpu.memory_space<vmem>>, vector<1x128xf32>
      %15 = vector.broadcast %14 : vector<1x128xf32> to vector<256x128xf32>
      %16 = arith.addf %13, %15 : vector<256x128xf32>
      %cst_15 = arith.constant 0.000000e+00 : f32
      %17 = vector.broadcast %cst_15 : f32 to vector<256x128xf32>
      %18 = arith.cmpf oge, %16, %17 : vector<256x128xf32>
      %cst_16 = arith.constant 2.000000e-01 : f32
      %19 = vector.broadcast %cst_16 : f32 to vector<256x128xf32>
      %20 = arith.mulf %19, %16 : vector<256x128xf32>
      %21 = arith.select %18, %16, %20 : vector<256x128xi1>, vector<256x128xf32>
      %22 = arith.truncf %21 : vector<256x128xf32> to vector<256x128xbf16>
      %c0_17 = arith.constant 0 : index
      %c0_18 = arith.constant 0 : index
      %c0_19 = arith.constant 0 : index
      %23 = vector.load %arg7[%c0_17, %c0_18, %c0_19] : memref<1x256x128xbf16, #tpu.memory_space<vmem>>, vector<1x256x128xbf16>
      %24 = vector.shape_cast %23 : vector<1x256x128xbf16> to vector<256x128xbf16>
      %25 = vector.shape_cast %22 : vector<256x128xbf16> to vector<1x256x128xbf16>
      tpu.vector_store %arg7[%c0_17, %c0_18, %c0_19], %25 {strides = array<i32>} : memref<1x256x128xbf16, #tpu.memory_space<vmem>>, vector<1x256x128xbf16>,
    } else {
    }
    return
  }
  func.func @transform_0(%arg0: i32, %arg1: i32, %arg2: i32, %arg3: i32) -> (i32, i32, i32) {
    %c0_i32 = arith.constant 0 : i32
    return %arg0, %arg1, %arg3 : i32, i32, i32
  }
  func.func @transform_1(%arg0: i32, %arg1: i32, %arg2: i32, %arg3: i32) -> (i32, i32) {
    %c0_i32 = arith.constant 0 : i32
    return %arg3, %arg2 : i32, i32
  }
  func.func @transform_2(%arg0: i32, %arg1: i32, %arg2: i32, %arg3: i32) -> (i32, i32) {
    %c0_i32 = arith.constant 0 : i32
    %c0_i32_0 = arith.constant 0 : i32
    return %c0_i32, %arg2 : i32, i32
  }
  func.func @transform_3(%arg0: i32, %arg1: i32, %arg2: i32, %arg3: i32) -> (i32, i32, i32) {
    %c0_i32 = arith.constant 0 : i32
    return %arg0, %arg1, %arg2 : i32, i32, i32
  }
}

module attributes {stable_mosaic.version = 11 : i64} {
  func.func @_matmul_bias_act_kernel(%arg0: i32, %arg1: i32, %arg2: i32, %arg3: i32, %arg4: memref<1x64x1024xbf16, #tpu.memory_space<vmem>>, %arg5: memref<1024x128xbf16, #tpu.memory_space<vmem>>, %arg6: memref<1x128xf32, #tpu.memory_space<vmem>>, %arg7: memref<1x64x128xbf16, #tpu.memory_space<vmem>>, %arg8: memref<64x128xf32, #tpu.memory_space<vmem>>) attributes {dimension_semantics = [#tpu.dimension_semantics<parallel>, #tpu.dimension_semantics<parallel>, #tpu.dimension_semantics<parallel>, #tpu.dimension_semantics<arbitrary>], iteration_bounds = array<i64: 2, 1, 1, 1>, scalar_prefetch = 0 : i64, scratch_operands = 1 : i64, tpu.core_type = #tpu.core_type<tc>, window_params = [{transform_indices = @transform_0, window_bounds = array<i64: 1, 64, 1024>}, {transform_indices = @transform_1, window_bounds = array<i64: 1024, 128>}, {transform_indices = @transform_2, window_bounds = array<i64: 1, 128>}, {transform_indices = @transform_3, window_bounds = array<i64: 1, 64, 128>}]} {
    %c0_i32 = arith.constant 0 : i32
    %0 = arith.cmpi eq, %arg3, %c0_i32 : i32
    %1 = arith.extui %0 : i1 to i32
    %c0_i32_0 = arith.constant 0 : i32
    %2 = arith.cmpi ne, %1, %c0_i32_0 : i32
    scf.if %2 {
      %cst_11 = arith.constant 0.000000e+00 : f32
      %13 = vector.broadcast %cst_11 : f32 to vector<64x128xf32>
      %c0_12 = arith.constant 0 : index
      %c0_13 = arith.constant 0 : index
      %14 = vector.load %arg8[%c0_12, %c0_13] : memref<64x128xf32, #tpu.memory_space<vmem>>, vector<64x128xf32>
      tpu.vector_store %arg8[%c0_12, %c0_13], %13 {strides = array<i32>} : memref<64x128xf32, #tpu.memory_space<vmem>>, vector<64x128xf32>,
    } else {
    }
    %c0 = arith.constant 0 : index
    %c0_1 = arith.constant 0 : index
    %3 = vector.load %arg8[%c0, %c0_1] : memref<64x128xf32, #tpu.memory_space<vmem>>, vector<64x128xf32>
    %c0_2 = arith.constant 0 : index
    %c0_3 = arith.constant 0 : index
    %c0_4 = arith.constant 0 : index
    %4 = vector.load %arg4[%c0_2, %c0_3, %c0_4] : memref<1x64x1024xbf16, #tpu.memory_space<vmem>>, vector<1x64x1024xbf16>
    %5 = vector.shape_cast %4 : vector<1x64x1024xbf16> to vector<64x1024xbf16>
    %c0_5 = arith.constant 0 : index
    %c0_6 = arith.constant 0 : index
    %6 = vector.load %arg5[%c0_5, %c0_6] : memref<1024x128xbf16, #tpu.memory_space<vmem>>, vector<1024x128xbf16>
    %cst = arith.constant dense<0.000000e+00> : vector<64x128xf32>
    %7 = tpu.matmul %5, %6, %cst {dimension_numbers = #tpu.dot_dimension_numbers<[1], [0], [0], [1], [0, 0, 1, 1], [], []>} : vector<64x1024xbf16>, vector<1024x128xbf16>, vector<64x128xf32> -> vector<64x128xf32>
    %8 = arith.addf %3, %7 : vector<64x128xf32>
    %c0_7 = arith.constant 0 : index
    %c0_8 = arith.constant 0 : index
    %9 = vector.load %arg8[%c0_7, %c0_8] : memref<64x128xf32, #tpu.memory_space<vmem>>, vector<64x128xf32>
    tpu.vector_store %arg8[%c0_7, %c0_8], %8 {strides = array<i32>} : memref<64x128xf32, #tpu.memory_space<vmem>>, vector<64x128xf32>,
    %c0_i32_9 = arith.constant 0 : i32
    %10 = arith.cmpi eq, %arg3, %c0_i32_9 : i32
    %11 = arith.extui %10 : i1 to i32
    %c0_i32_10 = arith.constant 0 : i32
    %12 = arith.cmpi ne, %11, %c0_i32_10 : i32
    scf.if %12 {
      %c0_11 = arith.constant 0 : index
      %c0_12 = arith.constant 0 : index
      %13 = vector.load %arg8[%c0_11, %c0_12] : memref<64x128xf32, #tpu.memory_space<vmem>>, vector<64x128xf32>
      %c0_13 = arith.constant 0 : index
      %c0_14 = arith.constant 0 : index
      %14 = vector.load %arg6[%c0_13, %c0_14] : memref<1x128xf32, #tpu.memory_space<vmem>>, vector<1x128xf32>
      %15 = vector.broadcast %14 : vector<1x128xf32> to vector<64x128xf32>
      %16 = arith.addf %13, %15 : vector<64x128xf32>
      %17 = arith.truncf %16 : vector<64x128xf32> to vector<64x128xbf16>
      %c0_15 = arith.constant 0 : index
      %c0_16 = arith.constant 0 : index
      %c0_17 = arith.constant 0 : index
      %18 = vector.load %arg7[%c0_15, %c0_16, %c0_17] : memref<1x64x128xbf16, #tpu.memory_space<vmem>>, vector<1x64x128xbf16>
      %19 = vector.shape_cast %18 : vector<1x64x128xbf16> to vector<64x128xbf16>
      %20 = vector.shape_cast %17 : vector<64x128xbf16> to vector<1x64x128xbf16>
      tpu.vector_store %arg7[%c0_15, %c0_16, %c0_17], %20 {strides = array<i32>} : memref<1x64x128xbf16, #tpu.memory_space<vmem>>, vector<1x64x128xbf16>,
    } else {
    }
    return
  }
  func.func @transform_0(%arg0: i32, %arg1: i32, %arg2: i32, %arg3: i32) -> (i32, i32, i32) {
    %c0_i32 = arith.constant 0 : i32
    return %arg0, %arg1, %arg3 : i32, i32, i32
  }
  func.func @transform_1(%arg0: i32, %arg1: i32, %arg2: i32, %arg3: i32) -> (i32, i32) {
    %c0_i32 = arith.constant 0 : i32
    return %arg3, %arg2 : i32, i32
  }
  func.func @transform_2(%arg0: i32, %arg1: i32, %arg2: i32, %arg3: i32) -> (i32, i32) {
    %c0_i32 = arith.constant 0 : i32
    %c0_i32_0 = arith.constant 0 : i32
    return %c0_i32, %arg2 : i32, i32
  }
  func.func @transform_3(%arg0: i32, %arg1: i32, %arg2: i32, %arg3: i32) -> (i32, i32, i32) {
    %c0_i32 = arith.constant 0 : i32
    return %arg0, %arg1, %arg2 : i32, i32, i32
  }
}

module attributes {stable_mosaic.version = 11 : i64} {
  func.func @_inorm_lrelu_kernel(%arg0: i32, %arg1: i32, %arg2: memref<1x64x128xbf16, #tpu.memory_space<vmem>>, %arg3: memref<1x64x128xbf16, #tpu.memory_space<vmem>>) attributes {dimension_semantics = [#tpu.dimension_semantics<parallel>, #tpu.dimension_semantics<parallel>], iteration_bounds = array<i64: 2, 1>, scalar_prefetch = 0 : i64, scratch_operands = 0 : i64, tpu.core_type = #tpu.core_type<tc>, window_params = [{transform_indices = @transform_0, window_bounds = array<i64: 1, 64, 128>}, {transform_indices = @transform_1, window_bounds = array<i64: 1, 64, 128>}]} {
    %c0 = arith.constant 0 : index
    %c0_0 = arith.constant 0 : index
    %c0_1 = arith.constant 0 : index
    %0 = vector.load %arg2[%c0, %c0_0, %c0_1] : memref<1x64x128xbf16, #tpu.memory_space<vmem>>, vector<1x64x128xbf16>
    %1 = arith.extf %0 : vector<1x64x128xbf16> to vector<1x64x128xf32>
    %cst = arith.constant dense<0.000000e+00> : vector<1x128xf32>
    %2 = vector.multi_reduction <add>, %1, %cst [1] : vector<1x64x128xf32> to vector<1x128xf32>
    %3 = vector.shape_cast %2 : vector<1x128xf32> to vector<1x1x128xf32>
    %cst_2 = arith.constant 1.562500e-02 : f32
    %4 = vector.broadcast %cst_2 : f32 to vector<1x1x128xf32>
    %5 = arith.mulf %3, %4 : vector<1x1x128xf32>
    %6 = arith.mulf %1, %1 : vector<1x64x128xf32>
    %cst_3 = arith.constant dense<0.000000e+00> : vector<1x128xf32>
    %7 = vector.multi_reduction <add>, %6, %cst_3 [1] : vector<1x64x128xf32> to vector<1x128xf32>
    %8 = vector.shape_cast %7 : vector<1x128xf32> to vector<1x1x128xf32>
    %cst_4 = arith.constant 1.562500e-02 : f32
    %9 = vector.broadcast %cst_4 : f32 to vector<1x1x128xf32>
    %10 = arith.mulf %8, %9 : vector<1x1x128xf32>
    %11 = arith.mulf %5, %5 : vector<1x1x128xf32>
    %12 = arith.subf %10, %11 : vector<1x1x128xf32>
    %cst_5 = arith.constant 0.000000e+00 : f32
    %13 = vector.broadcast %cst_5 : f32 to vector<1x1x128xf32>
    %14 = arith.maximumf %12, %13 : vector<1x1x128xf32>
    %15 = vector.broadcast %5 : vector<1x1x128xf32> to vector<1x64x128xf32>
    %16 = arith.subf %1, %15 : vector<1x64x128xf32>
    %cst_6 = arith.constant 9.99999974E-6 : f32
    %17 = vector.broadcast %cst_6 : f32 to vector<1x1x128xf32>
    %18 = arith.addf %14, %17 : vector<1x1x128xf32>
    %19 = math.rsqrt %18 : vector<1x1x128xf32>
    %20 = vector.broadcast %19 : vector<1x1x128xf32> to vector<1x64x128xf32>
    %21 = arith.mulf %16, %20 : vector<1x64x128xf32>
    %cst_7 = arith.constant 0.000000e+00 : f32
    %22 = vector.broadcast %cst_7 : f32 to vector<1x64x128xf32>
    %23 = arith.cmpf oge, %21, %22 : vector<1x64x128xf32>
    %cst_8 = arith.constant 2.000000e-01 : f32
    %24 = vector.broadcast %cst_8 : f32 to vector<1x64x128xf32>
    %25 = arith.mulf %24, %21 : vector<1x64x128xf32>
    %26 = arith.select %23, %21, %25 : vector<1x64x128xi1>, vector<1x64x128xf32>
    %27 = arith.truncf %26 : vector<1x64x128xf32> to vector<1x64x128xbf16>
    %c0_9 = arith.constant 0 : index
    %c0_10 = arith.constant 0 : index
    %c0_11 = arith.constant 0 : index
    %28 = vector.load %arg3[%c0_9, %c0_10, %c0_11] : memref<1x64x128xbf16, #tpu.memory_space<vmem>>, vector<1x64x128xbf16>
    tpu.vector_store %arg3[%c0_9, %c0_10, %c0_11], %27 {strides = array<i32>} : memref<1x64x128xbf16, #tpu.memory_space<vmem>>, vector<1x64x128xbf16>,
    return
  }
  func.func @transform_0(%arg0: i32, %arg1: i32) -> (i32, i32, i32) {
    %c0_i32 = arith.constant 0 : i32
    %c0_i32_0 = arith.constant 0 : i32
    return %arg0, %c0_i32, %arg1 : i32, i32, i32
  }
  func.func @transform_1(%arg0: i32, %arg1: i32) -> (i32, i32, i32) {
    %c0_i32 = arith.constant 0 : i32
    %c0_i32_0 = arith.constant 0 : i32
    return %arg0, %c0_i32, %arg1 : i32, i32, i32
  }
}

module attributes {stable_mosaic.version = 11 : i64} {
  func.func @_matmul_bias_act_kernel(%arg0: i32, %arg1: i32, %arg2: i32, %arg3: i32, %arg4: memref<1x16x2048xbf16, #tpu.memory_space<vmem>>, %arg5: memref<2048x256xbf16, #tpu.memory_space<vmem>>, %arg6: memref<1x256xf32, #tpu.memory_space<vmem>>, %arg7: memref<1x16x256xbf16, #tpu.memory_space<vmem>>, %arg8: memref<16x256xf32, #tpu.memory_space<vmem>>) attributes {dimension_semantics = [#tpu.dimension_semantics<parallel>, #tpu.dimension_semantics<parallel>, #tpu.dimension_semantics<parallel>, #tpu.dimension_semantics<arbitrary>], iteration_bounds = array<i64: 2, 1, 1, 1>, scalar_prefetch = 0 : i64, scratch_operands = 1 : i64, tpu.core_type = #tpu.core_type<tc>, window_params = [{transform_indices = @transform_0, window_bounds = array<i64: 1, 16, 2048>}, {transform_indices = @transform_1, window_bounds = array<i64: 2048, 256>}, {transform_indices = @transform_2, window_bounds = array<i64: 1, 256>}, {transform_indices = @transform_3, window_bounds = array<i64: 1, 16, 256>}]} {
    %c0_i32 = arith.constant 0 : i32
    %0 = arith.cmpi eq, %arg3, %c0_i32 : i32
    %1 = arith.extui %0 : i1 to i32
    %c0_i32_0 = arith.constant 0 : i32
    %2 = arith.cmpi ne, %1, %c0_i32_0 : i32
    scf.if %2 {
      %cst_11 = arith.constant 0.000000e+00 : f32
      %13 = vector.broadcast %cst_11 : f32 to vector<16x256xf32>
      %c0_12 = arith.constant 0 : index
      %c0_13 = arith.constant 0 : index
      %14 = vector.load %arg8[%c0_12, %c0_13] : memref<16x256xf32, #tpu.memory_space<vmem>>, vector<16x256xf32>
      tpu.vector_store %arg8[%c0_12, %c0_13], %13 {strides = array<i32>} : memref<16x256xf32, #tpu.memory_space<vmem>>, vector<16x256xf32>,
    } else {
    }
    %c0 = arith.constant 0 : index
    %c0_1 = arith.constant 0 : index
    %3 = vector.load %arg8[%c0, %c0_1] : memref<16x256xf32, #tpu.memory_space<vmem>>, vector<16x256xf32>
    %c0_2 = arith.constant 0 : index
    %c0_3 = arith.constant 0 : index
    %c0_4 = arith.constant 0 : index
    %4 = vector.load %arg4[%c0_2, %c0_3, %c0_4] : memref<1x16x2048xbf16, #tpu.memory_space<vmem>>, vector<1x16x2048xbf16>
    %5 = vector.shape_cast %4 : vector<1x16x2048xbf16> to vector<16x2048xbf16>
    %c0_5 = arith.constant 0 : index
    %c0_6 = arith.constant 0 : index
    %6 = vector.load %arg5[%c0_5, %c0_6] : memref<2048x256xbf16, #tpu.memory_space<vmem>>, vector<2048x256xbf16>
    %cst = arith.constant dense<0.000000e+00> : vector<16x256xf32>
    %7 = tpu.matmul %5, %6, %cst {dimension_numbers = #tpu.dot_dimension_numbers<[1], [0], [0], [1], [0, 0, 1, 1], [], []>} : vector<16x2048xbf16>, vector<2048x256xbf16>, vector<16x256xf32> -> vector<16x256xf32>
    %8 = arith.addf %3, %7 : vector<16x256xf32>
    %c0_7 = arith.constant 0 : index
    %c0_8 = arith.constant 0 : index
    %9 = vector.load %arg8[%c0_7, %c0_8] : memref<16x256xf32, #tpu.memory_space<vmem>>, vector<16x256xf32>
    tpu.vector_store %arg8[%c0_7, %c0_8], %8 {strides = array<i32>} : memref<16x256xf32, #tpu.memory_space<vmem>>, vector<16x256xf32>,
    %c0_i32_9 = arith.constant 0 : i32
    %10 = arith.cmpi eq, %arg3, %c0_i32_9 : i32
    %11 = arith.extui %10 : i1 to i32
    %c0_i32_10 = arith.constant 0 : i32
    %12 = arith.cmpi ne, %11, %c0_i32_10 : i32
    scf.if %12 {
      %c0_11 = arith.constant 0 : index
      %c0_12 = arith.constant 0 : index
      %13 = vector.load %arg8[%c0_11, %c0_12] : memref<16x256xf32, #tpu.memory_space<vmem>>, vector<16x256xf32>
      %c0_13 = arith.constant 0 : index
      %c0_14 = arith.constant 0 : index
      %14 = vector.load %arg6[%c0_13, %c0_14] : memref<1x256xf32, #tpu.memory_space<vmem>>, vector<1x256xf32>
      %15 = vector.broadcast %14 : vector<1x256xf32> to vector<16x256xf32>
      %16 = arith.addf %13, %15 : vector<16x256xf32>
      %17 = arith.truncf %16 : vector<16x256xf32> to vector<16x256xbf16>
      %c0_15 = arith.constant 0 : index
      %c0_16 = arith.constant 0 : index
      %c0_17 = arith.constant 0 : index
      %18 = vector.load %arg7[%c0_15, %c0_16, %c0_17] : memref<1x16x256xbf16, #tpu.memory_space<vmem>>, vector<1x16x256xbf16>
      %19 = vector.shape_cast %18 : vector<1x16x256xbf16> to vector<16x256xbf16>
      %20 = vector.shape_cast %17 : vector<16x256xbf16> to vector<1x16x256xbf16>
      tpu.vector_store %arg7[%c0_15, %c0_16, %c0_17], %20 {strides = array<i32>} : memref<1x16x256xbf16, #tpu.memory_space<vmem>>, vector<1x16x256xbf16>,
    } else {
    }
    return
  }
  func.func @transform_0(%arg0: i32, %arg1: i32, %arg2: i32, %arg3: i32) -> (i32, i32, i32) {
    %c0_i32 = arith.constant 0 : i32
    return %arg0, %arg1, %arg3 : i32, i32, i32
  }
  func.func @transform_1(%arg0: i32, %arg1: i32, %arg2: i32, %arg3: i32) -> (i32, i32) {
    %c0_i32 = arith.constant 0 : i32
    return %arg3, %arg2 : i32, i32
  }
  func.func @transform_2(%arg0: i32, %arg1: i32, %arg2: i32, %arg3: i32) -> (i32, i32) {
    %c0_i32 = arith.constant 0 : i32
    %c0_i32_0 = arith.constant 0 : i32
    return %c0_i32, %arg2 : i32, i32
  }
  func.func @transform_3(%arg0: i32, %arg1: i32, %arg2: i32, %arg3: i32) -> (i32, i32, i32) {
    %c0_i32 = arith.constant 0 : i32
    return %arg0, %arg1, %arg2 : i32, i32, i32
  }
}

module attributes {stable_mosaic.version = 11 : i64} {
  func.func @_inorm_lrelu_kernel(%arg0: i32, %arg1: i32, %arg2: memref<1x16x256xbf16, #tpu.memory_space<vmem>>, %arg3: memref<1x16x256xbf16, #tpu.memory_space<vmem>>) attributes {dimension_semantics = [#tpu.dimension_semantics<parallel>, #tpu.dimension_semantics<parallel>], iteration_bounds = array<i64: 2, 1>, scalar_prefetch = 0 : i64, scratch_operands = 0 : i64, tpu.core_type = #tpu.core_type<tc>, window_params = [{transform_indices = @transform_0, window_bounds = array<i64: 1, 16, 256>}, {transform_indices = @transform_1, window_bounds = array<i64: 1, 16, 256>}]} {
    %c0 = arith.constant 0 : index
    %c0_0 = arith.constant 0 : index
    %c0_1 = arith.constant 0 : index
    %0 = vector.load %arg2[%c0, %c0_0, %c0_1] : memref<1x16x256xbf16, #tpu.memory_space<vmem>>, vector<1x16x256xbf16>
    %1 = arith.extf %0 : vector<1x16x256xbf16> to vector<1x16x256xf32>
    %cst = arith.constant dense<0.000000e+00> : vector<1x256xf32>
    %2 = vector.multi_reduction <add>, %1, %cst [1] : vector<1x16x256xf32> to vector<1x256xf32>
    %3 = vector.shape_cast %2 : vector<1x256xf32> to vector<1x1x256xf32>
    %cst_2 = arith.constant 6.250000e-02 : f32
    %4 = vector.broadcast %cst_2 : f32 to vector<1x1x256xf32>
    %5 = arith.mulf %3, %4 : vector<1x1x256xf32>
    %6 = arith.mulf %1, %1 : vector<1x16x256xf32>
    %cst_3 = arith.constant dense<0.000000e+00> : vector<1x256xf32>
    %7 = vector.multi_reduction <add>, %6, %cst_3 [1] : vector<1x16x256xf32> to vector<1x256xf32>
    %8 = vector.shape_cast %7 : vector<1x256xf32> to vector<1x1x256xf32>
    %cst_4 = arith.constant 6.250000e-02 : f32
    %9 = vector.broadcast %cst_4 : f32 to vector<1x1x256xf32>
    %10 = arith.mulf %8, %9 : vector<1x1x256xf32>
    %11 = arith.mulf %5, %5 : vector<1x1x256xf32>
    %12 = arith.subf %10, %11 : vector<1x1x256xf32>
    %cst_5 = arith.constant 0.000000e+00 : f32
    %13 = vector.broadcast %cst_5 : f32 to vector<1x1x256xf32>
    %14 = arith.maximumf %12, %13 : vector<1x1x256xf32>
    %15 = vector.broadcast %5 : vector<1x1x256xf32> to vector<1x16x256xf32>
    %16 = arith.subf %1, %15 : vector<1x16x256xf32>
    %cst_6 = arith.constant 9.99999974E-6 : f32
    %17 = vector.broadcast %cst_6 : f32 to vector<1x1x256xf32>
    %18 = arith.addf %14, %17 : vector<1x1x256xf32>
    %19 = math.rsqrt %18 : vector<1x1x256xf32>
    %20 = vector.broadcast %19 : vector<1x1x256xf32> to vector<1x16x256xf32>
    %21 = arith.mulf %16, %20 : vector<1x16x256xf32>
    %cst_7 = arith.constant 0.000000e+00 : f32
    %22 = vector.broadcast %cst_7 : f32 to vector<1x16x256xf32>
    %23 = arith.cmpf oge, %21, %22 : vector<1x16x256xf32>
    %cst_8 = arith.constant 2.000000e-01 : f32
    %24 = vector.broadcast %cst_8 : f32 to vector<1x16x256xf32>
    %25 = arith.mulf %24, %21 : vector<1x16x256xf32>
    %26 = arith.select %23, %21, %25 : vector<1x16x256xi1>, vector<1x16x256xf32>
    %27 = arith.truncf %26 : vector<1x16x256xf32> to vector<1x16x256xbf16>
    %c0_9 = arith.constant 0 : index
    %c0_10 = arith.constant 0 : index
    %c0_11 = arith.constant 0 : index
    %28 = vector.load %arg3[%c0_9, %c0_10, %c0_11] : memref<1x16x256xbf16, #tpu.memory_space<vmem>>, vector<1x16x256xbf16>
    tpu.vector_store %arg3[%c0_9, %c0_10, %c0_11], %27 {strides = array<i32>} : memref<1x16x256xbf16, #tpu.memory_space<vmem>>, vector<1x16x256xbf16>,
    return
  }
  func.func @transform_0(%arg0: i32, %arg1: i32) -> (i32, i32, i32) {
    %c0_i32 = arith.constant 0 : i32
    %c0_i32_0 = arith.constant 0 : i32
    return %arg0, %c0_i32, %arg1 : i32, i32, i32
  }
  func.func @transform_1(%arg0: i32, %arg1: i32) -> (i32, i32, i32) {
    %c0_i32 = arith.constant 0 : i32
    %c0_i32_0 = arith.constant 0 : i32
    return %arg0, %c0_i32, %arg1 : i32, i32, i32
  }
}

module attributes {stable_mosaic.version = 11 : i64} {
  func.func @_matmul_bias_act_kernel(%arg0: i32, %arg1: i32, %arg2: i32, %arg3: i32, %arg4: memref<1x4x4096xbf16, #tpu.memory_space<vmem>>, %arg5: memref<4096x512xbf16, #tpu.memory_space<vmem>>, %arg6: memref<1x512xf32, #tpu.memory_space<vmem>>, %arg7: memref<1x4x512xbf16, #tpu.memory_space<vmem>>, %arg8: memref<4x512xf32, #tpu.memory_space<vmem>>) attributes {dimension_semantics = [#tpu.dimension_semantics<parallel>, #tpu.dimension_semantics<parallel>, #tpu.dimension_semantics<parallel>, #tpu.dimension_semantics<arbitrary>], iteration_bounds = array<i64: 2, 1, 1, 1>, scalar_prefetch = 0 : i64, scratch_operands = 1 : i64, tpu.core_type = #tpu.core_type<tc>, window_params = [{transform_indices = @transform_0, window_bounds = array<i64: 1, 4, 4096>}, {transform_indices = @transform_1, window_bounds = array<i64: 4096, 512>}, {transform_indices = @transform_2, window_bounds = array<i64: 1, 512>}, {transform_indices = @transform_3, window_bounds = array<i64: 1, 4, 512>}]} {
    %c0_i32 = arith.constant 0 : i32
    %0 = arith.cmpi eq, %arg3, %c0_i32 : i32
    %1 = arith.extui %0 : i1 to i32
    %c0_i32_0 = arith.constant 0 : i32
    %2 = arith.cmpi ne, %1, %c0_i32_0 : i32
    scf.if %2 {
      %cst_11 = arith.constant 0.000000e+00 : f32
      %13 = vector.broadcast %cst_11 : f32 to vector<4x512xf32>
      %c0_12 = arith.constant 0 : index
      %c0_13 = arith.constant 0 : index
      %14 = vector.load %arg8[%c0_12, %c0_13] : memref<4x512xf32, #tpu.memory_space<vmem>>, vector<4x512xf32>
      tpu.vector_store %arg8[%c0_12, %c0_13], %13 {strides = array<i32>} : memref<4x512xf32, #tpu.memory_space<vmem>>, vector<4x512xf32>,
    } else {
    }
    %c0 = arith.constant 0 : index
    %c0_1 = arith.constant 0 : index
    %3 = vector.load %arg8[%c0, %c0_1] : memref<4x512xf32, #tpu.memory_space<vmem>>, vector<4x512xf32>
    %c0_2 = arith.constant 0 : index
    %c0_3 = arith.constant 0 : index
    %c0_4 = arith.constant 0 : index
    %4 = vector.load %arg4[%c0_2, %c0_3, %c0_4] : memref<1x4x4096xbf16, #tpu.memory_space<vmem>>, vector<1x4x4096xbf16>
    %5 = vector.shape_cast %4 : vector<1x4x4096xbf16> to vector<4x4096xbf16>
    %c0_5 = arith.constant 0 : index
    %c0_6 = arith.constant 0 : index
    %6 = vector.load %arg5[%c0_5, %c0_6] : memref<4096x512xbf16, #tpu.memory_space<vmem>>, vector<4096x512xbf16>
    %cst = arith.constant dense<0.000000e+00> : vector<4x512xf32>
    %7 = tpu.matmul %5, %6, %cst {dimension_numbers = #tpu.dot_dimension_numbers<[1], [0], [0], [1], [0, 0, 1, 1], [], []>} : vector<4x4096xbf16>, vector<4096x512xbf16>, vector<4x512xf32> -> vector<4x512xf32>
    %8 = arith.addf %3, %7 : vector<4x512xf32>
    %c0_7 = arith.constant 0 : index
    %c0_8 = arith.constant 0 : index
    %9 = vector.load %arg8[%c0_7, %c0_8] : memref<4x512xf32, #tpu.memory_space<vmem>>, vector<4x512xf32>
    tpu.vector_store %arg8[%c0_7, %c0_8], %8 {strides = array<i32>} : memref<4x512xf32, #tpu.memory_space<vmem>>, vector<4x512xf32>,
    %c0_i32_9 = arith.constant 0 : i32
    %10 = arith.cmpi eq, %arg3, %c0_i32_9 : i32
    %11 = arith.extui %10 : i1 to i32
    %c0_i32_10 = arith.constant 0 : i32
    %12 = arith.cmpi ne, %11, %c0_i32_10 : i32
    scf.if %12 {
      %c0_11 = arith.constant 0 : index
      %c0_12 = arith.constant 0 : index
      %13 = vector.load %arg8[%c0_11, %c0_12] : memref<4x512xf32, #tpu.memory_space<vmem>>, vector<4x512xf32>
      %c0_13 = arith.constant 0 : index
      %c0_14 = arith.constant 0 : index
      %14 = vector.load %arg6[%c0_13, %c0_14] : memref<1x512xf32, #tpu.memory_space<vmem>>, vector<1x512xf32>
      %15 = vector.broadcast %14 : vector<1x512xf32> to vector<4x512xf32>
      %16 = arith.addf %13, %15 : vector<4x512xf32>
      %17 = arith.truncf %16 : vector<4x512xf32> to vector<4x512xbf16>
      %c0_15 = arith.constant 0 : index
      %c0_16 = arith.constant 0 : index
      %c0_17 = arith.constant 0 : index
      %18 = vector.load %arg7[%c0_15, %c0_16, %c0_17] : memref<1x4x512xbf16, #tpu.memory_space<vmem>>, vector<1x4x512xbf16>
      %19 = vector.shape_cast %18 : vector<1x4x512xbf16> to vector<4x512xbf16>
      %20 = vector.shape_cast %17 : vector<4x512xbf16> to vector<1x4x512xbf16>
      tpu.vector_store %arg7[%c0_15, %c0_16, %c0_17], %20 {strides = array<i32>} : memref<1x4x512xbf16, #tpu.memory_space<vmem>>, vector<1x4x512xbf16>,
    } else {
    }
    return
  }
  func.func @transform_0(%arg0: i32, %arg1: i32, %arg2: i32, %arg3: i32) -> (i32, i32, i32) {
    %c0_i32 = arith.constant 0 : i32
    return %arg0, %arg1, %arg3 : i32, i32, i32
  }
  func.func @transform_1(%arg0: i32, %arg1: i32, %arg2: i32, %arg3: i32) -> (i32, i32) {
    %c0_i32 = arith.constant 0 : i32
    return %arg3, %arg2 : i32, i32
  }
  func.func @transform_2(%arg0: i32, %arg1: i32, %arg2: i32, %arg3: i32) -> (i32, i32) {
    %c0_i32 = arith.constant 0 : i32
    %c0_i32_0 = arith.constant 0 : i32
    return %c0_i32, %arg2 : i32, i32
  }
  func.func @transform_3(%arg0: i32, %arg1: i32, %arg2: i32, %arg3: i32) -> (i32, i32, i32) {
    %c0_i32 = arith.constant 0 : i32
    return %arg0, %arg1, %arg2 : i32, i32, i32
  }
}

module attributes {stable_mosaic.version = 11 : i64} {
  func.func @_inorm_lrelu_kernel(%arg0: i32, %arg1: i32, %arg2: memref<1x4x512xbf16, #tpu.memory_space<vmem>>, %arg3: memref<1x4x512xbf16, #tpu.memory_space<vmem>>) attributes {dimension_semantics = [#tpu.dimension_semantics<parallel>, #tpu.dimension_semantics<parallel>], iteration_bounds = array<i64: 2, 1>, scalar_prefetch = 0 : i64, scratch_operands = 0 : i64, tpu.core_type = #tpu.core_type<tc>, window_params = [{transform_indices = @transform_0, window_bounds = array<i64: 1, 4, 512>}, {transform_indices = @transform_1, window_bounds = array<i64: 1, 4, 512>}]} {
    %c0 = arith.constant 0 : index
    %c0_0 = arith.constant 0 : index
    %c0_1 = arith.constant 0 : index
    %0 = vector.load %arg2[%c0, %c0_0, %c0_1] : memref<1x4x512xbf16, #tpu.memory_space<vmem>>, vector<1x4x512xbf16>
    %1 = arith.extf %0 : vector<1x4x512xbf16> to vector<1x4x512xf32>
    %cst = arith.constant dense<0.000000e+00> : vector<1x512xf32>
    %2 = vector.multi_reduction <add>, %1, %cst [1] : vector<1x4x512xf32> to vector<1x512xf32>
    %3 = vector.shape_cast %2 : vector<1x512xf32> to vector<1x1x512xf32>
    %cst_2 = arith.constant 2.500000e-01 : f32
    %4 = vector.broadcast %cst_2 : f32 to vector<1x1x512xf32>
    %5 = arith.mulf %3, %4 : vector<1x1x512xf32>
    %6 = arith.mulf %1, %1 : vector<1x4x512xf32>
    %cst_3 = arith.constant dense<0.000000e+00> : vector<1x512xf32>
    %7 = vector.multi_reduction <add>, %6, %cst_3 [1] : vector<1x4x512xf32> to vector<1x512xf32>
    %8 = vector.shape_cast %7 : vector<1x512xf32> to vector<1x1x512xf32>
    %cst_4 = arith.constant 2.500000e-01 : f32
    %9 = vector.broadcast %cst_4 : f32 to vector<1x1x512xf32>
    %10 = arith.mulf %8, %9 : vector<1x1x512xf32>
    %11 = arith.mulf %5, %5 : vector<1x1x512xf32>
    %12 = arith.subf %10, %11 : vector<1x1x512xf32>
    %cst_5 = arith.constant 0.000000e+00 : f32
    %13 = vector.broadcast %cst_5 : f32 to vector<1x1x512xf32>
    %14 = arith.maximumf %12, %13 : vector<1x1x512xf32>
    %15 = vector.broadcast %5 : vector<1x1x512xf32> to vector<1x4x512xf32>
    %16 = arith.subf %1, %15 : vector<1x4x512xf32>
    %cst_6 = arith.constant 9.99999974E-6 : f32
    %17 = vector.broadcast %cst_6 : f32 to vector<1x1x512xf32>
    %18 = arith.addf %14, %17 : vector<1x1x512xf32>
    %19 = math.rsqrt %18 : vector<1x1x512xf32>
    %20 = vector.broadcast %19 : vector<1x1x512xf32> to vector<1x4x512xf32>
    %21 = arith.mulf %16, %20 : vector<1x4x512xf32>
    %cst_7 = arith.constant 0.000000e+00 : f32
    %22 = vector.broadcast %cst_7 : f32 to vector<1x4x512xf32>
    %23 = arith.cmpf oge, %21, %22 : vector<1x4x512xf32>
    %cst_8 = arith.constant 2.000000e-01 : f32
    %24 = vector.broadcast %cst_8 : f32 to vector<1x4x512xf32>
    %25 = arith.mulf %24, %21 : vector<1x4x512xf32>
    %26 = arith.select %23, %21, %25 : vector<1x4x512xi1>, vector<1x4x512xf32>
    %27 = arith.truncf %26 : vector<1x4x512xf32> to vector<1x4x512xbf16>
    %c0_9 = arith.constant 0 : index
    %c0_10 = arith.constant 0 : index
    %c0_11 = arith.constant 0 : index
    %28 = vector.load %arg3[%c0_9, %c0_10, %c0_11] : memref<1x4x512xbf16, #tpu.memory_space<vmem>>, vector<1x4x512xbf16>
    tpu.vector_store %arg3[%c0_9, %c0_10, %c0_11], %27 {strides = array<i32>} : memref<1x4x512xbf16, #tpu.memory_space<vmem>>, vector<1x4x512xbf16>,
    return
  }
  func.func @transform_0(%arg0: i32, %arg1: i32) -> (i32, i32, i32) {
    %c0_i32 = arith.constant 0 : i32
    %c0_i32_0 = arith.constant 0 : i32
    return %arg0, %c0_i32, %arg1 : i32, i32, i32
  }
  func.func @transform_1(%arg0: i32, %arg1: i32) -> (i32, i32, i32) {
    %c0_i32 = arith.constant 0 : i32
    %c0_i32_0 = arith.constant 0 : i32
    return %arg0, %c0_i32, %arg1 : i32, i32, i32
  }
}

module attributes {stable_mosaic.version = 11 : i64} {
  func.func @_matmul_bias_act_kernel(%arg0: i32, %arg1: i32, %arg2: i32, %arg3: i32, %arg4: memref<1x4x8192xbf16, #tpu.memory_space<vmem>>, %arg5: memref<8192x128xbf16, #tpu.memory_space<vmem>>, %arg6: memref<1x128xf32, #tpu.memory_space<vmem>>, %arg7: memref<1x4x128xf32, #tpu.memory_space<vmem>>, %arg8: memref<4x128xf32, #tpu.memory_space<vmem>>) attributes {dimension_semantics = [#tpu.dimension_semantics<parallel>, #tpu.dimension_semantics<parallel>, #tpu.dimension_semantics<parallel>, #tpu.dimension_semantics<arbitrary>], iteration_bounds = array<i64: 2, 1, 1, 1>, scalar_prefetch = 0 : i64, scratch_operands = 1 : i64, tpu.core_type = #tpu.core_type<tc>, window_params = [{transform_indices = @transform_0, window_bounds = array<i64: 1, 4, 8192>}, {transform_indices = @transform_1, window_bounds = array<i64: 8192, 128>}, {transform_indices = @transform_2, window_bounds = array<i64: 1, 128>}, {transform_indices = @transform_3, window_bounds = array<i64: 1, 4, 128>}]} {
    %c0_i32 = arith.constant 0 : i32
    %0 = arith.cmpi eq, %arg3, %c0_i32 : i32
    %1 = arith.extui %0 : i1 to i32
    %c0_i32_0 = arith.constant 0 : i32
    %2 = arith.cmpi ne, %1, %c0_i32_0 : i32
    scf.if %2 {
      %cst_11 = arith.constant 0.000000e+00 : f32
      %13 = vector.broadcast %cst_11 : f32 to vector<4x128xf32>
      %c0_12 = arith.constant 0 : index
      %c0_13 = arith.constant 0 : index
      %14 = vector.load %arg8[%c0_12, %c0_13] : memref<4x128xf32, #tpu.memory_space<vmem>>, vector<4x128xf32>
      tpu.vector_store %arg8[%c0_12, %c0_13], %13 {strides = array<i32>} : memref<4x128xf32, #tpu.memory_space<vmem>>, vector<4x128xf32>,
    } else {
    }
    %c0 = arith.constant 0 : index
    %c0_1 = arith.constant 0 : index
    %3 = vector.load %arg8[%c0, %c0_1] : memref<4x128xf32, #tpu.memory_space<vmem>>, vector<4x128xf32>
    %c0_2 = arith.constant 0 : index
    %c0_3 = arith.constant 0 : index
    %c0_4 = arith.constant 0 : index
    %4 = vector.load %arg4[%c0_2, %c0_3, %c0_4] : memref<1x4x8192xbf16, #tpu.memory_space<vmem>>, vector<1x4x8192xbf16>
    %5 = vector.shape_cast %4 : vector<1x4x8192xbf16> to vector<4x8192xbf16>
    %c0_5 = arith.constant 0 : index
    %c0_6 = arith.constant 0 : index
    %6 = vector.load %arg5[%c0_5, %c0_6] : memref<8192x128xbf16, #tpu.memory_space<vmem>>, vector<8192x128xbf16>
    %cst = arith.constant dense<0.000000e+00> : vector<4x128xf32>
    %7 = tpu.matmul %5, %6, %cst {dimension_numbers = #tpu.dot_dimension_numbers<[1], [0], [0], [1], [0, 0, 1, 1], [], []>} : vector<4x8192xbf16>, vector<8192x128xbf16>, vector<4x128xf32> -> vector<4x128xf32>
    %8 = arith.addf %3, %7 : vector<4x128xf32>
    %c0_7 = arith.constant 0 : index
    %c0_8 = arith.constant 0 : index
    %9 = vector.load %arg8[%c0_7, %c0_8] : memref<4x128xf32, #tpu.memory_space<vmem>>, vector<4x128xf32>
    tpu.vector_store %arg8[%c0_7, %c0_8], %8 {strides = array<i32>} : memref<4x128xf32, #tpu.memory_space<vmem>>, vector<4x128xf32>,
    %c0_i32_9 = arith.constant 0 : i32
    %10 = arith.cmpi eq, %arg3, %c0_i32_9 : i32
    %11 = arith.extui %10 : i1 to i32
    %c0_i32_10 = arith.constant 0 : i32
    %12 = arith.cmpi ne, %11, %c0_i32_10 : i32
    scf.if %12 {
      %c0_11 = arith.constant 0 : index
      %c0_12 = arith.constant 0 : index
      %13 = vector.load %arg8[%c0_11, %c0_12] : memref<4x128xf32, #tpu.memory_space<vmem>>, vector<4x128xf32>
      %c0_13 = arith.constant 0 : index
      %c0_14 = arith.constant 0 : index
      %14 = vector.load %arg6[%c0_13, %c0_14] : memref<1x128xf32, #tpu.memory_space<vmem>>, vector<1x128xf32>
      %15 = vector.broadcast %14 : vector<1x128xf32> to vector<4x128xf32>
      %16 = arith.addf %13, %15 : vector<4x128xf32>
      %c0_15 = arith.constant 0 : index
      %c0_16 = arith.constant 0 : index
      %c0_17 = arith.constant 0 : index
      %17 = vector.load %arg7[%c0_15, %c0_16, %c0_17] : memref<1x4x128xf32, #tpu.memory_space<vmem>>, vector<1x4x128xf32>
      %18 = vector.shape_cast %17 : vector<1x4x128xf32> to vector<4x128xf32>
      %19 = vector.shape_cast %16 : vector<4x128xf32> to vector<1x4x128xf32>
      tpu.vector_store %arg7[%c0_15, %c0_16, %c0_17], %19 {strides = array<i32>} : memref<1x4x128xf32, #tpu.memory_space<vmem>>, vector<1x4x128xf32>,
    } else {
    }
    return
  }
  func.func @transform_0(%arg0: i32, %arg1: i32, %arg2: i32, %arg3: i32) -> (i32, i32, i32) {
    %c0_i32 = arith.constant 0 : i32
    return %arg0, %arg1, %arg3 : i32, i32, i32
  }
  func.func @transform_1(%arg0: i32, %arg1: i32, %arg2: i32, %arg3: i32) -> (i32, i32) {
    %c0_i32 = arith.constant 0 : i32
    return %arg3, %arg2 : i32, i32
  }
  func.func @transform_2(%arg0: i32, %arg1: i32, %arg2: i32, %arg3: i32) -> (i32, i32) {
    %c0_i32 = arith.constant 0 : i32
    %c0_i32_0 = arith.constant 0 : i32
    return %c0_i32, %arg2 : i32, i32
  }
  func.func @transform_3(%arg0: i32, %arg1: i32, %arg2: i32, %arg3: i32) -> (i32, i32, i32) {
    %c0_i32 = arith.constant 0 : i32
    return %arg0, %arg1, %arg2 : i32, i32, i32
  }
}

</mosaic_0001>

<bundles_post_ra>
// kernel: dis_forward.8
= control target key start
LH: loop header
LB: loop body
LE: loop exit
PB: predicated region body
PF: predicated region fallthrough
CT: control target
= control target key end

     0   :  { %8 = vsyncpa [#allocation4], 0  ;;  %s1861_s0 = inlined_call_operand.vmem [shape: bf16[2,256,48], index: 0, kind: input, shape index: {}]   ;;  %s1862_s1 = inlined_call_operand.hbm [shape: bf16[48,128], index: 1, kind: input, shape index: {}]   ;;  %s1863_s2 = inlined_call_operand.hbm [shape: f32[1,128], index: 2, kind: input, shape index: {}]   ;;  %s1864_s3 = inlined_call_operand.vmem [shape: bf16[2,256,128], index: 3, kind: output, shape index: {}]  }
   0x1   :  { %9 = vsyncpa [#allocation6], 0  ;;  %s1682_s12 = smov 0   ;;  %s1684_s13 = smov 0  }
   0x2   :  { %s1686_s14 = smov 0  }
   0x3 LB: > { %s1233_s15 = sadd.s32 4294967295, %s1656_s14   ;;  %s41_s16 = sadd.s32 1, %s1652_s13  ;;  %s1656_s14 = sphi %s1686_s14, %s15_s14   ;;  %s1652_s13 = sphi %s1684_s13, %s1869_s13   ;;  %s1648_s12 = sphi %s1682_s12, %s1868_s12  }
   0x4   : > { %p43_p0 = scmp.ge.s32.totalorder %s41_s16, 2  ;;  %p1235_p1 = scmp.ge.s32.totalorder %s1656_s14, 1 }
   0x5   : > { %p160_p2 = scmp.lt.s32.totalorder %s1656_s14, 3  ;;  %p1707_p4 = scmp.eq.s32.totalorder %s1233_s15, 0 }
   0x6   : > { %s1871_s16 = smov (%p43_p0, %s41_s16), 0  ;;  %s1658_s19 = smov [#allocation3]  }
   0x7   : > { %p1703_p3 = pnand %p1235_p1, %p160_p2  ;;  %s176_s20 = sshll.u32 %s1658_s19, 4  ;;  %s177_s20 = int_to_ptr.vmem [resolvable:$true] %s176_s20 }
   0x8   : > { %s1659_s22 = smov [#allocation5]   ;;  %s1585_s24 = scalar_lea.vmem %s177_s20, 384 }
   0x9   : > { %p1516_p5 = pneg %p1703_p3  ;;  %s192_s23 = sshll.u32 %s1659_s22, 4  ;;  %s193_s23 = int_to_ptr.vmem [resolvable:$true] %s192_s23 }
   0xa   : > { %p1586_p8 = scmp.ne.s32.totalorder %s177_s20, %s1585_s24  ;;  %p1593_p11 = scmp.lt.s32.totalorder %s177_s20, %s177_s20 }
   0xb   : > { %p1715_p6 = pnand %p1707_p4, %p1516_p5  ;;  %p1594_p12 = scmp.lt.s32.totalorder %s1585_s24, %s1585_s24 }
   0xd   : > { %p1576_p7 = pneg %p1715_p6  ;;  %p1595_p13 = por %p1594_p12, %p1593_p11 }
   0xf   : > { %p1588_p9 = pnand %p1586_p8, %p1576_p7 }
  0x11   : > { %p1589_p10 = pneg %p1588_p9 }
  0x13   : > { %p1596_p0 = pnand %p1595_p13, %p1589_p10 }
  0x15   : > { %1599 = shalt.err (!%p1596_p0)
}
  0x16   : > { %s1660_s25 = smov 64   ;;  %s1661_s26 = smov 4  }
  0x17   : > { %1519 = dma.hbm_to_vmem [thread:$0]  (!%p1715_p6), %s1862_s1, 384, %s177_s20, [#allocation4], %s1660_s25, %s1660_s25, %s1661_s26  }
  0x18   : > { %s1611_s29 = scalar_lea.vmem %s193_s23, 16  ;;  %s1618_s30 = scalar_lea.vmem %s193_s23, 32 }
  0x19   : > { %p1612_p1 = scmp.ne.s32.totalorder %s193_s23, %s1611_s29  ;;  %p1619_p8 = scmp.lt.s32.totalorder %s193_s23, %s193_s23 }
  0x1a   : > { %p1620_p9 = scmp.lt.s32.totalorder %s1618_s30, %s1611_s29 }
  0x1b   : > { %p1614_p2 = pnand %p1612_p1, %p1576_p7 }
  0x1c   : > { %p1621_p10 = por %p1620_p9, %p1619_p8 }
  0x1d   : > { %p1615_p5 = pneg %p1614_p2 }
  0x1f   : > { %p1622_p11 = pnand %p1621_p10, %p1615_p5 }
  0x21   : > { %1625 = shalt.err (!%p1622_p11)
}
  0x22   : > { %1522 = dma.hbm_to_vmem [thread:$0]  (!%p1715_p6), %s1863_s2, 16, %s193_s23, [#allocation6]  }
  0x23   : > { %221 = sbr.rel (%p1703_p3) target bundleno = 291 (0x123), region = 32 }
  0x28   : > { %1639 = dma.done.wait (%p1707_p4), [#allocation4], 384  }
  0x29   : > { %1641 = vsyncadd (%p1707_p4), [#allocation4], 4294966912 }
  0x2a   : > { %1643 = dma.done.wait (%p1707_p4), [#allocation6], 16  }
  0x2b   : > { %1645 = vsyncadd (%p1707_p4), [#allocation6], 4294967280  ;;  %p264_p7 = scmp.lt.s32.totalorder %s1648_s12, 1  ;;  %v1555_v0 = vld [vmem:[#allocation3 + $0x10] sm:$0xff]   ;;  %v1556_v1 = vld [vmem:[#allocation3 + $0x8] sm:$0xff]   ;;  %vm495_vm0 = vcmask 392192  }
  0x2c   : > { %1464 = vmatprep.subr.bf16.mxu0 %v1555_v0  ;;  %1502 = vmatprep.subr.bf16.mxu1 %v1555_v0  ;;  %v1557_v2 = vld [vmem:[#allocation3] sm:$0xff]   ;;  %v1791_v19 = vld [vmem:[#allocation5] ss:$0 sm:$0xff] }
  0x2d   : > { %s1873_s12 = smov (!%p264_p7, %s1648_s12), 1  ;;  %1465 = vmatpush3.bf16.msra.mxu0 %v1555_v0  ;;  %1505 = vmatpush3.bf16.msra.mxu1 %v1555_v0 }
  0x2e   : > { %s1316_s6 = sshll.u32 %s1873_s12, 7  ;;  %1466 = vmatprep.subr.bf16.mxu0 %v1556_v1  ;;  %1503 = vmatprep.subr.bf16.mxu1 %v1556_v1 }
  0x2f   : > { %s1757_s9 = scalar_lea.vmem %s1861_s0, %s1316_s6  ;;  %s1806_s15 = scalar_lea.vmem %s1864_s3, %s1316_s6 }
  0x30   : > { %v1558_v3 = vld [vmem:[%s1757_s9] sm:$0xff]   ;;  %v1560_v5 = vld [vmem:[%s1757_s9 + $0x8] sm:$0xff]   ;;  %v1562_v7 = vld [vmem:[%s1757_s9 + $0x10] sm:$0xff]  }
  0x31   : > { %v1559_v4 = vld [vmem:[%s1757_s9 + $0x40] sm:$0xff]   ;;  %1470 = vmatprep.mubr.msk.bf16.mxu0 %vm495_vm0, %v1558_v3  ;;  %1467 = vmatpush3.bf16.msra.mxu0 %v1556_v1  ;;  %v1561_v6 = vld [vmem:[%s1757_s9 + $0x48] sm:$0xff]   ;;  %v1563_v8 = vld [vmem:[%s1757_s9 + $0x50] sm:$0xff]  }
  0x32   : > { %1486 = vmatprep.mubr.msk.bf16.mxu1 %vm495_vm0, %v1559_v4  ;;  %1506 = vmatpush3.bf16.msra.mxu1 %v1556_v1  ;;  %v1564_v9 = vld [vmem:[%s1757_s9 + $0x18] sm:$0xff]   ;;  %v1566_v11 = vld [vmem:[%s1757_s9 + $0x20] sm:$0xff]   ;;  %v1568_v13 = vld [vmem:[%s1757_s9 + $0x28] sm:$0xff]  }
  0x33   : > { %1468 = vmatprep.subr.bf16.mxu0 %v1557_v2  ;;  %1504 = vmatprep.subr.bf16.mxu1 %v1557_v2  ;;  %v1565_v10 = vld [vmem:[%s1757_s9 + $0x58] sm:$0xff]   ;;  %v1567_v12 = vld [vmem:[%s1757_s9 + $0x60] sm:$0xff]   ;;  %v1569_v14 = vld [vmem:[%s1757_s9 + $0x68] sm:$0xff]  }
  0x34   : > { %v1570_v15 = vld [vmem:[%s1757_s9 + $0x30] sm:$0xff]   ;;  %v1572_v17 = vld [vmem:[%s1757_s9 + $0x38] sm:$0xff]  }
  0x35   : > { %1469 = vmatpush3.bf16.msra.mxu0 %v1557_v2  ;;  %v1571_v16 = vld [vmem:[%s1757_s9 + $0x70] sm:$0xff]   ;;  %v1573_v18 = vld [vmem:[%s1757_s9 + $0x78] sm:$0xff]  }
  0x36   : > { %1507 = vmatpush3.bf16.msra.mxu1 %v1557_v2 }
  0x38   : > { %1471 = vmatmul.mubr.msk.bf16.vlgmr.msra.gmra.mxu0 %vm495_vm0, %v1560_v5 }
  0x39   : > { %1487 = vmatmul.mubr.msk.bf16.vlgmr.msra.gmra.mxu1 %vm495_vm0, %v1561_v6  ;;  %1474 = vmatprep.mubr.msk.bf16.mxu0 %vm495_vm0, %v1562_v7 }
  0x3a   : > { %1490 = vmatprep.mubr.msk.bf16.mxu1 %vm495_vm0, %v1563_v8 }
  0x40   : > { %1475 = vmatmul.mubr.msk.bf16.gmra.mxu0 %vm495_vm0, %v1564_v9 }
  0x41   : > { %1491 = vmatmul.mubr.msk.bf16.gmra.mxu1 %vm495_vm0, %v1565_v10  ;;  %1478 = vmatprep.mubr.msk.bf16.mxu0 %vm495_vm0, %v1566_v11 }
  0x42   : > { %1494 = vmatprep.mubr.msk.bf16.mxu1 %vm495_vm0, %v1567_v12 }
  0x48   : > { %1479 = vmatmul.mubr.msk.bf16.gmra.mxu0 %vm495_vm0, %v1568_v13 }
  0x49   : > { %1495 = vmatmul.mubr.msk.bf16.gmra.mxu1 %vm495_vm0, %v1569_v14  ;;  %1482 = vmatprep.mubr.msk.bf16.mxu0 %vm495_vm0, %v1570_v15 }
  0x4a   : > { %1498 = vmatprep.mubr.msk.bf16.mxu1 %vm495_vm0, %v1571_v16 }
  0x50   : > { %1483 = vmatmul.mubr.msk.bf16.gmra.mxu0 %vm495_vm0, %v1572_v17 }
  0x51   : > { %1499 = vmatmul.mubr.msk.bf16.gmra.mxu1 %vm495_vm0, %v1573_v18 }
  0xf8   : > { %v1472_v20 = vpop.f32.mrf.mxu0 }
  0xf9   : > { %v1488_v21 = vpop.f32.mrf.mxu1  ;;  %v813_v22 = vadd.f32 %v1472_v20, %v1791_v19 }
  0xfa   : > { %v829_v23 = vadd.f32 %v1488_v21, %v1791_v19  ;;  %v578_v24 = vpop.f32.mrf.mxu0 }
  0xfb   : > { %v642_v25 = vpop.f32.mrf.mxu1  ;;  %vm845_vm1 = vcmp.ge.f32.partialorder %v813_v22, 0.0  ;;  %v877_v26 = vmul.f32 0.2, %v813_v22  ;;  %v811_v28 = vadd.f32 %v1791_v19, %v578_v24 }
  0xfc   : > { %vm861_vm2 = vcmp.ge.f32.partialorder %v829_v23, 0.0  ;;  %v893_v27 = vmul.f32 0.2, %v829_v23  ;;  %v827_v29 = vadd.f32 %v1791_v19, %v642_v25  ;;  %v1473_v30 = vpop.f32.mrf.mxu0 }
  0xfd   : > { %v1489_v31 = vpop.f32.mrf.mxu1  ;;  %v909_v32 = vsel %vm845_vm1, %v813_v22, %v877_v26  ;;  %v814_v33 = vadd.f32 %v1473_v30, %v1791_v19  ;;  %vm843_vm3 = vcmp.ge.f32.partialorder %v811_v28, 0.0  ;;  %v875_v36 = vmul.f32 0.2, %v811_v28 }
  0xfe   : > { %v830_v34 = vadd.f32 %v1489_v31, %v1791_v19  ;;  %v925_v35 = vsel %vm861_vm2, %v829_v23, %v893_v27  ;;  %vm859_vm4 = vcmp.ge.f32.partialorder %v827_v29, 0.0  ;;  %v581_v37 = vpop.f32.mrf.mxu0  ;;  %v891_v42 = vmul.f32 0.2, %v827_v29 }
  0xff   : > { %v645_v38 = vpop.f32.mrf.mxu1  ;;  %vm846_vm5 = vcmp.ge.f32.partialorder %v814_v33, 0.0  ;;  %v878_v39 = vmul.f32 0.2, %v814_v33  ;;  %v907_v41 = vsel %vm843_vm3, %v811_v28, %v875_v36  ;;  %v812_v43 = vadd.f32 %v1791_v19, %v581_v37 }
 0x100   : > { %vm862_vm6 = vcmp.ge.f32.partialorder %v830_v34, 0.0  ;;  %v894_v40 = vmul.f32 0.2, %v830_v34  ;;  %v828_v44 = vadd.f32 %v1791_v19, %v645_v38  ;;  %v1476_v45 = vpop.f32.mrf.mxu0  ;;  %v923_v58 = vsel %vm859_vm4, %v827_v29, %v891_v42 }
 0x101   : > { %v1492_v46 = vpop.f32.mrf.mxu1  ;;  %v910_v47 = vsel %vm846_vm5, %v814_v33, %v878_v39  ;;  %v817_v49 = vadd.f32 %v1476_v45, %v1791_v19  ;;  %vm844_vm7 = vcmp.ge.f32.partialorder %v812_v43, 0.0  ;;  %v876_v53 = vmul.f32 0.2, %v812_v43 }
 0x102   : > { %v926_v48 = vsel %vm862_vm6, %v830_v34, %v894_v40  ;;  %v833_v50 = vadd.f32 %v1492_v46, %v1791_v19  ;;  %v1358_v51 = vpack.c.bf16 %v910_v47, %v909_v32  ;;  %v594_v54 = vpop.f32.mrf.mxu0  ;;  %vm860_vm8 = vcmp.ge.f32.partialorder %v828_v44, 0.0 }
 0x103   : > { %v1398_v52 = vpack.c.bf16 %v926_v48, %v925_v35  ;;  %v658_v55 = vpop.f32.mrf.mxu1  ;;  %v892_v56 = vmul.f32 0.2, %v828_v44  ;;  %vm849_vm9 = vcmp.ge.f32.partialorder %v817_v49, 0.0  ;;  %v881_v57 = vmul.f32 0.2, %v817_v49 }
 0x104   : > { %1430 = vst [vmem:[%s1806_s15 + $0x8] sm:$0xff] %v1358_v51   ;;  %v908_v59 = vsel %vm844_vm7, %v812_v43, %v876_v53  ;;  %v897_v60 = vmul.f32 0.2, %v833_v50  ;;  %v815_v61 = vadd.f32 %v1791_v19, %v594_v54  ;;  %v1477_v62 = vpop.f32.mrf.mxu0  ;;  %vm865_vm10 = vcmp.ge.f32.partialorder %v833_v50, 0.0 }
 0x105   : > { %1438 = vst [vmem:[%s1806_s15 + $0x48] sm:$0xff] %v1398_v52   ;;  %v1493_v63 = vpop.f32.mrf.mxu1  ;;  %v1353_v0 = vpack.c.bf16 %v908_v59, %v907_v41  ;;  %v924_v1 = vsel %vm860_vm8, %v828_v44, %v892_v56  ;;  %v831_v2 = vadd.f32 %v1791_v19, %v658_v55  ;;  %v913_v4 = vsel %vm849_vm9, %v817_v49, %v881_v57 }
 0x106   : > { %v1393_v3 = vpack.c.bf16 %v924_v1, %v923_v58  ;;  %vm847_vm11 = vcmp.ge.f32.partialorder %v815_v61, 0.0  ;;  %v879_v5 = vmul.f32 0.2, %v815_v61  ;;  %v597_v6 = vpop.f32.mrf.mxu0  ;;  %v818_v9 = vadd.f32 %v1477_v62, %v1791_v19 }
 0x107   : > { %v661_v7 = vpop.f32.mrf.mxu1  ;;  %1354 = vst [vmem:[%s1806_s15] sm:$0xff] %v1353_v0   ;;  %vm863_vm12 = vcmp.ge.f32.partialorder %v831_v2, 0.0  ;;  %v895_v8 = vmul.f32 0.2, %v831_v2  ;;  %v834_v10 = vadd.f32 %v1493_v63, %v1791_v19  ;;  %v929_v11 = vsel %vm865_vm10, %v833_v50, %v897_v60 }
 0x108   : > { %1437 = vst [vmem:[%s1806_s15 + $0x40] sm:$0xff] %v1393_v3   ;;  %v911_v12 = vsel %vm847_vm11, %v815_v61, %v879_v5  ;;  %v816_v13 = vadd.f32 %v1791_v19, %v597_v6  ;;  %v832_v14 = vadd.f32 %v1791_v19, %v661_v7  ;;  %v1480_v15 = vpop.f32.mrf.mxu0  ;;  %vm850_vm13 = vcmp.ge.f32.partialorder %v818_v9, 0.0 }
 0x109   : > { %v1496_v16 = vpop.f32.mrf.mxu1  ;;  %v927_v17 = vsel %vm863_vm12, %v831_v2, %v895_v8  ;;  %v882_v18 = vmul.f32 0.2, %v818_v9  ;;  %vm866_vm14 = vcmp.ge.f32.partialorder %v834_v10, 0.0  ;;  %v898_v20 = vmul.f32 0.2, %v834_v10 }
 0x10a   : > { %vm848_vm15 = vcmp.ge.f32.partialorder %v816_v13, 0.0  ;;  %v880_v21 = vmul.f32 0.2, %v816_v13  ;;  %vm864_vm0 = vcmp.ge.f32.partialorder %v832_v14, 0.0  ;;  %v610_v22 = vpop.f32.mrf.mxu0  ;;  %v896_v25 = vmul.f32 0.2, %v832_v14 }
 0x10b   : > { %v674_v23 = vpop.f32.mrf.mxu1  ;;  %v914_v24 = vsel %vm850_vm13, %v818_v9, %v882_v18  ;;  %v821_v26 = vadd.f32 %v1480_v15, %v1791_v19  ;;  %v837_v27 = vadd.f32 %v1496_v16, %v1791_v19  ;;  %v930_v29 = vsel %vm866_vm14, %v834_v10, %v898_v20 }
 0x10c   : > { %v1368_v28 = vpack.c.bf16 %v914_v24, %v913_v4  ;;  %v912_v30 = vsel %vm848_vm15, %v816_v13, %v880_v21  ;;  %v819_v31 = vadd.f32 %v1791_v19, %v610_v22  ;;  %v1481_v32 = vpop.f32.mrf.mxu0  ;;  %v1408_v34 = vpack.c.bf16 %v930_v29, %v929_v11 }
 0x10d   : > { %v1497_v33 = vpop.f32.mrf.mxu1  ;;  %v1363_v35 = vpack.c.bf16 %v912_v30, %v911_v12  ;;  %v928_v36 = vsel %vm864_vm0, %v832_v14, %v896_v25  ;;  %vm853_vm1 = vcmp.ge.f32.partialorder %v821_v26, 0.0  ;;  %v885_v38 = vmul.f32 0.2, %v821_v26 }
 0x10e   : > { %1432 = vst [vmem:[%s1806_s15 + $0x18] sm:$0xff] %v1368_v28   ;;  %v1403_v37 = vpack.c.bf16 %v928_v36, %v927_v17  ;;  %vm869_vm2 = vcmp.ge.f32.partialorder %v837_v27, 0.0  ;;  %v901_v39 = vmul.f32 0.2, %v837_v27  ;;  %v613_v40 = vpop.f32.mrf.mxu0  ;;  %1440 = vst [vmem:[%s1806_s15 + $0x58] sm:$0xff] %v1408_v34   ;;  %vm851_vm3 = vcmp.ge.f32.partialorder %v819_v31, 0.0 }
 0x10f   : > { %v677_v41 = vpop.f32.mrf.mxu1  ;;  %1431 = vst [vmem:[%s1806_s15 + $0x10] sm:$0xff] %v1363_v35   ;;  %v883_v42 = vmul.f32 0.2, %v819_v31  ;;  %v835_v43 = vadd.f32 %v1791_v19, %v674_v23  ;;  %v822_v44 = vadd.f32 %v1481_v32, %v1791_v19  ;;  %v917_v45 = vsel %vm853_vm1, %v821_v26, %v885_v38 }
 0x110   : > { %1439 = vst [vmem:[%s1806_s15 + $0x50] sm:$0xff] %v1403_v37   ;;  %v838_v46 = vadd.f32 %v1497_v33, %v1791_v19  ;;  %v820_v47 = vadd.f32 %v1791_v19, %v613_v40  ;;  %v1484_v48 = vpop.f32.mrf.mxu0  ;;  %v933_v50 = vsel %vm869_vm2, %v837_v27, %v901_v39  ;;  %v836_v58 = vadd.f32 %v1791_v19, %v677_v41 }
 0x111   : > { %v1500_v49 = vpop.f32.mrf.mxu1  ;;  %v915_v51 = vsel %vm851_vm3, %v819_v31, %v883_v42  ;;  %vm867_vm4 = vcmp.ge.f32.partialorder %v835_v43, 0.0  ;;  %vm854_vm5 = vcmp.ge.f32.partialorder %v822_v44, 0.0  ;;  %v886_v52 = vmul.f32 0.2, %v822_v44 }
 0x112   : > { %vm870_vm6 = vcmp.ge.f32.partialorder %v838_v46, 0.0  ;;  %v902_v53 = vmul.f32 0.2, %v838_v46  ;;  %vm852_vm7 = vcmp.ge.f32.partialorder %v820_v47, 0.0  ;;  %v626_v54 = vpop.f32.mrf.mxu0  ;;  %v899_v56 = vmul.f32 0.2, %v835_v43 }
 0x113   : > { %v690_v55 = vpop.f32.mrf.mxu1  ;;  %v884_v57 = vmul.f32 0.2, %v820_v47  ;;  %v825_v59 = vadd.f32 %v1484_v48, %v1791_v19  ;;  %v918_v60 = vsel %vm854_vm5, %v822_v44, %v886_v52  ;;  %v841_v62 = vadd.f32 %v1500_v49, %v1791_v19 }
 0x114   : > { %v934_v61 = vsel %vm870_vm6, %v838_v46, %v902_v53  ;;  %v823_v63 = vadd.f32 %v1791_v19, %v626_v54  ;;  %v1485_v0 = vpop.f32.mrf.mxu0  ;;  %v1378_v2 = vpack.c.bf16 %v918_v60, %v917_v45  ;;  %vm868_vm8 = vcmp.ge.f32.partialorder %v836_v58, 0.0 }
 0x115   : > { %v1501_v1 = vpop.f32.mrf.mxu1  ;;  %v1418_v3 = vpack.c.bf16 %v934_v61, %v933_v50  ;;  %v916_v4 = vsel %vm852_vm7, %v820_v47, %v884_v57  ;;  %v900_v6 = vmul.f32 0.2, %v836_v58  ;;  %v889_v7 = vmul.f32 0.2, %v825_v59 }
 0x116   : > { %v1373_v5 = vpack.c.bf16 %v916_v4, %v915_v51  ;;  %v931_v8 = vsel %vm867_vm4, %v835_v43, %v899_v56  ;;  %1434 = vst [vmem:[%s1806_s15 + $0x28] sm:$0xff] %v1378_v2   ;;  %vm857_vm9 = vcmp.ge.f32.partialorder %v825_v59, 0.0  ;;  %v905_v10 = vmul.f32 0.2, %v841_v62  ;;  %v629_v13 = vpop.f32.mrf.mxu0 }
 0x117   : > { %1442 = vst [vmem:[%s1806_s15 + $0x68] sm:$0xff] %v1418_v3   ;;  %v932_v9 = vsel %vm868_vm8, %v836_v58, %v900_v6  ;;  %v839_v11 = vadd.f32 %v1791_v19, %v690_v55  ;;  %v826_v12 = vadd.f32 %v1485_v0, %v1791_v19  ;;  %v693_v14 = vpop.f32.mrf.mxu1  ;;  %vm873_vm10 = vcmp.ge.f32.partialorder %v841_v62, 0.0 }
 0x118   : > { %1433 = vst [vmem:[%s1806_s15 + $0x20] sm:$0xff] %v1373_v5   ;;  %v1413_v15 = vpack.c.bf16 %v932_v9, %v931_v8  ;;  %vm855_vm11 = vcmp.ge.f32.partialorder %v823_v63, 0.0  ;;  %v842_v16 = vadd.f32 %v1501_v1, %v1791_v19  ;;  %v921_v17 = vsel %vm857_vm9, %v825_v59, %v889_v7 }
 0x119   : > { %v887_v18 = vmul.f32 0.2, %v823_v63  ;;  %vm858_vm12 = vcmp.ge.f32.partialorder %v826_v12, 0.0  ;;  %v890_v20 = vmul.f32 0.2, %v826_v12  ;;  %v824_v22 = vadd.f32 %v1791_v19, %v629_v13 }
 0x11a   : > { %1441 = vst [vmem:[%s1806_s15 + $0x60] sm:$0xff] %v1413_v15   ;;  %vm874_vm13 = vcmp.ge.f32.partialorder %v842_v16, 0.0  ;;  %v906_v21 = vmul.f32 0.2, %v842_v16  ;;  %v840_v23 = vadd.f32 %v1791_v19, %v693_v14  ;;  %v937_v24 = vsel %vm873_vm10, %v841_v62, %v905_v10 }
 0x11b   : > { %vm871_vm14 = vcmp.ge.f32.partialorder %v839_v11, 0.0  ;;  %v903_v25 = vmul.f32 0.2, %v839_v11  ;;  %v922_v26 = vsel %vm858_vm12, %v826_v12, %v890_v20  ;;  %vm856_vm15 = vcmp.ge.f32.partialorder %v824_v22, 0.0 }
 0x11c   : > { %v1388_v27 = vpack.c.bf16 %v922_v26, %v921_v17  ;;  %v938_v28 = vsel %vm874_vm13, %v842_v16, %v906_v21  ;;  %v888_v29 = vmul.f32 0.2, %v824_v22  ;;  %vm872_vm0 = vcmp.ge.f32.partialorder %v840_v23, 0.0 }
 0x11d   : > { %v1428_v30 = vpack.c.bf16 %v938_v28, %v937_v24  ;;  %v904_v31 = vmul.f32 0.2, %v840_v23  ;;  %v919_v32 = vsel %vm855_vm11, %v823_v63, %v887_v18  ;;  %v935_v34 = vsel %vm871_vm14, %v839_v11, %v903_v25 }
 0x11e   : > { %1436 = vst [vmem:[%s1806_s15 + $0x38] sm:$0xff] %v1388_v27   ;;  %v920_v33 = vsel %vm856_vm15, %v824_v22, %v888_v29 }
 0x11f   : > { %1444 = vst [vmem:[%s1806_s15 + $0x78] sm:$0xff] %v1428_v30   ;;  %v1383_v19 = vpack.c.bf16 %v920_v33, %v919_v32  ;;  %v936_v35 = vsel %vm872_vm0, %v840_v23, %v904_v31 }
 0x120   : > { %v1423_v36 = vpack.c.bf16 %v936_v35, %v935_v34 }
 0x121   : > { %1435 = vst [vmem:[%s1806_s15 + $0x30] sm:$0xff] %v1383_v19  }
 0x122   : > { %1443 = vst [vmem:[%s1806_s15 + $0x70] sm:$0xff] %v1423_v36  }
 0x123 PF: > { %s15_s14 = sadd.s32 1, %s1656_s14   ;;  %s1868_s12 = smov %s1652_s13 }
 0x124   : > { %p12_p3 = scmp.ge.s32.totalorder %s15_s14, 4   ;;  %s1869_s13 = smov %s1871_s16 }
 0x126   :  { %14 = sbr.rel (!%p12_p3) target bundleno = 3 (0x3), region = 81 }
 0x12b   :  { %1135 = vsyncpa [#allocation4], 1 }
 0x12c   :  { %1137 = vsyncpa [#allocation4 + $0x1], 1 }
 0x12d   :  { %1138 = vsyncpa [#allocation6], 1 }

// kernel: dis_forward.10
= control target key start
LH: loop header
LB: loop body
LE: loop exit
PB: predicated region body
PF: predicated region fallthrough
CT: control target
= control target key end

     0   :  { %s499_s6 = smov 0   ;;  %s501_s7 = smov 0   ;;  %s539_s0 = inlined_call_operand.vmem [shape: bf16[2,64,128], index: 0, kind: input, shape index: {}]   ;;  %s540_s1 = inlined_call_operand.vmem [shape: bf16[2,64,128], index: 1, kind: output, shape index: {}]  }
   0x1   :  { %s503_s8 = smov 0  }
   0x2 LB: > { %s23_s9 = sadd.s32 1, %s483_s7  ;;  %p372_p0 = scmp.ge.s32.totalorder %s487_s8, 1  ;;  %s487_s8 = sphi %s503_s8, %s11_s8   ;;  %s483_s7 = sphi %s501_s7, %s542_s7   ;;  %s479_s6 = sphi %s499_s6, %s541_s6  }
   0x3   : > { %p25_p1 = scmp.ge.s32.totalorder %s23_s9, 2  ;;  %p106_p2 = scmp.lt.s32.totalorder %s487_s8, 3 }
   0x5   : > { %s544_s9 = smov (%p25_p1, %s23_s9), 0  ;;  %p107_p3 = pnand %p372_p0, %p106_p2 }
   0x6   : > { %p132_p4 = scmp.lt.s32.totalorder (!%p107_p3), %s479_s6, 1 }
   0x7   : > { %110 = sbr.rel (%p107_p3) target bundleno = 81 (0x51), region = 24 }
   0xc   : > { %s546_s6 = smov (!%p132_p4, %s479_s6), 1 }
   0xd   : > { %s387_s10 = sshll.u32 %s546_s6, 5 }
   0xe   : > { %s139_s13 = scalar_lea.vmem %s539_s0, %s387_s10  ;;  %s147_s16 = scalar_lea.vmem %s540_s1, %s387_s10 }
   0xf   : > { %v398_v0 = vld [vmem:[%s139_s13] sm:$0xff]   ;;  %v433_v1 = vld [vmem:[%s139_s13 + $0x8] sm:$0xff]   ;;  %v434_v2 = vld [vmem:[%s139_s13 + $0x10] sm:$0xff]  }
  0x10   : > { %v399_v3 = vunpack.c.l.bf16 %v398_v0  ;;  %v400_v4 = vunpack.c.h.bf16 %v398_v0  ;;  %v403_v5 = vunpack.c.l.bf16 %v433_v1  ;;  %v404_v6 = vunpack.c.h.bf16 %v433_v1  ;;  %v435_v12 = vld [vmem:[%s139_s13 + $0x18] sm:$0xff]  }
  0x11   : > { %v407_v7 = vunpack.c.l.bf16 %v434_v2  ;;  %v408_v13 = vunpack.c.h.bf16 %v434_v2  ;;  %v411_v17 = vunpack.c.l.bf16 %v435_v12  ;;  %v412_v21 = vunpack.c.h.bf16 %v435_v12 }
  0x12   : > { %v164_v8 = vadd.f32 %v400_v4, %v399_v3  ;;  %v178_v9 = vmul.f32 %v399_v3, %v399_v3  ;;  %v179_v10 = vmul.f32 %v400_v4, %v400_v4  ;;  %v180_v11 = vmul.f32 %v403_v5, %v403_v5 }
  0x13   : > { %v181_v15 = vmul.f32 %v404_v6, %v404_v6  ;;  %v182_v19 = vmul.f32 %v407_v7, %v407_v7  ;;  %v183_v23 = vmul.f32 %v408_v13, %v408_v13  ;;  %v184_v26 = vmul.f32 %v411_v17, %v411_v17 }
  0x14   : > { %v165_v14 = vadd.f32 %v403_v5, %v164_v8  ;;  %v186_v16 = vadd.f32 %v179_v10, %v178_v9  ;;  %v185_v29 = vmul.f32 %v412_v21, %v412_v21 }
  0x16   : > { %v166_v18 = vadd.f32 %v404_v6, %v165_v14  ;;  %v187_v20 = vadd.f32 %v186_v16, %v180_v11 }
  0x18   : > { %v167_v22 = vadd.f32 %v407_v7, %v166_v18  ;;  %v188_v24 = vadd.f32 %v187_v20, %v181_v15 }
  0x1a   : > { %v168_v25 = vadd.f32 %v408_v13, %v167_v22  ;;  %v189_v27 = vadd.f32 %v188_v24, %v182_v19 }
  0x1c   : > { %v169_v28 = vadd.f32 %v411_v17, %v168_v25  ;;  %v190_v30 = vadd.f32 %v189_v27, %v183_v23 }
  0x1e   : > { %v170_v31 = vadd.f32 %v412_v21, %v169_v28  ;;  %v191_v32 = vadd.f32 %v190_v30, %v184_v26 }
  0x20   : > { %v171_v33 = vrot.slane %v170_v31, 4  ;;  %v192_v34 = vadd.f32 %v191_v32, %v185_v29 }
  0x22   : > { %v172_v35 = vadd.f32 %v171_v33, %v170_v31  ;;  %v193_v36 = vrot.slane %v192_v34, 4 }
  0x24   : > { %v173_v37 = vrot.slane %v172_v35, 2  ;;  %v194_v38 = vadd.f32 %v193_v36, %v192_v34 }
  0x26   : > { %v174_v39 = vadd.f32 %v173_v37, %v172_v35  ;;  %v195_v40 = vrot.slane %v194_v38, 2 }
  0x28   : > { %v175_v41 = vrot.slane %v174_v39, 1  ;;  %v196_v42 = vadd.f32 %v195_v40, %v194_v38 }
  0x2a   : > { %v176_v43 = vadd.f32 %v175_v41, %v174_v39  ;;  %v197_v44 = vrot.slane %v196_v42, 1 }
  0x2c   : > { %v177_v45 = vmul.f32 0.015625, %v176_v43  ;;  %v198_v46 = vadd.f32 %v197_v44, %v196_v42 }
  0x2e   : > { %v199_v47 = vmul.f32 0.015625, %v198_v46  ;;  %v200_v48 = vmul.f32 %v177_v45, %v177_v45  ;;  %v203_v52 = vsub.f32 %v399_v3, %v177_v45  ;;  %v204_v53 = vsub.f32 %v400_v4, %v177_v45 }
  0x2f   : > { %v205_v54 = vsub.f32 %v403_v5, %v177_v45  ;;  %v206_v55 = vsub.f32 %v404_v6, %v177_v45  ;;  %v207_v56 = vsub.f32 %v407_v7, %v177_v45  ;;  %v208_v57 = vsub.f32 %v408_v13, %v177_v45 }
  0x30   : > { %v201_v49 = vsub.f32 %v199_v47, %v200_v48  ;;  %v209_v58 = vsub.f32 %v411_v17, %v177_v45  ;;  %v210_v59 = vsub.f32 %v412_v21, %v177_v45 }
  0x32   : > { %v202_v50 = vmax.f32 %v201_v49, 0.0 }
  0x34   : > { %v211_v51 = vadd.f32 1e-05, %v202_v50 }
  0x36   : > { %463 = vrsqrt.f32 %v211_v51 }
  0x43   : > { %v464_v60 = vpop.eup %463 }
  0x44   : > { %v213_v61 = vmul.f32 %v464_v60, %v203_v52  ;;  %v214_v62 = vmul.f32 %v464_v60, %v204_v53  ;;  %v215_v63 = vmul.f32 %v464_v60, %v205_v54  ;;  %v216_v0 = vmul.f32 %v464_v60, %v206_v55 }
  0x45   : > { %v217_v1 = vmul.f32 %v464_v60, %v207_v56  ;;  %v218_v2 = vmul.f32 %v464_v60, %v208_v57  ;;  %v219_v8 = vmul.f32 %v464_v60, %v209_v58  ;;  %v220_v9 = vmul.f32 %v464_v60, %v210_v59 }
  0x46   : > { %vm221_vm0 = vcmp.ge.f32.partialorder %v213_v61, 0.0  ;;  %vm222_vm1 = vcmp.ge.f32.partialorder %v214_v62, 0.0  ;;  %v229_v3 = vmul.f32 0.2, %v213_v61  ;;  %v230_v4 = vmul.f32 0.2, %v214_v62 }
  0x47   : > { %vm223_vm2 = vcmp.ge.f32.partialorder %v215_v63, 0.0  ;;  %vm224_vm3 = vcmp.ge.f32.partialorder %v216_v0, 0.0  ;;  %v231_v5 = vmul.f32 0.2, %v215_v63  ;;  %v232_v6 = vmul.f32 0.2, %v216_v0 }
  0x48   : > { %v237_v7 = vsel %vm221_vm0, %v213_v61, %v229_v3  ;;  %v238_v10 = vsel %vm222_vm1, %v214_v62, %v230_v4  ;;  %vm225_vm4 = vcmp.ge.f32.partialorder %v217_v1, 0.0  ;;  %vm226_vm5 = vcmp.ge.f32.partialorder %v218_v2, 0.0 }
  0x49   : > { %v416_v11 = vpack.c.bf16 %v238_v10, %v237_v7  ;;  %v239_v12 = vsel %vm223_vm2, %v215_v63, %v231_v5  ;;  %v240_v13 = vsel %vm224_vm3, %v216_v0, %v232_v6  ;;  %v233_v14 = vmul.f32 0.2, %v217_v1 }
  0x4a   : > { %v421_v15 = vpack.c.bf16 %v240_v13, %v239_v12  ;;  %v234_v16 = vmul.f32 0.2, %v218_v2  ;;  %vm227_vm6 = vcmp.ge.f32.partialorder %v219_v8, 0.0  ;;  %vm228_vm7 = vcmp.ge.f32.partialorder %v220_v9, 0.0 }
  0x4b   : > { %417 = vst [vmem:[%s147_s16] sm:$0xff] %v416_v11   ;;  %v241_v17 = vsel %vm225_vm4, %v217_v1, %v233_v14  ;;  %v235_v18 = vmul.f32 0.2, %v219_v8  ;;  %v236_v19 = vmul.f32 0.2, %v220_v9 }
  0x4c   : > { %436 = vst [vmem:[%s147_s16 + $0x8] sm:$0xff] %v421_v15   ;;  %v242_v20 = vsel %vm226_vm5, %v218_v2, %v234_v16 }
  0x4d   : > { %v426_v21 = vpack.c.bf16 %v242_v20, %v241_v17  ;;  %v243_v22 = vsel %vm227_vm6, %v219_v8, %v235_v18  ;;  %v244_v23 = vsel %vm228_vm7, %v220_v9, %v236_v19 }
  0x4e   : > { %v431_v24 = vpack.c.bf16 %v244_v23, %v243_v22 }
  0x4f   : > { %437 = vst [vmem:[%s147_s16 + $0x10] sm:$0xff] %v426_v21  }
  0x50   : > { %438 = vst [vmem:[%s147_s16 + $0x18] sm:$0xff] %v431_v24  }
  0x51 PF: > { %s11_s8 = sadd.s32 1, %s487_s8   ;;  %s541_s6 = smov %s483_s7 }
  0x52   : > { %p8_p5 = scmp.ge.s32.totalorder %s11_s8, 4   ;;  %s542_s7 = smov %s544_s9 }
  0x54   :  { %10 = sbr.rel (!%p8_p5) target bundleno = 2 (0x2), region = 54 }

// kernel: dis_forward.9
= control target key start
LH: loop header
LB: loop body
LE: loop exit
PB: predicated region body
PF: predicated region fallthrough
CT: control target
= control target key end

     0   :  { %s1947_s12 = smov 0   ;;  %s1949_s13 = smov 0   ;;  %s2269_s0 = inlined_call_operand.vmem [shape: bf16[2,64,1024], index: 0, kind: input, shape index: {}]   ;;  %s2270_s1 = inlined_call_operand.vmem [shape: bf16[1024,128], index: 1, kind: input, shape index: {}]   ;;  %s2271_s2 = inlined_call_operand.vmem [shape: f32[1,128], index: 2, kind: input, shape index: {}]   ;;  %s2272_s3 = inlined_call_operand.vmem [shape: bf16[2,64,128], index: 3, kind: output, shape index: {}]  }
   0x1   :  { %s1951_s14 = smov 0  }
   0x2 LB: > { %s39_s15 = sadd.s32 1, %s1921_s13  ;;  %p1510_p0 = scmp.ge.s32.totalorder %s1925_s14, 1  ;;  %s1925_s14 = sphi %s1951_s14, %s13_s14   ;;  %s1921_s13 = sphi %s1949_s13, %s2274_s13   ;;  %s1917_s12 = sphi %s1947_s12, %s2273_s12  }
   0x3   : > { %p41_p1 = scmp.ge.s32.totalorder %s39_s15, 2  ;;  %p206_p2 = scmp.lt.s32.totalorder %s1925_s14, 3 }
   0x5   : > { %s2276_s15 = smov (%p41_p1, %s39_s15), 0  ;;  %p207_p3 = pnand %p1510_p0, %p206_p2 }
   0x6   : > { %p259_p4 = scmp.lt.s32.totalorder (!%p207_p3), %s1917_s12, 1 }
   0x7   : > { %210 = sbr.rel (%p207_p3) target bundleno = 312 (0x138), region = 32 }
   0xc   : > { %v1839_v0 = vld [vmem:[%s2270_s1 + $0x78] sm:$0xff]   ;;  %v1843_v4 = vld [vmem:[%s2270_s1 + $0x70] sm:$0xff]   ;;  %v1847_v8 = vld [vmem:[%s2270_s1 + $0x68] sm:$0xff]   ;;  %s2278_s12 = smov (!%p259_p4, %s1917_s12), 1 }
   0xd   : > { %v1840_v1 = vld [vmem:[%s2270_s1 + $0xf8] sm:$0xff]   ;;  %1655 = vmatprep.subr.bf16.mxu0 %v1839_v0  ;;  %v1844_v5 = vld [vmem:[%s2270_s1 + $0xf0] sm:$0xff]   ;;  %v1848_v9 = vld [vmem:[%s2270_s1 + $0xe8] sm:$0xff]   ;;  %s1622_s24 = sshll.u32 %s2278_s12, 8  ;;  %s1623_s10 = sshll.u32 %s2278_s12, 5 }
   0xe   : > { %v1841_v2 = vld [vmem:[%s2270_s1 + $0x38] sm:$0xff]   ;;  %1695 = vmatprep.subr.bf16.mxu1 %v1840_v1  ;;  %v1845_v6 = vld [vmem:[%s2270_s1 + $0x30] sm:$0xff]   ;;  %v1849_v10 = vld [vmem:[%s2270_s1 + $0x28] sm:$0xff]   ;;  %s2065_s6 = scalar_lea.vmem %s2269_s0, %s1622_s24  ;;  %s2236_s17 = scalar_lea.vmem %s2272_s3, %s1623_s10 }
   0xf   : > { %v1842_v3 = vld [vmem:[%s2270_s1 + $0xb8] sm:$0xff]   ;;  %1656 = vmatpush3.bf16.msra.mxu0 %v1841_v2  ;;  %v1846_v7 = vld [vmem:[%s2270_s1 + $0xb0] sm:$0xff]   ;;  %v1850_v11 = vld [vmem:[%s2270_s1 + $0xa8] sm:$0xff]  }
  0x10   : > { %1696 = vmatpush3.bf16.msra.mxu1 %v1842_v3  ;;  %1657 = vmatprep.subr.bf16.mxu0 %v1843_v4  ;;  %v1851_v12 = vld [vmem:[%s2270_s1 + $0x60] sm:$0xff]   ;;  %v1855_v16 = vld [vmem:[%s2270_s1 + $0x58] sm:$0xff]   ;;  %v1859_v20 = vld [vmem:[%s2270_s1 + $0x50] sm:$0xff]  }
  0x11   : > { %1697 = vmatprep.subr.bf16.mxu1 %v1844_v5  ;;  %v1852_v13 = vld [vmem:[%s2270_s1 + $0xe0] sm:$0xff]   ;;  %v1856_v17 = vld [vmem:[%s2270_s1 + $0xd8] sm:$0xff]   ;;  %v1860_v21 = vld [vmem:[%s2270_s1 + $0xd0] sm:$0xff]  }
  0x12   : > { %v1853_v14 = vld [vmem:[%s2270_s1 + $0x20] sm:$0xff]   ;;  %v1857_v18 = vld [vmem:[%s2270_s1 + $0x18] sm:$0xff]   ;;  %v1861_v22 = vld [vmem:[%s2270_s1 + $0x10] sm:$0xff]  }
  0x13   : > { %1658 = vmatpush3.bf16.msra.mxu0 %v1845_v6  ;;  %v1854_v15 = vld [vmem:[%s2270_s1 + $0xa0] sm:$0xff]   ;;  %v1858_v19 = vld [vmem:[%s2270_s1 + $0x98] sm:$0xff]   ;;  %v1862_v23 = vld [vmem:[%s2270_s1 + $0x90] sm:$0xff]  }
  0x14   : > { %1698 = vmatpush3.bf16.msra.mxu1 %v1846_v7  ;;  %1659 = vmatprep.subr.bf16.mxu0 %v1847_v8  ;;  %v1863_v24 = vld [vmem:[%s2270_s1 + $0x48] sm:$0xff]   ;;  %v1867_v28 = vld [vmem:[%s2270_s1 + $0x40] sm:$0xff]   ;;  %v1871_v40 = vld [vmem:[%s2270_s1 + $0x178] sm:$0xff]  }
  0x15   : > { %1699 = vmatprep.subr.bf16.mxu1 %v1848_v9  ;;  %v1864_v25 = vld [vmem:[%s2270_s1 + $0xc8] sm:$0xff]   ;;  %v1868_v29 = vld [vmem:[%s2270_s1 + $0xc0] sm:$0xff]   ;;  %v1872_v41 = vld [vmem:[%s2270_s1 + $0x1f8] sm:$0xff]  }
  0x16   : > { %v1865_v26 = vld [vmem:[%s2270_s1 + $0x8] sm:$0xff]   ;;  %v1869_v30 = vld [vmem:[%s2270_s1] sm:$0xff]   ;;  %v1873_v42 = vld [vmem:[%s2270_s1 + $0x138] sm:$0xff]  }
  0x17   : > { %1660 = vmatpush3.bf16.msra.mxu0 %v1849_v10  ;;  %v1866_v27 = vld [vmem:[%s2270_s1 + $0x88] sm:$0xff]   ;;  %v1870_v31 = vld [vmem:[%s2270_s1 + $0x80] sm:$0xff]   ;;  %v1874_v43 = vld [vmem:[%s2270_s1 + $0x1b8] sm:$0xff]  }
  0x18   : > { %1700 = vmatpush3.bf16.msra.mxu1 %v1850_v11  ;;  %1661 = vmatprep.subr.bf16.mxu0 %v1851_v12  ;;  %v319_v32 = vld [vmem:[%s2065_s6] sm:$0xff]  ;;  %v320_v34 = vld [vmem:[%s2065_s6 + $0x8] sm:$0xff]  ;;  %v1875_v44 = vld [vmem:[%s2270_s1 + $0x170] sm:$0xff]  }
  0x19   : > { %1701 = vmatprep.subr.bf16.mxu1 %v1852_v13  ;;  %v323_v33 = vld [vmem:[%s2065_s6 + $0x20] sm:$0xff]  ;;  %v324_v37 = vld [vmem:[%s2065_s6 + $0x28] sm:$0xff]  ;;  %v1876_v45 = vld [vmem:[%s2270_s1 + $0x1f0] sm:$0xff]  }
  0x1a   : > { %v1515_v35 = vcombine.low %v319_v32, %v323_v33  ;;  %v1516_v36 = vcombine.high %v319_v32, %v323_v33  ;;  %v1517_v38 = vcombine.low %v320_v34, %v324_v37  ;;  %v1518_v39 = vcombine.high %v320_v34, %v324_v37  ;;  %v1877_v46 = vld [vmem:[%s2270_s1 + $0x130] sm:$0xff]   ;;  %v327_v48 = vld [vmem:[%s2065_s6 + $0x40] sm:$0xff]  ;;  %v328_v51 = vld [vmem:[%s2065_s6 + $0x48] sm:$0xff] }
  0x1b   : > { %1662 = vmatpush3.bf16.msra.mxu0 %v1853_v14  ;;  %v1878_v47 = vld [vmem:[%s2270_s1 + $0x1b0] sm:$0xff]   ;;  %v331_v49 = vld [vmem:[%s2065_s6 + $0x60] sm:$0xff]  ;;  %v332_v52 = vld [vmem:[%s2065_s6 + $0x68] sm:$0xff] }
  0x1c   : > { %1702 = vmatpush3.bf16.msra.mxu1 %v1854_v15  ;;  %1663 = vmatprep.subr.bf16.mxu0 %v1855_v16  ;;  %v1524_v50 = vcombine.high %v327_v48, %v331_v49  ;;  %v1523_v53 = vcombine.low %v327_v48, %v331_v49  ;;  %v1526_v54 = vcombine.high %v328_v51, %v332_v52  ;;  %v1879_v56 = vld [vmem:[%s2270_s1 + $0x168] sm:$0xff]   ;;  %v1883_v60 = vld [vmem:[%s2270_s1 + $0x160] sm:$0xff]   ;;  %v1887_v8 = vld [vmem:[%s2270_s1 + $0x158] sm:$0xff]  }
  0x1d   : > { %1703 = vmatprep.subr.bf16.mxu1 %v1856_v17  ;;  %1055 = vmatprep.mubr.bf16.mxu0 %v1516_v36  ;;  %v1525_v55 = vcombine.low %v328_v51, %v332_v52  ;;  %v1880_v57 = vld [vmem:[%s2270_s1 + $0x1e8] sm:$0xff]   ;;  %v1884_v61 = vld [vmem:[%s2270_s1 + $0x1e0] sm:$0xff]   ;;  %v1888_v9 = vld [vmem:[%s2270_s1 + $0x1d8] sm:$0xff]  }
  0x1e   : > { %1120 = vmatprep.mubr.bf16.mxu1 %v1518_v39  ;;  %v1881_v58 = vld [vmem:[%s2270_s1 + $0x128] sm:$0xff]   ;;  %v1885_v62 = vld [vmem:[%s2270_s1 + $0x120] sm:$0xff]   ;;  %v1889_v10 = vld [vmem:[%s2270_s1 + $0x118] sm:$0xff]  }
  0x1f   : > { %1664 = vmatpush3.bf16.msra.mxu0 %v1857_v18  ;;  %v1882_v59 = vld [vmem:[%s2270_s1 + $0x1a8] sm:$0xff]   ;;  %v1886_v63 = vld [vmem:[%s2270_s1 + $0x1a0] sm:$0xff]   ;;  %v1890_v11 = vld [vmem:[%s2270_s1 + $0x198] sm:$0xff]  }
  0x20   : > { %1704 = vmatpush3.bf16.msra.mxu1 %v1858_v19  ;;  %1665 = vmatprep.subr.bf16.mxu0 %v1859_v20  ;;  %v335_v0 = vld [vmem:[%s2065_s6 + $0x80] sm:$0xff]  ;;  %v336_v2 = vld [vmem:[%s2065_s6 + $0x88] sm:$0xff]  ;;  %v1891_v12 = vld [vmem:[%s2270_s1 + $0x150] sm:$0xff]  }
  0x21   : > { %1705 = vmatprep.subr.bf16.mxu1 %v1860_v21  ;;  %v339_v1 = vld [vmem:[%s2065_s6 + $0xa0] sm:$0xff]  ;;  %v340_v3 = vld [vmem:[%s2065_s6 + $0xa8] sm:$0xff]  ;;  %v1892_v13 = vld [vmem:[%s2270_s1 + $0x1d0] sm:$0xff]  }
  0x22   : > { %v1532_v4 = vcombine.high %v335_v0, %v339_v1  ;;  %v1534_v5 = vcombine.high %v336_v2, %v340_v3  ;;  %v1531_v6 = vcombine.low %v335_v0, %v339_v1  ;;  %v1533_v7 = vcombine.low %v336_v2, %v340_v3  ;;  %v1893_v14 = vld [vmem:[%s2270_s1 + $0x110] sm:$0xff]   ;;  %v343_v16 = vld [vmem:[%s2065_s6 + $0xc0] sm:$0xff]  ;;  %v344_v18 = vld [vmem:[%s2065_s6 + $0xc8] sm:$0xff] }
  0x23   : > { %1666 = vmatpush3.bf16.msra.mxu0 %v1861_v22  ;;  %v1894_v15 = vld [vmem:[%s2270_s1 + $0x190] sm:$0xff]   ;;  %v347_v17 = vld [vmem:[%s2065_s6 + $0xe0] sm:$0xff]  ;;  %v348_v20 = vld [vmem:[%s2065_s6 + $0xe8] sm:$0xff] }
  0x24   : > { %1706 = vmatpush3.bf16.msra.mxu1 %v1862_v23  ;;  %1667 = vmatprep.subr.bf16.mxu0 %v1863_v24  ;;  %v1540_v19 = vcombine.high %v343_v16, %v347_v17  ;;  %v1539_v21 = vcombine.low %v343_v16, %v347_v17  ;;  %v1542_v22 = vcombine.high %v344_v18, %v348_v20  ;;  %v1895_v24 = vld [vmem:[%s2270_s1 + $0x148] sm:$0xff]   ;;  %v321_v32 = vld [vmem:[%s2065_s6 + $0x10] sm:$0xff]  ;;  %v322_v36 = vld [vmem:[%s2065_s6 + $0x18] sm:$0xff] }
  0x25   : > { %1707 = vmatprep.subr.bf16.mxu1 %v1864_v25  ;;  %v1541_v23 = vcombine.low %v344_v18, %v348_v20  ;;  %v1896_v25 = vld [vmem:[%s2270_s1 + $0x1c8] sm:$0xff]   ;;  %v325_v33 = vld [vmem:[%s2065_s6 + $0x30] sm:$0xff]  ;;  %v326_v37 = vld [vmem:[%s2065_s6 + $0x38] sm:$0xff] }
  0x26   : > { %v1519_v34 = vcombine.low %v321_v32, %v325_v33  ;;  %v1521_v39 = vcombine.low %v322_v36, %v326_v37  ;;  %v338_v48 = vld [vmem:[%s2065_s6 + $0x98] sm:$0xff] }
  0x27   : > { %1668 = vmatpush3.bf16.msra.mxu0 %v1865_v26  ;;  %v1897_v26 = vld [vmem:[%s2270_s1 + $0x108] sm:$0xff]   ;;  %v342_v49 = vld [vmem:[%s2065_s6 + $0xb8] sm:$0xff] }
  0x28   : > { %1708 = vmatpush3.bf16.msra.mxu1 %v1866_v27  ;;  %1669 = vmatprep.subr.bf16.mxu0 %v1867_v28  ;;  %v1898_v27 = vld [vmem:[%s2270_s1 + $0x188] sm:$0xff]   ;;  %v1899_v28 = vld [vmem:[%s2270_s1 + $0x140] sm:$0xff]  }
  0x29   : > { %1709 = vmatprep.subr.bf16.mxu1 %v1868_v29  ;;  %v1900_v29 = vld [vmem:[%s2270_s1 + $0x1c0] sm:$0xff]  }
  0x2b   : > { %1670 = vmatpush3.bf16.msra.mxu0 %v1869_v30  ;;  %v1901_v30 = vld [vmem:[%s2270_s1 + $0x100] sm:$0xff]  }
  0x2c   : > { %1710 = vmatpush3.bf16.msra.mxu1 %v1870_v31  ;;  %1735 = vmatprep.subr.bf16.mxu0 %v1871_v40  ;;  %v1902_v31 = vld [vmem:[%s2270_s1 + $0x180] sm:$0xff]   ;;  %v1522_v40 = vcombine.high %v322_v36, %v326_v37 }
  0x2d   : > { %1775 = vmatprep.subr.bf16.mxu1 %v1872_v41  ;;  %v333_v41 = vld [vmem:[%s2065_s6 + $0x70] sm:$0xff] }
  0x2e   : > { %1056 = vmatmul.mubr.bf16.vlgmr.msra.gmra.mxu0 %v1515_v35  ;;  %v1520_v35 = vcombine.high %v321_v32, %v325_v33 }
  0x2f   : > { %1121 = vmatmul.mubr.bf16.vlgmr.msra.gmra.mxu1 %v1517_v38  ;;  %1736 = vmatpush3.bf16.msra.mxu0 %v1873_v42  ;;  %v329_v38 = vld [vmem:[%s2065_s6 + $0x50] sm:$0xff]  ;;  %v330_v42 = vld [vmem:[%s2065_s6 + $0x58] sm:$0xff] }
  0x30   : > { %1776 = vmatpush3.bf16.msra.mxu1 %v1874_v43  ;;  %1737 = vmatprep.subr.bf16.mxu0 %v1875_v44  ;;  %v334_v43 = vld [vmem:[%s2065_s6 + $0x78] sm:$0xff]  ;;  %v1528_v44 = vcombine.high %v329_v38, %v333_v41 }
  0x31   : > { %1777 = vmatprep.subr.bf16.mxu1 %v1876_v45  ;;  %1063 = vmatprep.mubr.bf16.mxu0 %v1524_v50  ;;  %v1530_v45 = vcombine.high %v330_v42, %v334_v43  ;;  %v1527_v50 = vcombine.low %v329_v38, %v333_v41  ;;  %v1529_v51 = vcombine.low %v330_v42, %v334_v43 }
  0x32   : > { %1128 = vmatprep.mubr.bf16.mxu1 %v1526_v54  ;;  %v345_v54 = vld [vmem:[%s2065_s6 + $0xd0] sm:$0xff] }
  0x33   : > { %1738 = vmatpush3.bf16.msra.mxu0 %v1877_v46  ;;  %v337_v46 = vld [vmem:[%s2065_s6 + $0x90] sm:$0xff] }
  0x34   : > { %1778 = vmatpush3.bf16.msra.mxu1 %v1878_v47  ;;  %1739 = vmatprep.subr.bf16.mxu0 %v1879_v56  ;;  %v341_v47 = vld [vmem:[%s2065_s6 + $0xb0] sm:$0xff]  ;;  %v346_v56 = vld [vmem:[%s2065_s6 + $0xd8] sm:$0xff] }
  0x35   : > { %1779 = vmatprep.subr.bf16.mxu1 %v1880_v57  ;;  %v1536_v52 = vcombine.high %v337_v46, %v341_v47  ;;  %v350_v57 = vld [vmem:[%s2065_s6 + $0xf8] sm:$0xff] }
  0x36   : > { %1064 = vmatmul.mubr.bf16.gmra.mxu0 %v1523_v53  ;;  %v1538_v53 = vcombine.high %v338_v48, %v342_v49 }
  0x37   : > { %1129 = vmatmul.mubr.bf16.gmra.mxu1 %v1525_v55  ;;  %1740 = vmatpush3.bf16.msra.mxu0 %v1881_v58  ;;  %v349_v55 = vld [vmem:[%s2065_s6 + $0xf0] sm:$0xff]  ;;  %v1535_v58 = vcombine.low %v337_v46, %v341_v47 }
  0x38   : > { %1780 = vmatpush3.bf16.msra.mxu1 %v1882_v59  ;;  %1741 = vmatprep.subr.bf16.mxu0 %v1883_v60  ;;  %v1537_v59 = vcombine.low %v338_v48, %v342_v49  ;;  %v1544_v60 = vcombine.high %v345_v54, %v349_v55 }
  0x39   : > { %1781 = vmatprep.subr.bf16.mxu1 %v1884_v61  ;;  %1071 = vmatprep.mubr.bf16.mxu0 %v1532_v4  ;;  %v1546_v61 = vcombine.high %v346_v56, %v350_v57 }
  0x3a   : > { %1136 = vmatprep.mubr.bf16.mxu1 %v1534_v5 }
  0x3b   : > { %1742 = vmatpush3.bf16.msra.mxu0 %v1885_v62  ;;  %v1543_v62 = vcombine.low %v345_v54, %v349_v55 }
  0x3c   : > { %1782 = vmatpush3.bf16.msra.mxu1 %v1886_v63  ;;  %1743 = vmatprep.subr.bf16.mxu0 %v1887_v8  ;;  %v1545_v63 = vcombine.low %v346_v56, %v350_v57 }
  0x3d   : > { %1783 = vmatprep.subr.bf16.mxu1 %v1888_v9 }
  0x3e   : > { %1072 = vmatmul.mubr.bf16.gmra.mxu0 %v1531_v6 }
  0x3f   : > { %1137 = vmatmul.mubr.bf16.gmra.mxu1 %v1533_v7  ;;  %1744 = vmatpush3.bf16.msra.mxu0 %v1889_v10 }
  0x40   : > { %1784 = vmatpush3.bf16.msra.mxu1 %v1890_v11  ;;  %1745 = vmatprep.subr.bf16.mxu0 %v1891_v12 }
  0x41   : > { %1785 = vmatprep.subr.bf16.mxu1 %v1892_v13  ;;  %1079 = vmatprep.mubr.bf16.mxu0 %v1540_v19 }
  0x42   : > { %1144 = vmatprep.mubr.bf16.mxu1 %v1542_v22 }
  0x43   : > { %1746 = vmatpush3.bf16.msra.mxu0 %v1893_v14 }
  0x44   : > { %1786 = vmatpush3.bf16.msra.mxu1 %v1894_v15  ;;  %1747 = vmatprep.subr.bf16.mxu0 %v1895_v24 }
  0x45   : > { %1787 = vmatprep.subr.bf16.mxu1 %v1896_v25 }
  0x46   : > { %1080 = vmatmul.mubr.bf16.gmra.mxu0 %v1539_v21 }
  0x47   : > { %1145 = vmatmul.mubr.bf16.gmra.mxu1 %v1541_v23  ;;  %1748 = vmatpush3.bf16.msra.mxu0 %v1897_v26 }
  0x48   : > { %1788 = vmatpush3.bf16.msra.mxu1 %v1898_v27  ;;  %1749 = vmatprep.subr.bf16.mxu0 %v1899_v28 }
  0x49   : > { %1789 = vmatprep.subr.bf16.mxu1 %v1900_v29  ;;  %1185 = vmatprep.mubr.bf16.mxu0 %v1520_v35 }
  0x4a   : > { %1250 = vmatprep.mubr.bf16.mxu1 %v1522_v40 }
  0x4b   : > { %1750 = vmatpush3.bf16.msra.mxu0 %v1901_v30 }
  0x4c   : > { %1790 = vmatpush3.bf16.msra.mxu1 %v1902_v31 }
  0x4e   : > { %1186 = vmatmul.mubr.bf16.vlgmr.msra.gmra.mxu0 %v1519_v34 }
  0x4f   : > { %1251 = vmatmul.mubr.bf16.vlgmr.msra.gmra.mxu1 %v1521_v39  ;;  %1193 = vmatprep.mubr.bf16.mxu0 %v1528_v44 }
  0x50   : > { %1258 = vmatprep.mubr.bf16.mxu1 %v1530_v45 }
  0x56   : > { %1194 = vmatmul.mubr.bf16.gmra.mxu0 %v1527_v50 }
  0x57   : > { %1259 = vmatmul.mubr.bf16.gmra.mxu1 %v1529_v51  ;;  %1201 = vmatprep.mubr.bf16.mxu0 %v1536_v52 }
  0x58   : > { %1266 = vmatprep.mubr.bf16.mxu1 %v1538_v53 }
  0x5e   : > { %1202 = vmatmul.mubr.bf16.gmra.mxu0 %v1535_v58  ;;  %v2228_v58 = vld [vmem:[%s2271_s2] ss:$0 sm:$0xff] }
  0x5f   : > { %1267 = vmatmul.mubr.bf16.gmra.mxu1 %v1537_v59  ;;  %1209 = vmatprep.mubr.bf16.mxu0 %v1544_v60 }
  0x60   : > { %1274 = vmatprep.mubr.bf16.mxu1 %v1546_v61 }
  0x66   : > { %1210 = vmatmul.mubr.bf16.gmra.mxu0 %v1543_v62 }
  0x67   : > { %1275 = vmatmul.mubr.bf16.gmra.mxu1 %v1545_v63 }
  0xee   : > { %v1671_v0 = vpop.f32.mrf.mxu0 }
  0xef   : > { %v1711_v1 = vpop.f32.mrf.mxu1 }
  0xf0   : > { %v1672_v2 = vpop.f32.mrf.mxu0 }
  0xf1   : > { %v1712_v3 = vpop.f32.mrf.mxu1  ;;  %v1673_v32 = vadd.f32 %v1672_v2, %v1671_v0 }
  0xf2   : > { %v1674_v4 = vpop.f32.mrf.mxu0  ;;  %v1713_v33 = vadd.f32 %v1712_v3, %v1711_v1 }
  0xf3   : > { %v1714_v5 = vpop.f32.mrf.mxu1 }
  0xf4   : > { %v1675_v6 = vpop.f32.mrf.mxu0  ;;  %v1123_v37 = vadd.f32 %v1713_v33, %v1673_v32 }
  0xf5   : > { %v1715_v7 = vpop.f32.mrf.mxu1  ;;  %v1676_v38 = vadd.f32 %v1675_v6, %v1674_v4 }
  0xf6   : > { %v1677_v8 = vpop.f32.mrf.mxu0  ;;  %v1716_v39 = vadd.f32 %v1715_v7, %v1714_v5 }
  0xf7   : > { %v1717_v9 = vpop.f32.mrf.mxu1 }
  0xf8   : > { %v1678_v10 = vpop.f32.mrf.mxu0  ;;  %v1126_v48 = vadd.f32 %v1716_v39, %v1676_v38 }
  0xf9   : > { %v1718_v11 = vpop.f32.mrf.mxu1  ;;  %v1679_v45 = vadd.f32 %v1678_v10, %v1677_v8 }
  0xfa   : > { %v1680_v12 = vpop.f32.mrf.mxu0  ;;  %v1719_v46 = vadd.f32 %v1718_v11, %v1717_v9 }
  0xfb   : > { %v1720_v13 = vpop.f32.mrf.mxu1 }
  0xfc   : > { %v1681_v14 = vpop.f32.mrf.mxu0  ;;  %v1131_v57 = vadd.f32 %v1719_v46, %v1679_v45 }
  0xfd   : > { %v1721_v15 = vpop.f32.mrf.mxu1  ;;  %v1682_v60 = vadd.f32 %v1681_v14, %v1680_v12 }
  0xfe   : > { %v1683_v16 = vpop.f32.mrf.mxu0  ;;  %v1722_v61 = vadd.f32 %v1721_v15, %v1720_v13 }
  0xff   : > { %v1723_v17 = vpop.f32.mrf.mxu1 }
 0x100   : > { %v1684_v18 = vpop.f32.mrf.mxu0  ;;  %v1134_v9 = vadd.f32 %v1722_v61, %v1682_v60 }
 0x101   : > { %v1724_v19 = vpop.f32.mrf.mxu1  ;;  %v1685_v6 = vadd.f32 %v1684_v18, %v1683_v16 }
 0x102   : > { %v2201_v20 = vpop.f32.mrf.mxu0  ;;  %v1725_v7 = vadd.f32 %v1724_v19, %v1723_v17 }
 0x103   : > { %v2203_v21 = vpop.f32.mrf.mxu1 }
 0x104   : > { %v2205_v22 = vpop.f32.mrf.mxu0  ;;  %v1139_v16 = vadd.f32 %v1725_v7, %v1685_v6 }
 0x105   : > { %v2207_v23 = vpop.f32.mrf.mxu1  ;;  %v1688_v18 = vadd.f32 %v2205_v22, %v2201_v20 }
 0x106   : > { %v2209_v24 = vpop.f32.mrf.mxu0  ;;  %v1728_v19 = vadd.f32 %v2207_v23, %v2203_v21 }
 0x107   : > { %v2211_v25 = vpop.f32.mrf.mxu1 }
 0x108   : > { %v2213_v26 = vpop.f32.mrf.mxu0 }
 0x109   : > { %v2215_v27 = vpop.f32.mrf.mxu1 }
 0x10a   : > { %v2217_v28 = vpop.f32.mrf.mxu0  ;;  %v1731_v20 = vadd.f32 %v2215_v27, %v2211_v25 }
 0x10b   : > { %v2219_v29 = vpop.f32.mrf.mxu1 }
 0x10c   : > { %v2221_v30 = vpop.f32.mrf.mxu0 }
 0x10d   : > { %v2223_v31 = vpop.f32.mrf.mxu1 }
 0x10e   : > { %v1751_v34 = vpop.f32.mrf.mxu0  ;;  %v1734_v25 = vadd.f32 %v2223_v31, %v2219_v29 }
 0x10f   : > { %v1791_v35 = vpop.f32.mrf.mxu1 }
 0x110   : > { %v1752_v36 = vpop.f32.mrf.mxu0 }
 0x111   : > { %v1753_v40 = vadd.f32 %v1752_v36, %v1751_v34  ;;  %v1792_v41 = vpop.f32.mrf.mxu1 }
 0x112   : > { %v1754_v42 = vpop.f32.mrf.mxu0  ;;  %v1793_v49 = vadd.f32 %v1792_v41, %v1791_v35 }
 0x113   : > { %v1188_v43 = vadd.f32 %v1753_v40, %v1123_v37  ;;  %v1794_v44 = vpop.f32.mrf.mxu1 }
 0x114   : > { %v1755_v47 = vpop.f32.mrf.mxu0 }
 0x115   : > { %v1756_v50 = vadd.f32 %v1755_v47, %v1754_v42  ;;  %v1795_v51 = vpop.f32.mrf.mxu1  ;;  %v1253_v53 = vadd.f32 %v1793_v49, %v1188_v43  ;;  %v1691_v43 = vadd.f32 %v2213_v26, %v2209_v24  ;;  %v1694_v24 = vadd.f32 %v2221_v30, %v2217_v28 }
 0x116   : > { %v1757_v52 = vpop.f32.mrf.mxu0  ;;  %v1796_v55 = vadd.f32 %v1795_v51, %v1794_v44  ;;  %v1142_v44 = vadd.f32 %v1728_v19, %v1688_v18 }
 0x117   : > { %v1191_v54 = vadd.f32 %v1756_v50, %v1126_v48  ;;  %v1797_v56 = vpop.f32.mrf.mxu1  ;;  %v1317_v2 = vadd.f32 %v2228_v58, %v1253_v53 }
 0x118   : > { %v1758_v59 = vpop.f32.mrf.mxu0 }
 0x119   : > { %v1256_v62 = vadd.f32 %v1796_v55, %v1191_v54  ;;  %v1759_v63 = vadd.f32 %v1758_v59, %v1757_v52  ;;  %v1798_v0 = vpop.f32.mrf.mxu1  ;;  %v1147_v52 = vadd.f32 %v1731_v20, %v1691_v43 }
 0x11a   : > { %v1760_v1 = vpop.f32.mrf.mxu0  ;;  %v1799_v11 = vadd.f32 %v1798_v0, %v1797_v56 }
 0x11b   : > { %v1318_v3 = vadd.f32 %v2228_v58, %v1256_v62  ;;  %v1196_v4 = vadd.f32 %v1759_v63, %v1131_v57  ;;  %v1800_v5 = vpop.f32.mrf.mxu1  ;;  %v1150_v62 = vadd.f32 %v1734_v25, %v1694_v24 }
 0x11c   : > { %v1761_v8 = vpop.f32.mrf.mxu0 }
 0x11d   : > { %v1635_v10 = vpack.c.bf16 %v1318_v3, %v1317_v2  ;;  %v1762_v12 = vadd.f32 %v1761_v8, %v1760_v1  ;;  %v1801_v13 = vpop.f32.mrf.mxu1  ;;  %v1261_v15 = vadd.f32 %v1799_v11, %v1196_v4 }
 0x11e   : > { %v1763_v14 = vpop.f32.mrf.mxu0  ;;  %v1802_v33 = vadd.f32 %v1801_v13, %v1800_v5 }
 0x11f   : > { %1636 = vst [vmem:[%s2236_s17] sm:$0xff] %v1635_v10   ;;  %v1199_v32 = vadd.f32 %v1762_v12, %v1134_v9  ;;  %v1803_v34 = vpop.f32.mrf.mxu1  ;;  %v1319_v39 = vadd.f32 %v2228_v58, %v1261_v15 }
 0x120   : > { %v1764_v17 = vpop.f32.mrf.mxu0 }
 0x121   : > { %v1264_v35 = vadd.f32 %v1802_v33, %v1199_v32  ;;  %v1765_v36 = vadd.f32 %v1764_v17, %v1763_v14  ;;  %v1804_v37 = vpop.f32.mrf.mxu1 }
 0x122   : > { %v1766_v38 = vpop.f32.mrf.mxu0  ;;  %v1805_v23 = vadd.f32 %v1804_v37, %v1803_v34 }
 0x123   : > { %v1320_v40 = vadd.f32 %v2228_v58, %v1264_v35  ;;  %v1204_v41 = vadd.f32 %v1765_v36, %v1139_v16  ;;  %v1806_v42 = vpop.f32.mrf.mxu1 }
 0x124   : > { %v1767_v22 = vpop.f32.mrf.mxu0 }
 0x125   : > { %v1640_v21 = vpack.c.bf16 %v1320_v40, %v1319_v39  ;;  %v1768_v45 = vadd.f32 %v1767_v22, %v1766_v38  ;;  %v1807_v46 = vpop.f32.mrf.mxu1  ;;  %v1269_v48 = vadd.f32 %v1805_v23, %v1204_v41 }
 0x126   : > { %v1769_v47 = vpop.f32.mrf.mxu0  ;;  %v1808_v50 = vadd.f32 %v1807_v46, %v1806_v42 }
 0x127   : > { %1652 = vst [vmem:[%s2236_s17 + $0x8] sm:$0xff] %v1640_v21   ;;  %v1207_v49 = vadd.f32 %v1768_v45, %v1142_v44  ;;  %v1809_v51 = vpop.f32.mrf.mxu1  ;;  %v1321_v56 = vadd.f32 %v2228_v58, %v1269_v48 }
 0x128   : > { %v1770_v53 = vpop.f32.mrf.mxu0 }
 0x129   : > { %v1272_v26 = vadd.f32 %v1808_v50, %v1207_v49  ;;  %v1771_v27 = vadd.f32 %v1770_v53, %v1769_v47  ;;  %v1810_v54 = vpop.f32.mrf.mxu1 }
 0x12a   : > { %v1772_v55 = vpop.f32.mrf.mxu0  ;;  %v1811_v0 = vadd.f32 %v1810_v54, %v1809_v51 }
 0x12b   : > { %v1322_v57 = vadd.f32 %v2228_v58, %v1272_v26  ;;  %v1212_v59 = vadd.f32 %v1771_v27, %v1147_v52  ;;  %v1812_v60 = vpop.f32.mrf.mxu1 }
 0x12c   : > { %v1773_v61 = vpop.f32.mrf.mxu0 }
 0x12d   : > { %v1645_v63 = vpack.c.bf16 %v1322_v57, %v1321_v56  ;;  %v1774_v28 = vadd.f32 %v1773_v61, %v1772_v55  ;;  %v1813_v30 = vpop.f32.mrf.mxu1  ;;  %v1277_v1 = vadd.f32 %v1811_v0, %v1212_v59 }
 0x12e   : > { %v1814_v31 = vadd.f32 %v1813_v30, %v1812_v60 }
 0x12f   : > { %1653 = vst [vmem:[%s2236_s17 + $0x10] sm:$0xff] %v1645_v63   ;;  %v1215_v29 = vadd.f32 %v1774_v28, %v1150_v62  ;;  %v1323_v3 = vadd.f32 %v2228_v58, %v1277_v1 }
 0x131   : > { %v1280_v2 = vadd.f32 %v1814_v31, %v1215_v29 }
 0x133   : > { %v1324_v4 = vadd.f32 %v2228_v58, %v1280_v2 }
 0x135   : > { %v1650_v5 = vpack.c.bf16 %v1324_v4, %v1323_v3 }
 0x137   : > { %1654 = vst [vmem:[%s2236_s17 + $0x18] sm:$0xff] %v1650_v5  }
 0x138 PF: > { %s13_s14 = sadd.s32 1, %s1925_s14   ;;  %s2273_s12 = smov %s1921_s13 }
 0x139   : > { %p10_p5 = scmp.ge.s32.totalorder %s13_s14, 4   ;;  %s2274_s13 = smov %s2276_s15 }
 0x13b   :  { %12 = sbr.rel (!%p10_p5) target bundleno = 2 (0x2), region = 76 }

// kernel: dis_forward.12
= control target key start
LH: loop header
LB: loop body
LE: loop exit
PB: predicated region body
PF: predicated region fallthrough
CT: control target
= control target key end

     0   :  { %s408_s6 = smov 0   ;;  %s410_s7 = smov 0   ;;  %s448_s0 = inlined_call_operand.vmem [shape: bf16[2,16,256], index: 0, kind: input, shape index: {}]   ;;  %s449_s1 = inlined_call_operand.vmem [shape: bf16[2,16,256], index: 1, kind: output, shape index: {}]  }
   0x1   :  { %s412_s8 = smov 0  }
   0x2 LB: > { %s23_s9 = sadd.s32 1, %s392_s7  ;;  %p333_p0 = scmp.ge.s32.totalorder %s396_s8, 1  ;;  %s396_s8 = sphi %s412_s8, %s11_s8   ;;  %s392_s7 = sphi %s410_s7, %s451_s7   ;;  %s388_s6 = sphi %s408_s6, %s450_s6  }
   0x3   : > { %p25_p1 = scmp.ge.s32.totalorder %s23_s9, 2  ;;  %p108_p2 = scmp.lt.s32.totalorder %s396_s8, 3 }
   0x5   : > { %s453_s9 = smov (%p25_p1, %s23_s9), 0  ;;  %p109_p3 = pnand %p333_p0, %p108_p2 }
   0x6   : > { %p137_p4 = scmp.lt.s32.totalorder (!%p109_p3), %s388_s6, 1 }
   0x7   : > { %112 = sbr.rel (%p109_p3) target bundleno = 66 (0x42), region = 24 }
   0xc   : > { %s455_s6 = smov (!%p137_p4, %s388_s6), 1 }
   0xd   : > { %s342_s10 = sshll.u32 %s455_s6, 4 }
   0xe   : > { %s144_s13 = scalar_lea.vmem %s448_s0, %s342_s10  ;;  %s154_s16 = scalar_lea.vmem %s449_s1, %s342_s10 }
   0xf   : > { %v156_v0 = vld [vmem:[%s144_s13] sm:$0xff]  ;;  %v157_v1 = vld [vmem:[%s144_s13 + $0x8] sm:$0xff] }
  0x10   : > { %v158_v2 = vunpack.c.l.bf16 %v156_v0  ;;  %v159_v3 = vunpack.c.h.bf16 %v156_v0  ;;  %v160_v4 = vunpack.c.l.bf16 %v157_v1  ;;  %v161_v5 = vunpack.c.h.bf16 %v157_v1 }
  0x12   : > { %v162_v6 = vadd.f32 %v160_v4, %v158_v2  ;;  %v169_v7 = vadd.f32 %v161_v5, %v159_v3  ;;  %v178_v8 = vmul.f32 %v158_v2, %v158_v2  ;;  %v179_v9 = vmul.f32 %v159_v3, %v159_v3 }
  0x13   : > { %v180_v10 = vmul.f32 %v160_v4, %v160_v4  ;;  %v181_v11 = vmul.f32 %v161_v5, %v161_v5 }
  0x14   : > { %v163_v12 = vrot.slane %v162_v6, 4  ;;  %v170_v13 = vrot.slane %v169_v7, 4 }
  0x15   : > { %v182_v14 = vadd.f32 %v180_v10, %v178_v8  ;;  %v189_v15 = vadd.f32 %v181_v11, %v179_v9 }
  0x16   : > { %v164_v16 = vadd.f32 %v163_v12, %v162_v6  ;;  %v171_v17 = vadd.f32 %v170_v13, %v169_v7 }
  0x17   : > { %v183_v18 = vrot.slane %v182_v14, 4  ;;  %v190_v19 = vrot.slane %v189_v15, 4 }
  0x18   : > { %v165_v20 = vrot.slane %v164_v16, 2  ;;  %v172_v21 = vrot.slane %v171_v17, 2 }
  0x19   : > { %v184_v22 = vadd.f32 %v183_v18, %v182_v14  ;;  %v191_v23 = vadd.f32 %v190_v19, %v189_v15 }
  0x1a   : > { %v166_v24 = vadd.f32 %v165_v20, %v164_v16  ;;  %v173_v25 = vadd.f32 %v172_v21, %v171_v17 }
  0x1b   : > { %v185_v26 = vrot.slane %v184_v22, 2  ;;  %v192_v27 = vrot.slane %v191_v23, 2 }
  0x1c   : > { %v167_v28 = vrot.slane %v166_v24, 1  ;;  %v174_v29 = vrot.slane %v173_v25, 1 }
  0x1d   : > { %v186_v30 = vadd.f32 %v185_v26, %v184_v22  ;;  %v193_v31 = vadd.f32 %v192_v27, %v191_v23 }
  0x1e   : > { %v168_v32 = vadd.f32 %v167_v28, %v166_v24  ;;  %v175_v33 = vadd.f32 %v174_v29, %v173_v25 }
  0x1f   : > { %v187_v34 = vrot.slane %v186_v30, 1  ;;  %v194_v35 = vrot.slane %v193_v31, 1 }
  0x20   : > { %v176_v36 = vmul.f32 0.0625, %v168_v32  ;;  %v177_v37 = vmul.f32 0.0625, %v175_v33 }
  0x21   : > { %v188_v38 = vadd.f32 %v187_v34, %v186_v30  ;;  %v195_v39 = vadd.f32 %v194_v35, %v193_v31 }
  0x22   : > { %v198_v40 = vmul.f32 %v176_v36, %v176_v36  ;;  %v199_v41 = vmul.f32 %v177_v37, %v177_v37  ;;  %v204_v50 = vsub.f32 %v158_v2, %v176_v36  ;;  %v206_v51 = vsub.f32 %v160_v4, %v176_v36 }
  0x23   : > { %v196_v42 = vmul.f32 0.0625, %v188_v38  ;;  %v197_v43 = vmul.f32 0.0625, %v195_v39  ;;  %v205_v52 = vsub.f32 %v159_v3, %v177_v37  ;;  %v207_v53 = vsub.f32 %v161_v5, %v177_v37 }
  0x25   : > { %v200_v44 = vsub.f32 %v196_v42, %v198_v40  ;;  %v201_v45 = vsub.f32 %v197_v43, %v199_v41 }
  0x27   : > { %v202_v46 = vmax.f32 %v200_v44, 0.0  ;;  %v203_v47 = vmax.f32 %v201_v45, 0.0 }
  0x29   : > { %v208_v48 = vadd.f32 1e-05, %v202_v46  ;;  %v209_v49 = vadd.f32 1e-05, %v203_v47 }
  0x2b   : > { %370 = vrsqrt.f32 %v208_v48 }
  0x2c   : > { %372 = vrsqrt.f32 %v209_v49 }
  0x38   : > { %v371_v54 = vpop.eup %370 }
  0x39   : > { %v373_v55 = vpop.eup %372  ;;  %v212_v56 = vmul.f32 %v371_v54, %v204_v50  ;;  %v214_v57 = vmul.f32 %v371_v54, %v206_v51 }
  0x3a   : > { %v213_v58 = vmul.f32 %v373_v55, %v205_v52  ;;  %v215_v59 = vmul.f32 %v373_v55, %v207_v53 }
  0x3b   : > { %vm216_vm0 = vcmp.ge.f32.partialorder %v212_v56, 0.0  ;;  %v220_v60 = vmul.f32 0.2, %v212_v56  ;;  %vm218_vm1 = vcmp.ge.f32.partialorder %v214_v57, 0.0  ;;  %v222_v61 = vmul.f32 0.2, %v214_v57 }
  0x3c   : > { %vm217_vm2 = vcmp.ge.f32.partialorder %v213_v58, 0.0  ;;  %v221_v62 = vmul.f32 0.2, %v213_v58  ;;  %vm219_vm3 = vcmp.ge.f32.partialorder %v215_v59, 0.0  ;;  %v223_v63 = vmul.f32 0.2, %v215_v59 }
  0x3d   : > { %v224_v0 = vsel %vm216_vm0, %v212_v56, %v220_v60  ;;  %v226_v1 = vsel %vm218_vm1, %v214_v57, %v222_v61 }
  0x3e   : > { %v225_v2 = vsel %vm217_vm2, %v213_v58, %v221_v62  ;;  %v227_v3 = vsel %vm219_vm3, %v215_v59, %v223_v63 }
  0x3f   : > { %v344_v4 = vpack.c.bf16 %v225_v2, %v224_v0  ;;  %v345_v5 = vpack.c.bf16 %v227_v3, %v226_v1 }
  0x41   : > { %240 = vst [vmem:[%s154_s16] sm:$0xff] %v344_v4  ;;  %241 = vst [vmem:[%s154_s16 + $0x8] sm:$0xff] %v345_v5 }
  0x42 PF: > { %s11_s8 = sadd.s32 1, %s396_s8   ;;  %s450_s6 = smov %s392_s7 }
  0x43   : > { %p8_p5 = scmp.ge.s32.totalorder %s11_s8, 4   ;;  %s451_s7 = smov %s453_s9 }
  0x45   :  { %10 = sbr.rel (!%p8_p5) target bundleno = 2 (0x2), region = 54 }

// kernel: dis_forward.11
= control target key start
LH: loop header
LB: loop body
LE: loop exit
PB: predicated region body
PF: predicated region fallthrough
CT: control target
= control target key end

     0   :  { %s3243_s12 = smov 0   ;;  %s3245_s13 = smov 0   ;;  %s4121_s0 = inlined_call_operand.vmem [shape: bf16[2,16,2048], index: 0, kind: input, shape index: {}]   ;;  %s4122_s1 = inlined_call_operand.vmem [shape: bf16[2048,256], index: 1, kind: input, shape index: {}]   ;;  %s4123_s2 = inlined_call_operand.vmem [shape: f32[1,256], index: 2, kind: input, shape index: {}]   ;;  %s4124_s3 = inlined_call_operand.vmem [shape: bf16[2,16,256], index: 3, kind: output, shape index: {}]  }
   0x1   :  { %s3247_s14 = smov 0  }
   0x2 LB: > { %s39_s15 = sadd.s32 1, %s3217_s13  ;;  %p2506_p0 = scmp.ge.s32.totalorder %s3221_s14, 1  ;;  %s3221_s14 = sphi %s3247_s14, %s13_s14   ;;  %s3217_s13 = sphi %s3245_s13, %s4126_s13   ;;  %s3213_s12 = sphi %s3243_s12, %s4125_s12  }
   0x3   : > { %p41_p1 = scmp.ge.s32.totalorder %s39_s15, 2  ;;  %p211_p2 = scmp.lt.s32.totalorder %s3221_s14, 3 }
   0x5   : > { %s4128_s15 = smov (%p41_p1, %s39_s15), 0  ;;  %p212_p3 = pnand %p2506_p0, %p211_p2 }
   0x6   : > { %p269_p4 = scmp.lt.s32.totalorder (!%p212_p3), %s3213_s12, 1 }
   0x7   : > { %215 = sbr.rel (%p212_p3) target bundleno = 477 (0x1dd), region = 32 }
   0xc   : > { %v2815_v0 = vld [vmem:[%s4122_s1 + $0x74] ss:$8 sps:$4 sm:$0xff]   ;;  %v2819_v2 = vld [vmem:[%s4122_s1 + $0x70] ss:$8 sps:$4 sm:$0xff]   ;;  %v2821_v4 = vld [vmem:[%s4122_s1 + $0x64] ss:$8 sps:$4 sm:$0xff]  }
   0xd   : > { %v2817_v1 = vld [vmem:[%s4122_s1 + $0x174] ss:$8 sps:$4 sm:$0xff]   ;;  %1960 = vmatprep.subr.bf16.mxu0 %v2815_v0  ;;  %v2820_v3 = vld [vmem:[%s4122_s1 + $0x170] ss:$8 sps:$4 sm:$0xff]   ;;  %v2823_v5 = vld [vmem:[%s4122_s1 + $0x164] ss:$8 sps:$4 sm:$0xff]  }
   0xe   : > { %2003 = vmatprep.subr.bf16.mxu1 %v2817_v1  ;;  %1961 = vmatpush1.bf16.msra.mxu0 %v2819_v2  ;;  %v2825_v6 = vld [vmem:[%s4122_s1 + $0x60] ss:$8 sps:$4 sm:$0xff]   ;;  %v2827_v8 = vld [vmem:[%s4122_s1 + $0x54] ss:$8 sps:$4 sm:$0xff]   ;;  %v2831_v10 = vld [vmem:[%s4122_s1 + $0x50] ss:$8 sps:$4 sm:$0xff]  }
   0xf   : > { %2004 = vmatpush1.bf16.msra.mxu1 %v2820_v3  ;;  %1962 = vmatprep.subr.bf16.mxu0 %v2821_v4  ;;  %v2826_v7 = vld [vmem:[%s4122_s1 + $0x160] ss:$8 sps:$4 sm:$0xff]   ;;  %v2829_v9 = vld [vmem:[%s4122_s1 + $0x154] ss:$8 sps:$4 sm:$0xff]   ;;  %v2832_v11 = vld [vmem:[%s4122_s1 + $0x150] ss:$8 sps:$4 sm:$0xff]  }
  0x10   : > { %2005 = vmatprep.subr.bf16.mxu1 %v2823_v5  ;;  %v2833_v12 = vld [vmem:[%s4122_s1 + $0x44] ss:$8 sps:$4 sm:$0xff]   ;;  %v2837_v14 = vld [vmem:[%s4122_s1 + $0x40] ss:$8 sps:$4 sm:$0xff]   ;;  %v2839_v16 = vld [vmem:[%s4122_s1 + $0x34] ss:$8 sps:$4 sm:$0xff]  }
  0x11   : > { %v2835_v13 = vld [vmem:[%s4122_s1 + $0x144] ss:$8 sps:$4 sm:$0xff]   ;;  %v2838_v15 = vld [vmem:[%s4122_s1 + $0x140] ss:$8 sps:$4 sm:$0xff]   ;;  %v2841_v17 = vld [vmem:[%s4122_s1 + $0x134] ss:$8 sps:$4 sm:$0xff]  }
  0x12   : > { %1963 = vmatpush1.bf16.msra.mxu0 %v2825_v6  ;;  %v2843_v18 = vld [vmem:[%s4122_s1 + $0x30] ss:$8 sps:$4 sm:$0xff]   ;;  %v2845_v20 = vld [vmem:[%s4122_s1 + $0x24] ss:$8 sps:$4 sm:$0xff]   ;;  %v2849_v22 = vld [vmem:[%s4122_s1 + $0x20] ss:$8 sps:$4 sm:$0xff]  }
  0x13   : > { %2006 = vmatpush1.bf16.msra.mxu1 %v2826_v7  ;;  %1964 = vmatprep.subr.bf16.mxu0 %v2827_v8  ;;  %v2844_v19 = vld [vmem:[%s4122_s1 + $0x130] ss:$8 sps:$4 sm:$0xff]   ;;  %v2847_v21 = vld [vmem:[%s4122_s1 + $0x124] ss:$8 sps:$4 sm:$0xff]   ;;  %v2850_v23 = vld [vmem:[%s4122_s1 + $0x120] ss:$8 sps:$4 sm:$0xff]  }
  0x14   : > { %2007 = vmatprep.subr.bf16.mxu1 %v2829_v9  ;;  %v2851_v24 = vld [vmem:[%s4122_s1 + $0x14] ss:$8 sps:$4 sm:$0xff]   ;;  %v2855_v26 = vld [vmem:[%s4122_s1 + $0x10] ss:$8 sps:$4 sm:$0xff]   ;;  %v2857_v28 = vld [vmem:[%s4122_s1 + $0x4] ss:$8 sps:$4 sm:$0xff]  }
  0x15   : > { %v2853_v25 = vld [vmem:[%s4122_s1 + $0x114] ss:$8 sps:$4 sm:$0xff]   ;;  %v2856_v27 = vld [vmem:[%s4122_s1 + $0x110] ss:$8 sps:$4 sm:$0xff]   ;;  %v2859_v29 = vld [vmem:[%s4122_s1 + $0x104] ss:$8 sps:$4 sm:$0xff]  }
  0x16   : > { %1965 = vmatpush1.bf16.msra.mxu0 %v2831_v10  ;;  %v2861_v30 = vld [vmem:[%s4122_s1] ss:$8 sps:$4 sm:$0xff]   ;;  %v2863_v32 = vld [vmem:[%s4122_s1 + $0xf4] ss:$8 sps:$4 sm:$0xff]   ;;  %v2867_v34 = vld [vmem:[%s4122_s1 + $0xf0] ss:$8 sps:$4 sm:$0xff]  }
  0x17   : > { %2008 = vmatpush1.bf16.msra.mxu1 %v2832_v11  ;;  %1966 = vmatprep.subr.bf16.mxu0 %v2833_v12  ;;  %v2862_v31 = vld [vmem:[%s4122_s1 + $0x100] ss:$8 sps:$4 sm:$0xff]   ;;  %v2865_v33 = vld [vmem:[%s4122_s1 + $0x1f4] ss:$8 sps:$4 sm:$0xff]   ;;  %v2868_v35 = vld [vmem:[%s4122_s1 + $0x1f0] ss:$8 sps:$4 sm:$0xff]  }
  0x18   : > { %2009 = vmatprep.subr.bf16.mxu1 %v2835_v13  ;;  %v2869_v36 = vld [vmem:[%s4122_s1 + $0xe4] ss:$8 sps:$4 sm:$0xff]   ;;  %s4130_s12 = smov (!%p269_p4, %s3213_s12), 1  ;;  %v2873_v38 = vld [vmem:[%s4122_s1 + $0xe0] ss:$8 sps:$4 sm:$0xff]  }
  0x19   : > { %v2871_v37 = vld [vmem:[%s4122_s1 + $0x1e4] ss:$8 sps:$4 sm:$0xff]   ;;  %v2874_v39 = vld [vmem:[%s4122_s1 + $0x1e0] ss:$8 sps:$4 sm:$0xff]   ;;  %v2875_v40 = vld [vmem:[%s4122_s1 + $0xd4] ss:$8 sps:$4 sm:$0xff]  }
  0x1a   : > { %1967 = vmatpush1.bf16.msra.mxu0 %v2837_v14  ;;  %s2787_s29 = sshll.u32 %s4130_s12, 7  ;;  %v2877_v41 = vld [vmem:[%s4122_s1 + $0x1d4] ss:$8 sps:$4 sm:$0xff]   ;;  %v2879_v42 = vld [vmem:[%s4122_s1 + $0xd0] ss:$8 sps:$4 sm:$0xff]   ;;  %s2788_s18 = sshll.u32 %s4130_s12, 4 }
  0x1b   : > { %2010 = vmatpush1.bf16.msra.mxu1 %v2838_v15  ;;  %1968 = vmatprep.subr.bf16.mxu0 %v2839_v16  ;;  %v2880_v43 = vld [vmem:[%s4122_s1 + $0x1d0] ss:$8 sps:$4 sm:$0xff]   ;;  %s3403_s11 = scalar_lea.vmem %s4121_s0, %s2787_s29  ;;  %v2881_v44 = vld [vmem:[%s4122_s1 + $0xc4] ss:$8 sps:$4 sm:$0xff]   ;;  %v2885_v46 = vld [vmem:[%s4122_s1 + $0xc0] ss:$8 sps:$4 sm:$0xff]   ;;  %s313_s21 = scalar_lea.vmem %s4124_s3, %s2788_s18 }
  0x1c   : > { %2011 = vmatprep.subr.bf16.mxu1 %v2841_v17  ;;  %v2883_v45 = vld [vmem:[%s4122_s1 + $0x1c4] ss:$8 sps:$4 sm:$0xff]   ;;  %v2886_v47 = vld [vmem:[%s4122_s1 + $0x1c0] ss:$8 sps:$4 sm:$0xff]   ;;  %v2887_v52 = vld [vmem:[%s4122_s1 + $0xb4] ss:$8 sps:$4 sm:$0xff]  }
  0x1d   : > { %v328_v48 = vld [vmem:[%s3403_s11] sm:$0xff]  ;;  %v329_v50 = vld [vmem:[%s3403_s11 + $0x8] sm:$0xff]  ;;  %v2889_v54 = vld [vmem:[%s4122_s1 + $0x1b4] ss:$8 sps:$4 sm:$0xff]  }
  0x1e   : > { %1969 = vmatpush1.bf16.msra.mxu0 %v2843_v18  ;;  %v336_v49 = vld [vmem:[%s3403_s11 + $0x40] sm:$0xff]  ;;  %v337_v51 = vld [vmem:[%s3403_s11 + $0x48] sm:$0xff]  ;;  %v2891_v56 = vld [vmem:[%s4122_s1 + $0xb0] ss:$8 sps:$4 sm:$0xff]  }
  0x1f   : > { %2012 = vmatpush1.bf16.msra.mxu1 %v2844_v19  ;;  %1970 = vmatprep.subr.bf16.mxu0 %v2845_v20  ;;  %v2512_v53 = vcombine.high %v328_v48, %v336_v49  ;;  %v2514_v55 = vcombine.high %v329_v50, %v337_v51  ;;  %v2892_v57 = vld [vmem:[%s4122_s1 + $0x1b0] ss:$8 sps:$4 sm:$0xff]   ;;  %v2893_v58 = vld [vmem:[%s4122_s1 + $0xa4] ss:$8 sps:$4 sm:$0xff]   ;;  %v2897_v60 = vld [vmem:[%s4122_s1 + $0xa0] ss:$8 sps:$4 sm:$0xff]   ;;  %v2511_v8 = vcombine.low %v328_v48, %v336_v49 }
  0x20   : > { %2013 = vmatprep.subr.bf16.mxu1 %v2847_v21  ;;  %v2895_v59 = vld [vmem:[%s4122_s1 + $0x1a4] ss:$8 sps:$4 sm:$0xff]   ;;  %v2898_v61 = vld [vmem:[%s4122_s1 + $0x1a0] ss:$8 sps:$4 sm:$0xff]   ;;  %v2899_v62 = vld [vmem:[%s4122_s1 + $0x94] ss:$8 sps:$4 sm:$0xff]   ;;  %v2513_v9 = vcombine.low %v329_v50, %v337_v51 }
  0x21   : > { %1992 = vmatprep.mubr.bf16.mxu0 %v2512_v53  ;;  %2035 = vmatprep.mubr.bf16.mxu1 %v2514_v55  ;;  %v2901_v63 = vld [vmem:[%s4122_s1 + $0x194] ss:$8 sps:$4 sm:$0xff]   ;;  %v2903_v0 = vld [vmem:[%s4122_s1 + $0x90] ss:$8 sps:$4 sm:$0xff]   ;;  %v2905_v2 = vld [vmem:[%s4122_s1 + $0x84] ss:$8 sps:$4 sm:$0xff]  }
  0x22   : > { %1971 = vmatpush1.bf16.msra.mxu0 %v2849_v22  ;;  %v2904_v1 = vld [vmem:[%s4122_s1 + $0x190] ss:$8 sps:$4 sm:$0xff]   ;;  %v2907_v3 = vld [vmem:[%s4122_s1 + $0x184] ss:$8 sps:$4 sm:$0xff]   ;;  %v2909_v4 = vld [vmem:[%s4122_s1 + $0x80] ss:$8 sps:$4 sm:$0xff]  }
  0x23   : > { %2014 = vmatpush1.bf16.msra.mxu1 %v2850_v23  ;;  %1972 = vmatprep.subr.bf16.mxu0 %v2851_v24  ;;  %v2910_v5 = vld [vmem:[%s4122_s1 + $0x180] ss:$8 sps:$4 sm:$0xff]   ;;  %v2913_v6 = vld [vmem:[%s4122_s1 + $0x274] ss:$8 sps:$4 sm:$0xff]   ;;  %v2911_v10 = vld [vmem:[%s4122_s1 + $0x270] ss:$8 sps:$4 sm:$0xff]  }
  0x24   : > { %2015 = vmatprep.subr.bf16.mxu1 %v2853_v25  ;;  %v2916_v7 = vld [vmem:[%s4122_s1 + $0x374] ss:$8 sps:$4 sm:$0xff]   ;;  %v2914_v11 = vld [vmem:[%s4122_s1 + $0x370] ss:$8 sps:$4 sm:$0xff]   ;;  %v2919_v12 = vld [vmem:[%s4122_s1 + $0x264] ss:$8 sps:$4 sm:$0xff]  }
  0x25   : > { %v2922_v13 = vld [vmem:[%s4122_s1 + $0x364] ss:$8 sps:$4 sm:$0xff]   ;;  %v2917_v14 = vld [vmem:[%s4122_s1 + $0x260] ss:$8 sps:$4 sm:$0xff]   ;;  %v2925_v16 = vld [vmem:[%s4122_s1 + $0x254] ss:$8 sps:$4 sm:$0xff]  }
  0x26   : > { %1973 = vmatpush1.bf16.msra.mxu0 %v2855_v26  ;;  %v2920_v15 = vld [vmem:[%s4122_s1 + $0x360] ss:$8 sps:$4 sm:$0xff]   ;;  %v2928_v17 = vld [vmem:[%s4122_s1 + $0x354] ss:$8 sps:$4 sm:$0xff]   ;;  %v2923_v18 = vld [vmem:[%s4122_s1 + $0x250] ss:$8 sps:$4 sm:$0xff]  }
  0x27   : > { %2016 = vmatpush1.bf16.msra.mxu1 %v2856_v27  ;;  %1974 = vmatprep.subr.bf16.mxu0 %v2857_v28  ;;  %v2926_v19 = vld [vmem:[%s4122_s1 + $0x350] ss:$8 sps:$4 sm:$0xff]   ;;  %v2931_v20 = vld [vmem:[%s4122_s1 + $0x244] ss:$8 sps:$4 sm:$0xff]   ;;  %v2929_v22 = vld [vmem:[%s4122_s1 + $0x240] ss:$8 sps:$4 sm:$0xff]  }
  0x28   : > { %2017 = vmatprep.subr.bf16.mxu1 %v2859_v29  ;;  %v2934_v21 = vld [vmem:[%s4122_s1 + $0x344] ss:$8 sps:$4 sm:$0xff]   ;;  %v2932_v23 = vld [vmem:[%s4122_s1 + $0x340] ss:$8 sps:$4 sm:$0xff]   ;;  %v2937_v24 = vld [vmem:[%s4122_s1 + $0x234] ss:$8 sps:$4 sm:$0xff]  }
  0x29   : > { %v2940_v25 = vld [vmem:[%s4122_s1 + $0x334] ss:$8 sps:$4 sm:$0xff]   ;;  %v2935_v26 = vld [vmem:[%s4122_s1 + $0x230] ss:$8 sps:$4 sm:$0xff]   ;;  %v2943_v28 = vld [vmem:[%s4122_s1 + $0x224] ss:$8 sps:$4 sm:$0xff]  }
  0x2a   : > { %1975 = vmatpush1.bf16.msra.mxu0 %v2861_v30  ;;  %v2938_v27 = vld [vmem:[%s4122_s1 + $0x330] ss:$8 sps:$4 sm:$0xff]   ;;  %v2946_v29 = vld [vmem:[%s4122_s1 + $0x324] ss:$8 sps:$4 sm:$0xff]   ;;  %v2941_v30 = vld [vmem:[%s4122_s1 + $0x220] ss:$8 sps:$4 sm:$0xff]  }
  0x2b   : > { %2018 = vmatpush1.bf16.msra.mxu1 %v2862_v31  ;;  %1976 = vmatprep.subr.bf16.mxu0 %v2863_v32  ;;  %v2944_v31 = vld [vmem:[%s4122_s1 + $0x320] ss:$8 sps:$4 sm:$0xff]   ;;  %v2949_v32 = vld [vmem:[%s4122_s1 + $0x214] ss:$8 sps:$4 sm:$0xff]   ;;  %v2959_v48 = vld [vmem:[%s4122_s1 + $0x2f0] ss:$8 sps:$4 sm:$0xff]  }
  0x2c   : > { %2019 = vmatprep.subr.bf16.mxu1 %v2865_v33  ;;  %v2952_v33 = vld [vmem:[%s4122_s1 + $0x314] ss:$8 sps:$4 sm:$0xff]   ;;  %v2962_v49 = vld [vmem:[%s4122_s1 + $0x3f0] ss:$8 sps:$4 sm:$0xff]   ;;  %v2967_v50 = vld [vmem:[%s4122_s1 + $0x2e4] ss:$8 sps:$4 sm:$0xff]  }
  0x2d   : > { %v2970_v51 = vld [vmem:[%s4122_s1 + $0x3e4] ss:$8 sps:$4 sm:$0xff]   ;;  %v2968_v53 = vld [vmem:[%s4122_s1 + $0x3e0] ss:$8 sps:$4 sm:$0xff]   ;;  %v2976_v55 = vld [vmem:[%s4122_s1 + $0x3d4] ss:$8 sps:$4 sm:$0xff]  }
  0x2e   : > { %1977 = vmatpush2.bf16.msra.mxu0 %v2867_v34  ;;  %v2947_v34 = vld [vmem:[%s4122_s1 + $0x210] ss:$8 sps:$4 sm:$0xff]  }
  0x2f   : > { %2020 = vmatpush2.bf16.msra.mxu1 %v2868_v35  ;;  %1978 = vmatprep.subr.bf16.mxu0 %v2869_v36  ;;  %v2950_v35 = vld [vmem:[%s4122_s1 + $0x310] ss:$8 sps:$4 sm:$0xff]  }
  0x30   : > { %2021 = vmatprep.subr.bf16.mxu1 %v2871_v37  ;;  %v3554_v36 = vld [vmem:[%s3403_s11 + $0x10] sm:$0xff] }
  0x31   : > { %v3557_v37 = vld [vmem:[%s3403_s11 + $0x50] sm:$0xff] }
  0x32   : > { %1979 = vmatpush2.bf16.msra.mxu0 %v2873_v38  ;;  %v3560_v38 = vld [vmem:[%s3403_s11 + $0x18] sm:$0xff] }
  0x33   : > { %2022 = vmatpush2.bf16.msra.mxu1 %v2874_v39  ;;  %1980 = vmatprep.subr.bf16.mxu0 %v2875_v40  ;;  %v3563_v39 = vld [vmem:[%s3403_s11 + $0x58] sm:$0xff]  ;;  %v2955_v40 = vld [vmem:[%s4122_s1 + $0x204] ss:$8 sps:$4 sm:$0xff]  }
  0x34   : > { %2023 = vmatprep.subr.bf16.mxu1 %v2877_v41  ;;  %v2516_v41 = vcombine.high %v3554_v36, %v3557_v37 }
  0x36   : > { %1981 = vmatpush2.bf16.msra.mxu0 %v2879_v42  ;;  %v2958_v42 = vld [vmem:[%s4122_s1 + $0x304] ss:$8 sps:$4 sm:$0xff]  }
  0x37   : > { %2024 = vmatpush2.bf16.msra.mxu1 %v2880_v43  ;;  %1982 = vmatprep.subr.bf16.mxu0 %v2881_v44  ;;  %v2518_v43 = vcombine.high %v3560_v38, %v3563_v39  ;;  %v2953_v44 = vld [vmem:[%s4122_s1 + $0x200] ss:$8 sps:$4 sm:$0xff]  }
  0x38   : > { %2025 = vmatprep.subr.bf16.mxu1 %v2883_v45  ;;  %v2956_v45 = vld [vmem:[%s4122_s1 + $0x300] ss:$8 sps:$4 sm:$0xff]  }
  0x3a   : > { %1983 = vmatpush2.bf16.msra.mxu0 %v2885_v46  ;;  %v2961_v46 = vld [vmem:[%s4122_s1 + $0x2f4] ss:$8 sps:$4 sm:$0xff]  }
  0x3b   : > { %2026 = vmatpush2.bf16.msra.mxu1 %v2886_v47  ;;  %1984 = vmatprep.subr.bf16.mxu0 %v2887_v52  ;;  %v2964_v47 = vld [vmem:[%s4122_s1 + $0x3f4] ss:$8 sps:$4 sm:$0xff]   ;;  %v2965_v52 = vld [vmem:[%s4122_s1 + $0x2e0] ss:$8 sps:$4 sm:$0xff]  }
  0x3c   : > { %2027 = vmatprep.subr.bf16.mxu1 %v2889_v54  ;;  %v2973_v54 = vld [vmem:[%s4122_s1 + $0x2d4] ss:$8 sps:$4 sm:$0xff]  }
  0x3e   : > { %1985 = vmatpush2.bf16.msra.mxu0 %v2891_v56  ;;  %v2971_v56 = vld [vmem:[%s4122_s1 + $0x2d0] ss:$8 sps:$4 sm:$0xff]  }
  0x3f   : > { %2028 = vmatpush2.bf16.msra.mxu1 %v2892_v57  ;;  %1986 = vmatprep.subr.bf16.mxu0 %v2893_v58  ;;  %v2974_v57 = vld [vmem:[%s4122_s1 + $0x3d0] ss:$8 sps:$4 sm:$0xff]   ;;  %v2979_v58 = vld [vmem:[%s4122_s1 + $0x2c4] ss:$8 sps:$4 sm:$0xff]  }
  0x40   : > { %2029 = vmatprep.subr.bf16.mxu1 %v2895_v59  ;;  %v2982_v59 = vld [vmem:[%s4122_s1 + $0x3c4] ss:$8 sps:$4 sm:$0xff]  }
  0x42   : > { %1987 = vmatpush2.bf16.msra.mxu0 %v2897_v60  ;;  %v2977_v60 = vld [vmem:[%s4122_s1 + $0x2c0] ss:$8 sps:$4 sm:$0xff]  }
  0x43   : > { %2030 = vmatpush2.bf16.msra.mxu1 %v2898_v61  ;;  %1988 = vmatprep.subr.bf16.mxu0 %v2899_v62  ;;  %v2980_v61 = vld [vmem:[%s4122_s1 + $0x3c0] ss:$8 sps:$4 sm:$0xff]   ;;  %v2985_v62 = vld [vmem:[%s4122_s1 + $0x2b4] ss:$8 sps:$4 sm:$0xff]  }
  0x44   : > { %2031 = vmatprep.subr.bf16.mxu1 %v2901_v63  ;;  %v2988_v63 = vld [vmem:[%s4122_s1 + $0x3b4] ss:$8 sps:$4 sm:$0xff]  }
  0x46   : > { %1989 = vmatpush2.bf16.msra.mxu0 %v2903_v0  ;;  %v2983_v0 = vld [vmem:[%s4122_s1 + $0x2b0] ss:$8 sps:$4 sm:$0xff]  }
  0x47   : > { %2032 = vmatpush2.bf16.msra.mxu1 %v2904_v1  ;;  %1990 = vmatprep.subr.bf16.mxu0 %v2905_v2  ;;  %v2986_v1 = vld [vmem:[%s4122_s1 + $0x3b0] ss:$8 sps:$4 sm:$0xff]   ;;  %v2991_v2 = vld [vmem:[%s4122_s1 + $0x2a4] ss:$8 sps:$4 sm:$0xff]  }
  0x48   : > { %2033 = vmatprep.subr.bf16.mxu1 %v2907_v3  ;;  %v2994_v3 = vld [vmem:[%s4122_s1 + $0x3a4] ss:$8 sps:$4 sm:$0xff]  }
  0x4a   : > { %1991 = vmatpush2.bf16.msra.mxu0 %v2909_v4  ;;  %v2989_v4 = vld [vmem:[%s4122_s1 + $0x2a0] ss:$8 sps:$4 sm:$0xff]  }
  0x4b   : > { %2034 = vmatpush2.bf16.msra.mxu1 %v2910_v5  ;;  %2046 = vmatprep.subr.bf16.mxu0 %v2913_v6  ;;  %v2992_v5 = vld [vmem:[%s4122_s1 + $0x3a0] ss:$8 sps:$4 sm:$0xff]   ;;  %v2997_v6 = vld [vmem:[%s4122_s1 + $0x294] ss:$8 sps:$4 sm:$0xff]  }
  0x4c   : > { %2089 = vmatprep.subr.bf16.mxu1 %v2916_v7  ;;  %v3000_v7 = vld [vmem:[%s4122_s1 + $0x394] ss:$8 sps:$4 sm:$0xff]  }
  0x4d   : > { %1993 = vmatmul.mubr.bf16.vlgmr.msra.gmra.mxu0 %v2511_v8  ;;  %v2995_v8 = vld [vmem:[%s4122_s1 + $0x290] ss:$8 sps:$4 sm:$0xff]  }
  0x4e   : > { %2036 = vmatmul.mubr.bf16.vlgmr.msra.gmra.mxu1 %v2513_v9  ;;  %2047 = vmatpush1.bf16.msra.mxu0 %v2911_v10  ;;  %v2998_v9 = vld [vmem:[%s4122_s1 + $0x390] ss:$8 sps:$4 sm:$0xff]   ;;  %v3003_v10 = vld [vmem:[%s4122_s1 + $0x284] ss:$8 sps:$4 sm:$0xff]  }
  0x4f   : > { %2090 = vmatpush1.bf16.msra.mxu1 %v2914_v11  ;;  %2048 = vmatprep.subr.bf16.mxu0 %v2919_v12  ;;  %v3006_v11 = vld [vmem:[%s4122_s1 + $0x384] ss:$8 sps:$4 sm:$0xff]   ;;  %v3001_v12 = vld [vmem:[%s4122_s1 + $0x280] ss:$8 sps:$4 sm:$0xff]  }
  0x50   : > { %2091 = vmatprep.subr.bf16.mxu1 %v2922_v13  ;;  %2078 = vmatprep.mubr.bf16.mxu0 %v2516_v41  ;;  %v3004_v13 = vld [vmem:[%s4122_s1 + $0x380] ss:$8 sps:$4 sm:$0xff]   ;;  %v3034_v41 = vld [vmem:[%s4122_s1 + $0x530] ss:$8 sps:$4 sm:$0xff]  }
  0x51   : > { %2121 = vmatprep.mubr.bf16.mxu1 %v2518_v43  ;;  %v3042_v43 = vld [vmem:[%s4122_s1 + $0x524] ss:$8 sps:$4 sm:$0xff]  }
  0x52   : > { %2049 = vmatpush1.bf16.msra.mxu0 %v2917_v14  ;;  %v3009_v14 = vld [vmem:[%s4122_s1 + $0x474] ss:$8 sps:$4 sm:$0xff]  }
  0x53   : > { %2092 = vmatpush1.bf16.msra.mxu1 %v2920_v15  ;;  %2050 = vmatprep.subr.bf16.mxu0 %v2925_v16  ;;  %v3012_v15 = vld [vmem:[%s4122_s1 + $0x574] ss:$8 sps:$4 sm:$0xff]   ;;  %v2515_v16 = vcombine.low %v3554_v36, %v3557_v37  ;;  %v3025_v36 = vld [vmem:[%s4122_s1 + $0x440] ss:$8 sps:$4 sm:$0xff]  }
  0x54   : > { %2093 = vmatprep.subr.bf16.mxu1 %v2928_v17  ;;  %v2517_v17 = vcombine.low %v3560_v38, %v3563_v39  ;;  %v3028_v37 = vld [vmem:[%s4122_s1 + $0x540] ss:$8 sps:$4 sm:$0xff]   ;;  %v3033_v38 = vld [vmem:[%s4122_s1 + $0x434] ss:$8 sps:$4 sm:$0xff]  }
  0x55   : > { %v3036_v39 = vld [vmem:[%s4122_s1 + $0x534] ss:$8 sps:$4 sm:$0xff]  }
  0x56   : > { %2051 = vmatpush1.bf16.msra.mxu0 %v2923_v18  ;;  %v3007_v18 = vld [vmem:[%s4122_s1 + $0x470] ss:$8 sps:$4 sm:$0xff]  }
  0x57   : > { %2094 = vmatpush1.bf16.msra.mxu1 %v2926_v19  ;;  %2052 = vmatprep.subr.bf16.mxu0 %v2931_v20  ;;  %v3010_v19 = vld [vmem:[%s4122_s1 + $0x570] ss:$8 sps:$4 sm:$0xff]   ;;  %v3015_v20 = vld [vmem:[%s4122_s1 + $0x464] ss:$8 sps:$4 sm:$0xff]  }
  0x58   : > { %2095 = vmatprep.subr.bf16.mxu1 %v2934_v21  ;;  %v3018_v21 = vld [vmem:[%s4122_s1 + $0x564] ss:$8 sps:$4 sm:$0xff]  }
  0x5a   : > { %2053 = vmatpush1.bf16.msra.mxu0 %v2929_v22  ;;  %v3013_v22 = vld [vmem:[%s4122_s1 + $0x460] ss:$8 sps:$4 sm:$0xff]  }
  0x5b   : > { %2096 = vmatpush1.bf16.msra.mxu1 %v2932_v23  ;;  %2054 = vmatprep.subr.bf16.mxu0 %v2937_v24  ;;  %v3016_v23 = vld [vmem:[%s4122_s1 + $0x560] ss:$8 sps:$4 sm:$0xff]  }
  0x5c   : > { %2097 = vmatprep.subr.bf16.mxu1 %v2940_v25  ;;  %v3706_v24 = vld [vmem:[%s3403_s11 + $0x20] sm:$0xff] }
  0x5d   : > { %v3709_v25 = vld [vmem:[%s3403_s11 + $0x60] sm:$0xff] }
  0x5e   : > { %2055 = vmatpush1.bf16.msra.mxu0 %v2935_v26  ;;  %v3712_v26 = vld [vmem:[%s3403_s11 + $0x28] sm:$0xff] }
  0x5f   : > { %2098 = vmatpush1.bf16.msra.mxu1 %v2938_v27  ;;  %2056 = vmatprep.subr.bf16.mxu0 %v2943_v28  ;;  %v3715_v27 = vld [vmem:[%s3403_s11 + $0x68] sm:$0xff]  ;;  %v3021_v28 = vld [vmem:[%s4122_s1 + $0x454] ss:$8 sps:$4 sm:$0xff]  }
  0x60   : > { %2099 = vmatprep.subr.bf16.mxu1 %v2946_v29  ;;  %v2520_v29 = vcombine.high %v3706_v24, %v3709_v25 }
  0x62   : > { %2057 = vmatpush1.bf16.msra.mxu0 %v2941_v30  ;;  %v3024_v30 = vld [vmem:[%s4122_s1 + $0x554] ss:$8 sps:$4 sm:$0xff]  }
  0x63   : > { %2100 = vmatpush1.bf16.msra.mxu1 %v2944_v31  ;;  %2058 = vmatprep.subr.bf16.mxu0 %v2949_v32  ;;  %v2522_v31 = vcombine.high %v3712_v26, %v3715_v27  ;;  %v3019_v32 = vld [vmem:[%s4122_s1 + $0x450] ss:$8 sps:$4 sm:$0xff]  }
  0x64   : > { %2101 = vmatprep.subr.bf16.mxu1 %v2952_v33  ;;  %v3022_v33 = vld [vmem:[%s4122_s1 + $0x550] ss:$8 sps:$4 sm:$0xff]  }
  0x66   : > { %2059 = vmatpush1.bf16.msra.mxu0 %v2947_v34  ;;  %v3027_v34 = vld [vmem:[%s4122_s1 + $0x444] ss:$8 sps:$4 sm:$0xff]  }
  0x67   : > { %2102 = vmatpush1.bf16.msra.mxu1 %v2950_v35  ;;  %2060 = vmatprep.subr.bf16.mxu0 %v2955_v40  ;;  %v3030_v35 = vld [vmem:[%s4122_s1 + $0x544] ss:$8 sps:$4 sm:$0xff]   ;;  %v3031_v40 = vld [vmem:[%s4122_s1 + $0x430] ss:$8 sps:$4 sm:$0xff]  }
  0x68   : > { %2103 = vmatprep.subr.bf16.mxu1 %v2958_v42  ;;  %v3039_v42 = vld [vmem:[%s4122_s1 + $0x424] ss:$8 sps:$4 sm:$0xff]  }
  0x6a   : > { %2061 = vmatpush1.bf16.msra.mxu0 %v2953_v44  ;;  %v3037_v44 = vld [vmem:[%s4122_s1 + $0x420] ss:$8 sps:$4 sm:$0xff]  }
  0x6b   : > { %2104 = vmatpush1.bf16.msra.mxu1 %v2956_v45  ;;  %2062 = vmatprep.subr.bf16.mxu0 %v2961_v46  ;;  %v3040_v45 = vld [vmem:[%s4122_s1 + $0x520] ss:$8 sps:$4 sm:$0xff]   ;;  %v3045_v46 = vld [vmem:[%s4122_s1 + $0x414] ss:$8 sps:$4 sm:$0xff]  }
  0x6c   : > { %2105 = vmatprep.subr.bf16.mxu1 %v2964_v47  ;;  %v3048_v47 = vld [vmem:[%s4122_s1 + $0x514] ss:$8 sps:$4 sm:$0xff]  }
  0x6e   : > { %2063 = vmatpush2.bf16.msra.mxu0 %v2959_v48  ;;  %v3043_v48 = vld [vmem:[%s4122_s1 + $0x410] ss:$8 sps:$4 sm:$0xff]  }
  0x6f   : > { %2106 = vmatpush2.bf16.msra.mxu1 %v2962_v49  ;;  %2064 = vmatprep.subr.bf16.mxu0 %v2967_v50  ;;  %v3046_v49 = vld [vmem:[%s4122_s1 + $0x510] ss:$8 sps:$4 sm:$0xff]   ;;  %v3051_v50 = vld [vmem:[%s4122_s1 + $0x404] ss:$8 sps:$4 sm:$0xff]  }
  0x70   : > { %2107 = vmatprep.subr.bf16.mxu1 %v2970_v51  ;;  %v3054_v51 = vld [vmem:[%s4122_s1 + $0x504] ss:$8 sps:$4 sm:$0xff]  }
  0x72   : > { %2065 = vmatpush2.bf16.msra.mxu0 %v2965_v52  ;;  %v3049_v52 = vld [vmem:[%s4122_s1 + $0x400] ss:$8 sps:$4 sm:$0xff]  }
  0x73   : > { %2108 = vmatpush2.bf16.msra.mxu1 %v2968_v53  ;;  %2066 = vmatprep.subr.bf16.mxu0 %v2973_v54  ;;  %v3052_v53 = vld [vmem:[%s4122_s1 + $0x500] ss:$8 sps:$4 sm:$0xff]   ;;  %v3057_v54 = vld [vmem:[%s4122_s1 + $0x4f4] ss:$8 sps:$4 sm:$0xff]  }
  0x74   : > { %2109 = vmatprep.subr.bf16.mxu1 %v2976_v55  ;;  %v3060_v55 = vld [vmem:[%s4122_s1 + $0x5f4] ss:$8 sps:$4 sm:$0xff]  }
  0x76   : > { %2067 = vmatpush2.bf16.msra.mxu0 %v2971_v56  ;;  %v3055_v56 = vld [vmem:[%s4122_s1 + $0x4f0] ss:$8 sps:$4 sm:$0xff]  }
  0x77   : > { %2110 = vmatpush2.bf16.msra.mxu1 %v2974_v57  ;;  %2068 = vmatprep.subr.bf16.mxu0 %v2979_v58  ;;  %v3058_v57 = vld [vmem:[%s4122_s1 + $0x5f0] ss:$8 sps:$4 sm:$0xff]   ;;  %v3063_v58 = vld [vmem:[%s4122_s1 + $0x4e4] ss:$8 sps:$4 sm:$0xff]  }
  0x78   : > { %2111 = vmatprep.subr.bf16.mxu1 %v2982_v59  ;;  %v3066_v59 = vld [vmem:[%s4122_s1 + $0x5e4] ss:$8 sps:$4 sm:$0xff]  }
  0x7a   : > { %2069 = vmatpush2.bf16.msra.mxu0 %v2977_v60  ;;  %v3061_v60 = vld [vmem:[%s4122_s1 + $0x4e0] ss:$8 sps:$4 sm:$0xff]  }
  0x7b   : > { %2112 = vmatpush2.bf16.msra.mxu1 %v2980_v61  ;;  %2070 = vmatprep.subr.bf16.mxu0 %v2985_v62  ;;  %v3064_v61 = vld [vmem:[%s4122_s1 + $0x5e0] ss:$8 sps:$4 sm:$0xff]   ;;  %v3069_v62 = vld [vmem:[%s4122_s1 + $0x4d4] ss:$8 sps:$4 sm:$0xff]  }
  0x7c   : > { %2113 = vmatprep.subr.bf16.mxu1 %v2988_v63  ;;  %v3072_v63 = vld [vmem:[%s4122_s1 + $0x5d4] ss:$8 sps:$4 sm:$0xff]  }
  0x7e   : > { %2071 = vmatpush2.bf16.msra.mxu0 %v2983_v0  ;;  %v3067_v0 = vld [vmem:[%s4122_s1 + $0x4d0] ss:$8 sps:$4 sm:$0xff]  }
  0x7f   : > { %2114 = vmatpush2.bf16.msra.mxu1 %v2986_v1  ;;  %2072 = vmatprep.subr.bf16.mxu0 %v2991_v2  ;;  %v3070_v1 = vld [vmem:[%s4122_s1 + $0x5d0] ss:$8 sps:$4 sm:$0xff]   ;;  %v3075_v2 = vld [vmem:[%s4122_s1 + $0x4c4] ss:$8 sps:$4 sm:$0xff]  }
  0x80   : > { %2115 = vmatprep.subr.bf16.mxu1 %v2994_v3  ;;  %v3078_v3 = vld [vmem:[%s4122_s1 + $0x5c4] ss:$8 sps:$4 sm:$0xff]  }
  0x82   : > { %2073 = vmatpush2.bf16.msra.mxu0 %v2989_v4  ;;  %v3073_v4 = vld [vmem:[%s4122_s1 + $0x4c0] ss:$8 sps:$4 sm:$0xff]  }
  0x83   : > { %2116 = vmatpush2.bf16.msra.mxu1 %v2992_v5  ;;  %2074 = vmatprep.subr.bf16.mxu0 %v2997_v6  ;;  %v3076_v5 = vld [vmem:[%s4122_s1 + $0x5c0] ss:$8 sps:$4 sm:$0xff]   ;;  %v3081_v6 = vld [vmem:[%s4122_s1 + $0x4b4] ss:$8 sps:$4 sm:$0xff]  }
  0x84   : > { %2117 = vmatprep.subr.bf16.mxu1 %v3000_v7  ;;  %v3084_v7 = vld [vmem:[%s4122_s1 + $0x5b4] ss:$8 sps:$4 sm:$0xff]  }
  0x86   : > { %2075 = vmatpush2.bf16.msra.mxu0 %v2995_v8  ;;  %v3079_v8 = vld [vmem:[%s4122_s1 + $0x4b0] ss:$8 sps:$4 sm:$0xff]  }
  0x87   : > { %2118 = vmatpush2.bf16.msra.mxu1 %v2998_v9  ;;  %2076 = vmatprep.subr.bf16.mxu0 %v3003_v10  ;;  %v3082_v9 = vld [vmem:[%s4122_s1 + $0x5b0] ss:$8 sps:$4 sm:$0xff]   ;;  %v3087_v10 = vld [vmem:[%s4122_s1 + $0x4a4] ss:$8 sps:$4 sm:$0xff]  }
  0x88   : > { %2119 = vmatprep.subr.bf16.mxu1 %v3006_v11  ;;  %v3090_v11 = vld [vmem:[%s4122_s1 + $0x5a4] ss:$8 sps:$4 sm:$0xff]  }
  0x8a   : > { %2077 = vmatpush2.bf16.msra.mxu0 %v3001_v12  ;;  %v3085_v12 = vld [vmem:[%s4122_s1 + $0x4a0] ss:$8 sps:$4 sm:$0xff]  }
  0x8b   : > { %2120 = vmatpush2.bf16.msra.mxu1 %v3004_v13  ;;  %2132 = vmatprep.subr.bf16.mxu0 %v3009_v14  ;;  %v3088_v13 = vld [vmem:[%s4122_s1 + $0x5a0] ss:$8 sps:$4 sm:$0xff]   ;;  %v3093_v14 = vld [vmem:[%s4122_s1 + $0x494] ss:$8 sps:$4 sm:$0xff]  }
  0x8c   : > { %2175 = vmatprep.subr.bf16.mxu1 %v3012_v15  ;;  %v3096_v15 = vld [vmem:[%s4122_s1 + $0x594] ss:$8 sps:$4 sm:$0xff]  }
  0x8d   : > { %2079 = vmatmul.mubr.bf16.vlgmr.msra.gmra.mxu0 %v2515_v16  ;;  %v3091_v16 = vld [vmem:[%s4122_s1 + $0x490] ss:$8 sps:$4 sm:$0xff]  }
  0x8e   : > { %2122 = vmatmul.mubr.bf16.vlgmr.msra.gmra.mxu1 %v2517_v17  ;;  %2133 = vmatpush1.bf16.msra.mxu0 %v3007_v18  ;;  %v3094_v17 = vld [vmem:[%s4122_s1 + $0x590] ss:$8 sps:$4 sm:$0xff]   ;;  %v3099_v18 = vld [vmem:[%s4122_s1 + $0x484] ss:$8 sps:$4 sm:$0xff]  }
  0x8f   : > { %2176 = vmatpush1.bf16.msra.mxu1 %v3010_v19  ;;  %2134 = vmatprep.subr.bf16.mxu0 %v3015_v20  ;;  %v3102_v19 = vld [vmem:[%s4122_s1 + $0x584] ss:$8 sps:$4 sm:$0xff]   ;;  %v3097_v20 = vld [vmem:[%s4122_s1 + $0x480] ss:$8 sps:$4 sm:$0xff]  }
  0x90   : > { %2177 = vmatprep.subr.bf16.mxu1 %v3018_v21  ;;  %2164 = vmatprep.mubr.bf16.mxu0 %v2520_v29  ;;  %v3100_v21 = vld [vmem:[%s4122_s1 + $0x580] ss:$8 sps:$4 sm:$0xff]   ;;  %v2519_v29 = vcombine.low %v3706_v24, %v3709_v25  ;;  %v3111_v24 = vld [vmem:[%s4122_s1 + $0x664] ss:$8 sps:$4 sm:$0xff]  }
  0x91   : > { %2207 = vmatprep.mubr.bf16.mxu1 %v2522_v31  ;;  %v3903_v31 = vld [vmem:[%s3403_s11 + $0x70] sm:$0xff]  ;;  %v3114_v25 = vld [vmem:[%s4122_s1 + $0x764] ss:$8 sps:$4 sm:$0xff]  }
  0x92   : > { %2135 = vmatpush1.bf16.msra.mxu0 %v3013_v22  ;;  %v3105_v22 = vld [vmem:[%s4122_s1 + $0x674] ss:$8 sps:$4 sm:$0xff]  }
  0x93   : > { %2178 = vmatpush1.bf16.msra.mxu1 %v3016_v23  ;;  %2136 = vmatprep.subr.bf16.mxu0 %v3021_v28  ;;  %v3108_v23 = vld [vmem:[%s4122_s1 + $0x774] ss:$8 sps:$4 sm:$0xff]  }
  0x94   : > { %2179 = vmatprep.subr.bf16.mxu1 %v3024_v30  ;;  %v3896_v28 = vld [vmem:[%s3403_s11 + $0x30] sm:$0xff]  ;;  %v2521_v30 = vcombine.low %v3712_v26, %v3715_v27 }
  0x95   : > { %v2524_v26 = vcombine.high %v3896_v28, %v3903_v31 }
  0x96   : > { %2137 = vmatpush1.bf16.msra.mxu0 %v3019_v32  ;;  %v3906_v32 = vld [vmem:[%s3403_s11 + $0x38] sm:$0xff] }
  0x97   : > { %2180 = vmatpush1.bf16.msra.mxu1 %v3022_v33  ;;  %2138 = vmatprep.subr.bf16.mxu0 %v3027_v34  ;;  %v3909_v33 = vld [vmem:[%s3403_s11 + $0x78] sm:$0xff] }
  0x98   : > { %2181 = vmatprep.subr.bf16.mxu1 %v3030_v35  ;;  %v3103_v34 = vld [vmem:[%s4122_s1 + $0x670] ss:$8 sps:$4 sm:$0xff]   ;;  %v2526_v27 = vcombine.high %v3906_v32, %v3909_v33 }
  0x99   : > { %v3106_v35 = vld [vmem:[%s4122_s1 + $0x770] ss:$8 sps:$4 sm:$0xff]  }
  0x9a   : > { %2139 = vmatpush1.bf16.msra.mxu0 %v3025_v36  ;;  %v3109_v36 = vld [vmem:[%s4122_s1 + $0x660] ss:$8 sps:$4 sm:$0xff]  }
  0x9b   : > { %2182 = vmatpush1.bf16.msra.mxu1 %v3028_v37  ;;  %2140 = vmatprep.subr.bf16.mxu0 %v3033_v38  ;;  %v3112_v37 = vld [vmem:[%s4122_s1 + $0x760] ss:$8 sps:$4 sm:$0xff]   ;;  %v3117_v38 = vld [vmem:[%s4122_s1 + $0x654] ss:$8 sps:$4 sm:$0xff]  }
  0x9c   : > { %2183 = vmatprep.subr.bf16.mxu1 %v3036_v39  ;;  %v3120_v39 = vld [vmem:[%s4122_s1 + $0x754] ss:$8 sps:$4 sm:$0xff]  }
  0x9e   : > { %2141 = vmatpush1.bf16.msra.mxu0 %v3031_v40  ;;  %v3115_v40 = vld [vmem:[%s4122_s1 + $0x650] ss:$8 sps:$4 sm:$0xff]  }
  0x9f   : > { %2184 = vmatpush1.bf16.msra.mxu1 %v3034_v41  ;;  %2142 = vmatprep.subr.bf16.mxu0 %v3039_v42  ;;  %v3118_v41 = vld [vmem:[%s4122_s1 + $0x750] ss:$8 sps:$4 sm:$0xff]   ;;  %v3123_v42 = vld [vmem:[%s4122_s1 + $0x644] ss:$8 sps:$4 sm:$0xff]  }
  0xa0   : > { %2185 = vmatprep.subr.bf16.mxu1 %v3042_v43  ;;  %v3126_v43 = vld [vmem:[%s4122_s1 + $0x744] ss:$8 sps:$4 sm:$0xff]  }
  0xa2   : > { %2143 = vmatpush1.bf16.msra.mxu0 %v3037_v44  ;;  %v3121_v44 = vld [vmem:[%s4122_s1 + $0x640] ss:$8 sps:$4 sm:$0xff]  }
  0xa3   : > { %2186 = vmatpush1.bf16.msra.mxu1 %v3040_v45  ;;  %2144 = vmatprep.subr.bf16.mxu0 %v3045_v46  ;;  %v3124_v45 = vld [vmem:[%s4122_s1 + $0x740] ss:$8 sps:$4 sm:$0xff]   ;;  %v3129_v46 = vld [vmem:[%s4122_s1 + $0x634] ss:$8 sps:$4 sm:$0xff]  }
  0xa4   : > { %2187 = vmatprep.subr.bf16.mxu1 %v3048_v47  ;;  %v3132_v47 = vld [vmem:[%s4122_s1 + $0x734] ss:$8 sps:$4 sm:$0xff]  }
  0xa6   : > { %2145 = vmatpush1.bf16.msra.mxu0 %v3043_v48  ;;  %v3127_v48 = vld [vmem:[%s4122_s1 + $0x630] ss:$8 sps:$4 sm:$0xff]  }
  0xa7   : > { %2188 = vmatpush1.bf16.msra.mxu1 %v3046_v49  ;;  %2146 = vmatprep.subr.bf16.mxu0 %v3051_v50  ;;  %v3130_v49 = vld [vmem:[%s4122_s1 + $0x730] ss:$8 sps:$4 sm:$0xff]   ;;  %v3135_v50 = vld [vmem:[%s4122_s1 + $0x624] ss:$8 sps:$4 sm:$0xff]  }
  0xa8   : > { %2189 = vmatprep.subr.bf16.mxu1 %v3054_v51  ;;  %v3138_v51 = vld [vmem:[%s4122_s1 + $0x724] ss:$8 sps:$4 sm:$0xff]  }
  0xaa   : > { %2147 = vmatpush1.bf16.msra.mxu0 %v3049_v52  ;;  %v3133_v52 = vld [vmem:[%s4122_s1 + $0x620] ss:$8 sps:$4 sm:$0xff]  }
  0xab   : > { %2190 = vmatpush1.bf16.msra.mxu1 %v3052_v53  ;;  %2148 = vmatprep.subr.bf16.mxu0 %v3057_v54  ;;  %v3136_v53 = vld [vmem:[%s4122_s1 + $0x720] ss:$8 sps:$4 sm:$0xff]   ;;  %v3141_v54 = vld [vmem:[%s4122_s1 + $0x614] ss:$8 sps:$4 sm:$0xff]  }
  0xac   : > { %2191 = vmatprep.subr.bf16.mxu1 %v3060_v55  ;;  %v3144_v55 = vld [vmem:[%s4122_s1 + $0x714] ss:$8 sps:$4 sm:$0xff]  }
  0xae   : > { %2149 = vmatpush2.bf16.msra.mxu0 %v3055_v56  ;;  %v3139_v56 = vld [vmem:[%s4122_s1 + $0x610] ss:$8 sps:$4 sm:$0xff]  }
  0xaf   : > { %2192 = vmatpush2.bf16.msra.mxu1 %v3058_v57  ;;  %2150 = vmatprep.subr.bf16.mxu0 %v3063_v58  ;;  %v3142_v57 = vld [vmem:[%s4122_s1 + $0x710] ss:$8 sps:$4 sm:$0xff]   ;;  %v3147_v58 = vld [vmem:[%s4122_s1 + $0x604] ss:$8 sps:$4 sm:$0xff]  }
  0xb0   : > { %2193 = vmatprep.subr.bf16.mxu1 %v3066_v59  ;;  %v3150_v59 = vld [vmem:[%s4122_s1 + $0x704] ss:$8 sps:$4 sm:$0xff]  }
  0xb2   : > { %2151 = vmatpush2.bf16.msra.mxu0 %v3061_v60  ;;  %v3145_v60 = vld [vmem:[%s4122_s1 + $0x600] ss:$8 sps:$4 sm:$0xff]  }
  0xb3   : > { %2194 = vmatpush2.bf16.msra.mxu1 %v3064_v61  ;;  %2152 = vmatprep.subr.bf16.mxu0 %v3069_v62  ;;  %v3148_v61 = vld [vmem:[%s4122_s1 + $0x700] ss:$8 sps:$4 sm:$0xff]   ;;  %v3153_v62 = vld [vmem:[%s4122_s1 + $0x6f4] ss:$8 sps:$4 sm:$0xff]  }
  0xb4   : > { %2195 = vmatprep.subr.bf16.mxu1 %v3072_v63  ;;  %v3156_v63 = vld [vmem:[%s4122_s1 + $0x7f4] ss:$8 sps:$4 sm:$0xff]  }
  0xb6   : > { %2153 = vmatpush2.bf16.msra.mxu0 %v3067_v0  ;;  %v3151_v0 = vld [vmem:[%s4122_s1 + $0x6f0] ss:$8 sps:$4 sm:$0xff]  }
  0xb7   : > { %2196 = vmatpush2.bf16.msra.mxu1 %v3070_v1  ;;  %2154 = vmatprep.subr.bf16.mxu0 %v3075_v2  ;;  %v3154_v1 = vld [vmem:[%s4122_s1 + $0x7f0] ss:$8 sps:$4 sm:$0xff]   ;;  %v3159_v2 = vld [vmem:[%s4122_s1 + $0x6e4] ss:$8 sps:$4 sm:$0xff]  }
  0xb8   : > { %2197 = vmatprep.subr.bf16.mxu1 %v3078_v3  ;;  %v3162_v3 = vld [vmem:[%s4122_s1 + $0x7e4] ss:$8 sps:$4 sm:$0xff]  }
  0xba   : > { %2155 = vmatpush2.bf16.msra.mxu0 %v3073_v4  ;;  %v3157_v4 = vld [vmem:[%s4122_s1 + $0x6e0] ss:$8 sps:$4 sm:$0xff]  }
  0xbb   : > { %2198 = vmatpush2.bf16.msra.mxu1 %v3076_v5  ;;  %2156 = vmatprep.subr.bf16.mxu0 %v3081_v6  ;;  %v3160_v5 = vld [vmem:[%s4122_s1 + $0x7e0] ss:$8 sps:$4 sm:$0xff]   ;;  %v3165_v6 = vld [vmem:[%s4122_s1 + $0x6d4] ss:$8 sps:$4 sm:$0xff]  }
  0xbc   : > { %2199 = vmatprep.subr.bf16.mxu1 %v3084_v7  ;;  %v3168_v7 = vld [vmem:[%s4122_s1 + $0x7d4] ss:$8 sps:$4 sm:$0xff]  }
  0xbe   : > { %2157 = vmatpush2.bf16.msra.mxu0 %v3079_v8  ;;  %v3163_v8 = vld [vmem:[%s4122_s1 + $0x6d0] ss:$8 sps:$4 sm:$0xff]  }
  0xbf   : > { %2200 = vmatpush2.bf16.msra.mxu1 %v3082_v9  ;;  %2158 = vmatprep.subr.bf16.mxu0 %v3087_v10  ;;  %v3166_v9 = vld [vmem:[%s4122_s1 + $0x7d0] ss:$8 sps:$4 sm:$0xff]   ;;  %v3171_v10 = vld [vmem:[%s4122_s1 + $0x6c4] ss:$8 sps:$4 sm:$0xff]  }
  0xc0   : > { %2201 = vmatprep.subr.bf16.mxu1 %v3090_v11  ;;  %v3174_v11 = vld [vmem:[%s4122_s1 + $0x7c4] ss:$8 sps:$4 sm:$0xff]  }
  0xc2   : > { %2159 = vmatpush2.bf16.msra.mxu0 %v3085_v12  ;;  %v3169_v12 = vld [vmem:[%s4122_s1 + $0x6c0] ss:$8 sps:$4 sm:$0xff]  }
  0xc3   : > { %2202 = vmatpush2.bf16.msra.mxu1 %v3088_v13  ;;  %2160 = vmatprep.subr.bf16.mxu0 %v3093_v14  ;;  %v3172_v13 = vld [vmem:[%s4122_s1 + $0x7c0] ss:$8 sps:$4 sm:$0xff]   ;;  %v3177_v14 = vld [vmem:[%s4122_s1 + $0x6b4] ss:$8 sps:$4 sm:$0xff]  }
  0xc4   : > { %2203 = vmatprep.subr.bf16.mxu1 %v3096_v15  ;;  %v3180_v15 = vld [vmem:[%s4122_s1 + $0x7b4] ss:$8 sps:$4 sm:$0xff]  }
  0xc6   : > { %2161 = vmatpush2.bf16.msra.mxu0 %v3091_v16  ;;  %v3175_v16 = vld [vmem:[%s4122_s1 + $0x6b0] ss:$8 sps:$4 sm:$0xff]  }
  0xc7   : > { %2204 = vmatpush2.bf16.msra.mxu1 %v3094_v17  ;;  %2162 = vmatprep.subr.bf16.mxu0 %v3099_v18  ;;  %v3178_v17 = vld [vmem:[%s4122_s1 + $0x7b0] ss:$8 sps:$4 sm:$0xff]   ;;  %v3183_v18 = vld [vmem:[%s4122_s1 + $0x6a4] ss:$8 sps:$4 sm:$0xff]  }
  0xc8   : > { %2205 = vmatprep.subr.bf16.mxu1 %v3102_v19  ;;  %v3186_v19 = vld [vmem:[%s4122_s1 + $0x7a4] ss:$8 sps:$4 sm:$0xff]  }
  0xca   : > { %2163 = vmatpush2.bf16.msra.mxu0 %v3097_v20  ;;  %v3181_v20 = vld [vmem:[%s4122_s1 + $0x6a0] ss:$8 sps:$4 sm:$0xff]  }
  0xcb   : > { %2206 = vmatpush2.bf16.msra.mxu1 %v3100_v21  ;;  %2218 = vmatprep.subr.bf16.mxu0 %v3105_v22  ;;  %v3184_v21 = vld [vmem:[%s4122_s1 + $0x7a0] ss:$8 sps:$4 sm:$0xff]   ;;  %v3189_v22 = vld [vmem:[%s4122_s1 + $0x694] ss:$8 sps:$4 sm:$0xff]  }
  0xcc   : > { %2261 = vmatprep.subr.bf16.mxu1 %v3108_v23  ;;  %v3192_v23 = vld [vmem:[%s4122_s1 + $0x794] ss:$8 sps:$4 sm:$0xff]  }
  0xcd   : > { %2165 = vmatmul.mubr.bf16.vlgmr.msra.gmra.mxu0 %v2519_v29  ;;  %v3187_v29 = vld [vmem:[%s4122_s1 + $0x690] ss:$8 sps:$4 sm:$0xff]  }
  0xce   : > { %2208 = vmatmul.mubr.bf16.vlgmr.msra.gmra.mxu1 %v2521_v30  ;;  %2219 = vmatpush1.bf16.msra.mxu0 %v3103_v34  ;;  %v3190_v30 = vld [vmem:[%s4122_s1 + $0x790] ss:$8 sps:$4 sm:$0xff]   ;;  %v3195_v34 = vld [vmem:[%s4122_s1 + $0x684] ss:$8 sps:$4 sm:$0xff]  }
  0xcf   : > { %2262 = vmatpush1.bf16.msra.mxu1 %v3106_v35  ;;  %2220 = vmatprep.subr.bf16.mxu0 %v3111_v24  ;;  %v3198_v35 = vld [vmem:[%s4122_s1 + $0x784] ss:$8 sps:$4 sm:$0xff]   ;;  %v3193_v24 = vld [vmem:[%s4122_s1 + $0x680] ss:$8 sps:$4 sm:$0xff]  }
  0xd0   : > { %2263 = vmatprep.subr.bf16.mxu1 %v3114_v25  ;;  %2250 = vmatprep.mubr.bf16.mxu0 %v2524_v26  ;;  %v3196_v25 = vld [vmem:[%s4122_s1 + $0x780] ss:$8 sps:$4 sm:$0xff]   ;;  %v2523_v26 = vcombine.low %v3896_v28, %v3903_v31 }
  0xd1   : > { %2293 = vmatprep.mubr.bf16.mxu1 %v2526_v27  ;;  %v2525_v27 = vcombine.low %v3906_v32, %v3909_v33 }
  0xd2   : > { %2221 = vmatpush1.bf16.msra.mxu0 %v3109_v36 }
  0xd3   : > { %2264 = vmatpush1.bf16.msra.mxu1 %v3112_v37  ;;  %2222 = vmatprep.subr.bf16.mxu0 %v3117_v38 }
  0xd4   : > { %2265 = vmatprep.subr.bf16.mxu1 %v3120_v39 }
  0xd6   : > { %2223 = vmatpush1.bf16.msra.mxu0 %v3115_v40 }
  0xd7   : > { %2266 = vmatpush1.bf16.msra.mxu1 %v3118_v41  ;;  %2224 = vmatprep.subr.bf16.mxu0 %v3123_v42 }
  0xd8   : > { %2267 = vmatprep.subr.bf16.mxu1 %v3126_v43 }
  0xda   : > { %2225 = vmatpush1.bf16.msra.mxu0 %v3121_v44 }
  0xdb   : > { %2268 = vmatpush1.bf16.msra.mxu1 %v3124_v45  ;;  %2226 = vmatprep.subr.bf16.mxu0 %v3129_v46 }
  0xdc   : > { %2269 = vmatprep.subr.bf16.mxu1 %v3132_v47 }
  0xde   : > { %2227 = vmatpush1.bf16.msra.mxu0 %v3127_v48 }
  0xdf   : > { %2270 = vmatpush1.bf16.msra.mxu1 %v3130_v49  ;;  %2228 = vmatprep.subr.bf16.mxu0 %v3135_v50 }
  0xe0   : > { %2271 = vmatprep.subr.bf16.mxu1 %v3138_v51 }
  0xe2   : > { %2229 = vmatpush1.bf16.msra.mxu0 %v3133_v52 }
  0xe3   : > { %2272 = vmatpush1.bf16.msra.mxu1 %v3136_v53  ;;  %2230 = vmatprep.subr.bf16.mxu0 %v3141_v54 }
  0xe4   : > { %2273 = vmatprep.subr.bf16.mxu1 %v3144_v55  ;;  %v2321_v55 = vlaneseq }
  0xe6   : > { %2231 = vmatpush1.bf16.msra.mxu0 %v3139_v56 }
  0xe7   : > { %2274 = vmatpush1.bf16.msra.mxu1 %v3142_v57  ;;  %2232 = vmatprep.subr.bf16.mxu0 %v3147_v58 }
  0xe8   : > { %2275 = vmatprep.subr.bf16.mxu1 %v3150_v59 }
  0xea   : > { %2233 = vmatpush1.bf16.msra.mxu0 %v3145_v60 }
  0xeb   : > { %2276 = vmatpush1.bf16.msra.mxu1 %v3148_v61  ;;  %2234 = vmatprep.subr.bf16.mxu0 %v3153_v62 }
  0xec   : > { %2277 = vmatprep.subr.bf16.mxu1 %v3156_v63  ;;  %v2322_v63 = vshrl.u32 %v2321_v55, 7 }
  0xee   : > { %2235 = vmatpush2.bf16.msra.mxu0 %v3151_v0 }
  0xef   : > { %2278 = vmatpush2.bf16.msra.mxu1 %v3154_v1  ;;  %2236 = vmatprep.subr.bf16.mxu0 %v3159_v2 }
  0xf0   : > { %2279 = vmatprep.subr.bf16.mxu1 %v3162_v3 }
  0xf2   : > { %2237 = vmatpush2.bf16.msra.mxu0 %v3157_v4 }
  0xf3   : > { %2280 = vmatpush2.bf16.msra.mxu1 %v3160_v5  ;;  %2238 = vmatprep.subr.bf16.mxu0 %v3165_v6 }
  0xf4   : > { %2281 = vmatprep.subr.bf16.mxu1 %v3168_v7  ;;  %v2323_v7 = vsub.s32 0, %v2322_v63 }
  0xf6   : > { %2239 = vmatpush2.bf16.msra.mxu0 %v3163_v8 }
  0xf7   : > { %2282 = vmatpush2.bf16.msra.mxu1 %v3166_v9  ;;  %2240 = vmatprep.subr.bf16.mxu0 %v3171_v10 }
  0xf8   : > { %2283 = vmatprep.subr.bf16.mxu1 %v3174_v11  ;;  %v2319_v11 = vld [vmem:[%s4123_s2] sm:$0x3] }
  0xfa   : > { %2241 = vmatpush2.bf16.msra.mxu0 %v3169_v12  ;;  %v2327_v12 = vsub.s32 1, %v2322_v63 }
  0xfb   : > { %2284 = vmatpush2.bf16.msra.mxu1 %v3172_v13  ;;  %2242 = vmatprep.subr.bf16.mxu0 %v3177_v14 }
  0xfc   : > { %2285 = vmatprep.subr.bf16.mxu1 %v3180_v15 }
  0xfe   : > { %2243 = vmatpush2.bf16.msra.mxu0 %v3175_v16 }
  0xff   : > { %2286 = vmatpush2.bf16.msra.mxu1 %v3178_v17  ;;  %2244 = vmatprep.subr.bf16.mxu0 %v3183_v18  ;;  %v2324_v18 = vrot.slane %v2319_v11, %v2323_v7 }
 0x100   : > { %2287 = vmatprep.subr.bf16.mxu1 %v3186_v19 }
 0x102   : > { %2245 = vmatpush2.bf16.msra.mxu0 %v3181_v20 }
 0x103   : > { %2288 = vmatpush2.bf16.msra.mxu1 %v3184_v21  ;;  %2246 = vmatprep.subr.bf16.mxu0 %v3189_v22 }
 0x104   : > { %2289 = vmatprep.subr.bf16.mxu1 %v3192_v23 }
 0x106   : > { %2247 = vmatpush2.bf16.msra.mxu0 %v3187_v29  ;;  %v2328_v29 = vrot.slane %v2319_v11, %v2327_v12 }
 0x107   : > { %2290 = vmatpush2.bf16.msra.mxu1 %v3190_v30  ;;  %2248 = vmatprep.subr.bf16.mxu0 %v3195_v34 }
 0x108   : > { %2291 = vmatprep.subr.bf16.mxu1 %v3198_v35 }
 0x10a   : > { %2249 = vmatpush2.bf16.msra.mxu0 %v3193_v24 }
 0x10b   : > { %2292 = vmatpush2.bf16.msra.mxu1 %v3196_v25 }
 0x10d   : > { %2251 = vmatmul.mubr.bf16.vlgmr.msra.gmra.mxu0 %v2523_v26  ;;  %v1994_v36 = vpop.f32.mrf.mxu0 }
 0x10e   : > { %2294 = vmatmul.mubr.bf16.vlgmr.msra.gmra.mxu1 %v2525_v27  ;;  %v2037_v37 = vpop.f32.mrf.mxu1 }
 0x10f   : > { %v1996_v38 = vpop.f32.mrf.mxu0  ;;  %v2038_v50 = vadd.f32 %v2037_v37, %v1994_v36 }
 0x110   : > { %v2039_v39 = vpop.f32.mrf.mxu1 }
 0x111   : > { %v1998_v40 = vpop.f32.mrf.mxu0  ;;  %v2040_v51 = vadd.f32 %v2039_v39, %v1996_v38 }
 0x112   : > { %v2041_v41 = vpop.f32.mrf.mxu1 }
 0x113   : > { %v2000_v42 = vpop.f32.mrf.mxu0  ;;  %v2042_v56 = vadd.f32 %v2041_v41, %v1998_v40 }
 0x114   : > { %v2043_v43 = vpop.f32.mrf.mxu1 }
 0x115   : > { %v2044_v58 = vadd.f32 %v2043_v43, %v2000_v42 }
 0x14d   : > { %v2080_v44 = vpop.f32.mrf.mxu0 }
 0x14e   : > { %v2123_v45 = vpop.f32.mrf.mxu1  ;;  %v2081_v52 = vadd.f32 %v2080_v44, %v2038_v50 }
 0x14f   : > { %v2082_v46 = vpop.f32.mrf.mxu0 }
 0x150   : > { %v2125_v47 = vpop.f32.mrf.mxu1  ;;  %v2083_v57 = vadd.f32 %v2082_v46, %v2040_v51  ;;  %v2124_v59 = vadd.f32 %v2123_v45, %v2081_v52 }
 0x151   : > { %v2084_v28 = vpop.f32.mrf.mxu0 }
 0x152   : > { %v2127_v31 = vpop.f32.mrf.mxu1  ;;  %v2085_v60 = vadd.f32 %v2084_v28, %v2042_v56  ;;  %v2126_v0 = vadd.f32 %v2125_v47, %v2083_v57 }
 0x153   : > { %v2086_v48 = vpop.f32.mrf.mxu0 }
 0x154   : > { %v2129_v32 = vpop.f32.mrf.mxu1  ;;  %v2087_v1 = vadd.f32 %v2086_v48, %v2044_v58  ;;  %v2128_v3 = vadd.f32 %v2127_v31, %v2085_v60 }
 0x156   : > { %v2130_v8 = vadd.f32 %v2129_v32, %v2087_v1 }
 0x18d   : > { %v2166_v33 = vpop.f32.mrf.mxu0 }
 0x18e   : > { %v2209_v49 = vpop.f32.mrf.mxu1  ;;  %v2167_v2 = vadd.f32 %v2166_v33, %v2124_v59 }
 0x18f   : > { %v2168_v53 = vpop.f32.mrf.mxu0 }
 0x190   : > { %v2211_v54 = vpop.f32.mrf.mxu1  ;;  %v2169_v4 = vadd.f32 %v2168_v53, %v2126_v0  ;;  %v2210_v9 = vadd.f32 %v2209_v49, %v2167_v2 }
 0x191   : > { %v2170_v61 = vpop.f32.mrf.mxu0 }
 0x192   : > { %v2213_v62 = vpop.f32.mrf.mxu1  ;;  %v2171_v10 = vadd.f32 %v2170_v61, %v2128_v3  ;;  %v2212_v15 = vadd.f32 %v2211_v54, %v2169_v4 }
 0x193   : > { %v2172_v5 = vpop.f32.mrf.mxu0 }
 0x194   : > { %v2215_v6 = vpop.f32.mrf.mxu1  ;;  %v2173_v16 = vadd.f32 %v2172_v5, %v2130_v8  ;;  %v2214_v21 = vadd.f32 %v2213_v62, %v2171_v10 }
 0x196   : > { %v2216_v35 = vadd.f32 %v2215_v6, %v2173_v16 }
 0x1cd   : > { %v2252_v13 = vpop.f32.mrf.mxu0 }
 0x1ce   : > { %v2295_v14 = vpop.f32.mrf.mxu1  ;;  %v2253_v17 = vadd.f32 %v2252_v13, %v2210_v9 }
 0x1cf   : > { %v2254_v19 = vpop.f32.mrf.mxu0 }
 0x1d0   : > { %v2297_v20 = vpop.f32.mrf.mxu1  ;;  %v2296_v22 = vadd.f32 %v2295_v14, %v2253_v17  ;;  %v2255_v23 = vadd.f32 %v2254_v19, %v2212_v15 }
 0x1d1   : > { %v2256_v30 = vpop.f32.mrf.mxu0 }
 0x1d2   : > { %v2299_v34 = vpop.f32.mrf.mxu1  ;;  %v2298_v24 = vadd.f32 %v2297_v20, %v2255_v23  ;;  %v2257_v25 = vadd.f32 %v2256_v30, %v2214_v21  ;;  %v2331_v27 = vadd.f32 %v2324_v18, %v2296_v22 }
 0x1d3   : > { %v2258_v26 = vpop.f32.mrf.mxu0 }
 0x1d4   : > { %v2332_v36 = vadd.f32 %v2328_v29, %v2298_v24  ;;  %v2300_v37 = vadd.f32 %v2299_v34, %v2257_v25  ;;  %v2259_v38 = vadd.f32 %v2258_v26, %v2216_v35  ;;  %v2301_v39 = vpop.f32.mrf.mxu1 }
 0x1d6   : > { %v2789_v40 = vpack.c.bf16 %v2332_v36, %v2331_v27  ;;  %v2302_v41 = vadd.f32 %v2301_v39, %v2259_v38  ;;  %v2333_v42 = vadd.f32 %v2324_v18, %v2300_v37 }
 0x1d8   : > { %2347 = vst [vmem:[%s313_s21] sm:$0xff] %v2789_v40  ;;  %v2334_v43 = vadd.f32 %v2328_v29, %v2302_v41 }
 0x1da   : > { %v2790_v44 = vpack.c.bf16 %v2334_v43, %v2333_v42 }
 0x1dc   : > { %2348 = vst [vmem:[%s313_s21 + $0x8] sm:$0xff] %v2790_v44 }
 0x1dd PF: > { %s13_s14 = sadd.s32 1, %s3221_s14   ;;  %s4125_s12 = smov %s3217_s13 }
 0x1de   : > { %p10_p5 = scmp.ge.s32.totalorder %s13_s14, 4   ;;  %s4126_s13 = smov %s4128_s15 }
 0x1e0   :  { %12 = sbr.rel (!%p10_p5) target bundleno = 2 (0x2), region = 76 }

// kernel: dis_forward.14
= control target key start
LH: loop header
LB: loop body
LE: loop exit
PB: predicated region body
PF: predicated region fallthrough
CT: control target
= control target key end

     0   :  { %s487_s6 = smov 0   ;;  %s489_s7 = smov 0   ;;  %s551_s0 = inlined_call_operand.vmem [shape: bf16[2,4,512], index: 0, kind: input, shape index: {}]   ;;  %s552_s1 = inlined_call_operand.vmem [shape: bf16[2,4,512], index: 1, kind: output, shape index: {}]  }
   0x1   :  { %s491_s8 = smov 0  }
   0x2 LB: > { %s23_s9 = sadd.s32 1, %s470_s7  ;;  %p408_p0 = scmp.ge.s32.totalorder %s474_s8, 1  ;;  %s474_s8 = sphi %s491_s8, %s11_s8   ;;  %s470_s7 = sphi %s489_s7, %s554_s7   ;;  %s466_s6 = sphi %s487_s6, %s553_s6  }
   0x3   : > { %p25_p1 = scmp.ge.s32.totalorder %s23_s9, 2  ;;  %p108_p2 = scmp.lt.s32.totalorder %s474_s8, 3 }
   0x5   : > { %s556_s9 = smov (%p25_p1, %s23_s9), 0  ;;  %p109_p3 = pnand %p408_p0, %p108_p2 }
   0x6   : > { %p137_p4 = scmp.lt.s32.totalorder (!%p109_p3), %s466_s6, 1 }
   0x7   : > { %112 = sbr.rel (%p109_p3) target bundleno = 77 (0x4d), region = 24 }
   0xc   : > { %s558_s6 = smov (!%p137_p4, %s466_s6), 1  ;;  %vm165_vm0 = vcmask 1043456  }
   0xd   : > { %s417_s10 = sshll.u32 %s558_s6, 3 }
   0xe   : > { %s144_s13 = scalar_lea.vmem %s551_s0, %s417_s10  ;;  %s154_s16 = scalar_lea.vmem %s552_s1, %s417_s10 }
   0xf   : > { %v156_v0 = vld [vmem:[%s144_s13] sm:$0xff] }
  0x10   : > { %v513_v1 = vunpack.c.l.bf16 %v156_v0  ;;  %v515_v2 = vunpack.c.h.bf16 %v156_v0 }
  0x12   : > { %v161_v3 = vcombine.high %v513_v1, %v513_v1  ;;  %v162_v4 = vcombine.high %v515_v2, %v515_v2  ;;  %v166_v5 = vsel %vm165_vm0, %v513_v1, 0.0  ;;  %v180_v6 = vsel %vm165_vm0, %v515_v2, 0.0 }
  0x13   : > { %v167_v7 = vrot.slane %v166_v5, 4  ;;  %v181_v8 = vrot.slane %v180_v6, 4  ;;  %v198_v9 = vmul.f32 %v513_v1, %v513_v1  ;;  %v199_v10 = vmul.f32 %v515_v2, %v515_v2 }
  0x14   : > { %v173_v11 = vsel %vm165_vm0, %v161_v3, 0.0  ;;  %v187_v12 = vsel %vm165_vm0, %v162_v4, 0.0 }
  0x15   : > { %v168_v13 = vadd.f32 %v167_v7, %v166_v5  ;;  %v174_v14 = vrot.slane %v173_v11, 4  ;;  %v182_v15 = vadd.f32 %v181_v8, %v180_v6  ;;  %v188_v16 = vrot.slane %v187_v12, 4 }
  0x16   : > { %v202_v17 = vcombine.high %v198_v9, %v198_v9  ;;  %v203_v18 = vcombine.high %v199_v10, %v199_v10  ;;  %v206_v19 = vsel %vm165_vm0, %v198_v9, 0.0  ;;  %v220_v20 = vsel %vm165_vm0, %v199_v10, 0.0 }
  0x17   : > { %v169_v21 = vrot.slane %v168_v13, 2  ;;  %v175_v22 = vadd.f32 %v174_v14, %v173_v11  ;;  %v183_v23 = vrot.slane %v182_v15, 2  ;;  %v189_v24 = vadd.f32 %v188_v16, %v187_v12 }
  0x18   : > { %v207_v25 = vrot.slane %v206_v19, 4  ;;  %v213_v26 = vsel %vm165_vm0, %v202_v17, 0.0  ;;  %v221_v27 = vrot.slane %v220_v20, 4  ;;  %v227_v28 = vsel %vm165_vm0, %v203_v18, 0.0 }
  0x19   : > { %v170_v29 = vadd.f32 %v169_v21, %v168_v13  ;;  %v176_v30 = vrot.slane %v175_v22, 2  ;;  %v184_v31 = vadd.f32 %v183_v23, %v182_v15  ;;  %v190_v32 = vrot.slane %v189_v24, 2 }
  0x1a   : > { %v208_v33 = vadd.f32 %v207_v25, %v206_v19  ;;  %v214_v34 = vrot.slane %v213_v26, 4  ;;  %v222_v35 = vadd.f32 %v221_v27, %v220_v20  ;;  %v228_v36 = vrot.slane %v227_v28, 4 }
  0x1b   : > { %v171_v37 = vrot.slane %v170_v29, 1  ;;  %v177_v38 = vadd.f32 %v176_v30, %v175_v22  ;;  %v185_v39 = vrot.slane %v184_v31, 1  ;;  %v191_v40 = vadd.f32 %v190_v32, %v189_v24 }
  0x1c   : > { %v209_v41 = vrot.slane %v208_v33, 2  ;;  %v215_v42 = vadd.f32 %v214_v34, %v213_v26  ;;  %v223_v43 = vrot.slane %v222_v35, 2  ;;  %v229_v44 = vadd.f32 %v228_v36, %v227_v28 }
  0x1d   : > { %v172_v45 = vadd.f32 %v171_v37, %v170_v29  ;;  %v178_v46 = vrot.slane %v177_v38, 1  ;;  %v186_v47 = vadd.f32 %v185_v39, %v184_v31  ;;  %v192_v48 = vrot.slane %v191_v40, 1 }
  0x1e   : > { %v210_v49 = vadd.f32 %v209_v41, %v208_v33  ;;  %v216_v50 = vrot.slane %v215_v42, 2  ;;  %v224_v51 = vadd.f32 %v223_v43, %v222_v35  ;;  %v230_v52 = vrot.slane %v229_v44, 2 }
  0x1f   : > { %v179_v53 = vadd.f32 %v178_v46, %v177_v38  ;;  %v193_v54 = vadd.f32 %v192_v48, %v191_v40  ;;  %v194_v55 = vmul.f32 0.25, %v172_v45  ;;  %v196_v56 = vmul.f32 0.25, %v186_v47 }
  0x20   : > { %v211_v57 = vrot.slane %v210_v49, 1  ;;  %v217_v58 = vadd.f32 %v216_v50, %v215_v42  ;;  %v225_v59 = vrot.slane %v224_v51, 1  ;;  %v231_v60 = vadd.f32 %v230_v52, %v229_v44 }
  0x21   : > { %v195_v61 = vmul.f32 0.25, %v179_v53  ;;  %v197_v62 = vmul.f32 0.25, %v193_v54  ;;  %v238_v63 = vmul.f32 %v194_v55, %v194_v55  ;;  %v240_v0 = vmul.f32 %v196_v56, %v196_v56 }
  0x22   : > { %v212_v3 = vadd.f32 %v211_v57, %v210_v49  ;;  %v218_v4 = vrot.slane %v217_v58, 1  ;;  %v226_v5 = vadd.f32 %v225_v59, %v224_v51  ;;  %v232_v6 = vrot.slane %v231_v60, 1 }
  0x23   : > { %v239_v7 = vmul.f32 %v195_v61, %v195_v61  ;;  %v241_v8 = vmul.f32 %v197_v62, %v197_v62  ;;  %v254_v27 = vcombine.low %v194_v55, %v195_v61  ;;  %v255_v28 = vcombine.low %v196_v56, %v197_v62 }
  0x24   : > { %v219_v9 = vadd.f32 %v218_v4, %v217_v58  ;;  %v233_v10 = vadd.f32 %v232_v6, %v231_v60  ;;  %v234_v11 = vmul.f32 0.25, %v212_v3  ;;  %v236_v12 = vmul.f32 0.25, %v226_v5 }
  0x25   : > { %v258_v31 = vsub.f32 %v513_v1, %v254_v27  ;;  %v259_v33 = vsub.f32 %v515_v2, %v255_v28  ;;  %v476_v34 = vmov 1983009808   ;;  %v303_v36 = vlaneseq }
  0x26   : > { %v235_v13 = vmul.f32 0.25, %v219_v9  ;;  %v237_v14 = vmul.f32 0.25, %v233_v10  ;;  %v242_v15 = vsub.f32 %v234_v11, %v238_v63  ;;  %v244_v16 = vsub.f32 %v236_v12, %v240_v0 }
  0x27   : > { %v301_v35 = vunpack.c.l.s4 %v476_v34  ;;  %v304_v43 = vshrl.u32 %v303_v36, 7 }
  0x28   : > { %v243_v17 = vsub.f32 %v235_v13, %v239_v7  ;;  %v245_v18 = vsub.f32 %v237_v14, %v241_v8  ;;  %v246_v19 = vmax.f32 %v242_v15, 0.0  ;;  %v248_v20 = vmax.f32 %v244_v16, 0.0 }
  0x29   : > { %v302_v42 = vunpack.c.0.s8 %v301_v35 }
  0x2a   : > { %v247_v21 = vmax.f32 %v243_v17, 0.0  ;;  %v249_v22 = vmax.f32 %v245_v18, 0.0  ;;  %v260_v23 = vadd.f32 1e-05, %v246_v19  ;;  %v262_v24 = vadd.f32 1e-05, %v248_v20 }
  0x2b   : > { %v305_v48 = vsub.s32 %v302_v42, %v304_v43 }
  0x2c   : > { %v261_v25 = vadd.f32 1e-05, %v247_v21  ;;  %v263_v26 = vadd.f32 1e-05, %v249_v22  ;;  %444 = vrsqrt.f32 %v260_v23 }
  0x2d   : > { %446 = vrsqrt.f32 %v262_v24 }
  0x2e   : > { %448 = vrsqrt.f32 %v261_v25 }
  0x2f   : > { %450 = vrsqrt.f32 %v263_v26 }
  0x39   : > { %v445_v29 = vpop.eup %444 }
  0x3a   : > { %v447_v30 = vpop.eup %446 }
  0x3b   : > { %v449_v32 = vpop.eup %448 }
  0x3c   : > { %v451_v37 = vpop.eup %450  ;;  %v272_v38 = vcombine.low %v445_v29, %v449_v32 }
  0x3d   : > { %v273_v39 = vcombine.low %v447_v30, %v451_v37 }
  0x3e   : > { %v276_v40 = vmul.f32 %v272_v38, %v258_v31 }
  0x3f   : > { %v277_v41 = vmul.f32 %v273_v39, %v259_v33 }
  0x40   : > { %vm278_vm1 = vcmp.ge.f32.partialorder %v276_v40, 0.0  ;;  %v280_v44 = vmul.f32 0.2, %v276_v40 }
  0x41   : > { %vm279_vm2 = vcmp.ge.f32.partialorder %v277_v41, 0.0  ;;  %v281_v45 = vmul.f32 0.2, %v277_v41 }
  0x42   : > { %v282_v46 = vsel %vm278_vm1, %v276_v40, %v280_v44 }
  0x43   : > { %v283_v1 = vsel %vm279_vm2, %v277_v41, %v281_v45  ;;  %v286_v47 = vcombine.high %v282_v46, %v282_v46 }
  0x44   : > { %v287_v2 = vcombine.high %v283_v1, %v283_v1 }
  0x45   : > { %v413_v49 = vpack.c.bf16 %v286_v47, %v282_v46 }
  0x46   : > { %v414_v50 = vpack.c.bf16 %v287_v2, %v283_v1 }
  0x47   : > { %v306_v51 = vrot.slane %v413_v49, %v305_v48 }
  0x48   : > { %v313_v52 = vrot.slane %v414_v50, %v305_v48 }
  0x4a   : > { %v314_v53 = vcombine.low %v306_v51, %v313_v52 }
  0x4c   : > { %316 = vst [vmem:[%s154_s16] sm:$0xff] %v314_v53 }
  0x4d PF: > { %s11_s8 = sadd.s32 1, %s474_s8   ;;  %s553_s6 = smov %s470_s7 }
  0x4e   : > { %p8_p5 = scmp.ge.s32.totalorder %s11_s8, 4   ;;  %s554_s7 = smov %s556_s9 }
  0x50   :  { %10 = sbr.rel (!%p8_p5) target bundleno = 2 (0x2), region = 54 }

// kernel: dis_forward.13
= control target key start
LH: loop header
LB: loop body
LE: loop exit
PB: predicated region body
PF: predicated region fallthrough
CT: control target
= control target key end

     0   :  { %s10833_s12 = smov 0   ;;  %s10835_s13 = smov 0   ;;  %s14221_s0 = inlined_call_operand.vmem [shape: bf16[2,4,4096], index: 0, kind: input, shape index: {}]   ;;  %s14222_s1 = inlined_call_operand.vmem [shape: bf16[4096,512], index: 1, kind: input, shape index: {}]   ;;  %s14223_s2 = inlined_call_operand.vmem [shape: f32[1,512], index: 2, kind: input, shape index: {}]   ;;  %s14224_s3 = inlined_call_operand.vmem [shape: bf16[2,4,512], index: 3, kind: output, shape index: {}]  }
   0x1   :  { %s10837_s14 = smov 0  }
   0x2 LB: > { %s39_s15 = sadd.s32 1, %s10806_s13  ;;  %p8184_p0 = scmp.ge.s32.totalorder %s10810_s14, 1  ;;  %s10810_s14 = sphi %s10837_s14, %s13_s14   ;;  %s10806_s13 = sphi %s10835_s13, %s14226_s13   ;;  %s10802_s12 = sphi %s10833_s12, %s14225_s12  }
   0x3   : > { %p41_p1 = scmp.ge.s32.totalorder %s39_s15, 2  ;;  %p209_p2 = scmp.lt.s32.totalorder %s10810_s14, 3 }
   0x5   : > { %s14228_s15 = smov (%p41_p1, %s39_s15), 0  ;;  %p210_p3 = pnand %p8184_p0, %p209_p2 }
   0x6   : > { %p264_p4 = scmp.lt.s32.totalorder (!%p210_p3), %s10802_s12, 1 }
   0x7   : > { %213 = sbr.rel (%p210_p3) target bundleno = 1249 (0x4e1), region = 32 }
   0xc   : > { %v9244_v0 = vld [vmem:[%s14222_s1 + $0xe4] ss:$16 sps:$4 sm:$0xff]   ;;  %v9248_v2 = vld [vmem:[%s14222_s1 + $0xe0] ss:$16 sps:$4 sm:$0xff]   ;;  %v10812_v36 = vmov 1983009808   ;;  %v1360_v38 = vlaneseq }
   0xd   : > { %v9246_v1 = vld [vmem:[%s14222_s1 + $0x2e4] ss:$16 sps:$4 sm:$0xff]   ;;  %6644 = vmatprep.subr.bf16.mxu0 %v9244_v0  ;;  %v9249_v3 = vld [vmem:[%s14222_s1 + $0x2e0] ss:$16 sps:$4 sm:$0xff]   ;;  %v1358_v37 = vunpack.c.l.s4 %v10812_v36  ;;  %s14230_s12 = smov (!%p264_p4, %s10802_s12), 1 }
   0xe   : > { %6685 = vmatprep.subr.bf16.mxu1 %v9246_v1  ;;  %v9250_v4 = vld [vmem:[%s14222_s1 + $0xc4] ss:$16 sps:$4 sm:$0xff]   ;;  %6645 = vmatpush1.bf16.msra.mxu0 %v9248_v2  ;;  %v9254_v6 = vld [vmem:[%s14222_s1 + $0xc0] ss:$16 sps:$4 sm:$0xff]   ;;  %v10974_v43 = vshrl.u32 %v1360_v38, 7  ;;  %s9217_s29 = sshll.u32 %s14230_s12, 6 }
   0xf   : > { %6686 = vmatpush1.bf16.msra.mxu1 %v9249_v3  ;;  %v9252_v5 = vld [vmem:[%s14222_s1 + $0x2c4] ss:$16 sps:$4 sm:$0xff]   ;;  %6646 = vmatprep.subr.bf16.mxu0 %v9250_v4  ;;  %v9255_v7 = vld [vmem:[%s14222_s1 + $0x2c0] ss:$16 sps:$4 sm:$0xff]   ;;  %v1359_v42 = vunpack.c.0.s8 %v1358_v37  ;;  %s10995_s11 = scalar_lea.vmem %s14221_s0, %s9217_s29  ;;  %s9218_s8 = sshll.u32 %s14230_s12, 3 }
  0x10   : > { %6687 = vmatprep.subr.bf16.mxu1 %v9252_v5  ;;  %v9256_v8 = vld [vmem:[%s14222_s1 + $0xa4] ss:$16 sps:$4 sm:$0xff]   ;;  %v9260_v10 = vld [vmem:[%s14222_s1 + $0xa0] ss:$16 sps:$4 sm:$0xff]   ;;  %v317_v38 = vld [vmem:[%s10995_s11 + $0x8] sm:$0xff]  ;;  %s306_s16 = scalar_lea.vmem %s14224_s3, %s9218_s8 }
  0x11   : > { %v9258_v9 = vld [vmem:[%s14222_s1 + $0x2a4] ss:$16 sps:$4 sm:$0xff]   ;;  %v9261_v11 = vld [vmem:[%s14222_s1 + $0x2a0] ss:$16 sps:$4 sm:$0xff]   ;;  %v10998_v49 = vsub.s32 %v1359_v42, %v10974_v43 }
  0x12   : > { %6647 = vmatpush1.bf16.msra.mxu0 %v9254_v6  ;;  %v9262_v12 = vld [vmem:[%s14222_s1 + $0x84] ss:$16 sps:$4 sm:$0xff]   ;;  %v9266_v14 = vld [vmem:[%s14222_s1 + $0x80] ss:$16 sps:$4 sm:$0xff]  }
  0x13   : > { %6688 = vmatpush1.bf16.msra.mxu1 %v9255_v7  ;;  %6648 = vmatprep.subr.bf16.mxu0 %v9256_v8  ;;  %v9264_v13 = vld [vmem:[%s14222_s1 + $0x284] ss:$16 sps:$4 sm:$0xff]   ;;  %v9267_v15 = vld [vmem:[%s14222_s1 + $0x280] ss:$16 sps:$4 sm:$0xff]  }
  0x14   : > { %6689 = vmatprep.subr.bf16.mxu1 %v9258_v9  ;;  %v9268_v16 = vld [vmem:[%s14222_s1 + $0x64] ss:$16 sps:$4 sm:$0xff]   ;;  %v9272_v18 = vld [vmem:[%s14222_s1 + $0x60] ss:$16 sps:$4 sm:$0xff]  }
  0x15   : > { %v9270_v17 = vld [vmem:[%s14222_s1 + $0x264] ss:$16 sps:$4 sm:$0xff]   ;;  %v9273_v19 = vld [vmem:[%s14222_s1 + $0x260] ss:$16 sps:$4 sm:$0xff]  }
  0x16   : > { %6649 = vmatpush1.bf16.msra.mxu0 %v9260_v10  ;;  %v9274_v20 = vld [vmem:[%s14222_s1 + $0x44] ss:$16 sps:$4 sm:$0xff]   ;;  %v9278_v22 = vld [vmem:[%s14222_s1 + $0x40] ss:$16 sps:$4 sm:$0xff]  }
  0x17   : > { %6690 = vmatpush1.bf16.msra.mxu1 %v9261_v11  ;;  %6650 = vmatprep.subr.bf16.mxu0 %v9262_v12  ;;  %v9276_v21 = vld [vmem:[%s14222_s1 + $0x244] ss:$16 sps:$4 sm:$0xff]   ;;  %v9279_v23 = vld [vmem:[%s14222_s1 + $0x240] ss:$16 sps:$4 sm:$0xff]  }
  0x18   : > { %6691 = vmatprep.subr.bf16.mxu1 %v9264_v13  ;;  %v9280_v24 = vld [vmem:[%s14222_s1 + $0x24] ss:$16 sps:$4 sm:$0xff]   ;;  %v9284_v26 = vld [vmem:[%s14222_s1 + $0x20] ss:$16 sps:$4 sm:$0xff]  }
  0x19   : > { %v9282_v25 = vld [vmem:[%s14222_s1 + $0x224] ss:$16 sps:$4 sm:$0xff]   ;;  %v9285_v27 = vld [vmem:[%s14222_s1 + $0x220] ss:$16 sps:$4 sm:$0xff]  }
  0x1a   : > { %6651 = vmatpush1.bf16.msra.mxu0 %v9266_v14  ;;  %v9286_v28 = vld [vmem:[%s14222_s1 + $0x4] ss:$16 sps:$4 sm:$0xff]   ;;  %v9290_v30 = vld [vmem:[%s14222_s1] ss:$16 sps:$4 sm:$0xff]  }
  0x1b   : > { %6692 = vmatpush1.bf16.msra.mxu1 %v9267_v15  ;;  %6652 = vmatprep.subr.bf16.mxu0 %v9268_v16  ;;  %v9288_v29 = vld [vmem:[%s14222_s1 + $0x204] ss:$16 sps:$4 sm:$0xff]   ;;  %v9291_v31 = vld [vmem:[%s14222_s1 + $0x200] ss:$16 sps:$4 sm:$0xff]  }
  0x1c   : > { %6693 = vmatprep.subr.bf16.mxu1 %v9270_v17  ;;  %v9292_v32 = vld [vmem:[%s14222_s1 + $0x1e4] ss:$16 sps:$4 sm:$0xff]   ;;  %v9296_v34 = vld [vmem:[%s14222_s1 + $0x1e0] ss:$16 sps:$4 sm:$0xff]  }
  0x1d   : > { %v9294_v33 = vld [vmem:[%s14222_s1 + $0x3e4] ss:$16 sps:$4 sm:$0xff]   ;;  %v9297_v35 = vld [vmem:[%s14222_s1 + $0x3e0] ss:$16 sps:$4 sm:$0xff]  }
  0x1e   : > { %6653 = vmatpush1.bf16.msra.mxu0 %v9272_v18  ;;  %v9298_v39 = vld [vmem:[%s14222_s1 + $0x1c4] ss:$16 sps:$4 sm:$0xff]   ;;  %v9302_v41 = vld [vmem:[%s14222_s1 + $0x1c0] ss:$16 sps:$4 sm:$0xff]  }
  0x1f   : > { %6694 = vmatpush1.bf16.msra.mxu1 %v9273_v19  ;;  %6654 = vmatprep.subr.bf16.mxu0 %v9274_v20  ;;  %v9300_v40 = vld [vmem:[%s14222_s1 + $0x3c4] ss:$16 sps:$4 sm:$0xff]   ;;  %v9303_v44 = vld [vmem:[%s14222_s1 + $0x3c0] ss:$16 sps:$4 sm:$0xff]  }
  0x20   : > { %6695 = vmatprep.subr.bf16.mxu1 %v9276_v21  ;;  %v9304_v45 = vld [vmem:[%s14222_s1 + $0x1a4] ss:$16 sps:$4 sm:$0xff]   ;;  %v9308_v47 = vld [vmem:[%s14222_s1 + $0x1a0] ss:$16 sps:$4 sm:$0xff]  }
  0x21   : > { %v9306_v46 = vld [vmem:[%s14222_s1 + $0x3a4] ss:$16 sps:$4 sm:$0xff]   ;;  %v9309_v48 = vld [vmem:[%s14222_s1 + $0x3a0] ss:$16 sps:$4 sm:$0xff]  }
  0x22   : > { %6655 = vmatpush1.bf16.msra.mxu0 %v9278_v22  ;;  %v9310_v50 = vld [vmem:[%s14222_s1 + $0x184] ss:$16 sps:$4 sm:$0xff]   ;;  %v9314_v53 = vld [vmem:[%s14222_s1 + $0x180] ss:$16 sps:$4 sm:$0xff]  }
  0x23   : > { %6696 = vmatpush1.bf16.msra.mxu1 %v9279_v23  ;;  %6656 = vmatprep.subr.bf16.mxu0 %v9280_v24  ;;  %v9312_v51 = vld [vmem:[%s14222_s1 + $0x384] ss:$16 sps:$4 sm:$0xff]   ;;  %v9315_v56 = vld [vmem:[%s14222_s1 + $0x380] ss:$16 sps:$4 sm:$0xff]  }
  0x24   : > { %6697 = vmatprep.subr.bf16.mxu1 %v9282_v25  ;;  %v316_v52 = vld [vmem:[%s10995_s11] sm:$0xff] }
  0x25   : > { %v11011_v54 = vrot.slane %v316_v52, %v10998_v49  ;;  %v1356_v55 = vcombine.high %v316_v52, %v316_v52  ;;  %v9316_v57 = vld [vmem:[%s14222_s1 + $0x164] ss:$16 sps:$4 sm:$0xff]   ;;  %v9320_v61 = vld [vmem:[%s14222_s1 + $0x160] ss:$16 sps:$4 sm:$0xff]  }
  0x26   : > { %6657 = vmatpush1.bf16.msra.mxu0 %v9284_v26  ;;  %v9318_v58 = vld [vmem:[%s14222_s1 + $0x364] ss:$16 sps:$4 sm:$0xff]   ;;  %v9321_v63 = vld [vmem:[%s14222_s1 + $0x360] ss:$16 sps:$4 sm:$0xff]  }
  0x27   : > { %6698 = vmatpush1.bf16.msra.mxu1 %v9285_v27  ;;  %6658 = vmatprep.subr.bf16.mxu0 %v9286_v28  ;;  %v11024_v59 = vcombine.high %v11011_v54, %v11011_v54  ;;  %v11027_v60 = vrot.slane %v1356_v55, %v10998_v49  ;;  %v9322_v0 = vld [vmem:[%s14222_s1 + $0x144] ss:$16 sps:$4 sm:$0xff]   ;;  %v9326_v2 = vld [vmem:[%s14222_s1 + $0x140] ss:$16 sps:$4 sm:$0xff]  }
  0x28   : > { %6699 = vmatprep.subr.bf16.mxu1 %v9288_v29  ;;  %v9324_v1 = vld [vmem:[%s14222_s1 + $0x344] ss:$16 sps:$4 sm:$0xff]   ;;  %v9327_v3 = vld [vmem:[%s14222_s1 + $0x340] ss:$16 sps:$4 sm:$0xff]  }
  0x29   : > { %6676 = vmatprep.mubr.bf16.mxu0 %v11024_v59  ;;  %v11035_v62 = vcombine.high %v11027_v60, %v11027_v60  ;;  %v9328_v4 = vld [vmem:[%s14222_s1 + $0x124] ss:$16 sps:$4 sm:$0xff]   ;;  %v9332_v6 = vld [vmem:[%s14222_s1 + $0x120] ss:$16 sps:$4 sm:$0xff]  }
  0x2a   : > { %6659 = vmatpush1.bf16.msra.mxu0 %v9290_v30  ;;  %v9330_v5 = vld [vmem:[%s14222_s1 + $0x324] ss:$16 sps:$4 sm:$0xff]   ;;  %v9333_v7 = vld [vmem:[%s14222_s1 + $0x320] ss:$16 sps:$4 sm:$0xff]  }
  0x2b   : > { %6700 = vmatpush1.bf16.msra.mxu1 %v9291_v31  ;;  %6660 = vmatprep.subr.bf16.mxu0 %v9292_v32  ;;  %v9334_v8 = vld [vmem:[%s14222_s1 + $0x104] ss:$16 sps:$4 sm:$0xff]   ;;  %v9338_v10 = vld [vmem:[%s14222_s1 + $0x100] ss:$16 sps:$4 sm:$0xff]  }
  0x2c   : > { %6701 = vmatprep.subr.bf16.mxu1 %v9294_v33  ;;  %6717 = vmatprep.mubr.bf16.mxu1 %v11035_v62  ;;  %v9336_v9 = vld [vmem:[%s14222_s1 + $0x304] ss:$16 sps:$4 sm:$0xff]   ;;  %v9339_v11 = vld [vmem:[%s14222_s1 + $0x300] ss:$16 sps:$4 sm:$0xff]  }
  0x2d   : > { %v9343_v12 = vld [vmem:[%s14222_s1 + $0x4e4] ss:$16 sps:$4 sm:$0xff]   ;;  %v9341_v14 = vld [vmem:[%s14222_s1 + $0x4e0] ss:$16 sps:$4 sm:$0xff]  }
  0x2e   : > { %6661 = vmatpush2.bf16.msra.mxu0 %v9296_v34  ;;  %v9346_v13 = vld [vmem:[%s14222_s1 + $0x6e4] ss:$16 sps:$4 sm:$0xff]   ;;  %v9344_v15 = vld [vmem:[%s14222_s1 + $0x6e0] ss:$16 sps:$4 sm:$0xff]  }
  0x2f   : > { %6702 = vmatpush2.bf16.msra.mxu1 %v9297_v35  ;;  %6662 = vmatprep.subr.bf16.mxu0 %v9298_v39  ;;  %v9349_v16 = vld [vmem:[%s14222_s1 + $0x4c4] ss:$16 sps:$4 sm:$0xff]   ;;  %v9347_v18 = vld [vmem:[%s14222_s1 + $0x4c0] ss:$16 sps:$4 sm:$0xff]   ;;  %v11159_v39 = vrot.slane %v317_v38, %v10998_v49 }
  0x30   : > { %6703 = vmatprep.subr.bf16.mxu1 %v9300_v40  ;;  %v9352_v17 = vld [vmem:[%s14222_s1 + $0x6c4] ss:$16 sps:$4 sm:$0xff]   ;;  %v9350_v19 = vld [vmem:[%s14222_s1 + $0x6c0] ss:$16 sps:$4 sm:$0xff]   ;;  %v1373_v40 = vcombine.high %v317_v38, %v317_v38 }
  0x31   : > { %v9355_v20 = vld [vmem:[%s14222_s1 + $0x4a4] ss:$16 sps:$4 sm:$0xff]   ;;  %v9353_v22 = vld [vmem:[%s14222_s1 + $0x4a0] ss:$16 sps:$4 sm:$0xff]  }
  0x32   : > { %6663 = vmatpush2.bf16.msra.mxu0 %v9302_v41  ;;  %v9358_v21 = vld [vmem:[%s14222_s1 + $0x6a4] ss:$16 sps:$4 sm:$0xff]   ;;  %v9356_v23 = vld [vmem:[%s14222_s1 + $0x6a0] ss:$16 sps:$4 sm:$0xff]  }
  0x33   : > { %6704 = vmatpush2.bf16.msra.mxu1 %v9303_v44  ;;  %6664 = vmatprep.subr.bf16.mxu0 %v9304_v45  ;;  %v9361_v24 = vld [vmem:[%s14222_s1 + $0x484] ss:$16 sps:$4 sm:$0xff]   ;;  %v9359_v26 = vld [vmem:[%s14222_s1 + $0x480] ss:$16 sps:$4 sm:$0xff]   ;;  %v11169_v44 = vcombine.high %v11159_v39, %v11159_v39  ;;  %v11172_v45 = vrot.slane %v1373_v40, %v10998_v49 }
  0x34   : > { %6705 = vmatprep.subr.bf16.mxu1 %v9306_v46  ;;  %v9364_v25 = vld [vmem:[%s14222_s1 + $0x684] ss:$16 sps:$4 sm:$0xff]   ;;  %v9362_v27 = vld [vmem:[%s14222_s1 + $0x680] ss:$16 sps:$4 sm:$0xff]  }
  0x35   : > { %v9367_v28 = vld [vmem:[%s14222_s1 + $0x464] ss:$16 sps:$4 sm:$0xff]   ;;  %v9365_v30 = vld [vmem:[%s14222_s1 + $0x460] ss:$16 sps:$4 sm:$0xff]  }
  0x36   : > { %6665 = vmatpush2.bf16.msra.mxu0 %v9308_v47  ;;  %v9370_v29 = vld [vmem:[%s14222_s1 + $0x664] ss:$16 sps:$4 sm:$0xff]   ;;  %v9368_v31 = vld [vmem:[%s14222_s1 + $0x660] ss:$16 sps:$4 sm:$0xff]  }
  0x37   : > { %6706 = vmatpush2.bf16.msra.mxu1 %v9309_v48  ;;  %6666 = vmatprep.subr.bf16.mxu0 %v9310_v50  ;;  %v9373_v32 = vld [vmem:[%s14222_s1 + $0x444] ss:$16 sps:$4 sm:$0xff]   ;;  %v9371_v34 = vld [vmem:[%s14222_s1 + $0x440] ss:$16 sps:$4 sm:$0xff]   ;;  %v11183_v48 = vcombine.high %v11172_v45, %v11172_v45 }
  0x38   : > { %6707 = vmatprep.subr.bf16.mxu1 %v9312_v51  ;;  %v9376_v33 = vld [vmem:[%s14222_s1 + $0x644] ss:$16 sps:$4 sm:$0xff]   ;;  %v9374_v35 = vld [vmem:[%s14222_s1 + $0x640] ss:$16 sps:$4 sm:$0xff]  }
  0x39   : > { %v9379_v36 = vld [vmem:[%s14222_s1 + $0x424] ss:$16 sps:$4 sm:$0xff]   ;;  %v9377_v41 = vld [vmem:[%s14222_s1 + $0x420] ss:$16 sps:$4 sm:$0xff]  }
  0x3a   : > { %6667 = vmatpush2.bf16.msra.mxu0 %v9314_v53  ;;  %v9382_v37 = vld [vmem:[%s14222_s1 + $0x624] ss:$16 sps:$4 sm:$0xff]   ;;  %v9380_v42 = vld [vmem:[%s14222_s1 + $0x620] ss:$16 sps:$4 sm:$0xff]  }
  0x3b   : > { %6708 = vmatpush2.bf16.msra.mxu1 %v9315_v56  ;;  %6668 = vmatprep.subr.bf16.mxu0 %v9316_v57  ;;  %v9385_v46 = vld [vmem:[%s14222_s1 + $0x404] ss:$16 sps:$4 sm:$0xff]   ;;  %v9383_v50 = vld [vmem:[%s14222_s1 + $0x400] ss:$16 sps:$4 sm:$0xff]  }
  0x3c   : > { %6709 = vmatprep.subr.bf16.mxu1 %v9318_v58  ;;  %v9388_v47 = vld [vmem:[%s14222_s1 + $0x604] ss:$16 sps:$4 sm:$0xff]   ;;  %v9386_v51 = vld [vmem:[%s14222_s1 + $0x600] ss:$16 sps:$4 sm:$0xff]  }
  0x3d   : > { %v9391_v52 = vld [vmem:[%s14222_s1 + $0x5e4] ss:$16 sps:$4 sm:$0xff]   ;;  %v9389_v55 = vld [vmem:[%s14222_s1 + $0x5e0] ss:$16 sps:$4 sm:$0xff]  }
  0x3e   : > { %6669 = vmatpush2.bf16.msra.mxu0 %v9320_v61  ;;  %v9394_v53 = vld [vmem:[%s14222_s1 + $0x7e4] ss:$16 sps:$4 sm:$0xff]   ;;  %v9392_v56 = vld [vmem:[%s14222_s1 + $0x7e0] ss:$16 sps:$4 sm:$0xff]  }
  0x3f   : > { %6710 = vmatpush2.bf16.msra.mxu1 %v9321_v63  ;;  %6670 = vmatprep.subr.bf16.mxu0 %v9322_v0  ;;  %v9397_v57 = vld [vmem:[%s14222_s1 + $0x5c4] ss:$16 sps:$4 sm:$0xff]   ;;  %v9395_v61 = vld [vmem:[%s14222_s1 + $0x5c0] ss:$16 sps:$4 sm:$0xff]  }
  0x40   : > { %6711 = vmatprep.subr.bf16.mxu1 %v9324_v1  ;;  %v9400_v58 = vld [vmem:[%s14222_s1 + $0x7c4] ss:$16 sps:$4 sm:$0xff]   ;;  %v9398_v63 = vld [vmem:[%s14222_s1 + $0x7c0] ss:$16 sps:$4 sm:$0xff]  }
  0x41   : > { %v9403_v0 = vld [vmem:[%s14222_s1 + $0x5a4] ss:$16 sps:$4 sm:$0xff]  }
  0x42   : > { %6671 = vmatpush2.bf16.msra.mxu0 %v9326_v2  ;;  %v9406_v1 = vld [vmem:[%s14222_s1 + $0x7a4] ss:$16 sps:$4 sm:$0xff]   ;;  %v9401_v2 = vld [vmem:[%s14222_s1 + $0x5a0] ss:$16 sps:$4 sm:$0xff]  }
  0x43   : > { %6712 = vmatpush2.bf16.msra.mxu1 %v9327_v3  ;;  %6672 = vmatprep.subr.bf16.mxu0 %v9328_v4  ;;  %v9404_v3 = vld [vmem:[%s14222_s1 + $0x7a0] ss:$16 sps:$4 sm:$0xff]   ;;  %v9409_v4 = vld [vmem:[%s14222_s1 + $0x584] ss:$16 sps:$4 sm:$0xff]  }
  0x44   : > { %6713 = vmatprep.subr.bf16.mxu1 %v9330_v5  ;;  %v9412_v5 = vld [vmem:[%s14222_s1 + $0x784] ss:$16 sps:$4 sm:$0xff]  }
  0x45   : > { %v9455_v38 = vld [vmem:[%s14222_s1 + $0xaa4] ss:$16 sps:$4 sm:$0xff]  }
  0x46   : > { %6673 = vmatpush2.bf16.msra.mxu0 %v9332_v6  ;;  %v9407_v6 = vld [vmem:[%s14222_s1 + $0x580] ss:$16 sps:$4 sm:$0xff]  }
  0x47   : > { %6714 = vmatpush2.bf16.msra.mxu1 %v9333_v7  ;;  %6674 = vmatprep.subr.bf16.mxu0 %v9334_v8  ;;  %v9410_v7 = vld [vmem:[%s14222_s1 + $0x780] ss:$16 sps:$4 sm:$0xff]   ;;  %v9415_v8 = vld [vmem:[%s14222_s1 + $0x564] ss:$16 sps:$4 sm:$0xff]  }
  0x48   : > { %6715 = vmatprep.subr.bf16.mxu1 %v9336_v9  ;;  %v9418_v9 = vld [vmem:[%s14222_s1 + $0x764] ss:$16 sps:$4 sm:$0xff]  }
  0x4a   : > { %6675 = vmatpush2.bf16.msra.mxu0 %v9338_v10  ;;  %v9413_v10 = vld [vmem:[%s14222_s1 + $0x560] ss:$16 sps:$4 sm:$0xff]  }
  0x4b   : > { %6716 = vmatpush2.bf16.msra.mxu1 %v9339_v11  ;;  %6726 = vmatprep.subr.bf16.mxu0 %v9343_v12  ;;  %v9416_v11 = vld [vmem:[%s14222_s1 + $0x760] ss:$16 sps:$4 sm:$0xff]   ;;  %v9421_v12 = vld [vmem:[%s14222_s1 + $0x544] ss:$16 sps:$4 sm:$0xff]  }
  0x4c   : > { %6767 = vmatprep.subr.bf16.mxu1 %v9346_v13  ;;  %v9424_v13 = vld [vmem:[%s14222_s1 + $0x744] ss:$16 sps:$4 sm:$0xff]  }
  0x4d   : > { %6677 = vmatmul.mubr.bf16.vlgmr.msra.gmra.mxu0 %v11011_v54 }
  0x4e   : > { %6718 = vmatmul.mubr.bf16.vlgmr.msra.gmra.mxu1 %v11027_v60  ;;  %6727 = vmatpush1.bf16.msra.mxu0 %v9341_v14  ;;  %v9419_v14 = vld [vmem:[%s14222_s1 + $0x540] ss:$16 sps:$4 sm:$0xff]  }
  0x4f   : > { %6768 = vmatpush1.bf16.msra.mxu1 %v9344_v15  ;;  %6728 = vmatprep.subr.bf16.mxu0 %v9349_v16  ;;  %v9422_v15 = vld [vmem:[%s14222_s1 + $0x740] ss:$16 sps:$4 sm:$0xff]   ;;  %v9427_v16 = vld [vmem:[%s14222_s1 + $0x524] ss:$16 sps:$4 sm:$0xff]  }
  0x50   : > { %6769 = vmatprep.subr.bf16.mxu1 %v9352_v17  ;;  %6758 = vmatprep.mubr.bf16.mxu0 %v11169_v44  ;;  %v9430_v17 = vld [vmem:[%s14222_s1 + $0x724] ss:$16 sps:$4 sm:$0xff]  }
  0x51   : > { %6799 = vmatprep.mubr.bf16.mxu1 %v11183_v48 }
  0x52   : > { %6729 = vmatpush1.bf16.msra.mxu0 %v9347_v18  ;;  %v9425_v18 = vld [vmem:[%s14222_s1 + $0x520] ss:$16 sps:$4 sm:$0xff]  }
  0x53   : > { %6770 = vmatpush1.bf16.msra.mxu1 %v9350_v19  ;;  %6730 = vmatprep.subr.bf16.mxu0 %v9355_v20  ;;  %v9428_v19 = vld [vmem:[%s14222_s1 + $0x720] ss:$16 sps:$4 sm:$0xff]   ;;  %v9433_v20 = vld [vmem:[%s14222_s1 + $0x504] ss:$16 sps:$4 sm:$0xff]  }
  0x54   : > { %6771 = vmatprep.subr.bf16.mxu1 %v9358_v21  ;;  %v9436_v21 = vld [vmem:[%s14222_s1 + $0x704] ss:$16 sps:$4 sm:$0xff]  }
  0x56   : > { %6731 = vmatpush1.bf16.msra.mxu0 %v9353_v22  ;;  %v9431_v22 = vld [vmem:[%s14222_s1 + $0x500] ss:$16 sps:$4 sm:$0xff]  }
  0x57   : > { %6772 = vmatpush1.bf16.msra.mxu1 %v9356_v23  ;;  %6732 = vmatprep.subr.bf16.mxu0 %v9361_v24  ;;  %v9434_v23 = vld [vmem:[%s14222_s1 + $0x700] ss:$16 sps:$4 sm:$0xff]   ;;  %v9440_v24 = vld [vmem:[%s14222_s1 + $0x8e4] ss:$16 sps:$4 sm:$0xff]  }
  0x58   : > { %6773 = vmatprep.subr.bf16.mxu1 %v9364_v25  ;;  %v9443_v25 = vld [vmem:[%s14222_s1 + $0xae4] ss:$16 sps:$4 sm:$0xff]  }
  0x5a   : > { %6733 = vmatpush1.bf16.msra.mxu0 %v9359_v26  ;;  %v9438_v26 = vld [vmem:[%s14222_s1 + $0x8e0] ss:$16 sps:$4 sm:$0xff]  }
  0x5b   : > { %6774 = vmatpush1.bf16.msra.mxu1 %v9362_v27  ;;  %6734 = vmatprep.subr.bf16.mxu0 %v9367_v28  ;;  %v9441_v27 = vld [vmem:[%s14222_s1 + $0xae0] ss:$16 sps:$4 sm:$0xff]   ;;  %v9446_v28 = vld [vmem:[%s14222_s1 + $0x8c4] ss:$16 sps:$4 sm:$0xff]  }
  0x5c   : > { %6775 = vmatprep.subr.bf16.mxu1 %v9370_v29  ;;  %v318_v29 = vld [vmem:[%s10995_s11 + $0x10] sm:$0xff] }
  0x5e   : > { %6735 = vmatpush1.bf16.msra.mxu0 %v9365_v30  ;;  %v9449_v30 = vld [vmem:[%s14222_s1 + $0xac4] ss:$16 sps:$4 sm:$0xff]  }
  0x5f   : > { %6776 = vmatpush1.bf16.msra.mxu1 %v9368_v31  ;;  %6736 = vmatprep.subr.bf16.mxu0 %v9373_v32  ;;  %v11308_v31 = vrot.slane %v318_v29, %v10998_v49  ;;  %v1390_v32 = vcombine.high %v318_v29, %v318_v29  ;;  %v9521_v29 = vld [vmem:[%s14222_s1 + $0xb44] ss:$16 sps:$4 sm:$0xff]  }
  0x60   : > { %6777 = vmatprep.subr.bf16.mxu1 %v9376_v33  ;;  %v9444_v33 = vld [vmem:[%s14222_s1 + $0x8c0] ss:$16 sps:$4 sm:$0xff]  }
  0x62   : > { %6737 = vmatpush1.bf16.msra.mxu0 %v9371_v34  ;;  %v11317_v34 = vcombine.high %v11308_v31, %v11308_v31 }
  0x63   : > { %6778 = vmatpush1.bf16.msra.mxu1 %v9374_v35  ;;  %6738 = vmatprep.subr.bf16.mxu0 %v9379_v36  ;;  %v11320_v35 = vrot.slane %v1390_v32, %v10998_v49  ;;  %v9447_v36 = vld [vmem:[%s14222_s1 + $0xac0] ss:$16 sps:$4 sm:$0xff]  }
  0x64   : > { %6779 = vmatprep.subr.bf16.mxu1 %v9382_v37  ;;  %v9452_v37 = vld [vmem:[%s14222_s1 + $0x8a4] ss:$16 sps:$4 sm:$0xff]   ;;  %v9519_v32 = vld [vmem:[%s14222_s1 + $0xb40] ss:$16 sps:$4 sm:$0xff]  }
  0x65   : > { %v11333_v40 = vcombine.high %v11320_v35, %v11320_v35 }
  0x66   : > { %6739 = vmatpush1.bf16.msra.mxu0 %v9377_v41  ;;  %v9450_v41 = vld [vmem:[%s14222_s1 + $0x8a0] ss:$16 sps:$4 sm:$0xff]  }
  0x67   : > { %6780 = vmatpush1.bf16.msra.mxu1 %v9380_v42  ;;  %6740 = vmatprep.subr.bf16.mxu0 %v9385_v46  ;;  %v9453_v42 = vld [vmem:[%s14222_s1 + $0xaa0] ss:$16 sps:$4 sm:$0xff]   ;;  %v9458_v46 = vld [vmem:[%s14222_s1 + $0x884] ss:$16 sps:$4 sm:$0xff]  }
  0x68   : > { %6781 = vmatprep.subr.bf16.mxu1 %v9388_v47  ;;  %v9461_v47 = vld [vmem:[%s14222_s1 + $0xa84] ss:$16 sps:$4 sm:$0xff]  }
  0x6a   : > { %6741 = vmatpush1.bf16.msra.mxu0 %v9383_v50  ;;  %v9456_v50 = vld [vmem:[%s14222_s1 + $0x880] ss:$16 sps:$4 sm:$0xff]  }
  0x6b   : > { %6782 = vmatpush1.bf16.msra.mxu1 %v9386_v51  ;;  %6742 = vmatprep.subr.bf16.mxu0 %v9391_v52  ;;  %v9459_v51 = vld [vmem:[%s14222_s1 + $0xa80] ss:$16 sps:$4 sm:$0xff]   ;;  %v9464_v52 = vld [vmem:[%s14222_s1 + $0x864] ss:$16 sps:$4 sm:$0xff]  }
  0x6c   : > { %6783 = vmatprep.subr.bf16.mxu1 %v9394_v53  ;;  %v9467_v53 = vld [vmem:[%s14222_s1 + $0xa64] ss:$16 sps:$4 sm:$0xff]  }
  0x6e   : > { %6743 = vmatpush2.bf16.msra.mxu0 %v9389_v55  ;;  %v9462_v55 = vld [vmem:[%s14222_s1 + $0x860] ss:$16 sps:$4 sm:$0xff]  }
  0x6f   : > { %6784 = vmatpush2.bf16.msra.mxu1 %v9392_v56  ;;  %6744 = vmatprep.subr.bf16.mxu0 %v9397_v57  ;;  %v9465_v56 = vld [vmem:[%s14222_s1 + $0xa60] ss:$16 sps:$4 sm:$0xff]   ;;  %v9470_v57 = vld [vmem:[%s14222_s1 + $0x844] ss:$16 sps:$4 sm:$0xff]  }
  0x70   : > { %6785 = vmatprep.subr.bf16.mxu1 %v9400_v58  ;;  %v9473_v58 = vld [vmem:[%s14222_s1 + $0xa44] ss:$16 sps:$4 sm:$0xff]  }
  0x72   : > { %6745 = vmatpush2.bf16.msra.mxu0 %v9395_v61  ;;  %v9468_v61 = vld [vmem:[%s14222_s1 + $0x840] ss:$16 sps:$4 sm:$0xff]  }
  0x73   : > { %6786 = vmatpush2.bf16.msra.mxu1 %v9398_v63  ;;  %6746 = vmatprep.subr.bf16.mxu0 %v9403_v0  ;;  %v9471_v63 = vld [vmem:[%s14222_s1 + $0xa40] ss:$16 sps:$4 sm:$0xff]   ;;  %v9476_v0 = vld [vmem:[%s14222_s1 + $0x824] ss:$16 sps:$4 sm:$0xff]  }
  0x74   : > { %6787 = vmatprep.subr.bf16.mxu1 %v9406_v1  ;;  %v9479_v1 = vld [vmem:[%s14222_s1 + $0xa24] ss:$16 sps:$4 sm:$0xff]  }
  0x76   : > { %6747 = vmatpush2.bf16.msra.mxu0 %v9401_v2  ;;  %v9474_v2 = vld [vmem:[%s14222_s1 + $0x820] ss:$16 sps:$4 sm:$0xff]  }
  0x77   : > { %6788 = vmatpush2.bf16.msra.mxu1 %v9404_v3  ;;  %6748 = vmatprep.subr.bf16.mxu0 %v9409_v4  ;;  %v9477_v3 = vld [vmem:[%s14222_s1 + $0xa20] ss:$16 sps:$4 sm:$0xff]   ;;  %v9482_v4 = vld [vmem:[%s14222_s1 + $0x804] ss:$16 sps:$4 sm:$0xff]  }
  0x78   : > { %6789 = vmatprep.subr.bf16.mxu1 %v9412_v5  ;;  %v9485_v5 = vld [vmem:[%s14222_s1 + $0xa04] ss:$16 sps:$4 sm:$0xff]  }
  0x7a   : > { %6749 = vmatpush2.bf16.msra.mxu0 %v9407_v6  ;;  %v9480_v6 = vld [vmem:[%s14222_s1 + $0x800] ss:$16 sps:$4 sm:$0xff]  }
  0x7b   : > { %6790 = vmatpush2.bf16.msra.mxu1 %v9410_v7  ;;  %6750 = vmatprep.subr.bf16.mxu0 %v9415_v8  ;;  %v9483_v7 = vld [vmem:[%s14222_s1 + $0xa00] ss:$16 sps:$4 sm:$0xff]   ;;  %v9488_v8 = vld [vmem:[%s14222_s1 + $0x9e4] ss:$16 sps:$4 sm:$0xff]  }
  0x7c   : > { %6791 = vmatprep.subr.bf16.mxu1 %v9418_v9  ;;  %v9491_v9 = vld [vmem:[%s14222_s1 + $0xbe4] ss:$16 sps:$4 sm:$0xff]  }
  0x7e   : > { %6751 = vmatpush2.bf16.msra.mxu0 %v9413_v10  ;;  %v9486_v10 = vld [vmem:[%s14222_s1 + $0x9e0] ss:$16 sps:$4 sm:$0xff]  }
  0x7f   : > { %6792 = vmatpush2.bf16.msra.mxu1 %v9416_v11  ;;  %6752 = vmatprep.subr.bf16.mxu0 %v9421_v12  ;;  %v9489_v11 = vld [vmem:[%s14222_s1 + $0xbe0] ss:$16 sps:$4 sm:$0xff]   ;;  %v9494_v12 = vld [vmem:[%s14222_s1 + $0x9c4] ss:$16 sps:$4 sm:$0xff]  }
  0x80   : > { %6793 = vmatprep.subr.bf16.mxu1 %v9424_v13  ;;  %v9497_v13 = vld [vmem:[%s14222_s1 + $0xbc4] ss:$16 sps:$4 sm:$0xff]  }
  0x82   : > { %6753 = vmatpush2.bf16.msra.mxu0 %v9419_v14  ;;  %v9492_v14 = vld [vmem:[%s14222_s1 + $0x9c0] ss:$16 sps:$4 sm:$0xff]  }
  0x83   : > { %6794 = vmatpush2.bf16.msra.mxu1 %v9422_v15  ;;  %6754 = vmatprep.subr.bf16.mxu0 %v9427_v16  ;;  %v9495_v15 = vld [vmem:[%s14222_s1 + $0xbc0] ss:$16 sps:$4 sm:$0xff]   ;;  %v9500_v16 = vld [vmem:[%s14222_s1 + $0x9a4] ss:$16 sps:$4 sm:$0xff]  }
  0x84   : > { %6795 = vmatprep.subr.bf16.mxu1 %v9430_v17  ;;  %v9503_v17 = vld [vmem:[%s14222_s1 + $0xba4] ss:$16 sps:$4 sm:$0xff]  }
  0x86   : > { %6755 = vmatpush2.bf16.msra.mxu0 %v9425_v18  ;;  %v9498_v18 = vld [vmem:[%s14222_s1 + $0x9a0] ss:$16 sps:$4 sm:$0xff]  }
  0x87   : > { %6796 = vmatpush2.bf16.msra.mxu1 %v9428_v19  ;;  %6756 = vmatprep.subr.bf16.mxu0 %v9433_v20  ;;  %v9501_v19 = vld [vmem:[%s14222_s1 + $0xba0] ss:$16 sps:$4 sm:$0xff]   ;;  %v9506_v20 = vld [vmem:[%s14222_s1 + $0x984] ss:$16 sps:$4 sm:$0xff]  }
  0x88   : > { %6797 = vmatprep.subr.bf16.mxu1 %v9436_v21  ;;  %v9509_v21 = vld [vmem:[%s14222_s1 + $0xb84] ss:$16 sps:$4 sm:$0xff]  }
  0x8a   : > { %6757 = vmatpush2.bf16.msra.mxu0 %v9431_v22  ;;  %v9504_v22 = vld [vmem:[%s14222_s1 + $0x980] ss:$16 sps:$4 sm:$0xff]  }
  0x8b   : > { %6798 = vmatpush2.bf16.msra.mxu1 %v9434_v23  ;;  %6808 = vmatprep.subr.bf16.mxu0 %v9440_v24  ;;  %v9507_v23 = vld [vmem:[%s14222_s1 + $0xb80] ss:$16 sps:$4 sm:$0xff]   ;;  %v9512_v24 = vld [vmem:[%s14222_s1 + $0x964] ss:$16 sps:$4 sm:$0xff]  }
  0x8c   : > { %6849 = vmatprep.subr.bf16.mxu1 %v9443_v25  ;;  %v9515_v25 = vld [vmem:[%s14222_s1 + $0xb64] ss:$16 sps:$4 sm:$0xff]  }
  0x8d   : > { %6759 = vmatmul.mubr.bf16.vlgmr.msra.gmra.mxu0 %v11159_v39 }
  0x8e   : > { %6800 = vmatmul.mubr.bf16.vlgmr.msra.gmra.mxu1 %v11172_v45  ;;  %6809 = vmatpush1.bf16.msra.mxu0 %v9438_v26  ;;  %v9510_v26 = vld [vmem:[%s14222_s1 + $0x960] ss:$16 sps:$4 sm:$0xff]  }
  0x8f   : > { %6850 = vmatpush1.bf16.msra.mxu1 %v9441_v27  ;;  %6810 = vmatprep.subr.bf16.mxu0 %v9446_v28  ;;  %v9513_v27 = vld [vmem:[%s14222_s1 + $0xb60] ss:$16 sps:$4 sm:$0xff]   ;;  %v9518_v28 = vld [vmem:[%s14222_s1 + $0x944] ss:$16 sps:$4 sm:$0xff]  }
  0x90   : > { %6851 = vmatprep.subr.bf16.mxu1 %v9449_v30  ;;  %6840 = vmatprep.mubr.bf16.mxu0 %v11317_v34  ;;  %v9516_v30 = vld [vmem:[%s14222_s1 + $0x940] ss:$16 sps:$4 sm:$0xff]  }
  0x91   : > { %6881 = vmatprep.mubr.bf16.mxu1 %v11333_v40 }
  0x92   : > { %6811 = vmatpush1.bf16.msra.mxu0 %v9444_v33  ;;  %v9524_v33 = vld [vmem:[%s14222_s1 + $0x924] ss:$16 sps:$4 sm:$0xff]  }
  0x93   : > { %6852 = vmatpush1.bf16.msra.mxu1 %v9447_v36  ;;  %6812 = vmatprep.subr.bf16.mxu0 %v9452_v37  ;;  %v9527_v36 = vld [vmem:[%s14222_s1 + $0xb24] ss:$16 sps:$4 sm:$0xff]   ;;  %v9522_v37 = vld [vmem:[%s14222_s1 + $0x920] ss:$16 sps:$4 sm:$0xff]  }
  0x94   : > { %6853 = vmatprep.subr.bf16.mxu1 %v9455_v38  ;;  %v9525_v38 = vld [vmem:[%s14222_s1 + $0xb20] ss:$16 sps:$4 sm:$0xff]  }
  0x96   : > { %6813 = vmatpush1.bf16.msra.mxu0 %v9450_v41  ;;  %v319_v41 = vld [vmem:[%s10995_s11 + $0x18] sm:$0xff] }
  0x97   : > { %6854 = vmatpush1.bf16.msra.mxu1 %v9453_v42  ;;  %6814 = vmatprep.subr.bf16.mxu0 %v9458_v46  ;;  %v9530_v42 = vld [vmem:[%s14222_s1 + $0x904] ss:$16 sps:$4 sm:$0xff]  }
  0x98   : > { %6855 = vmatprep.subr.bf16.mxu1 %v9461_v47  ;;  %v9533_v46 = vld [vmem:[%s14222_s1 + $0xb04] ss:$16 sps:$4 sm:$0xff]   ;;  %v1407_v47 = vcombine.high %v319_v41, %v319_v41 }
  0x9a   : > { %6815 = vmatpush1.bf16.msra.mxu0 %v9456_v50  ;;  %v9528_v50 = vld [vmem:[%s14222_s1 + $0x900] ss:$16 sps:$4 sm:$0xff]  }
  0x9b   : > { %6856 = vmatpush1.bf16.msra.mxu1 %v9459_v51  ;;  %6816 = vmatprep.subr.bf16.mxu0 %v9464_v52  ;;  %v9531_v51 = vld [vmem:[%s14222_s1 + $0xb00] ss:$16 sps:$4 sm:$0xff]   ;;  %v9537_v52 = vld [vmem:[%s14222_s1 + $0xce4] ss:$16 sps:$4 sm:$0xff]  }
  0x9c   : > { %6857 = vmatprep.subr.bf16.mxu1 %v9467_v53  ;;  %v9540_v53 = vld [vmem:[%s14222_s1 + $0xee4] ss:$16 sps:$4 sm:$0xff]  }
  0x9e   : > { %6817 = vmatpush1.bf16.msra.mxu0 %v9462_v55  ;;  %v11507_v55 = vrot.slane %v319_v41, %v10998_v49  ;;  %v9597_v41 = vld [vmem:[%s14222_s1 + $0xda4] ss:$16 sps:$4 sm:$0xff]  }
  0x9f   : > { %6858 = vmatpush1.bf16.msra.mxu1 %v9465_v56  ;;  %6818 = vmatprep.subr.bf16.mxu0 %v9470_v57  ;;  %v11510_v56 = vrot.slane %v1407_v47, %v10998_v49  ;;  %v9535_v57 = vld [vmem:[%s14222_s1 + $0xce0] ss:$16 sps:$4 sm:$0xff]  }
  0xa0   : > { %6859 = vmatprep.subr.bf16.mxu1 %v9473_v58  ;;  %v9538_v58 = vld [vmem:[%s14222_s1 + $0xee0] ss:$16 sps:$4 sm:$0xff]  }
  0xa1   : > { %v9598_v47 = vld [vmem:[%s14222_s1 + $0xfa0] ss:$16 sps:$4 sm:$0xff]  }
  0xa2   : > { %6819 = vmatpush1.bf16.msra.mxu0 %v9468_v61  ;;  %v9543_v61 = vld [vmem:[%s14222_s1 + $0xcc4] ss:$16 sps:$4 sm:$0xff]  }
  0xa3   : > { %6860 = vmatpush1.bf16.msra.mxu1 %v9471_v63  ;;  %6820 = vmatprep.subr.bf16.mxu0 %v9476_v0  ;;  %v9546_v63 = vld [vmem:[%s14222_s1 + $0xec4] ss:$16 sps:$4 sm:$0xff]   ;;  %v11526_v0 = vcombine.high %v11507_v55, %v11507_v55 }
  0xa4   : > { %6861 = vmatprep.subr.bf16.mxu1 %v9479_v1  ;;  %v11530_v1 = vcombine.high %v11510_v56, %v11510_v56 }
  0xa6   : > { %6821 = vmatpush1.bf16.msra.mxu0 %v9474_v2  ;;  %v9541_v2 = vld [vmem:[%s14222_s1 + $0xcc0] ss:$16 sps:$4 sm:$0xff]  }
  0xa7   : > { %6862 = vmatpush1.bf16.msra.mxu1 %v9477_v3  ;;  %6822 = vmatprep.subr.bf16.mxu0 %v9482_v4  ;;  %v9544_v3 = vld [vmem:[%s14222_s1 + $0xec0] ss:$16 sps:$4 sm:$0xff]   ;;  %v9549_v4 = vld [vmem:[%s14222_s1 + $0xca4] ss:$16 sps:$4 sm:$0xff]  }
  0xa8   : > { %6863 = vmatprep.subr.bf16.mxu1 %v9485_v5  ;;  %v9552_v5 = vld [vmem:[%s14222_s1 + $0xea4] ss:$16 sps:$4 sm:$0xff]  }
  0xaa   : > { %6823 = vmatpush1.bf16.msra.mxu0 %v9480_v6  ;;  %v9547_v6 = vld [vmem:[%s14222_s1 + $0xca0] ss:$16 sps:$4 sm:$0xff]  }
  0xab   : > { %6864 = vmatpush1.bf16.msra.mxu1 %v9483_v7  ;;  %6824 = vmatprep.subr.bf16.mxu0 %v9488_v8  ;;  %v9550_v7 = vld [vmem:[%s14222_s1 + $0xea0] ss:$16 sps:$4 sm:$0xff]   ;;  %v9555_v8 = vld [vmem:[%s14222_s1 + $0xc84] ss:$16 sps:$4 sm:$0xff]  }
  0xac   : > { %6865 = vmatprep.subr.bf16.mxu1 %v9491_v9  ;;  %v9558_v9 = vld [vmem:[%s14222_s1 + $0xe84] ss:$16 sps:$4 sm:$0xff]  }
  0xae   : > { %6825 = vmatpush2.bf16.msra.mxu0 %v9486_v10  ;;  %v9553_v10 = vld [vmem:[%s14222_s1 + $0xc80] ss:$16 sps:$4 sm:$0xff]  }
  0xaf   : > { %6866 = vmatpush2.bf16.msra.mxu1 %v9489_v11  ;;  %6826 = vmatprep.subr.bf16.mxu0 %v9494_v12  ;;  %v9556_v11 = vld [vmem:[%s14222_s1 + $0xe80] ss:$16 sps:$4 sm:$0xff]   ;;  %v9561_v12 = vld [vmem:[%s14222_s1 + $0xc64] ss:$16 sps:$4 sm:$0xff]  }
  0xb0   : > { %6867 = vmatprep.subr.bf16.mxu1 %v9497_v13  ;;  %v9564_v13 = vld [vmem:[%s14222_s1 + $0xe64] ss:$16 sps:$4 sm:$0xff]  }
  0xb2   : > { %6827 = vmatpush2.bf16.msra.mxu0 %v9492_v14  ;;  %v9559_v14 = vld [vmem:[%s14222_s1 + $0xc60] ss:$16 sps:$4 sm:$0xff]  }
  0xb3   : > { %6868 = vmatpush2.bf16.msra.mxu1 %v9495_v15  ;;  %6828 = vmatprep.subr.bf16.mxu0 %v9500_v16  ;;  %v9562_v15 = vld [vmem:[%s14222_s1 + $0xe60] ss:$16 sps:$4 sm:$0xff]   ;;  %v9567_v16 = vld [vmem:[%s14222_s1 + $0xc44] ss:$16 sps:$4 sm:$0xff]  }
  0xb4   : > { %6869 = vmatprep.subr.bf16.mxu1 %v9503_v17  ;;  %v9570_v17 = vld [vmem:[%s14222_s1 + $0xe44] ss:$16 sps:$4 sm:$0xff]  }
  0xb6   : > { %6829 = vmatpush2.bf16.msra.mxu0 %v9498_v18  ;;  %v9565_v18 = vld [vmem:[%s14222_s1 + $0xc40] ss:$16 sps:$4 sm:$0xff]  }
  0xb7   : > { %6870 = vmatpush2.bf16.msra.mxu1 %v9501_v19  ;;  %6830 = vmatprep.subr.bf16.mxu0 %v9506_v20  ;;  %v9568_v19 = vld [vmem:[%s14222_s1 + $0xe40] ss:$16 sps:$4 sm:$0xff]   ;;  %v9573_v20 = vld [vmem:[%s14222_s1 + $0xc24] ss:$16 sps:$4 sm:$0xff]  }
  0xb8   : > { %6871 = vmatprep.subr.bf16.mxu1 %v9509_v21  ;;  %v9576_v21 = vld [vmem:[%s14222_s1 + $0xe24] ss:$16 sps:$4 sm:$0xff]  }
  0xba   : > { %6831 = vmatpush2.bf16.msra.mxu0 %v9504_v22  ;;  %v9571_v22 = vld [vmem:[%s14222_s1 + $0xc20] ss:$16 sps:$4 sm:$0xff]  }
  0xbb   : > { %6872 = vmatpush2.bf16.msra.mxu1 %v9507_v23  ;;  %6832 = vmatprep.subr.bf16.mxu0 %v9512_v24  ;;  %v9574_v23 = vld [vmem:[%s14222_s1 + $0xe20] ss:$16 sps:$4 sm:$0xff]   ;;  %v9579_v24 = vld [vmem:[%s14222_s1 + $0xc04] ss:$16 sps:$4 sm:$0xff]  }
  0xbc   : > { %6873 = vmatprep.subr.bf16.mxu1 %v9515_v25  ;;  %v9582_v25 = vld [vmem:[%s14222_s1 + $0xe04] ss:$16 sps:$4 sm:$0xff]  }
  0xbe   : > { %6833 = vmatpush2.bf16.msra.mxu0 %v9510_v26  ;;  %v9577_v26 = vld [vmem:[%s14222_s1 + $0xc00] ss:$16 sps:$4 sm:$0xff]  }
  0xbf   : > { %6874 = vmatpush2.bf16.msra.mxu1 %v9513_v27  ;;  %6834 = vmatprep.subr.bf16.mxu0 %v9518_v28  ;;  %v9580_v27 = vld [vmem:[%s14222_s1 + $0xe00] ss:$16 sps:$4 sm:$0xff]   ;;  %v9585_v28 = vld [vmem:[%s14222_s1 + $0xde4] ss:$16 sps:$4 sm:$0xff]  }
  0xc0   : > { %6875 = vmatprep.subr.bf16.mxu1 %v9521_v29  ;;  %v9588_v29 = vld [vmem:[%s14222_s1 + $0xfe4] ss:$16 sps:$4 sm:$0xff]  }
  0xc2   : > { %6835 = vmatpush2.bf16.msra.mxu0 %v9516_v30  ;;  %v9583_v30 = vld [vmem:[%s14222_s1 + $0xde0] ss:$16 sps:$4 sm:$0xff]  }
  0xc3   : > { %6876 = vmatpush2.bf16.msra.mxu1 %v9519_v32  ;;  %6836 = vmatprep.subr.bf16.mxu0 %v9524_v33  ;;  %v9586_v32 = vld [vmem:[%s14222_s1 + $0xfe0] ss:$16 sps:$4 sm:$0xff]   ;;  %v9591_v33 = vld [vmem:[%s14222_s1 + $0xdc4] ss:$16 sps:$4 sm:$0xff]  }
  0xc4   : > { %6877 = vmatprep.subr.bf16.mxu1 %v9527_v36  ;;  %v9594_v36 = vld [vmem:[%s14222_s1 + $0xfc4] ss:$16 sps:$4 sm:$0xff]  }
  0xc6   : > { %6837 = vmatpush2.bf16.msra.mxu0 %v9522_v37  ;;  %v9589_v37 = vld [vmem:[%s14222_s1 + $0xdc0] ss:$16 sps:$4 sm:$0xff]  }
  0xc7   : > { %6878 = vmatpush2.bf16.msra.mxu1 %v9525_v38  ;;  %6838 = vmatprep.subr.bf16.mxu0 %v9530_v42  ;;  %v9592_v38 = vld [vmem:[%s14222_s1 + $0xfc0] ss:$16 sps:$4 sm:$0xff]   ;;  %v9600_v42 = vld [vmem:[%s14222_s1 + $0xfa4] ss:$16 sps:$4 sm:$0xff]  }
  0xc8   : > { %6879 = vmatprep.subr.bf16.mxu1 %v9533_v46  ;;  %v9595_v46 = vld [vmem:[%s14222_s1 + $0xda0] ss:$16 sps:$4 sm:$0xff]  }
  0xca   : > { %6839 = vmatpush2.bf16.msra.mxu0 %v9528_v50  ;;  %v9603_v50 = vld [vmem:[%s14222_s1 + $0xd84] ss:$16 sps:$4 sm:$0xff]  }
  0xcb   : > { %6880 = vmatpush2.bf16.msra.mxu1 %v9531_v51  ;;  %6890 = vmatprep.subr.bf16.mxu0 %v9537_v52  ;;  %v9606_v51 = vld [vmem:[%s14222_s1 + $0xf84] ss:$16 sps:$4 sm:$0xff]   ;;  %v9601_v52 = vld [vmem:[%s14222_s1 + $0xd80] ss:$16 sps:$4 sm:$0xff]  }
  0xcc   : > { %6931 = vmatprep.subr.bf16.mxu1 %v9540_v53  ;;  %v9604_v53 = vld [vmem:[%s14222_s1 + $0xf80] ss:$16 sps:$4 sm:$0xff]  }
  0xcd   : > { %6841 = vmatmul.mubr.bf16.vlgmr.msra.gmra.mxu0 %v11308_v31 }
  0xce   : > { %6882 = vmatmul.mubr.bf16.vlgmr.msra.gmra.mxu1 %v11320_v35  ;;  %6891 = vmatpush1.bf16.msra.mxu0 %v9535_v57  ;;  %v9609_v57 = vld [vmem:[%s14222_s1 + $0xd64] ss:$16 sps:$4 sm:$0xff]  }
  0xcf   : > { %6932 = vmatpush1.bf16.msra.mxu1 %v9538_v58  ;;  %6892 = vmatprep.subr.bf16.mxu0 %v9543_v61  ;;  %v9612_v58 = vld [vmem:[%s14222_s1 + $0xf64] ss:$16 sps:$4 sm:$0xff]   ;;  %v9607_v61 = vld [vmem:[%s14222_s1 + $0xd60] ss:$16 sps:$4 sm:$0xff]  }
  0xd0   : > { %6933 = vmatprep.subr.bf16.mxu1 %v9546_v63  ;;  %6922 = vmatprep.mubr.bf16.mxu0 %v11526_v0  ;;  %v9610_v63 = vld [vmem:[%s14222_s1 + $0xf60] ss:$16 sps:$4 sm:$0xff]  }
  0xd1   : > { %6963 = vmatprep.mubr.bf16.mxu1 %v11530_v1 }
  0xd2   : > { %6893 = vmatpush1.bf16.msra.mxu0 %v9541_v2  ;;  %v9615_v2 = vld [vmem:[%s14222_s1 + $0xd44] ss:$16 sps:$4 sm:$0xff]  }
  0xd3   : > { %6934 = vmatpush1.bf16.msra.mxu1 %v9544_v3  ;;  %6894 = vmatprep.subr.bf16.mxu0 %v9549_v4  ;;  %v9618_v3 = vld [vmem:[%s14222_s1 + $0xf44] ss:$16 sps:$4 sm:$0xff]   ;;  %v9613_v4 = vld [vmem:[%s14222_s1 + $0xd40] ss:$16 sps:$4 sm:$0xff]  }
  0xd4   : > { %6935 = vmatprep.subr.bf16.mxu1 %v9552_v5  ;;  %v9616_v5 = vld [vmem:[%s14222_s1 + $0xf40] ss:$16 sps:$4 sm:$0xff]  }
  0xd6   : > { %6895 = vmatpush1.bf16.msra.mxu0 %v9547_v6  ;;  %v9621_v6 = vld [vmem:[%s14222_s1 + $0xd24] ss:$16 sps:$4 sm:$0xff]  }
  0xd7   : > { %6936 = vmatpush1.bf16.msra.mxu1 %v9550_v7  ;;  %6896 = vmatprep.subr.bf16.mxu0 %v9555_v8  ;;  %v9624_v7 = vld [vmem:[%s14222_s1 + $0xf24] ss:$16 sps:$4 sm:$0xff]   ;;  %v9619_v8 = vld [vmem:[%s14222_s1 + $0xd20] ss:$16 sps:$4 sm:$0xff]  }
  0xd8   : > { %6937 = vmatprep.subr.bf16.mxu1 %v9558_v9  ;;  %v320_v9 = vld [vmem:[%s10995_s11 + $0x20] sm:$0xff] }
  0xda   : > { %6897 = vmatpush1.bf16.msra.mxu0 %v9553_v10  ;;  %v9622_v10 = vld [vmem:[%s14222_s1 + $0xf20] ss:$16 sps:$4 sm:$0xff]  }
  0xdb   : > { %6938 = vmatpush1.bf16.msra.mxu1 %v9556_v11  ;;  %6898 = vmatprep.subr.bf16.mxu0 %v9561_v12  ;;  %v9627_v11 = vld [vmem:[%s14222_s1 + $0xd04] ss:$16 sps:$4 sm:$0xff]  }
  0xdc   : > { %6939 = vmatprep.subr.bf16.mxu1 %v9564_v13  ;;  %v9630_v12 = vld [vmem:[%s14222_s1 + $0xf04] ss:$16 sps:$4 sm:$0xff]   ;;  %v1424_v13 = vcombine.high %v320_v9, %v320_v9 }
  0xde   : > { %6899 = vmatpush1.bf16.msra.mxu0 %v9559_v14  ;;  %v9625_v14 = vld [vmem:[%s14222_s1 + $0xd00] ss:$16 sps:$4 sm:$0xff]  }
  0xdf   : > { %6940 = vmatpush1.bf16.msra.mxu1 %v9562_v15  ;;  %6900 = vmatprep.subr.bf16.mxu0 %v9567_v16  ;;  %v9628_v15 = vld [vmem:[%s14222_s1 + $0xf00] ss:$16 sps:$4 sm:$0xff]   ;;  %v9634_v16 = vld [vmem:[%s14222_s1 + $0x10e4] ss:$16 sps:$4 sm:$0xff]  }
  0xe0   : > { %6941 = vmatprep.subr.bf16.mxu1 %v9570_v17  ;;  %v9637_v17 = vld [vmem:[%s14222_s1 + $0x12e4] ss:$16 sps:$4 sm:$0xff]  }
  0xe2   : > { %6901 = vmatpush1.bf16.msra.mxu0 %v9565_v18  ;;  %v11718_v18 = vrot.slane %v320_v9, %v10998_v49  ;;  %v9673_v9 = vld [vmem:[%s14222_s1 + $0x1224] ss:$16 sps:$4 sm:$0xff]  }
  0xe3   : > { %6942 = vmatpush1.bf16.msra.mxu1 %v9568_v19  ;;  %6902 = vmatprep.subr.bf16.mxu0 %v9573_v20  ;;  %v11721_v19 = vrot.slane %v1424_v13, %v10998_v49  ;;  %v9632_v20 = vld [vmem:[%s14222_s1 + $0x10e0] ss:$16 sps:$4 sm:$0xff]   ;;  %v9679_v13 = vld [vmem:[%s14222_s1 + $0x1204] ss:$16 sps:$4 sm:$0xff]  }
  0xe4   : > { %6943 = vmatprep.subr.bf16.mxu1 %v9576_v21  ;;  %v9635_v21 = vld [vmem:[%s14222_s1 + $0x12e0] ss:$16 sps:$4 sm:$0xff]  }
  0xe6   : > { %6903 = vmatpush1.bf16.msra.mxu0 %v9571_v22  ;;  %v9640_v22 = vld [vmem:[%s14222_s1 + $0x10c4] ss:$16 sps:$4 sm:$0xff]  }
  0xe7   : > { %6944 = vmatpush1.bf16.msra.mxu1 %v9574_v23  ;;  %6904 = vmatprep.subr.bf16.mxu0 %v9579_v24  ;;  %v9643_v23 = vld [vmem:[%s14222_s1 + $0x12c4] ss:$16 sps:$4 sm:$0xff]   ;;  %v11737_v24 = vcombine.high %v11718_v18, %v11718_v18 }
  0xe8   : > { %6945 = vmatprep.subr.bf16.mxu1 %v9582_v25  ;;  %v11741_v25 = vcombine.high %v11721_v19, %v11721_v19 }
  0xea   : > { %6905 = vmatpush1.bf16.msra.mxu0 %v9577_v26 }
  0xeb   : > { %6946 = vmatpush1.bf16.msra.mxu1 %v9580_v27  ;;  %6906 = vmatprep.subr.bf16.mxu0 %v9585_v28  ;;  %v9638_v28 = vld [vmem:[%s14222_s1 + $0x10c0] ss:$16 sps:$4 sm:$0xff]  }
  0xec   : > { %6947 = vmatprep.subr.bf16.mxu1 %v9588_v29 }
  0xee   : > { %6907 = vmatpush2.bf16.msra.mxu0 %v9583_v30  ;;  %v9641_v30 = vld [vmem:[%s14222_s1 + $0x12c0] ss:$16 sps:$4 sm:$0xff]  }
  0xef   : > { %6948 = vmatpush2.bf16.msra.mxu1 %v9586_v32  ;;  %6908 = vmatprep.subr.bf16.mxu0 %v9591_v33  ;;  %v9646_v32 = vld [vmem:[%s14222_s1 + $0x10a4] ss:$16 sps:$4 sm:$0xff]  }
  0xf0   : > { %6949 = vmatprep.subr.bf16.mxu1 %v9594_v36 }
  0xf2   : > { %6909 = vmatpush2.bf16.msra.mxu0 %v9589_v37  ;;  %v9649_v37 = vld [vmem:[%s14222_s1 + $0x12a4] ss:$16 sps:$4 sm:$0xff]  }
  0xf3   : > { %6950 = vmatpush2.bf16.msra.mxu1 %v9592_v38  ;;  %6910 = vmatprep.subr.bf16.mxu0 %v9597_v41  ;;  %v9644_v41 = vld [vmem:[%s14222_s1 + $0x10a0] ss:$16 sps:$4 sm:$0xff]  }
  0xf4   : > { %6951 = vmatprep.subr.bf16.mxu1 %v9600_v42 }
  0xf6   : > { %6911 = vmatpush2.bf16.msra.mxu0 %v9595_v46 }
  0xf7   : > { %6952 = vmatpush2.bf16.msra.mxu1 %v9598_v47  ;;  %6912 = vmatprep.subr.bf16.mxu0 %v9603_v50  ;;  %v9647_v47 = vld [vmem:[%s14222_s1 + $0x12a0] ss:$16 sps:$4 sm:$0xff]  }
  0xf8   : > { %6953 = vmatprep.subr.bf16.mxu1 %v9606_v51 }
  0xfa   : > { %6913 = vmatpush2.bf16.msra.mxu0 %v9601_v52  ;;  %v9652_v52 = vld [vmem:[%s14222_s1 + $0x1084] ss:$16 sps:$4 sm:$0xff]  }
  0xfb   : > { %6954 = vmatpush2.bf16.msra.mxu1 %v9604_v53  ;;  %6914 = vmatprep.subr.bf16.mxu0 %v9609_v57  ;;  %v9655_v53 = vld [vmem:[%s14222_s1 + $0x1284] ss:$16 sps:$4 sm:$0xff]   ;;  %v9650_v57 = vld [vmem:[%s14222_s1 + $0x1080] ss:$16 sps:$4 sm:$0xff]  }
  0xfc   : > { %6955 = vmatprep.subr.bf16.mxu1 %v9612_v58  ;;  %v9653_v58 = vld [vmem:[%s14222_s1 + $0x1280] ss:$16 sps:$4 sm:$0xff]  }
  0xfe   : > { %6915 = vmatpush2.bf16.msra.mxu0 %v9607_v61  ;;  %v9658_v61 = vld [vmem:[%s14222_s1 + $0x1064] ss:$16 sps:$4 sm:$0xff]  }
  0xff   : > { %6956 = vmatpush2.bf16.msra.mxu1 %v9610_v63  ;;  %6916 = vmatprep.subr.bf16.mxu0 %v9615_v2  ;;  %v9661_v63 = vld [vmem:[%s14222_s1 + $0x1264] ss:$16 sps:$4 sm:$0xff]   ;;  %v9656_v2 = vld [vmem:[%s14222_s1 + $0x1060] ss:$16 sps:$4 sm:$0xff]  }
 0x100   : > { %6957 = vmatprep.subr.bf16.mxu1 %v9618_v3  ;;  %v9659_v3 = vld [vmem:[%s14222_s1 + $0x1260] ss:$16 sps:$4 sm:$0xff]  }
 0x102   : > { %6917 = vmatpush2.bf16.msra.mxu0 %v9613_v4  ;;  %v9664_v4 = vld [vmem:[%s14222_s1 + $0x1044] ss:$16 sps:$4 sm:$0xff]  }
 0x103   : > { %6958 = vmatpush2.bf16.msra.mxu1 %v9616_v5  ;;  %6918 = vmatprep.subr.bf16.mxu0 %v9621_v6  ;;  %v9667_v5 = vld [vmem:[%s14222_s1 + $0x1244] ss:$16 sps:$4 sm:$0xff]   ;;  %v9662_v6 = vld [vmem:[%s14222_s1 + $0x1040] ss:$16 sps:$4 sm:$0xff]  }
 0x104   : > { %6959 = vmatprep.subr.bf16.mxu1 %v9624_v7  ;;  %v9665_v7 = vld [vmem:[%s14222_s1 + $0x1240] ss:$16 sps:$4 sm:$0xff]  }
 0x106   : > { %6919 = vmatpush2.bf16.msra.mxu0 %v9619_v8  ;;  %v9670_v8 = vld [vmem:[%s14222_s1 + $0x1024] ss:$16 sps:$4 sm:$0xff]  }
 0x107   : > { %6960 = vmatpush2.bf16.msra.mxu1 %v9622_v10  ;;  %6920 = vmatprep.subr.bf16.mxu0 %v9627_v11  ;;  %v9668_v10 = vld [vmem:[%s14222_s1 + $0x1020] ss:$16 sps:$4 sm:$0xff]  }
 0x108   : > { %6961 = vmatprep.subr.bf16.mxu1 %v9630_v12  ;;  %v9671_v11 = vld [vmem:[%s14222_s1 + $0x1220] ss:$16 sps:$4 sm:$0xff]   ;;  %v9676_v12 = vld [vmem:[%s14222_s1 + $0x1004] ss:$16 sps:$4 sm:$0xff]  }
 0x10a   : > { %6921 = vmatpush2.bf16.msra.mxu0 %v9625_v14  ;;  %v9674_v14 = vld [vmem:[%s14222_s1 + $0x1000] ss:$16 sps:$4 sm:$0xff]  }
 0x10b   : > { %6962 = vmatpush2.bf16.msra.mxu1 %v9628_v15  ;;  %6972 = vmatprep.subr.bf16.mxu0 %v9634_v16  ;;  %v9677_v15 = vld [vmem:[%s14222_s1 + $0x1200] ss:$16 sps:$4 sm:$0xff]   ;;  %v9682_v16 = vld [vmem:[%s14222_s1 + $0x11e4] ss:$16 sps:$4 sm:$0xff]  }
 0x10c   : > { %7013 = vmatprep.subr.bf16.mxu1 %v9637_v17  ;;  %v9685_v17 = vld [vmem:[%s14222_s1 + $0x13e4] ss:$16 sps:$4 sm:$0xff]  }
 0x10d   : > { %v6678_v26 = vpop.f32.mrf.mxu0  ;;  %6923 = vmatmul.mubr.bf16.vlgmr.msra.gmra.mxu0 %v11507_v55 }
 0x10e   : > { %v6719_v27 = vpop.f32.mrf.mxu1  ;;  %6964 = vmatmul.mubr.bf16.vlgmr.msra.gmra.mxu1 %v11510_v56  ;;  %6973 = vmatpush1.bf16.msra.mxu0 %v9632_v20  ;;  %v9680_v20 = vld [vmem:[%s14222_s1 + $0x11e0] ss:$16 sps:$4 sm:$0xff]  }
 0x10f   : > { %v11748_v29 = vadd.f32 %v6719_v27, %v6678_v26  ;;  %7014 = vmatpush1.bf16.msra.mxu1 %v9635_v21  ;;  %v6680_v33 = vpop.f32.mrf.mxu0  ;;  %6974 = vmatprep.subr.bf16.mxu0 %v9640_v22  ;;  %v9683_v21 = vld [vmem:[%s14222_s1 + $0x13e0] ss:$16 sps:$4 sm:$0xff]   ;;  %v9688_v22 = vld [vmem:[%s14222_s1 + $0x11c4] ss:$16 sps:$4 sm:$0xff]  }
 0x110   : > { %v6721_v36 = vpop.f32.mrf.mxu1  ;;  %7015 = vmatprep.subr.bf16.mxu1 %v9643_v23  ;;  %7004 = vmatprep.mubr.bf16.mxu0 %v11737_v24  ;;  %v9691_v23 = vld [vmem:[%s14222_s1 + $0x13c4] ss:$16 sps:$4 sm:$0xff]   ;;  %v9686_v26 = vld [vmem:[%s14222_s1 + $0x11c0] ss:$16 sps:$4 sm:$0xff]  }
 0x111   : > { %v11759_v38 = vadd.f32 %v6721_v36, %v6680_v33  ;;  %7045 = vmatprep.mubr.bf16.mxu1 %v11741_v25  ;;  %v6682_v42 = vpop.f32.mrf.mxu0  ;;  %v9689_v27 = vld [vmem:[%s14222_s1 + $0x13c0] ss:$16 sps:$4 sm:$0xff]   ;;  %v9700_v36 = vld [vmem:[%s14222_s1 + $0x1184] ss:$16 sps:$4 sm:$0xff]  }
 0x112   : > { %v6723_v46 = vpop.f32.mrf.mxu1  ;;  %6975 = vmatpush1.bf16.msra.mxu0 %v9638_v28  ;;  %v9694_v28 = vld [vmem:[%s14222_s1 + $0x11a4] ss:$16 sps:$4 sm:$0xff]   ;;  %v9695_v33 = vld [vmem:[%s14222_s1 + $0x13a0] ss:$16 sps:$4 sm:$0xff]  }
 0x113   : > { %7016 = vmatpush1.bf16.msra.mxu1 %v9641_v30  ;;  %v6683_v50 = vpop.f32.mrf.mxu0  ;;  %6976 = vmatprep.subr.bf16.mxu0 %v9646_v32  ;;  %v9697_v30 = vld [vmem:[%s14222_s1 + $0x13a4] ss:$16 sps:$4 sm:$0xff]   ;;  %v9692_v32 = vld [vmem:[%s14222_s1 + $0x11a0] ss:$16 sps:$4 sm:$0xff]  }
 0x114   : > { %v6724_v51 = vpop.f32.mrf.mxu1  ;;  %7017 = vmatprep.subr.bf16.mxu1 %v9649_v37  ;;  %v9703_v37 = vld [vmem:[%s14222_s1 + $0x1384] ss:$16 sps:$4 sm:$0xff]   ;;  %v9701_v42 = vld [vmem:[%s14222_s1 + $0x1380] ss:$16 sps:$4 sm:$0xff]  }
 0x115   : > { %v9706_v46 = vld [vmem:[%s14222_s1 + $0x1164] ss:$16 sps:$4 sm:$0xff]   ;;  %v9704_v50 = vld [vmem:[%s14222_s1 + $0x1160] ss:$16 sps:$4 sm:$0xff]  }
 0x116   : > { %6977 = vmatpush1.bf16.msra.mxu0 %v9644_v41  ;;  %v9698_v41 = vld [vmem:[%s14222_s1 + $0x1180] ss:$16 sps:$4 sm:$0xff]  }
 0x117   : > { %7018 = vmatpush1.bf16.msra.mxu1 %v9647_v47  ;;  %6978 = vmatprep.subr.bf16.mxu0 %v9652_v52  ;;  %v9709_v47 = vld [vmem:[%s14222_s1 + $0x1364] ss:$16 sps:$4 sm:$0xff]   ;;  %v9707_v51 = vld [vmem:[%s14222_s1 + $0x1360] ss:$16 sps:$4 sm:$0xff]  }
 0x118   : > { %7019 = vmatprep.subr.bf16.mxu1 %v9655_v53  ;;  %v9712_v52 = vld [vmem:[%s14222_s1 + $0x1144] ss:$16 sps:$4 sm:$0xff]  }
 0x119   : > { %v9715_v53 = vld [vmem:[%s14222_s1 + $0x1344] ss:$16 sps:$4 sm:$0xff]  }
 0x11a   : > { %6979 = vmatpush1.bf16.msra.mxu0 %v9650_v57  ;;  %v9710_v57 = vld [vmem:[%s14222_s1 + $0x1140] ss:$16 sps:$4 sm:$0xff]  }
 0x11b   : > { %7020 = vmatpush1.bf16.msra.mxu1 %v9653_v58  ;;  %6980 = vmatprep.subr.bf16.mxu0 %v9658_v61  ;;  %v9713_v58 = vld [vmem:[%s14222_s1 + $0x1340] ss:$16 sps:$4 sm:$0xff]   ;;  %v9718_v61 = vld [vmem:[%s14222_s1 + $0x1124] ss:$16 sps:$4 sm:$0xff]  }
 0x11c   : > { %7021 = vmatprep.subr.bf16.mxu1 %v9661_v63  ;;  %v9721_v63 = vld [vmem:[%s14222_s1 + $0x1324] ss:$16 sps:$4 sm:$0xff]  }
 0x11e   : > { %6981 = vmatpush1.bf16.msra.mxu0 %v9656_v2  ;;  %v321_v2 = vld [vmem:[%s10995_s11 + $0x28] sm:$0xff] }
 0x11f   : > { %7022 = vmatpush1.bf16.msra.mxu1 %v9659_v3  ;;  %6982 = vmatprep.subr.bf16.mxu0 %v9664_v4  ;;  %v9716_v3 = vld [vmem:[%s14222_s1 + $0x1120] ss:$16 sps:$4 sm:$0xff]  }
 0x120   : > { %7023 = vmatprep.subr.bf16.mxu1 %v9667_v5  ;;  %v9719_v4 = vld [vmem:[%s14222_s1 + $0x1320] ss:$16 sps:$4 sm:$0xff]   ;;  %v9724_v5 = vld [vmem:[%s14222_s1 + $0x1104] ss:$16 sps:$4 sm:$0xff]  }
 0x122   : > { %6983 = vmatpush1.bf16.msra.mxu0 %v9662_v6  ;;  %v9727_v6 = vld [vmem:[%s14222_s1 + $0x1304] ss:$16 sps:$4 sm:$0xff]  }
 0x123   : > { %7024 = vmatpush1.bf16.msra.mxu1 %v9665_v7  ;;  %6984 = vmatprep.subr.bf16.mxu0 %v9670_v8  ;;  %v1441_v7 = vcombine.high %v321_v2, %v321_v2  ;;  %v9722_v8 = vld [vmem:[%s14222_s1 + $0x1100] ss:$16 sps:$4 sm:$0xff]  }
 0x124   : > { %7025 = vmatprep.subr.bf16.mxu1 %v9673_v9  ;;  %v9725_v9 = vld [vmem:[%s14222_s1 + $0x1300] ss:$16 sps:$4 sm:$0xff]  }
 0x126   : > { %6985 = vmatpush1.bf16.msra.mxu0 %v9668_v10  ;;  %v9731_v10 = vld [vmem:[%s14222_s1 + $0x14e4] ss:$16 sps:$4 sm:$0xff]  }
 0x127   : > { %7026 = vmatpush1.bf16.msra.mxu1 %v9671_v11  ;;  %6986 = vmatprep.subr.bf16.mxu0 %v9676_v12  ;;  %v9734_v11 = vld [vmem:[%s14222_s1 + $0x16e4] ss:$16 sps:$4 sm:$0xff]   ;;  %v9729_v12 = vld [vmem:[%s14222_s1 + $0x14e0] ss:$16 sps:$4 sm:$0xff]  }
 0x128   : > { %7027 = vmatprep.subr.bf16.mxu1 %v9679_v13  ;;  %v9732_v13 = vld [vmem:[%s14222_s1 + $0x16e0] ss:$16 sps:$4 sm:$0xff]  }
 0x12a   : > { %6987 = vmatpush1.bf16.msra.mxu0 %v9674_v14  ;;  %v11939_v14 = vrot.slane %v321_v2, %v10998_v49  ;;  %v9753_v2 = vld [vmem:[%s14222_s1 + $0x1460] ss:$16 sps:$4 sm:$0xff]  }
 0x12b   : > { %7028 = vmatpush1.bf16.msra.mxu1 %v9677_v15  ;;  %6988 = vmatprep.subr.bf16.mxu0 %v9682_v16  ;;  %v11942_v15 = vrot.slane %v1441_v7, %v10998_v49  ;;  %v9737_v16 = vld [vmem:[%s14222_s1 + $0x14c4] ss:$16 sps:$4 sm:$0xff]   ;;  %v9762_v7 = vld [vmem:[%s14222_s1 + $0x1640] ss:$16 sps:$4 sm:$0xff]  }
 0x12c   : > { %7029 = vmatprep.subr.bf16.mxu1 %v9685_v17  ;;  %v9740_v17 = vld [vmem:[%s14222_s1 + $0x16c4] ss:$16 sps:$4 sm:$0xff]  }
 0x12e   : > { %6989 = vmatpush2.bf16.msra.mxu0 %v9680_v20  ;;  %v9735_v20 = vld [vmem:[%s14222_s1 + $0x14c0] ss:$16 sps:$4 sm:$0xff]  }
 0x12f   : > { %7030 = vmatpush2.bf16.msra.mxu1 %v9683_v21  ;;  %6990 = vmatprep.subr.bf16.mxu0 %v9688_v22  ;;  %v9738_v21 = vld [vmem:[%s14222_s1 + $0x16c0] ss:$16 sps:$4 sm:$0xff]   ;;  %v11958_v22 = vcombine.high %v11939_v14, %v11939_v14 }
 0x130   : > { %7031 = vmatprep.subr.bf16.mxu1 %v9691_v23  ;;  %v11962_v23 = vcombine.high %v11942_v15, %v11942_v15 }
 0x132   : > { %6991 = vmatpush2.bf16.msra.mxu0 %v9686_v26 }
 0x133   : > { %7032 = vmatpush2.bf16.msra.mxu1 %v9689_v27  ;;  %6992 = vmatprep.subr.bf16.mxu0 %v9694_v28 }
 0x134   : > { %7033 = vmatprep.subr.bf16.mxu1 %v9697_v30 }
 0x136   : > { %6993 = vmatpush2.bf16.msra.mxu0 %v9692_v32 }
 0x137   : > { %7034 = vmatpush2.bf16.msra.mxu1 %v9695_v33  ;;  %6994 = vmatprep.subr.bf16.mxu0 %v9700_v36  ;;  %v9743_v33 = vld [vmem:[%s14222_s1 + $0x14a4] ss:$16 sps:$4 sm:$0xff]  }
 0x138   : > { %7035 = vmatprep.subr.bf16.mxu1 %v9703_v37  ;;  %v9746_v36 = vld [vmem:[%s14222_s1 + $0x16a4] ss:$16 sps:$4 sm:$0xff]  }
 0x13a   : > { %6995 = vmatpush2.bf16.msra.mxu0 %v9698_v41 }
 0x13b   : > { %7036 = vmatpush2.bf16.msra.mxu1 %v9701_v42  ;;  %6996 = vmatprep.subr.bf16.mxu0 %v9706_v46  ;;  %v9744_v42 = vld [vmem:[%s14222_s1 + $0x16a0] ss:$16 sps:$4 sm:$0xff]  }
 0x13c   : > { %7037 = vmatprep.subr.bf16.mxu1 %v9709_v47 }
 0x13e   : > { %6997 = vmatpush2.bf16.msra.mxu0 %v9704_v50 }
 0x13f   : > { %7038 = vmatpush2.bf16.msra.mxu1 %v9707_v51  ;;  %6998 = vmatprep.subr.bf16.mxu0 %v9712_v52  ;;  %v9749_v52 = vld [vmem:[%s14222_s1 + $0x1484] ss:$16 sps:$4 sm:$0xff]  }
 0x140   : > { %7039 = vmatprep.subr.bf16.mxu1 %v9715_v53  ;;  %v9752_v53 = vld [vmem:[%s14222_s1 + $0x1684] ss:$16 sps:$4 sm:$0xff]  }
 0x142   : > { %6999 = vmatpush2.bf16.msra.mxu0 %v9710_v57  ;;  %v9747_v57 = vld [vmem:[%s14222_s1 + $0x1480] ss:$16 sps:$4 sm:$0xff]  }
 0x143   : > { %7040 = vmatpush2.bf16.msra.mxu1 %v9713_v58  ;;  %7000 = vmatprep.subr.bf16.mxu0 %v9718_v61  ;;  %v9750_v58 = vld [vmem:[%s14222_s1 + $0x1680] ss:$16 sps:$4 sm:$0xff]   ;;  %v9755_v61 = vld [vmem:[%s14222_s1 + $0x1464] ss:$16 sps:$4 sm:$0xff]  }
 0x144   : > { %7041 = vmatprep.subr.bf16.mxu1 %v9721_v63  ;;  %v9758_v63 = vld [vmem:[%s14222_s1 + $0x1664] ss:$16 sps:$4 sm:$0xff]  }
 0x146   : > { %7001 = vmatpush2.bf16.msra.mxu0 %v9716_v3  ;;  %v9756_v3 = vld [vmem:[%s14222_s1 + $0x1660] ss:$16 sps:$4 sm:$0xff]  }
 0x147   : > { %7042 = vmatpush2.bf16.msra.mxu1 %v9719_v4  ;;  %7002 = vmatprep.subr.bf16.mxu0 %v9724_v5  ;;  %v9761_v4 = vld [vmem:[%s14222_s1 + $0x1444] ss:$16 sps:$4 sm:$0xff]  }
 0x148   : > { %7043 = vmatprep.subr.bf16.mxu1 %v9727_v6  ;;  %v9764_v5 = vld [vmem:[%s14222_s1 + $0x1644] ss:$16 sps:$4 sm:$0xff]   ;;  %v9759_v6 = vld [vmem:[%s14222_s1 + $0x1440] ss:$16 sps:$4 sm:$0xff]  }
 0x14a   : > { %7003 = vmatpush2.bf16.msra.mxu0 %v9722_v8  ;;  %v9767_v8 = vld [vmem:[%s14222_s1 + $0x1424] ss:$16 sps:$4 sm:$0xff]  }
 0x14b   : > { %7044 = vmatpush2.bf16.msra.mxu1 %v9725_v9  ;;  %7054 = vmatprep.subr.bf16.mxu0 %v9731_v10  ;;  %v9770_v9 = vld [vmem:[%s14222_s1 + $0x1624] ss:$16 sps:$4 sm:$0xff]   ;;  %v9765_v10 = vld [vmem:[%s14222_s1 + $0x1420] ss:$16 sps:$4 sm:$0xff]  }
 0x14c   : > { %7095 = vmatprep.subr.bf16.mxu1 %v9734_v11  ;;  %v9768_v11 = vld [vmem:[%s14222_s1 + $0x1620] ss:$16 sps:$4 sm:$0xff]  }
 0x14d   : > { %v6760_v26 = vpop.f32.mrf.mxu0  ;;  %7005 = vmatmul.mubr.bf16.vlgmr.msra.gmra.mxu0 %v11718_v18 }
 0x14e   : > { %v6801_v27 = vpop.f32.mrf.mxu1  ;;  %7046 = vmatmul.mubr.bf16.vlgmr.msra.gmra.mxu1 %v11721_v19  ;;  %v6761_v28 = vadd.f32 %v6760_v26, %v11748_v29  ;;  %7055 = vmatpush1.bf16.msra.mxu0 %v9729_v12  ;;  %v9741_v29 = vld [vmem:[%s14222_s1 + $0x14a0] ss:$16 sps:$4 sm:$0xff]   ;;  %v9773_v12 = vld [vmem:[%s14222_s1 + $0x1404] ss:$16 sps:$4 sm:$0xff]  }
 0x14f   : > { %7096 = vmatpush1.bf16.msra.mxu1 %v9732_v13  ;;  %v6762_v30 = vpop.f32.mrf.mxu0  ;;  %7056 = vmatprep.subr.bf16.mxu0 %v9737_v16  ;;  %v9776_v13 = vld [vmem:[%s14222_s1 + $0x1604] ss:$16 sps:$4 sm:$0xff]   ;;  %v9771_v16 = vld [vmem:[%s14222_s1 + $0x1400] ss:$16 sps:$4 sm:$0xff]  }
 0x150   : > { %v6803_v32 = vpop.f32.mrf.mxu1  ;;  %7097 = vmatprep.subr.bf16.mxu1 %v9740_v17  ;;  %v11973_v37 = vadd.f32 %v6801_v27, %v6761_v28  ;;  %v6763_v41 = vadd.f32 %v6762_v30, %v11759_v38  ;;  %7086 = vmatprep.mubr.bf16.mxu0 %v11958_v22  ;;  %v9774_v17 = vld [vmem:[%s14222_s1 + $0x1600] ss:$16 sps:$4 sm:$0xff]   ;;  %v9785_v28 = vld [vmem:[%s14222_s1 + $0x15c4] ss:$16 sps:$4 sm:$0xff]  }
 0x151   : > { %7127 = vmatprep.mubr.bf16.mxu1 %v11962_v23  ;;  %v6764_v46 = vpop.f32.mrf.mxu0  ;;  %v9777_v26 = vld [vmem:[%s14222_s1 + $0x15e0] ss:$16 sps:$4 sm:$0xff]   ;;  %v9788_v30 = vld [vmem:[%s14222_s1 + $0x17c4] ss:$16 sps:$4 sm:$0xff]  }
 0x152   : > { %v6805_v47 = vpop.f32.mrf.mxu1  ;;  %v11984_v50 = vadd.f32 %v6803_v32, %v6763_v41  ;;  %7057 = vmatpush1.bf16.msra.mxu0 %v9735_v20  ;;  %v9779_v20 = vld [vmem:[%s14222_s1 + $0x15e4] ss:$16 sps:$4 sm:$0xff]   ;;  %v9780_v27 = vld [vmem:[%s14222_s1 + $0x17e0] ss:$16 sps:$4 sm:$0xff]  }
 0x153   : > { %7098 = vmatpush1.bf16.msra.mxu1 %v9738_v21  ;;  %v6765_v51 = vpop.f32.mrf.mxu0  ;;  %7058 = vmatprep.subr.bf16.mxu0 %v9743_v33  ;;  %v9782_v21 = vld [vmem:[%s14222_s1 + $0x17e4] ss:$16 sps:$4 sm:$0xff]   ;;  %v9783_v32 = vld [vmem:[%s14222_s1 + $0x15c0] ss:$16 sps:$4 sm:$0xff]  }
 0x154   : > { %v6806_v38 = vpop.f32.mrf.mxu1  ;;  %7099 = vmatprep.subr.bf16.mxu1 %v9746_v36  ;;  %v9786_v33 = vld [vmem:[%s14222_s1 + $0x17c0] ss:$16 sps:$4 sm:$0xff]   ;;  %v9791_v36 = vld [vmem:[%s14222_s1 + $0x15a4] ss:$16 sps:$4 sm:$0xff]  }
 0x155   : > { %v9794_v41 = vld [vmem:[%s14222_s1 + $0x17a4] ss:$16 sps:$4 sm:$0xff]   ;;  %v9795_v51 = vld [vmem:[%s14222_s1 + $0x1580] ss:$16 sps:$4 sm:$0xff]  }
 0x156   : > { %7059 = vmatpush1.bf16.msra.mxu0 %v9741_v29  ;;  %v9789_v29 = vld [vmem:[%s14222_s1 + $0x15a0] ss:$16 sps:$4 sm:$0xff]   ;;  %v9797_v46 = vld [vmem:[%s14222_s1 + $0x1584] ss:$16 sps:$4 sm:$0xff]  }
 0x157   : > { %7100 = vmatpush1.bf16.msra.mxu1 %v9744_v42  ;;  %7060 = vmatprep.subr.bf16.mxu0 %v9749_v52  ;;  %v9792_v42 = vld [vmem:[%s14222_s1 + $0x17a0] ss:$16 sps:$4 sm:$0xff]   ;;  %v9800_v47 = vld [vmem:[%s14222_s1 + $0x1784] ss:$16 sps:$4 sm:$0xff]  }
 0x158   : > { %7101 = vmatprep.subr.bf16.mxu1 %v9752_v53  ;;  %v9798_v38 = vld [vmem:[%s14222_s1 + $0x1780] ss:$16 sps:$4 sm:$0xff]   ;;  %v9803_v52 = vld [vmem:[%s14222_s1 + $0x1564] ss:$16 sps:$4 sm:$0xff]  }
 0x159   : > { %v9806_v53 = vld [vmem:[%s14222_s1 + $0x1764] ss:$16 sps:$4 sm:$0xff]  }
 0x15a   : > { %7061 = vmatpush1.bf16.msra.mxu0 %v9747_v57  ;;  %v9801_v57 = vld [vmem:[%s14222_s1 + $0x1560] ss:$16 sps:$4 sm:$0xff]  }
 0x15b   : > { %7102 = vmatpush1.bf16.msra.mxu1 %v9750_v58  ;;  %7062 = vmatprep.subr.bf16.mxu0 %v9755_v61  ;;  %v9804_v58 = vld [vmem:[%s14222_s1 + $0x1760] ss:$16 sps:$4 sm:$0xff]   ;;  %v9809_v61 = vld [vmem:[%s14222_s1 + $0x1544] ss:$16 sps:$4 sm:$0xff]  }
 0x15c   : > { %7103 = vmatprep.subr.bf16.mxu1 %v9758_v63  ;;  %v9812_v63 = vld [vmem:[%s14222_s1 + $0x1744] ss:$16 sps:$4 sm:$0xff]  }
 0x15e   : > { %7063 = vmatpush1.bf16.msra.mxu0 %v9753_v2  ;;  %v9807_v2 = vld [vmem:[%s14222_s1 + $0x1540] ss:$16 sps:$4 sm:$0xff]  }
 0x15f   : > { %7104 = vmatpush1.bf16.msra.mxu1 %v9756_v3  ;;  %7064 = vmatprep.subr.bf16.mxu0 %v9761_v4  ;;  %v9810_v3 = vld [vmem:[%s14222_s1 + $0x1740] ss:$16 sps:$4 sm:$0xff]   ;;  %v9815_v4 = vld [vmem:[%s14222_s1 + $0x1524] ss:$16 sps:$4 sm:$0xff]  }
 0x160   : > { %7105 = vmatprep.subr.bf16.mxu1 %v9764_v5  ;;  %v9818_v5 = vld [vmem:[%s14222_s1 + $0x1724] ss:$16 sps:$4 sm:$0xff]  }
 0x162   : > { %7065 = vmatpush1.bf16.msra.mxu0 %v9759_v6  ;;  %v322_v6 = vld [vmem:[%s10995_s11 + $0x30] sm:$0xff] }
 0x163   : > { %7106 = vmatpush1.bf16.msra.mxu1 %v9762_v7  ;;  %7066 = vmatprep.subr.bf16.mxu0 %v9767_v8  ;;  %v9813_v7 = vld [vmem:[%s14222_s1 + $0x1520] ss:$16 sps:$4 sm:$0xff]  }
 0x164   : > { %7107 = vmatprep.subr.bf16.mxu1 %v9770_v9  ;;  %v9816_v8 = vld [vmem:[%s14222_s1 + $0x1720] ss:$16 sps:$4 sm:$0xff]   ;;  %v9821_v9 = vld [vmem:[%s14222_s1 + $0x1504] ss:$16 sps:$4 sm:$0xff]  }
 0x166   : > { %7067 = vmatpush1.bf16.msra.mxu0 %v9765_v10  ;;  %v9824_v10 = vld [vmem:[%s14222_s1 + $0x1704] ss:$16 sps:$4 sm:$0xff]  }
 0x167   : > { %7108 = vmatpush1.bf16.msra.mxu1 %v9768_v11  ;;  %7068 = vmatprep.subr.bf16.mxu0 %v9773_v12  ;;  %v1458_v11 = vcombine.high %v322_v6, %v322_v6  ;;  %v9819_v12 = vld [vmem:[%s14222_s1 + $0x1500] ss:$16 sps:$4 sm:$0xff]  }
 0x168   : > { %7109 = vmatprep.subr.bf16.mxu1 %v9776_v13  ;;  %v9822_v13 = vld [vmem:[%s14222_s1 + $0x1700] ss:$16 sps:$4 sm:$0xff]  }
 0x16a   : > { %7069 = vmatpush1.bf16.msra.mxu0 %v9771_v16  ;;  %v9828_v16 = vld [vmem:[%s14222_s1 + $0x18e4] ss:$16 sps:$4 sm:$0xff]  }
 0x16b   : > { %7110 = vmatpush1.bf16.msra.mxu1 %v9774_v17  ;;  %7070 = vmatprep.subr.bf16.mxu0 %v9779_v20  ;;  %v9831_v17 = vld [vmem:[%s14222_s1 + $0x1ae4] ss:$16 sps:$4 sm:$0xff]   ;;  %v9826_v20 = vld [vmem:[%s14222_s1 + $0x18e0] ss:$16 sps:$4 sm:$0xff]  }
 0x16c   : > { %7111 = vmatprep.subr.bf16.mxu1 %v9782_v21  ;;  %v9829_v21 = vld [vmem:[%s14222_s1 + $0x1ae0] ss:$16 sps:$4 sm:$0xff]  }
 0x16e   : > { %7071 = vmatpush2.bf16.msra.mxu0 %v9777_v26  ;;  %v12156_v26 = vrot.slane %v322_v6, %v10998_v49  ;;  %v9844_v6 = vld [vmem:[%s14222_s1 + $0x1880] ss:$16 sps:$4 sm:$0xff]  }
 0x16f   : > { %7112 = vmatpush2.bf16.msra.mxu1 %v9780_v27  ;;  %7072 = vmatprep.subr.bf16.mxu0 %v9785_v28  ;;  %v12159_v27 = vrot.slane %v1458_v11, %v10998_v49  ;;  %v9834_v28 = vld [vmem:[%s14222_s1 + $0x18c4] ss:$16 sps:$4 sm:$0xff]   ;;  %v9853_v11 = vld [vmem:[%s14222_s1 + $0x1a60] ss:$16 sps:$4 sm:$0xff]  }
 0x170   : > { %7113 = vmatprep.subr.bf16.mxu1 %v9788_v30  ;;  %v9837_v30 = vld [vmem:[%s14222_s1 + $0x1ac4] ss:$16 sps:$4 sm:$0xff]  }
 0x172   : > { %7073 = vmatpush2.bf16.msra.mxu0 %v9783_v32  ;;  %v9832_v32 = vld [vmem:[%s14222_s1 + $0x18c0] ss:$16 sps:$4 sm:$0xff]  }
 0x173   : > { %7114 = vmatpush2.bf16.msra.mxu1 %v9786_v33  ;;  %7074 = vmatprep.subr.bf16.mxu0 %v9791_v36  ;;  %v9835_v33 = vld [vmem:[%s14222_s1 + $0x1ac0] ss:$16 sps:$4 sm:$0xff]   ;;  %v12175_v36 = vcombine.high %v12156_v26, %v12156_v26 }
 0x174   : > { %7115 = vmatprep.subr.bf16.mxu1 %v9794_v41  ;;  %v12179_v41 = vcombine.high %v12159_v27, %v12159_v27 }
 0x176   : > { %7075 = vmatpush2.bf16.msra.mxu0 %v9789_v29 }
 0x177   : > { %7116 = vmatpush2.bf16.msra.mxu1 %v9792_v42  ;;  %7076 = vmatprep.subr.bf16.mxu0 %v9797_v46 }
 0x178   : > { %7117 = vmatprep.subr.bf16.mxu1 %v9800_v47 }
 0x17a   : > { %7077 = vmatpush2.bf16.msra.mxu0 %v9795_v51 }
 0x17b   : > { %7118 = vmatpush2.bf16.msra.mxu1 %v9798_v38  ;;  %7078 = vmatprep.subr.bf16.mxu0 %v9803_v52  ;;  %v9840_v38 = vld [vmem:[%s14222_s1 + $0x18a4] ss:$16 sps:$4 sm:$0xff]  }
 0x17c   : > { %7119 = vmatprep.subr.bf16.mxu1 %v9806_v53  ;;  %v9843_v52 = vld [vmem:[%s14222_s1 + $0x1aa4] ss:$16 sps:$4 sm:$0xff]  }
 0x17e   : > { %7079 = vmatpush2.bf16.msra.mxu0 %v9801_v57 }
 0x17f   : > { %7120 = vmatpush2.bf16.msra.mxu1 %v9804_v58  ;;  %7080 = vmatprep.subr.bf16.mxu0 %v9809_v61  ;;  %v9841_v58 = vld [vmem:[%s14222_s1 + $0x1aa0] ss:$16 sps:$4 sm:$0xff]  }
 0x180   : > { %7121 = vmatprep.subr.bf16.mxu1 %v9812_v63 }
 0x182   : > { %7081 = vmatpush2.bf16.msra.mxu0 %v9807_v2 }
 0x183   : > { %7122 = vmatpush2.bf16.msra.mxu1 %v9810_v3  ;;  %7082 = vmatprep.subr.bf16.mxu0 %v9815_v4  ;;  %v9846_v4 = vld [vmem:[%s14222_s1 + $0x1884] ss:$16 sps:$4 sm:$0xff]  }
 0x184   : > { %7123 = vmatprep.subr.bf16.mxu1 %v9818_v5  ;;  %v9849_v5 = vld [vmem:[%s14222_s1 + $0x1a84] ss:$16 sps:$4 sm:$0xff]  }
 0x186   : > { %7083 = vmatpush2.bf16.msra.mxu0 %v9813_v7  ;;  %v9847_v7 = vld [vmem:[%s14222_s1 + $0x1a80] ss:$16 sps:$4 sm:$0xff]  }
 0x187   : > { %7124 = vmatpush2.bf16.msra.mxu1 %v9816_v8  ;;  %7084 = vmatprep.subr.bf16.mxu0 %v9821_v9  ;;  %v9852_v8 = vld [vmem:[%s14222_s1 + $0x1864] ss:$16 sps:$4 sm:$0xff]  }
 0x188   : > { %7125 = vmatprep.subr.bf16.mxu1 %v9824_v10  ;;  %v9855_v9 = vld [vmem:[%s14222_s1 + $0x1a64] ss:$16 sps:$4 sm:$0xff]   ;;  %v9850_v10 = vld [vmem:[%s14222_s1 + $0x1860] ss:$16 sps:$4 sm:$0xff]  }
 0x18a   : > { %7085 = vmatpush2.bf16.msra.mxu0 %v9819_v12  ;;  %v9858_v12 = vld [vmem:[%s14222_s1 + $0x1844] ss:$16 sps:$4 sm:$0xff]  }
 0x18b   : > { %7126 = vmatpush2.bf16.msra.mxu1 %v9822_v13  ;;  %7136 = vmatprep.subr.bf16.mxu0 %v9828_v16  ;;  %v9861_v13 = vld [vmem:[%s14222_s1 + $0x1a44] ss:$16 sps:$4 sm:$0xff]   ;;  %v9856_v16 = vld [vmem:[%s14222_s1 + $0x1840] ss:$16 sps:$4 sm:$0xff]  }
 0x18c   : > { %7177 = vmatprep.subr.bf16.mxu1 %v9831_v17  ;;  %v9859_v17 = vld [vmem:[%s14222_s1 + $0x1a40] ss:$16 sps:$4 sm:$0xff]  }
 0x18d   : > { %v6842_v29 = vpop.f32.mrf.mxu0  ;;  %7087 = vmatmul.mubr.bf16.vlgmr.msra.gmra.mxu0 %v11939_v14 }
 0x18e   : > { %v6883_v42 = vpop.f32.mrf.mxu1  ;;  %7128 = vmatmul.mubr.bf16.vlgmr.msra.gmra.mxu1 %v11942_v15  ;;  %v6843_v46 = vadd.f32 %v6842_v29, %v11973_v37  ;;  %7137 = vmatpush1.bf16.msra.mxu0 %v9826_v20  ;;  %v9838_v37 = vld [vmem:[%s14222_s1 + $0x18a0] ss:$16 sps:$4 sm:$0xff]   ;;  %v9864_v20 = vld [vmem:[%s14222_s1 + $0x1824] ss:$16 sps:$4 sm:$0xff]  }
 0x18f   : > { %7178 = vmatpush1.bf16.msra.mxu1 %v9829_v21  ;;  %v6844_v47 = vpop.f32.mrf.mxu0  ;;  %7138 = vmatprep.subr.bf16.mxu0 %v9834_v28  ;;  %v9867_v21 = vld [vmem:[%s14222_s1 + $0x1a24] ss:$16 sps:$4 sm:$0xff]   ;;  %v9862_v28 = vld [vmem:[%s14222_s1 + $0x1820] ss:$16 sps:$4 sm:$0xff]  }
 0x190   : > { %v6885_v51 = vpop.f32.mrf.mxu1  ;;  %7179 = vmatprep.subr.bf16.mxu1 %v9837_v30  ;;  %v12190_v53 = vadd.f32 %v6883_v42, %v6843_v46  ;;  %v6845_v57 = vadd.f32 %v6844_v47, %v11984_v50  ;;  %7168 = vmatprep.mubr.bf16.mxu0 %v12175_v36  ;;  %v9865_v30 = vld [vmem:[%s14222_s1 + $0x1a20] ss:$16 sps:$4 sm:$0xff]   ;;  %v9876_v46 = vld [vmem:[%s14222_s1 + $0x19e4] ss:$16 sps:$4 sm:$0xff]  }
 0x191   : > { %7209 = vmatprep.mubr.bf16.mxu1 %v12179_v41  ;;  %v6846_v61 = vpop.f32.mrf.mxu0  ;;  %v9868_v29 = vld [vmem:[%s14222_s1 + $0x1800] ss:$16 sps:$4 sm:$0xff]   ;;  %v9879_v47 = vld [vmem:[%s14222_s1 + $0x1be4] ss:$16 sps:$4 sm:$0xff]  }
 0x192   : > { %v6887_v63 = vpop.f32.mrf.mxu1  ;;  %v12201_v2 = vadd.f32 %v6885_v51, %v6845_v57  ;;  %7139 = vmatpush1.bf16.msra.mxu0 %v9832_v32  ;;  %v9870_v32 = vld [vmem:[%s14222_s1 + $0x1804] ss:$16 sps:$4 sm:$0xff]   ;;  %v9871_v42 = vld [vmem:[%s14222_s1 + $0x1a00] ss:$16 sps:$4 sm:$0xff]  }
 0x193   : > { %7180 = vmatpush1.bf16.msra.mxu1 %v9835_v33  ;;  %v6847_v3 = vpop.f32.mrf.mxu0  ;;  %7140 = vmatprep.subr.bf16.mxu0 %v9840_v38  ;;  %v9873_v33 = vld [vmem:[%s14222_s1 + $0x1a04] ss:$16 sps:$4 sm:$0xff]   ;;  %v9874_v51 = vld [vmem:[%s14222_s1 + $0x19e0] ss:$16 sps:$4 sm:$0xff]  }
 0x194   : > { %v6888_v50 = vpop.f32.mrf.mxu1  ;;  %7181 = vmatprep.subr.bf16.mxu1 %v9843_v52  ;;  %v9877_v38 = vld [vmem:[%s14222_s1 + $0x1be0] ss:$16 sps:$4 sm:$0xff]   ;;  %v9882_v52 = vld [vmem:[%s14222_s1 + $0x19c4] ss:$16 sps:$4 sm:$0xff]  }
 0x195   : > { %v9885_v57 = vld [vmem:[%s14222_s1 + $0x1bc4] ss:$16 sps:$4 sm:$0xff]   ;;  %v9886_v3 = vld [vmem:[%s14222_s1 + $0x19a0] ss:$16 sps:$4 sm:$0xff]  }
 0x196   : > { %7141 = vmatpush1.bf16.msra.mxu0 %v9838_v37  ;;  %v9880_v37 = vld [vmem:[%s14222_s1 + $0x19c0] ss:$16 sps:$4 sm:$0xff]   ;;  %v9888_v61 = vld [vmem:[%s14222_s1 + $0x19a4] ss:$16 sps:$4 sm:$0xff]  }
 0x197   : > { %7182 = vmatpush1.bf16.msra.mxu1 %v9841_v58  ;;  %7142 = vmatprep.subr.bf16.mxu0 %v9846_v4  ;;  %v9883_v58 = vld [vmem:[%s14222_s1 + $0x1bc0] ss:$16 sps:$4 sm:$0xff]   ;;  %v9891_v63 = vld [vmem:[%s14222_s1 + $0x1ba4] ss:$16 sps:$4 sm:$0xff]  }
 0x198   : > { %7183 = vmatprep.subr.bf16.mxu1 %v9849_v5  ;;  %v9889_v50 = vld [vmem:[%s14222_s1 + $0x1ba0] ss:$16 sps:$4 sm:$0xff]   ;;  %v9894_v4 = vld [vmem:[%s14222_s1 + $0x1984] ss:$16 sps:$4 sm:$0xff]  }
 0x199   : > { %v9897_v5 = vld [vmem:[%s14222_s1 + $0x1b84] ss:$16 sps:$4 sm:$0xff]  }
 0x19a   : > { %7143 = vmatpush1.bf16.msra.mxu0 %v9844_v6  ;;  %v9892_v6 = vld [vmem:[%s14222_s1 + $0x1980] ss:$16 sps:$4 sm:$0xff]  }
 0x19b   : > { %7184 = vmatpush1.bf16.msra.mxu1 %v9847_v7  ;;  %7144 = vmatprep.subr.bf16.mxu0 %v9852_v8  ;;  %v9895_v7 = vld [vmem:[%s14222_s1 + $0x1b80] ss:$16 sps:$4 sm:$0xff]   ;;  %v9900_v8 = vld [vmem:[%s14222_s1 + $0x1964] ss:$16 sps:$4 sm:$0xff]  }
 0x19c   : > { %7185 = vmatprep.subr.bf16.mxu1 %v9855_v9  ;;  %v9903_v9 = vld [vmem:[%s14222_s1 + $0x1b64] ss:$16 sps:$4 sm:$0xff]  }
 0x19e   : > { %7145 = vmatpush1.bf16.msra.mxu0 %v9850_v10  ;;  %v9898_v10 = vld [vmem:[%s14222_s1 + $0x1960] ss:$16 sps:$4 sm:$0xff]  }
 0x19f   : > { %7186 = vmatpush1.bf16.msra.mxu1 %v9853_v11  ;;  %7146 = vmatprep.subr.bf16.mxu0 %v9858_v12  ;;  %v9901_v11 = vld [vmem:[%s14222_s1 + $0x1b60] ss:$16 sps:$4 sm:$0xff]   ;;  %v9906_v12 = vld [vmem:[%s14222_s1 + $0x1944] ss:$16 sps:$4 sm:$0xff]  }
 0x1a0   : > { %7187 = vmatprep.subr.bf16.mxu1 %v9861_v13  ;;  %v9909_v13 = vld [vmem:[%s14222_s1 + $0x1b44] ss:$16 sps:$4 sm:$0xff]  }
 0x1a2   : > { %7147 = vmatpush1.bf16.msra.mxu0 %v9856_v16  ;;  %v9904_v16 = vld [vmem:[%s14222_s1 + $0x1940] ss:$16 sps:$4 sm:$0xff]  }
 0x1a3   : > { %7188 = vmatpush1.bf16.msra.mxu1 %v9859_v17  ;;  %7148 = vmatprep.subr.bf16.mxu0 %v9864_v20  ;;  %v9907_v17 = vld [vmem:[%s14222_s1 + $0x1b40] ss:$16 sps:$4 sm:$0xff]   ;;  %v9912_v20 = vld [vmem:[%s14222_s1 + $0x1924] ss:$16 sps:$4 sm:$0xff]  }
 0x1a4   : > { %7189 = vmatprep.subr.bf16.mxu1 %v9867_v21  ;;  %v9915_v21 = vld [vmem:[%s14222_s1 + $0x1b24] ss:$16 sps:$4 sm:$0xff]  }
 0x1a6   : > { %7149 = vmatpush1.bf16.msra.mxu0 %v9862_v28  ;;  %v323_v28 = vld [vmem:[%s10995_s11 + $0x38] sm:$0xff] }
 0x1a7   : > { %7190 = vmatpush1.bf16.msra.mxu1 %v9865_v30  ;;  %7150 = vmatprep.subr.bf16.mxu0 %v9870_v32  ;;  %v9910_v30 = vld [vmem:[%s14222_s1 + $0x1920] ss:$16 sps:$4 sm:$0xff]  }
 0x1a8   : > { %7191 = vmatprep.subr.bf16.mxu1 %v9873_v33  ;;  %v9913_v32 = vld [vmem:[%s14222_s1 + $0x1b20] ss:$16 sps:$4 sm:$0xff]   ;;  %v9918_v33 = vld [vmem:[%s14222_s1 + $0x1904] ss:$16 sps:$4 sm:$0xff]  }
 0x1aa   : > { %7151 = vmatpush1.bf16.msra.mxu0 %v9868_v29  ;;  %v9921_v29 = vld [vmem:[%s14222_s1 + $0x1b04] ss:$16 sps:$4 sm:$0xff]  }
 0x1ab   : > { %7192 = vmatpush1.bf16.msra.mxu1 %v9871_v42  ;;  %7152 = vmatprep.subr.bf16.mxu0 %v9876_v46  ;;  %v1475_v42 = vcombine.high %v323_v28, %v323_v28  ;;  %v9916_v46 = vld [vmem:[%s14222_s1 + $0x1900] ss:$16 sps:$4 sm:$0xff]  }
 0x1ac   : > { %7193 = vmatprep.subr.bf16.mxu1 %v9879_v47  ;;  %v9919_v47 = vld [vmem:[%s14222_s1 + $0x1b00] ss:$16 sps:$4 sm:$0xff]  }
 0x1ae   : > { %7153 = vmatpush2.bf16.msra.mxu0 %v9874_v51  ;;  %v9925_v51 = vld [vmem:[%s14222_s1 + $0x1ce4] ss:$16 sps:$4 sm:$0xff]  }
 0x1af   : > { %7194 = vmatpush2.bf16.msra.mxu1 %v9877_v38  ;;  %7154 = vmatprep.subr.bf16.mxu0 %v9882_v52  ;;  %v9928_v38 = vld [vmem:[%s14222_s1 + $0x1ee4] ss:$16 sps:$4 sm:$0xff]   ;;  %v9923_v52 = vld [vmem:[%s14222_s1 + $0x1ce0] ss:$16 sps:$4 sm:$0xff]  }
 0x1b0   : > { %7195 = vmatprep.subr.bf16.mxu1 %v9885_v57  ;;  %v9926_v57 = vld [vmem:[%s14222_s1 + $0x1ee0] ss:$16 sps:$4 sm:$0xff]  }
 0x1b2   : > { %7155 = vmatpush2.bf16.msra.mxu0 %v9880_v37  ;;  %v12373_v37 = vrot.slane %v323_v28, %v10998_v49 }
 0x1b3   : > { %7196 = vmatpush2.bf16.msra.mxu1 %v9883_v58  ;;  %7156 = vmatprep.subr.bf16.mxu0 %v9888_v61  ;;  %v12376_v58 = vrot.slane %v1475_v42, %v10998_v49  ;;  %v9931_v61 = vld [vmem:[%s14222_s1 + $0x1cc4] ss:$16 sps:$4 sm:$0xff]   ;;  %v9944_v42 = vld [vmem:[%s14222_s1 + $0x1e80] ss:$16 sps:$4 sm:$0xff]  }
 0x1b4   : > { %7197 = vmatprep.subr.bf16.mxu1 %v9891_v63  ;;  %v9934_v63 = vld [vmem:[%s14222_s1 + $0x1ec4] ss:$16 sps:$4 sm:$0xff]  }
 0x1b6   : > { %7157 = vmatpush2.bf16.msra.mxu0 %v9886_v3  ;;  %v9929_v3 = vld [vmem:[%s14222_s1 + $0x1cc0] ss:$16 sps:$4 sm:$0xff]  }
 0x1b7   : > { %7198 = vmatpush2.bf16.msra.mxu1 %v9889_v50  ;;  %7158 = vmatprep.subr.bf16.mxu0 %v9894_v4  ;;  %v9932_v50 = vld [vmem:[%s14222_s1 + $0x1ec0] ss:$16 sps:$4 sm:$0xff]   ;;  %v12392_v4 = vcombine.high %v12373_v37, %v12373_v37 }
 0x1b8   : > { %7199 = vmatprep.subr.bf16.mxu1 %v9897_v5  ;;  %v12396_v5 = vcombine.high %v12376_v58, %v12376_v58 }
 0x1ba   : > { %7159 = vmatpush2.bf16.msra.mxu0 %v9892_v6 }
 0x1bb   : > { %7200 = vmatpush2.bf16.msra.mxu1 %v9895_v7  ;;  %7160 = vmatprep.subr.bf16.mxu0 %v9900_v8 }
 0x1bc   : > { %7201 = vmatprep.subr.bf16.mxu1 %v9903_v9 }
 0x1be   : > { %7161 = vmatpush2.bf16.msra.mxu0 %v9898_v10 }
 0x1bf   : > { %7202 = vmatpush2.bf16.msra.mxu1 %v9901_v11  ;;  %7162 = vmatprep.subr.bf16.mxu0 %v9906_v12  ;;  %v9937_v11 = vld [vmem:[%s14222_s1 + $0x1ca4] ss:$16 sps:$4 sm:$0xff]  }
 0x1c0   : > { %7203 = vmatprep.subr.bf16.mxu1 %v9909_v13  ;;  %v9940_v12 = vld [vmem:[%s14222_s1 + $0x1ea4] ss:$16 sps:$4 sm:$0xff]  }
 0x1c2   : > { %7163 = vmatpush2.bf16.msra.mxu0 %v9904_v16 }
 0x1c3   : > { %7204 = vmatpush2.bf16.msra.mxu1 %v9907_v17  ;;  %7164 = vmatprep.subr.bf16.mxu0 %v9912_v20  ;;  %v9938_v17 = vld [vmem:[%s14222_s1 + $0x1ea0] ss:$16 sps:$4 sm:$0xff]  }
 0x1c4   : > { %7205 = vmatprep.subr.bf16.mxu1 %v9915_v21 }
 0x1c6   : > { %7165 = vmatpush2.bf16.msra.mxu0 %v9910_v30 }
 0x1c7   : > { %7206 = vmatpush2.bf16.msra.mxu1 %v9913_v32  ;;  %7166 = vmatprep.subr.bf16.mxu0 %v9918_v33  ;;  %v9943_v32 = vld [vmem:[%s14222_s1 + $0x1c84] ss:$16 sps:$4 sm:$0xff]  }
 0x1c8   : > { %7207 = vmatprep.subr.bf16.mxu1 %v9921_v29  ;;  %v9946_v33 = vld [vmem:[%s14222_s1 + $0x1e84] ss:$16 sps:$4 sm:$0xff]   ;;  %v9941_v29 = vld [vmem:[%s14222_s1 + $0x1c80] ss:$16 sps:$4 sm:$0xff]  }
 0x1ca   : > { %7167 = vmatpush2.bf16.msra.mxu0 %v9916_v46  ;;  %v9949_v46 = vld [vmem:[%s14222_s1 + $0x1c64] ss:$16 sps:$4 sm:$0xff]  }
 0x1cb   : > { %7208 = vmatpush2.bf16.msra.mxu1 %v9919_v47  ;;  %7218 = vmatprep.subr.bf16.mxu0 %v9925_v51  ;;  %v9952_v47 = vld [vmem:[%s14222_s1 + $0x1e64] ss:$16 sps:$4 sm:$0xff]   ;;  %v9947_v51 = vld [vmem:[%s14222_s1 + $0x1c60] ss:$16 sps:$4 sm:$0xff]  }
 0x1cc   : > { %7259 = vmatprep.subr.bf16.mxu1 %v9928_v38  ;;  %v9950_v38 = vld [vmem:[%s14222_s1 + $0x1e60] ss:$16 sps:$4 sm:$0xff]  }
 0x1cd   : > { %v6924_v6 = vpop.f32.mrf.mxu0  ;;  %7169 = vmatmul.mubr.bf16.vlgmr.msra.gmra.mxu0 %v12156_v26 }
 0x1ce   : > { %v6965_v7 = vpop.f32.mrf.mxu1  ;;  %7210 = vmatmul.mubr.bf16.vlgmr.msra.gmra.mxu1 %v12159_v27  ;;  %v6925_v8 = vadd.f32 %v6924_v6, %v12190_v53  ;;  %7219 = vmatpush1.bf16.msra.mxu0 %v9923_v52  ;;  %v9935_v53 = vld [vmem:[%s14222_s1 + $0x1ca0] ss:$16 sps:$4 sm:$0xff]   ;;  %v9955_v52 = vld [vmem:[%s14222_s1 + $0x1c44] ss:$16 sps:$4 sm:$0xff]  }
 0x1cf   : > { %7260 = vmatpush1.bf16.msra.mxu1 %v9926_v57  ;;  %v6926_v9 = vpop.f32.mrf.mxu0  ;;  %7220 = vmatprep.subr.bf16.mxu0 %v9931_v61  ;;  %v9958_v57 = vld [vmem:[%s14222_s1 + $0x1e44] ss:$16 sps:$4 sm:$0xff]   ;;  %v9953_v61 = vld [vmem:[%s14222_s1 + $0x1c40] ss:$16 sps:$4 sm:$0xff]  }
 0x1d0   : > { %v6967_v10 = vpop.f32.mrf.mxu1  ;;  %7261 = vmatprep.subr.bf16.mxu1 %v9934_v63  ;;  %v12407_v13 = vadd.f32 %v6965_v7, %v6925_v8  ;;  %v6927_v16 = vadd.f32 %v6926_v9, %v12201_v2  ;;  %7250 = vmatprep.mubr.bf16.mxu0 %v12392_v4  ;;  %v9956_v63 = vld [vmem:[%s14222_s1 + $0x1e40] ss:$16 sps:$4 sm:$0xff]   ;;  %v9967_v8 = vld [vmem:[%s14222_s1 + $0x1c04] ss:$16 sps:$4 sm:$0xff]  }
 0x1d1   : > { %7291 = vmatprep.mubr.bf16.mxu1 %v12396_v5  ;;  %v6928_v20 = vpop.f32.mrf.mxu0  ;;  %v9959_v6 = vld [vmem:[%s14222_s1 + $0x1c20] ss:$16 sps:$4 sm:$0xff]   ;;  %v9970_v9 = vld [vmem:[%s14222_s1 + $0x1e04] ss:$16 sps:$4 sm:$0xff]  }
 0x1d2   : > { %v6969_v21 = vpop.f32.mrf.mxu1  ;;  %v12418_v28 = vadd.f32 %v6967_v10, %v6927_v16  ;;  %7221 = vmatpush1.bf16.msra.mxu0 %v9929_v3  ;;  %v9961_v3 = vld [vmem:[%s14222_s1 + $0x1c24] ss:$16 sps:$4 sm:$0xff]   ;;  %v9962_v7 = vld [vmem:[%s14222_s1 + $0x1e20] ss:$16 sps:$4 sm:$0xff]  }
 0x1d3   : > { %7262 = vmatpush1.bf16.msra.mxu1 %v9932_v50  ;;  %v6929_v30 = vpop.f32.mrf.mxu0  ;;  %7222 = vmatprep.subr.bf16.mxu0 %v9937_v11  ;;  %v9964_v50 = vld [vmem:[%s14222_s1 + $0x1e24] ss:$16 sps:$4 sm:$0xff]   ;;  %v9965_v10 = vld [vmem:[%s14222_s1 + $0x1c00] ss:$16 sps:$4 sm:$0xff]  }
 0x1d4   : > { %v6970_v2 = vpop.f32.mrf.mxu1  ;;  %7263 = vmatprep.subr.bf16.mxu1 %v9940_v12  ;;  %v9968_v11 = vld [vmem:[%s14222_s1 + $0x1e00] ss:$16 sps:$4 sm:$0xff]   ;;  %v9973_v12 = vld [vmem:[%s14222_s1 + $0x1de4] ss:$16 sps:$4 sm:$0xff]  }
 0x1d5   : > { %v9976_v16 = vld [vmem:[%s14222_s1 + $0x1fe4] ss:$16 sps:$4 sm:$0xff]   ;;  %v9977_v30 = vld [vmem:[%s14222_s1 + $0x1dc0] ss:$16 sps:$4 sm:$0xff]  }
 0x1d6   : > { %7223 = vmatpush1.bf16.msra.mxu0 %v9935_v53  ;;  %v9971_v53 = vld [vmem:[%s14222_s1 + $0x1de0] ss:$16 sps:$4 sm:$0xff]   ;;  %v9979_v20 = vld [vmem:[%s14222_s1 + $0x1dc4] ss:$16 sps:$4 sm:$0xff]  }
 0x1d7   : > { %7264 = vmatpush1.bf16.msra.mxu1 %v9938_v17  ;;  %7224 = vmatprep.subr.bf16.mxu0 %v9943_v32  ;;  %v9974_v17 = vld [vmem:[%s14222_s1 + $0x1fe0] ss:$16 sps:$4 sm:$0xff]   ;;  %v9982_v21 = vld [vmem:[%s14222_s1 + $0x1fc4] ss:$16 sps:$4 sm:$0xff]  }
 0x1d8   : > { %7265 = vmatprep.subr.bf16.mxu1 %v9946_v33  ;;  %v9980_v2 = vld [vmem:[%s14222_s1 + $0x1fc0] ss:$16 sps:$4 sm:$0xff]   ;;  %v9985_v32 = vld [vmem:[%s14222_s1 + $0x1da4] ss:$16 sps:$4 sm:$0xff]  }
 0x1d9   : > { %v9988_v33 = vld [vmem:[%s14222_s1 + $0x1fa4] ss:$16 sps:$4 sm:$0xff]  }
 0x1da   : > { %7225 = vmatpush1.bf16.msra.mxu0 %v9941_v29  ;;  %v9983_v29 = vld [vmem:[%s14222_s1 + $0x1da0] ss:$16 sps:$4 sm:$0xff]  }
 0x1db   : > { %7266 = vmatpush1.bf16.msra.mxu1 %v9944_v42  ;;  %7226 = vmatprep.subr.bf16.mxu0 %v9949_v46  ;;  %v9986_v42 = vld [vmem:[%s14222_s1 + $0x1fa0] ss:$16 sps:$4 sm:$0xff]   ;;  %v9991_v46 = vld [vmem:[%s14222_s1 + $0x1d84] ss:$16 sps:$4 sm:$0xff]  }
 0x1dc   : > { %7267 = vmatprep.subr.bf16.mxu1 %v9952_v47  ;;  %v9994_v47 = vld [vmem:[%s14222_s1 + $0x1f84] ss:$16 sps:$4 sm:$0xff]  }
 0x1de   : > { %7227 = vmatpush1.bf16.msra.mxu0 %v9947_v51  ;;  %v9989_v51 = vld [vmem:[%s14222_s1 + $0x1d80] ss:$16 sps:$4 sm:$0xff]  }
 0x1df   : > { %7268 = vmatpush1.bf16.msra.mxu1 %v9950_v38  ;;  %7228 = vmatprep.subr.bf16.mxu0 %v9955_v52  ;;  %v9992_v38 = vld [vmem:[%s14222_s1 + $0x1f80] ss:$16 sps:$4 sm:$0xff]   ;;  %v9997_v52 = vld [vmem:[%s14222_s1 + $0x1d64] ss:$16 sps:$4 sm:$0xff]  }
 0x1e0   : > { %7269 = vmatprep.subr.bf16.mxu1 %v9958_v57  ;;  %v10000_v57 = vld [vmem:[%s14222_s1 + $0x1f64] ss:$16 sps:$4 sm:$0xff]  }
 0x1e2   : > { %7229 = vmatpush1.bf16.msra.mxu0 %v9953_v61  ;;  %v9995_v61 = vld [vmem:[%s14222_s1 + $0x1d60] ss:$16 sps:$4 sm:$0xff]  }
 0x1e3   : > { %7270 = vmatpush1.bf16.msra.mxu1 %v9956_v63  ;;  %7230 = vmatprep.subr.bf16.mxu0 %v9961_v3  ;;  %v9998_v63 = vld [vmem:[%s14222_s1 + $0x1f60] ss:$16 sps:$4 sm:$0xff]   ;;  %v10003_v3 = vld [vmem:[%s14222_s1 + $0x1d44] ss:$16 sps:$4 sm:$0xff]  }
 0x1e4   : > { %7271 = vmatprep.subr.bf16.mxu1 %v9964_v50  ;;  %v10006_v50 = vld [vmem:[%s14222_s1 + $0x1f44] ss:$16 sps:$4 sm:$0xff]  }
 0x1e6   : > { %7231 = vmatpush1.bf16.msra.mxu0 %v9959_v6  ;;  %v10001_v6 = vld [vmem:[%s14222_s1 + $0x1d40] ss:$16 sps:$4 sm:$0xff]  }
 0x1e7   : > { %7272 = vmatpush1.bf16.msra.mxu1 %v9962_v7  ;;  %7232 = vmatprep.subr.bf16.mxu0 %v9967_v8  ;;  %v10004_v7 = vld [vmem:[%s14222_s1 + $0x1f40] ss:$16 sps:$4 sm:$0xff]   ;;  %v10009_v8 = vld [vmem:[%s14222_s1 + $0x1d24] ss:$16 sps:$4 sm:$0xff]  }
 0x1e8   : > { %7273 = vmatprep.subr.bf16.mxu1 %v9970_v9  ;;  %v10012_v9 = vld [vmem:[%s14222_s1 + $0x1f24] ss:$16 sps:$4 sm:$0xff]  }
 0x1ea   : > { %7233 = vmatpush1.bf16.msra.mxu0 %v9965_v10  ;;  %v10007_v10 = vld [vmem:[%s14222_s1 + $0x1d20] ss:$16 sps:$4 sm:$0xff]  }
 0x1eb   : > { %7274 = vmatpush1.bf16.msra.mxu1 %v9968_v11  ;;  %7234 = vmatprep.subr.bf16.mxu0 %v9973_v12  ;;  %v10010_v11 = vld [vmem:[%s14222_s1 + $0x1f20] ss:$16 sps:$4 sm:$0xff]   ;;  %v10015_v12 = vld [vmem:[%s14222_s1 + $0x1d04] ss:$16 sps:$4 sm:$0xff]  }
 0x1ec   : > { %7275 = vmatprep.subr.bf16.mxu1 %v9976_v16  ;;  %v10018_v16 = vld [vmem:[%s14222_s1 + $0x1f04] ss:$16 sps:$4 sm:$0xff]  }
 0x1ee   : > { %7235 = vmatpush2.bf16.msra.mxu0 %v9971_v53  ;;  %v10013_v53 = vld [vmem:[%s14222_s1 + $0x1d00] ss:$16 sps:$4 sm:$0xff]  }
 0x1ef   : > { %7276 = vmatpush2.bf16.msra.mxu1 %v9974_v17  ;;  %7236 = vmatprep.subr.bf16.mxu0 %v9979_v20  ;;  %v10016_v17 = vld [vmem:[%s14222_s1 + $0x1f00] ss:$16 sps:$4 sm:$0xff]   ;;  %v10022_v20 = vld [vmem:[%s14222_s1 + $0xec] ss:$16 sps:$4 sm:$0xff]  }
 0x1f0   : > { %7277 = vmatprep.subr.bf16.mxu1 %v9982_v21  ;;  %v10025_v21 = vld [vmem:[%s14222_s1 + $0x2ec] ss:$16 sps:$4 sm:$0xff]  }
 0x1f2   : > { %7237 = vmatpush2.bf16.msra.mxu0 %v9977_v30  ;;  %v10020_v30 = vld [vmem:[%s14222_s1 + $0xe8] ss:$16 sps:$4 sm:$0xff]  }
 0x1f3   : > { %7278 = vmatpush2.bf16.msra.mxu1 %v9980_v2  ;;  %7238 = vmatprep.subr.bf16.mxu0 %v9985_v32  ;;  %v10023_v2 = vld [vmem:[%s14222_s1 + $0x2e8] ss:$16 sps:$4 sm:$0xff]   ;;  %v10028_v32 = vld [vmem:[%s14222_s1 + $0xcc] ss:$16 sps:$4 sm:$0xff]  }
 0x1f4   : > { %7279 = vmatprep.subr.bf16.mxu1 %v9988_v33  ;;  %v10031_v33 = vld [vmem:[%s14222_s1 + $0x2cc] ss:$16 sps:$4 sm:$0xff]  }
 0x1f6   : > { %7239 = vmatpush2.bf16.msra.mxu0 %v9983_v29  ;;  %v10026_v29 = vld [vmem:[%s14222_s1 + $0xc8] ss:$16 sps:$4 sm:$0xff]  }
 0x1f7   : > { %7280 = vmatpush2.bf16.msra.mxu1 %v9986_v42  ;;  %7240 = vmatprep.subr.bf16.mxu0 %v9991_v46  ;;  %v10029_v42 = vld [vmem:[%s14222_s1 + $0x2c8] ss:$16 sps:$4 sm:$0xff]  }
 0x1f8   : > { %7281 = vmatprep.subr.bf16.mxu1 %v9994_v47 }
 0x1fa   : > { %7241 = vmatpush2.bf16.msra.mxu0 %v9989_v51 }
 0x1fb   : > { %7282 = vmatpush2.bf16.msra.mxu1 %v9992_v38  ;;  %7242 = vmatprep.subr.bf16.mxu0 %v9997_v52 }
 0x1fc   : > { %7283 = vmatprep.subr.bf16.mxu1 %v10000_v57  ;;  %v10034_v57 = vld [vmem:[%s14222_s1 + $0xac] ss:$16 sps:$4 sm:$0xff]  }
 0x1fe   : > { %7243 = vmatpush2.bf16.msra.mxu0 %v9995_v61  ;;  %v10037_v61 = vld [vmem:[%s14222_s1 + $0x2ac] ss:$16 sps:$4 sm:$0xff]  }
 0x1ff   : > { %7284 = vmatpush2.bf16.msra.mxu1 %v9998_v63  ;;  %7244 = vmatprep.subr.bf16.mxu0 %v10003_v3 }
 0x200   : > { %7285 = vmatprep.subr.bf16.mxu1 %v10006_v50  ;;  %v10035_v50 = vld [vmem:[%s14222_s1 + $0x2a8] ss:$16 sps:$4 sm:$0xff]  }
 0x202   : > { %7245 = vmatpush2.bf16.msra.mxu0 %v10001_v6 }
 0x203   : > { %7286 = vmatpush2.bf16.msra.mxu1 %v10004_v7  ;;  %7246 = vmatprep.subr.bf16.mxu0 %v10009_v8 }
 0x204   : > { %7287 = vmatprep.subr.bf16.mxu1 %v10012_v9 }
 0x206   : > { %7247 = vmatpush2.bf16.msra.mxu0 %v10007_v10  ;;  %v10040_v10 = vld [vmem:[%s14222_s1 + $0x8c] ss:$16 sps:$4 sm:$0xff]  }
 0x207   : > { %7288 = vmatpush2.bf16.msra.mxu1 %v10010_v11  ;;  %7248 = vmatprep.subr.bf16.mxu0 %v10015_v12  ;;  %v10041_v11 = vld [vmem:[%s14222_s1 + $0x288] ss:$16 sps:$4 sm:$0xff]   ;;  %v10046_v12 = vld [vmem:[%s14222_s1 + $0x6c] ss:$16 sps:$4 sm:$0xff]  }
 0x208   : > { %7289 = vmatprep.subr.bf16.mxu1 %v10018_v16  ;;  %v10049_v16 = vld [vmem:[%s14222_s1 + $0x26c] ss:$16 sps:$4 sm:$0xff]  }
 0x20a   : > { %7249 = vmatpush2.bf16.msra.mxu0 %v10013_v53  ;;  %v10044_v53 = vld [vmem:[%s14222_s1 + $0x68] ss:$16 sps:$4 sm:$0xff]  }
 0x20b   : > { %7290 = vmatpush2.bf16.msra.mxu1 %v10016_v17  ;;  %7300 = vmatprep.subr.bf16.mxu0 %v10022_v20  ;;  %v10047_v17 = vld [vmem:[%s14222_s1 + $0x268] ss:$16 sps:$4 sm:$0xff]   ;;  %v10052_v20 = vld [vmem:[%s14222_s1 + $0x4c] ss:$16 sps:$4 sm:$0xff]  }
 0x20c   : > { %7341 = vmatprep.subr.bf16.mxu1 %v10025_v21  ;;  %v10055_v21 = vld [vmem:[%s14222_s1 + $0x24c] ss:$16 sps:$4 sm:$0xff]  }
 0x20d   : > { %v7006_v46 = vpop.f32.mrf.mxu0  ;;  %7251 = vmatmul.mubr.bf16.vlgmr.msra.gmra.mxu0 %v12373_v37 }
 0x20e   : > { %v7047_v47 = vpop.f32.mrf.mxu1  ;;  %7292 = vmatmul.mubr.bf16.vlgmr.msra.gmra.mxu1 %v12376_v58  ;;  %v7007_v51 = vadd.f32 %v7006_v46, %v12407_v13  ;;  %7301 = vmatpush1.bf16.msra.mxu0 %v10020_v30  ;;  %v10032_v13 = vld [vmem:[%s14222_s1 + $0xa8] ss:$16 sps:$4 sm:$0xff]   ;;  %v10064_v46 = vld [vmem:[%s14222_s1 + $0xc] ss:$16 sps:$4 sm:$0xff]  }
 0x20f   : > { %7342 = vmatpush1.bf16.msra.mxu1 %v10023_v2  ;;  %v7008_v38 = vpop.f32.mrf.mxu0  ;;  %7302 = vmatprep.subr.bf16.mxu0 %v10028_v32  ;;  %v10050_v30 = vld [vmem:[%s14222_s1 + $0x48] ss:$16 sps:$4 sm:$0xff]   ;;  %v10058_v32 = vld [vmem:[%s14222_s1 + $0x2c] ss:$16 sps:$4 sm:$0xff]  }
 0x210   : > { %v7049_v52 = vpop.f32.mrf.mxu1  ;;  %7343 = vmatprep.subr.bf16.mxu1 %v10031_v33  ;;  %v12609_v63 = vadd.f32 %v7047_v47, %v7007_v51  ;;  %v7009_v3 = vadd.f32 %v7008_v38, %v12418_v28  ;;  %7332 = vmatprep.mubr.bf16.mxu0 %v11024_v59  ;;  %v10043_v59 = vld [vmem:[%s14222_s1 + $0x28c] ss:$16 sps:$4 sm:$0xff]   ;;  %v10053_v2 = vld [vmem:[%s14222_s1 + $0x248] ss:$16 sps:$4 sm:$0xff]  }
 0x211   : > { %7373 = vmatprep.mubr.bf16.mxu1 %v11035_v62  ;;  %v7010_v6 = vpop.f32.mrf.mxu0  ;;  %v10038_v62 = vld [vmem:[%s14222_s1 + $0x88] ss:$16 sps:$4 sm:$0xff]   ;;  %v10061_v33 = vld [vmem:[%s14222_s1 + $0x22c] ss:$16 sps:$4 sm:$0xff]  }
 0x212   : > { %v7051_v7 = vpop.f32.mrf.mxu1  ;;  %v12620_v8 = vadd.f32 %v7049_v52, %v7009_v3  ;;  %7303 = vmatpush1.bf16.msra.mxu0 %v10026_v29  ;;  %v10056_v29 = vld [vmem:[%s14222_s1 + $0x28] ss:$16 sps:$4 sm:$0xff]   ;;  %v10067_v47 = vld [vmem:[%s14222_s1 + $0x20c] ss:$16 sps:$4 sm:$0xff]  }
 0x213   : > { %7344 = vmatpush1.bf16.msra.mxu1 %v10029_v42  ;;  %v7011_v9 = vpop.f32.mrf.mxu0  ;;  %7304 = vmatprep.subr.bf16.mxu0 %v10034_v57  ;;  %v10059_v42 = vld [vmem:[%s14222_s1 + $0x228] ss:$16 sps:$4 sm:$0xff]   ;;  %v10070_v52 = vld [vmem:[%s14222_s1 + $0x1ec] ss:$16 sps:$4 sm:$0xff]  }
 0x214   : > { %v7052_v28 = vpop.f32.mrf.mxu1  ;;  %7345 = vmatprep.subr.bf16.mxu1 %v10037_v61  ;;  %v10062_v51 = vld [vmem:[%s14222_s1 + $0x8] ss:$16 sps:$4 sm:$0xff]   ;;  %v10073_v57 = vld [vmem:[%s14222_s1 + $0x3ec] ss:$16 sps:$4 sm:$0xff]  }
 0x215   : > { %v10065_v38 = vld [vmem:[%s14222_s1 + $0x208] ss:$16 sps:$4 sm:$0xff]   ;;  %v10082_v9 = vld [vmem:[%s14222_s1 + $0x1ac] ss:$16 sps:$4 sm:$0xff]  }
 0x216   : > { %7305 = vmatpush1.bf16.msra.mxu0 %v10032_v13  ;;  %v10068_v61 = vld [vmem:[%s14222_s1 + $0x1e8] ss:$16 sps:$4 sm:$0xff]   ;;  %v10076_v13 = vld [vmem:[%s14222_s1 + $0x1cc] ss:$16 sps:$4 sm:$0xff]  }
 0x217   : > { %7346 = vmatpush1.bf16.msra.mxu1 %v10035_v50  ;;  %7306 = vmatprep.subr.bf16.mxu0 %v10040_v10  ;;  %v10071_v3 = vld [vmem:[%s14222_s1 + $0x3e8] ss:$16 sps:$4 sm:$0xff]   ;;  %v10079_v50 = vld [vmem:[%s14222_s1 + $0x3cc] ss:$16 sps:$4 sm:$0xff]  }
 0x218   : > { %7347 = vmatprep.subr.bf16.mxu1 %v10043_v59  ;;  %v10074_v6 = vld [vmem:[%s14222_s1 + $0x1c8] ss:$16 sps:$4 sm:$0xff]   ;;  %v10085_v28 = vld [vmem:[%s14222_s1 + $0x3ac] ss:$16 sps:$4 sm:$0xff]  }
 0x219   : > { %v10077_v7 = vld [vmem:[%s14222_s1 + $0x3c8] ss:$16 sps:$4 sm:$0xff]  }
 0x21a   : > { %7307 = vmatpush1.bf16.msra.mxu0 %v10038_v62  ;;  %v10080_v10 = vld [vmem:[%s14222_s1 + $0x1a8] ss:$16 sps:$4 sm:$0xff]   ;;  %v10088_v62 = vld [vmem:[%s14222_s1 + $0x18c] ss:$16 sps:$4 sm:$0xff]  }
 0x21b   : > { %7348 = vmatpush1.bf16.msra.mxu1 %v10041_v11  ;;  %7308 = vmatprep.subr.bf16.mxu0 %v10046_v12  ;;  %v10083_v59 = vld [vmem:[%s14222_s1 + $0x3a8] ss:$16 sps:$4 sm:$0xff]   ;;  %v10091_v11 = vld [vmem:[%s14222_s1 + $0x38c] ss:$16 sps:$4 sm:$0xff]  }
 0x21c   : > { %7349 = vmatprep.subr.bf16.mxu1 %v10049_v16  ;;  %v10086_v12 = vld [vmem:[%s14222_s1 + $0x188] ss:$16 sps:$4 sm:$0xff]  }
 0x21d   : > { %v10089_v16 = vld [vmem:[%s14222_s1 + $0x388] ss:$16 sps:$4 sm:$0xff]  }
 0x21e   : > { %7309 = vmatpush1.bf16.msra.mxu0 %v10044_v53  ;;  %v10094_v53 = vld [vmem:[%s14222_s1 + $0x16c] ss:$16 sps:$4 sm:$0xff]  }
 0x21f   : > { %7350 = vmatpush1.bf16.msra.mxu1 %v10047_v17  ;;  %7310 = vmatprep.subr.bf16.mxu0 %v10052_v20  ;;  %v10097_v17 = vld [vmem:[%s14222_s1 + $0x36c] ss:$16 sps:$4 sm:$0xff]   ;;  %v10092_v20 = vld [vmem:[%s14222_s1 + $0x168] ss:$16 sps:$4 sm:$0xff]  }
 0x220   : > { %7351 = vmatprep.subr.bf16.mxu1 %v10055_v21  ;;  %v10095_v21 = vld [vmem:[%s14222_s1 + $0x368] ss:$16 sps:$4 sm:$0xff]  }
 0x222   : > { %7311 = vmatpush1.bf16.msra.mxu0 %v10050_v30  ;;  %v10100_v30 = vld [vmem:[%s14222_s1 + $0x14c] ss:$16 sps:$4 sm:$0xff]  }
 0x223   : > { %7352 = vmatpush1.bf16.msra.mxu1 %v10053_v2  ;;  %7312 = vmatprep.subr.bf16.mxu0 %v10058_v32  ;;  %v10103_v2 = vld [vmem:[%s14222_s1 + $0x34c] ss:$16 sps:$4 sm:$0xff]   ;;  %v10098_v32 = vld [vmem:[%s14222_s1 + $0x148] ss:$16 sps:$4 sm:$0xff]  }
 0x224   : > { %7353 = vmatprep.subr.bf16.mxu1 %v10061_v33  ;;  %v10101_v33 = vld [vmem:[%s14222_s1 + $0x348] ss:$16 sps:$4 sm:$0xff]  }
 0x226   : > { %7313 = vmatpush1.bf16.msra.mxu0 %v10056_v29  ;;  %v10106_v29 = vld [vmem:[%s14222_s1 + $0x12c] ss:$16 sps:$4 sm:$0xff]  }
 0x227   : > { %7354 = vmatpush1.bf16.msra.mxu1 %v10059_v42  ;;  %7314 = vmatprep.subr.bf16.mxu0 %v10064_v46  ;;  %v10109_v42 = vld [vmem:[%s14222_s1 + $0x32c] ss:$16 sps:$4 sm:$0xff]   ;;  %v10104_v46 = vld [vmem:[%s14222_s1 + $0x128] ss:$16 sps:$4 sm:$0xff]  }
 0x228   : > { %7355 = vmatprep.subr.bf16.mxu1 %v10067_v47  ;;  %v10107_v47 = vld [vmem:[%s14222_s1 + $0x328] ss:$16 sps:$4 sm:$0xff]  }
 0x22a   : > { %7315 = vmatpush1.bf16.msra.mxu0 %v10062_v51  ;;  %v10112_v51 = vld [vmem:[%s14222_s1 + $0x10c] ss:$16 sps:$4 sm:$0xff]  }
 0x22b   : > { %7356 = vmatpush1.bf16.msra.mxu1 %v10065_v38  ;;  %7316 = vmatprep.subr.bf16.mxu0 %v10070_v52  ;;  %v10115_v38 = vld [vmem:[%s14222_s1 + $0x30c] ss:$16 sps:$4 sm:$0xff]   ;;  %v10110_v52 = vld [vmem:[%s14222_s1 + $0x108] ss:$16 sps:$4 sm:$0xff]  }
 0x22c   : > { %7357 = vmatprep.subr.bf16.mxu1 %v10073_v57  ;;  %v10113_v57 = vld [vmem:[%s14222_s1 + $0x308] ss:$16 sps:$4 sm:$0xff]  }
 0x22e   : > { %7317 = vmatpush2.bf16.msra.mxu0 %v10068_v61  ;;  %v10118_v61 = vld [vmem:[%s14222_s1 + $0x4ec] ss:$16 sps:$4 sm:$0xff]  }
 0x22f   : > { %7358 = vmatpush2.bf16.msra.mxu1 %v10071_v3  ;;  %7318 = vmatprep.subr.bf16.mxu0 %v10076_v13  ;;  %v10121_v3 = vld [vmem:[%s14222_s1 + $0x6ec] ss:$16 sps:$4 sm:$0xff]   ;;  %v10116_v13 = vld [vmem:[%s14222_s1 + $0x4e8] ss:$16 sps:$4 sm:$0xff]  }
 0x230   : > { %7359 = vmatprep.subr.bf16.mxu1 %v10079_v50  ;;  %v10119_v50 = vld [vmem:[%s14222_s1 + $0x6e8] ss:$16 sps:$4 sm:$0xff]  }
 0x232   : > { %7319 = vmatpush2.bf16.msra.mxu0 %v10074_v6  ;;  %v10124_v6 = vld [vmem:[%s14222_s1 + $0x4cc] ss:$16 sps:$4 sm:$0xff]  }
 0x233   : > { %7360 = vmatpush2.bf16.msra.mxu1 %v10077_v7  ;;  %7320 = vmatprep.subr.bf16.mxu0 %v10082_v9  ;;  %v10127_v7 = vld [vmem:[%s14222_s1 + $0x6cc] ss:$16 sps:$4 sm:$0xff]  }
 0x234   : > { %7361 = vmatprep.subr.bf16.mxu1 %v10085_v28 }
 0x236   : > { %7321 = vmatpush2.bf16.msra.mxu0 %v10080_v10 }
 0x237   : > { %7362 = vmatpush2.bf16.msra.mxu1 %v10083_v59  ;;  %7322 = vmatprep.subr.bf16.mxu0 %v10088_v62  ;;  %v10122_v59 = vld [vmem:[%s14222_s1 + $0x4c8] ss:$16 sps:$4 sm:$0xff]  }
 0x238   : > { %7363 = vmatprep.subr.bf16.mxu1 %v10091_v11  ;;  %v10125_v62 = vld [vmem:[%s14222_s1 + $0x6c8] ss:$16 sps:$4 sm:$0xff]  }
 0x23a   : > { %7323 = vmatpush2.bf16.msra.mxu0 %v10086_v12 }
 0x23b   : > { %7364 = vmatpush2.bf16.msra.mxu1 %v10089_v16  ;;  %7324 = vmatprep.subr.bf16.mxu0 %v10094_v53 }
 0x23c   : > { %7365 = vmatprep.subr.bf16.mxu1 %v10097_v17 }
 0x23e   : > { %7325 = vmatpush2.bf16.msra.mxu0 %v10092_v20 }
 0x23f   : > { %7366 = vmatpush2.bf16.msra.mxu1 %v10095_v21  ;;  %7326 = vmatprep.subr.bf16.mxu0 %v10100_v30  ;;  %v10128_v21 = vld [vmem:[%s14222_s1 + $0x4a8] ss:$16 sps:$4 sm:$0xff]  }
 0x240   : > { %7367 = vmatprep.subr.bf16.mxu1 %v10103_v2  ;;  %v10131_v30 = vld [vmem:[%s14222_s1 + $0x6a8] ss:$16 sps:$4 sm:$0xff]  }
 0x242   : > { %7327 = vmatpush2.bf16.msra.mxu0 %v10098_v32  ;;  %v10134_v32 = vld [vmem:[%s14222_s1 + $0x488] ss:$16 sps:$4 sm:$0xff]  }
 0x243   : > { %7368 = vmatpush2.bf16.msra.mxu1 %v10101_v33  ;;  %7328 = vmatprep.subr.bf16.mxu0 %v10106_v29  ;;  %v10137_v33 = vld [vmem:[%s14222_s1 + $0x688] ss:$16 sps:$4 sm:$0xff]   ;;  %v10142_v29 = vld [vmem:[%s14222_s1 + $0x46c] ss:$16 sps:$4 sm:$0xff]  }
 0x244   : > { %7369 = vmatprep.subr.bf16.mxu1 %v10109_v42  ;;  %v10145_v42 = vld [vmem:[%s14222_s1 + $0x66c] ss:$16 sps:$4 sm:$0xff]  }
 0x246   : > { %7329 = vmatpush2.bf16.msra.mxu0 %v10104_v46  ;;  %v10140_v46 = vld [vmem:[%s14222_s1 + $0x468] ss:$16 sps:$4 sm:$0xff]  }
 0x247   : > { %7370 = vmatpush2.bf16.msra.mxu1 %v10107_v47  ;;  %7330 = vmatprep.subr.bf16.mxu0 %v10112_v51  ;;  %v10143_v47 = vld [vmem:[%s14222_s1 + $0x668] ss:$16 sps:$4 sm:$0xff]   ;;  %v10148_v51 = vld [vmem:[%s14222_s1 + $0x44c] ss:$16 sps:$4 sm:$0xff]  }
 0x248   : > { %7371 = vmatprep.subr.bf16.mxu1 %v10115_v38  ;;  %v10151_v38 = vld [vmem:[%s14222_s1 + $0x64c] ss:$16 sps:$4 sm:$0xff]  }
 0x24a   : > { %7331 = vmatpush2.bf16.msra.mxu0 %v10110_v52  ;;  %v10146_v52 = vld [vmem:[%s14222_s1 + $0x448] ss:$16 sps:$4 sm:$0xff]  }
 0x24b   : > { %7372 = vmatpush2.bf16.msra.mxu1 %v10113_v57  ;;  %7382 = vmatprep.subr.bf16.mxu0 %v10118_v61  ;;  %v10149_v57 = vld [vmem:[%s14222_s1 + $0x648] ss:$16 sps:$4 sm:$0xff]   ;;  %v10154_v61 = vld [vmem:[%s14222_s1 + $0x42c] ss:$16 sps:$4 sm:$0xff]  }
 0x24c   : > { %7423 = vmatprep.subr.bf16.mxu1 %v10121_v3  ;;  %v10157_v3 = vld [vmem:[%s14222_s1 + $0x62c] ss:$16 sps:$4 sm:$0xff]  }
 0x24d   : > { %v7088_v9 = vpop.f32.mrf.mxu0  ;;  %7333 = vmatmul.mubr.bf16.vlgmr.msra.gmra.mxu0 %v11011_v54  ;;  %v10130_v54 = vld [vmem:[%s14222_s1 + $0x4ac] ss:$16 sps:$4 sm:$0xff]  }
 0x24e   : > { %v7129_v28 = vpop.f32.mrf.mxu1  ;;  %7374 = vmatmul.mubr.bf16.vlgmr.msra.gmra.mxu1 %v11027_v60  ;;  %v7089_v10 = vadd.f32 %v7088_v9, %v12609_v63  ;;  %7383 = vmatpush1.bf16.msra.mxu0 %v10116_v13  ;;  %v10133_v60 = vld [vmem:[%s14222_s1 + $0x6ac] ss:$16 sps:$4 sm:$0xff]   ;;  %v10152_v13 = vld [vmem:[%s14222_s1 + $0x428] ss:$16 sps:$4 sm:$0xff]  }
 0x24f   : > { %7424 = vmatpush1.bf16.msra.mxu1 %v10119_v50  ;;  %v7090_v11 = vpop.f32.mrf.mxu0  ;;  %7384 = vmatprep.subr.bf16.mxu0 %v10124_v6  ;;  %v10155_v50 = vld [vmem:[%s14222_s1 + $0x628] ss:$16 sps:$4 sm:$0xff]   ;;  %v10160_v6 = vld [vmem:[%s14222_s1 + $0x40c] ss:$16 sps:$4 sm:$0xff]  }
 0x250   : > { %v7131_v12 = vpop.f32.mrf.mxu1  ;;  %7425 = vmatprep.subr.bf16.mxu1 %v10127_v7  ;;  %v12811_v63 = vadd.f32 %v7129_v28, %v7089_v10  ;;  %v7091_v16 = vadd.f32 %v7090_v11, %v12620_v8  ;;  %7414 = vmatprep.mubr.bf16.mxu0 %v11169_v44  ;;  %v10136_v44 = vld [vmem:[%s14222_s1 + $0x48c] ss:$16 sps:$4 sm:$0xff]   ;;  %v10158_v9 = vld [vmem:[%s14222_s1 + $0x408] ss:$16 sps:$4 sm:$0xff]  }
 0x251   : > { %7455 = vmatprep.mubr.bf16.mxu1 %v11183_v48  ;;  %v7092_v53 = vpop.f32.mrf.mxu0  ;;  %v10139_v48 = vld [vmem:[%s14222_s1 + $0x68c] ss:$16 sps:$4 sm:$0xff]   ;;  %v10161_v28 = vld [vmem:[%s14222_s1 + $0x608] ss:$16 sps:$4 sm:$0xff]  }
 0x252   : > { %v7133_v17 = vpop.f32.mrf.mxu1  ;;  %v12816_v20 = vadd.f32 %v7131_v12, %v7091_v16  ;;  %7385 = vmatpush1.bf16.msra.mxu0 %v10122_v59  ;;  %v10163_v7 = vld [vmem:[%s14222_s1 + $0x60c] ss:$16 sps:$4 sm:$0xff]   ;;  %v10167_v11 = vld [vmem:[%s14222_s1 + $0x7e8] ss:$16 sps:$4 sm:$0xff]  }
 0x253   : > { %7426 = vmatpush1.bf16.msra.mxu1 %v10125_v62  ;;  %v7093_v2 = vpop.f32.mrf.mxu0  ;;  %7386 = vmatprep.subr.bf16.mxu0 %v10130_v54  ;;  %v10166_v10 = vld [vmem:[%s14222_s1 + $0x5ec] ss:$16 sps:$4 sm:$0xff]   ;;  %v10164_v62 = vld [vmem:[%s14222_s1 + $0x5e8] ss:$16 sps:$4 sm:$0xff]  }
 0x254   : > { %v7134_v8 = vpop.f32.mrf.mxu1  ;;  %7427 = vmatprep.subr.bf16.mxu1 %v10133_v60  ;;  %v10169_v59 = vld [vmem:[%s14222_s1 + $0x7ec] ss:$16 sps:$4 sm:$0xff]   ;;  %v10170_v60 = vld [vmem:[%s14222_s1 + $0x5c8] ss:$16 sps:$4 sm:$0xff]  }
 0x255   : > { %v10172_v12 = vld [vmem:[%s14222_s1 + $0x5cc] ss:$16 sps:$4 sm:$0xff]   ;;  %v10173_v16 = vld [vmem:[%s14222_s1 + $0x7c8] ss:$16 sps:$4 sm:$0xff]  }
 0x256   : > { %7387 = vmatpush1.bf16.msra.mxu0 %v10128_v21  ;;  %v10175_v54 = vld [vmem:[%s14222_s1 + $0x7cc] ss:$16 sps:$4 sm:$0xff]   ;;  %v10176_v21 = vld [vmem:[%s14222_s1 + $0x5a8] ss:$16 sps:$4 sm:$0xff]  }
 0x257   : > { %7428 = vmatpush1.bf16.msra.mxu1 %v10131_v30  ;;  %7388 = vmatprep.subr.bf16.mxu0 %v10136_v44  ;;  %v10178_v53 = vld [vmem:[%s14222_s1 + $0x5ac] ss:$16 sps:$4 sm:$0xff]   ;;  %v10179_v30 = vld [vmem:[%s14222_s1 + $0x7a8] ss:$16 sps:$4 sm:$0xff]  }
 0x258   : > { %7429 = vmatprep.subr.bf16.mxu1 %v10139_v48  ;;  %v10181_v17 = vld [vmem:[%s14222_s1 + $0x7ac] ss:$16 sps:$4 sm:$0xff]   ;;  %v10182_v44 = vld [vmem:[%s14222_s1 + $0x588] ss:$16 sps:$4 sm:$0xff]  }
 0x259   : > { %v10184_v2 = vld [vmem:[%s14222_s1 + $0x58c] ss:$16 sps:$4 sm:$0xff]   ;;  %v10185_v48 = vld [vmem:[%s14222_s1 + $0x788] ss:$16 sps:$4 sm:$0xff]  }
 0x25a   : > { %7389 = vmatpush1.bf16.msra.mxu0 %v10134_v32  ;;  %v10187_v8 = vld [vmem:[%s14222_s1 + $0x78c] ss:$16 sps:$4 sm:$0xff]  }
 0x25b   : > { %7430 = vmatpush1.bf16.msra.mxu1 %v10137_v33  ;;  %7390 = vmatprep.subr.bf16.mxu0 %v10142_v29  ;;  %v10190_v32 = vld [vmem:[%s14222_s1 + $0x56c] ss:$16 sps:$4 sm:$0xff]   ;;  %v10188_v29 = vld [vmem:[%s14222_s1 + $0x568] ss:$16 sps:$4 sm:$0xff]  }
 0x25c   : > { %7431 = vmatprep.subr.bf16.mxu1 %v10145_v42  ;;  %v10193_v33 = vld [vmem:[%s14222_s1 + $0x76c] ss:$16 sps:$4 sm:$0xff]   ;;  %v10191_v42 = vld [vmem:[%s14222_s1 + $0x768] ss:$16 sps:$4 sm:$0xff]  }
 0x25e   : > { %7391 = vmatpush1.bf16.msra.mxu0 %v10140_v46  ;;  %v10196_v46 = vld [vmem:[%s14222_s1 + $0x54c] ss:$16 sps:$4 sm:$0xff]  }
 0x25f   : > { %7432 = vmatpush1.bf16.msra.mxu1 %v10143_v47  ;;  %7392 = vmatprep.subr.bf16.mxu0 %v10148_v51  ;;  %v10199_v47 = vld [vmem:[%s14222_s1 + $0x74c] ss:$16 sps:$4 sm:$0xff]   ;;  %v10194_v51 = vld [vmem:[%s14222_s1 + $0x548] ss:$16 sps:$4 sm:$0xff]  }
 0x260   : > { %7433 = vmatprep.subr.bf16.mxu1 %v10151_v38  ;;  %v10197_v38 = vld [vmem:[%s14222_s1 + $0x748] ss:$16 sps:$4 sm:$0xff]  }
 0x262   : > { %7393 = vmatpush1.bf16.msra.mxu0 %v10146_v52  ;;  %v10202_v52 = vld [vmem:[%s14222_s1 + $0x52c] ss:$16 sps:$4 sm:$0xff]  }
 0x263   : > { %7434 = vmatpush1.bf16.msra.mxu1 %v10149_v57  ;;  %7394 = vmatprep.subr.bf16.mxu0 %v10154_v61  ;;  %v10205_v57 = vld [vmem:[%s14222_s1 + $0x72c] ss:$16 sps:$4 sm:$0xff]   ;;  %v10200_v61 = vld [vmem:[%s14222_s1 + $0x528] ss:$16 sps:$4 sm:$0xff]  }
 0x264   : > { %7435 = vmatprep.subr.bf16.mxu1 %v10157_v3  ;;  %v10203_v3 = vld [vmem:[%s14222_s1 + $0x728] ss:$16 sps:$4 sm:$0xff]  }
 0x266   : > { %7395 = vmatpush1.bf16.msra.mxu0 %v10152_v13  ;;  %v10208_v13 = vld [vmem:[%s14222_s1 + $0x50c] ss:$16 sps:$4 sm:$0xff]  }
 0x267   : > { %7436 = vmatpush1.bf16.msra.mxu1 %v10155_v50  ;;  %7396 = vmatprep.subr.bf16.mxu0 %v10160_v6  ;;  %v10211_v50 = vld [vmem:[%s14222_s1 + $0x70c] ss:$16 sps:$4 sm:$0xff]   ;;  %v10206_v6 = vld [vmem:[%s14222_s1 + $0x508] ss:$16 sps:$4 sm:$0xff]  }
 0x268   : > { %7437 = vmatprep.subr.bf16.mxu1 %v10163_v7  ;;  %v10209_v7 = vld [vmem:[%s14222_s1 + $0x708] ss:$16 sps:$4 sm:$0xff]  }
 0x26a   : > { %7397 = vmatpush1.bf16.msra.mxu0 %v10158_v9  ;;  %v10214_v9 = vld [vmem:[%s14222_s1 + $0x8ec] ss:$16 sps:$4 sm:$0xff]  }
 0x26b   : > { %7438 = vmatpush1.bf16.msra.mxu1 %v10161_v28  ;;  %7398 = vmatprep.subr.bf16.mxu0 %v10166_v10  ;;  %v10217_v28 = vld [vmem:[%s14222_s1 + $0xaec] ss:$16 sps:$4 sm:$0xff]   ;;  %v10212_v10 = vld [vmem:[%s14222_s1 + $0x8e8] ss:$16 sps:$4 sm:$0xff]  }
 0x26c   : > { %7439 = vmatprep.subr.bf16.mxu1 %v10169_v59  ;;  %v10215_v59 = vld [vmem:[%s14222_s1 + $0xae8] ss:$16 sps:$4 sm:$0xff]  }
 0x26e   : > { %7399 = vmatpush2.bf16.msra.mxu0 %v10164_v62  ;;  %v10220_v62 = vld [vmem:[%s14222_s1 + $0x8cc] ss:$16 sps:$4 sm:$0xff]  }
 0x26f   : > { %7440 = vmatpush2.bf16.msra.mxu1 %v10167_v11  ;;  %7400 = vmatprep.subr.bf16.mxu0 %v10172_v12  ;;  %v10223_v11 = vld [vmem:[%s14222_s1 + $0xacc] ss:$16 sps:$4 sm:$0xff]  }
 0x270   : > { %7441 = vmatprep.subr.bf16.mxu1 %v10175_v54 }
 0x272   : > { %7401 = vmatpush2.bf16.msra.mxu0 %v10170_v60 }
 0x273   : > { %7442 = vmatpush2.bf16.msra.mxu1 %v10173_v16  ;;  %7402 = vmatprep.subr.bf16.mxu0 %v10178_v53  ;;  %v10218_v16 = vld [vmem:[%s14222_s1 + $0x8c8] ss:$16 sps:$4 sm:$0xff]  }
 0x274   : > { %7443 = vmatprep.subr.bf16.mxu1 %v10181_v17  ;;  %v10221_v53 = vld [vmem:[%s14222_s1 + $0xac8] ss:$16 sps:$4 sm:$0xff]  }
 0x276   : > { %7403 = vmatpush2.bf16.msra.mxu0 %v10176_v21 }
 0x277   : > { %7444 = vmatpush2.bf16.msra.mxu1 %v10179_v30  ;;  %7404 = vmatprep.subr.bf16.mxu0 %v10184_v2 }
 0x278   : > { %7445 = vmatprep.subr.bf16.mxu1 %v10187_v8 }
 0x27a   : > { %7405 = vmatpush2.bf16.msra.mxu0 %v10182_v44 }
 0x27b   : > { %7446 = vmatpush2.bf16.msra.mxu1 %v10185_v48  ;;  %7406 = vmatprep.subr.bf16.mxu0 %v10190_v32  ;;  %v10224_v48 = vld [vmem:[%s14222_s1 + $0x8a8] ss:$16 sps:$4 sm:$0xff]  }
 0x27c   : > { %7447 = vmatprep.subr.bf16.mxu1 %v10193_v33  ;;  %v10227_v32 = vld [vmem:[%s14222_s1 + $0xaa8] ss:$16 sps:$4 sm:$0xff]  }
 0x27e   : > { %7407 = vmatpush2.bf16.msra.mxu0 %v10188_v29  ;;  %v10230_v29 = vld [vmem:[%s14222_s1 + $0x888] ss:$16 sps:$4 sm:$0xff]  }
 0x27f   : > { %7448 = vmatpush2.bf16.msra.mxu1 %v10191_v42  ;;  %7408 = vmatprep.subr.bf16.mxu0 %v10196_v46  ;;  %v10233_v42 = vld [vmem:[%s14222_s1 + $0xa88] ss:$16 sps:$4 sm:$0xff]   ;;  %v10238_v46 = vld [vmem:[%s14222_s1 + $0x86c] ss:$16 sps:$4 sm:$0xff]  }
 0x280   : > { %7449 = vmatprep.subr.bf16.mxu1 %v10199_v47  ;;  %v10241_v47 = vld [vmem:[%s14222_s1 + $0xa6c] ss:$16 sps:$4 sm:$0xff]  }
 0x282   : > { %7409 = vmatpush2.bf16.msra.mxu0 %v10194_v51  ;;  %v10236_v51 = vld [vmem:[%s14222_s1 + $0x868] ss:$16 sps:$4 sm:$0xff]  }
 0x283   : > { %7450 = vmatpush2.bf16.msra.mxu1 %v10197_v38  ;;  %7410 = vmatprep.subr.bf16.mxu0 %v10202_v52  ;;  %v10239_v38 = vld [vmem:[%s14222_s1 + $0xa68] ss:$16 sps:$4 sm:$0xff]   ;;  %v10244_v52 = vld [vmem:[%s14222_s1 + $0x84c] ss:$16 sps:$4 sm:$0xff]  }
 0x284   : > { %7451 = vmatprep.subr.bf16.mxu1 %v10205_v57  ;;  %v10247_v57 = vld [vmem:[%s14222_s1 + $0xa4c] ss:$16 sps:$4 sm:$0xff]  }
 0x286   : > { %7411 = vmatpush2.bf16.msra.mxu0 %v10200_v61  ;;  %v10242_v61 = vld [vmem:[%s14222_s1 + $0x848] ss:$16 sps:$4 sm:$0xff]  }
 0x287   : > { %7452 = vmatpush2.bf16.msra.mxu1 %v10203_v3  ;;  %7412 = vmatprep.subr.bf16.mxu0 %v10208_v13  ;;  %v10245_v3 = vld [vmem:[%s14222_s1 + $0xa48] ss:$16 sps:$4 sm:$0xff]   ;;  %v10250_v13 = vld [vmem:[%s14222_s1 + $0x82c] ss:$16 sps:$4 sm:$0xff]  }
 0x288   : > { %7453 = vmatprep.subr.bf16.mxu1 %v10211_v50  ;;  %v10253_v50 = vld [vmem:[%s14222_s1 + $0xa2c] ss:$16 sps:$4 sm:$0xff]  }
 0x28a   : > { %7413 = vmatpush2.bf16.msra.mxu0 %v10206_v6  ;;  %v10248_v6 = vld [vmem:[%s14222_s1 + $0x828] ss:$16 sps:$4 sm:$0xff]  }
 0x28b   : > { %7454 = vmatpush2.bf16.msra.mxu1 %v10209_v7  ;;  %7464 = vmatprep.subr.bf16.mxu0 %v10214_v9  ;;  %v10251_v7 = vld [vmem:[%s14222_s1 + $0xa28] ss:$16 sps:$4 sm:$0xff]   ;;  %v10256_v9 = vld [vmem:[%s14222_s1 + $0x80c] ss:$16 sps:$4 sm:$0xff]  }
 0x28c   : > { %7505 = vmatprep.subr.bf16.mxu1 %v10217_v28  ;;  %v10259_v28 = vld [vmem:[%s14222_s1 + $0xa0c] ss:$16 sps:$4 sm:$0xff]  }
 0x28d   : > { %v7170_v12 = vpop.f32.mrf.mxu0  ;;  %7415 = vmatmul.mubr.bf16.vlgmr.msra.gmra.mxu0 %v11159_v39  ;;  %v10226_v39 = vld [vmem:[%s14222_s1 + $0x8ac] ss:$16 sps:$4 sm:$0xff]  }
 0x28e   : > { %v7211_v54 = vpop.f32.mrf.mxu1  ;;  %7456 = vmatmul.mubr.bf16.vlgmr.msra.gmra.mxu1 %v11172_v45  ;;  %v7171_v60 = vadd.f32 %v7170_v12, %v12811_v63  ;;  %7465 = vmatpush1.bf16.msra.mxu0 %v10212_v10  ;;  %v10229_v45 = vld [vmem:[%s14222_s1 + $0xaac] ss:$16 sps:$4 sm:$0xff]   ;;  %v10254_v10 = vld [vmem:[%s14222_s1 + $0x808] ss:$16 sps:$4 sm:$0xff]  }
 0x28f   : > { %7506 = vmatpush1.bf16.msra.mxu1 %v10215_v59  ;;  %v7172_v17 = vpop.f32.mrf.mxu0  ;;  %7466 = vmatprep.subr.bf16.mxu0 %v10220_v62  ;;  %v10257_v59 = vld [vmem:[%s14222_s1 + $0xa08] ss:$16 sps:$4 sm:$0xff]   ;;  %v10262_v62 = vld [vmem:[%s14222_s1 + $0x9ec] ss:$16 sps:$4 sm:$0xff]  }
 0x290   : > { %v7213_v21 = vpop.f32.mrf.mxu1  ;;  %7507 = vmatprep.subr.bf16.mxu1 %v10223_v11  ;;  %v13013_v63 = vadd.f32 %v7211_v54, %v7171_v60  ;;  %v7173_v30 = vadd.f32 %v7172_v17, %v12816_v20  ;;  %7496 = vmatprep.mubr.bf16.mxu0 %v11317_v34  ;;  %v10232_v34 = vld [vmem:[%s14222_s1 + $0x88c] ss:$16 sps:$4 sm:$0xff]   ;;  %v10260_v12 = vld [vmem:[%s14222_s1 + $0x9e8] ss:$16 sps:$4 sm:$0xff]  }
 0x291   : > { %7537 = vmatprep.mubr.bf16.mxu1 %v11333_v40  ;;  %v7174_v2 = vpop.f32.mrf.mxu0  ;;  %v10235_v40 = vld [vmem:[%s14222_s1 + $0xa8c] ss:$16 sps:$4 sm:$0xff]   ;;  %v10263_v54 = vld [vmem:[%s14222_s1 + $0xbe8] ss:$16 sps:$4 sm:$0xff]  }
 0x292   : > { %v7215_v8 = vpop.f32.mrf.mxu1  ;;  %v13018_v44 = vadd.f32 %v7213_v21, %v7173_v30  ;;  %7467 = vmatpush1.bf16.msra.mxu0 %v10218_v16  ;;  %v10265_v11 = vld [vmem:[%s14222_s1 + $0xbec] ss:$16 sps:$4 sm:$0xff]   ;;  %v10269_v17 = vld [vmem:[%s14222_s1 + $0xbc8] ss:$16 sps:$4 sm:$0xff]  }
 0x293   : > { %7508 = vmatpush1.bf16.msra.mxu1 %v10221_v53  ;;  %v7175_v33 = vpop.f32.mrf.mxu0  ;;  %7468 = vmatprep.subr.bf16.mxu0 %v10226_v39  ;;  %v10268_v60 = vld [vmem:[%s14222_s1 + $0x9cc] ss:$16 sps:$4 sm:$0xff]   ;;  %v10266_v53 = vld [vmem:[%s14222_s1 + $0x9c8] ss:$16 sps:$4 sm:$0xff]  }
 0x294   : > { %v7216_v20 = vpop.f32.mrf.mxu1  ;;  %7509 = vmatprep.subr.bf16.mxu1 %v10229_v45  ;;  %v10271_v16 = vld [vmem:[%s14222_s1 + $0xbcc] ss:$16 sps:$4 sm:$0xff]   ;;  %v10272_v45 = vld [vmem:[%s14222_s1 + $0x9a8] ss:$16 sps:$4 sm:$0xff]  }
 0x295   : > { %v10274_v21 = vld [vmem:[%s14222_s1 + $0x9ac] ss:$16 sps:$4 sm:$0xff]   ;;  %v10275_v30 = vld [vmem:[%s14222_s1 + $0xba8] ss:$16 sps:$4 sm:$0xff]  }
 0x296   : > { %7469 = vmatpush1.bf16.msra.mxu0 %v10224_v48  ;;  %v10277_v39 = vld [vmem:[%s14222_s1 + $0xbac] ss:$16 sps:$4 sm:$0xff]   ;;  %v10278_v48 = vld [vmem:[%s14222_s1 + $0x988] ss:$16 sps:$4 sm:$0xff]  }
 0x297   : > { %7510 = vmatpush1.bf16.msra.mxu1 %v10227_v32  ;;  %7470 = vmatprep.subr.bf16.mxu0 %v10232_v34  ;;  %v10280_v2 = vld [vmem:[%s14222_s1 + $0x98c] ss:$16 sps:$4 sm:$0xff]   ;;  %v10281_v32 = vld [vmem:[%s14222_s1 + $0xb88] ss:$16 sps:$4 sm:$0xff]  }
 0x298   : > { %7511 = vmatprep.subr.bf16.mxu1 %v10235_v40  ;;  %v10283_v8 = vld [vmem:[%s14222_s1 + $0xb8c] ss:$16 sps:$4 sm:$0xff]   ;;  %v10284_v34 = vld [vmem:[%s14222_s1 + $0x968] ss:$16 sps:$4 sm:$0xff]  }
 0x299   : > { %v10286_v33 = vld [vmem:[%s14222_s1 + $0x96c] ss:$16 sps:$4 sm:$0xff]   ;;  %v10287_v40 = vld [vmem:[%s14222_s1 + $0xb68] ss:$16 sps:$4 sm:$0xff]  }
 0x29a   : > { %7471 = vmatpush1.bf16.msra.mxu0 %v10230_v29  ;;  %v10289_v20 = vld [vmem:[%s14222_s1 + $0xb6c] ss:$16 sps:$4 sm:$0xff]  }
 0x29b   : > { %7512 = vmatpush1.bf16.msra.mxu1 %v10233_v42  ;;  %7472 = vmatprep.subr.bf16.mxu0 %v10238_v46  ;;  %v10292_v29 = vld [vmem:[%s14222_s1 + $0x94c] ss:$16 sps:$4 sm:$0xff]   ;;  %v10290_v46 = vld [vmem:[%s14222_s1 + $0x948] ss:$16 sps:$4 sm:$0xff]  }
 0x29c   : > { %7513 = vmatprep.subr.bf16.mxu1 %v10241_v47  ;;  %v10295_v42 = vld [vmem:[%s14222_s1 + $0xb4c] ss:$16 sps:$4 sm:$0xff]   ;;  %v10293_v47 = vld [vmem:[%s14222_s1 + $0xb48] ss:$16 sps:$4 sm:$0xff]  }
 0x29e   : > { %7473 = vmatpush1.bf16.msra.mxu0 %v10236_v51  ;;  %v10298_v51 = vld [vmem:[%s14222_s1 + $0x92c] ss:$16 sps:$4 sm:$0xff]  }
 0x29f   : > { %7514 = vmatpush1.bf16.msra.mxu1 %v10239_v38  ;;  %7474 = vmatprep.subr.bf16.mxu0 %v10244_v52  ;;  %v10301_v38 = vld [vmem:[%s14222_s1 + $0xb2c] ss:$16 sps:$4 sm:$0xff]   ;;  %v10296_v52 = vld [vmem:[%s14222_s1 + $0x928] ss:$16 sps:$4 sm:$0xff]  }
 0x2a0   : > { %7515 = vmatprep.subr.bf16.mxu1 %v10247_v57  ;;  %v10299_v57 = vld [vmem:[%s14222_s1 + $0xb28] ss:$16 sps:$4 sm:$0xff]  }
 0x2a2   : > { %7475 = vmatpush1.bf16.msra.mxu0 %v10242_v61  ;;  %v10304_v61 = vld [vmem:[%s14222_s1 + $0x90c] ss:$16 sps:$4 sm:$0xff]  }
 0x2a3   : > { %7516 = vmatpush1.bf16.msra.mxu1 %v10245_v3  ;;  %7476 = vmatprep.subr.bf16.mxu0 %v10250_v13  ;;  %v10307_v3 = vld [vmem:[%s14222_s1 + $0xb0c] ss:$16 sps:$4 sm:$0xff]   ;;  %v10302_v13 = vld [vmem:[%s14222_s1 + $0x908] ss:$16 sps:$4 sm:$0xff]  }
 0x2a4   : > { %7517 = vmatprep.subr.bf16.mxu1 %v10253_v50  ;;  %v10305_v50 = vld [vmem:[%s14222_s1 + $0xb08] ss:$16 sps:$4 sm:$0xff]  }
 0x2a6   : > { %7477 = vmatpush1.bf16.msra.mxu0 %v10248_v6  ;;  %v10310_v6 = vld [vmem:[%s14222_s1 + $0xcec] ss:$16 sps:$4 sm:$0xff]  }
 0x2a7   : > { %7518 = vmatpush1.bf16.msra.mxu1 %v10251_v7  ;;  %7478 = vmatprep.subr.bf16.mxu0 %v10256_v9  ;;  %v10313_v7 = vld [vmem:[%s14222_s1 + $0xeec] ss:$16 sps:$4 sm:$0xff]   ;;  %v10308_v9 = vld [vmem:[%s14222_s1 + $0xce8] ss:$16 sps:$4 sm:$0xff]  }
 0x2a8   : > { %7519 = vmatprep.subr.bf16.mxu1 %v10259_v28  ;;  %v10311_v28 = vld [vmem:[%s14222_s1 + $0xee8] ss:$16 sps:$4 sm:$0xff]  }
 0x2aa   : > { %7479 = vmatpush1.bf16.msra.mxu0 %v10254_v10  ;;  %v10316_v10 = vld [vmem:[%s14222_s1 + $0xccc] ss:$16 sps:$4 sm:$0xff]  }
 0x2ab   : > { %7520 = vmatpush1.bf16.msra.mxu1 %v10257_v59  ;;  %7480 = vmatprep.subr.bf16.mxu0 %v10262_v62  ;;  %v10319_v59 = vld [vmem:[%s14222_s1 + $0xecc] ss:$16 sps:$4 sm:$0xff]  }
 0x2ac   : > { %7521 = vmatprep.subr.bf16.mxu1 %v10265_v11 }
 0x2ae   : > { %7481 = vmatpush2.bf16.msra.mxu0 %v10260_v12 }
 0x2af   : > { %7522 = vmatpush2.bf16.msra.mxu1 %v10263_v54  ;;  %7482 = vmatprep.subr.bf16.mxu0 %v10268_v60  ;;  %v10314_v54 = vld [vmem:[%s14222_s1 + $0xcc8] ss:$16 sps:$4 sm:$0xff]  }
 0x2b0   : > { %7523 = vmatprep.subr.bf16.mxu1 %v10271_v16  ;;  %v10317_v60 = vld [vmem:[%s14222_s1 + $0xec8] ss:$16 sps:$4 sm:$0xff]  }
 0x2b2   : > { %7483 = vmatpush2.bf16.msra.mxu0 %v10266_v53 }
 0x2b3   : > { %7524 = vmatpush2.bf16.msra.mxu1 %v10269_v17  ;;  %7484 = vmatprep.subr.bf16.mxu0 %v10274_v21 }
 0x2b4   : > { %7525 = vmatprep.subr.bf16.mxu1 %v10277_v39 }
 0x2b6   : > { %7485 = vmatpush2.bf16.msra.mxu0 %v10272_v45 }
 0x2b7   : > { %7526 = vmatpush2.bf16.msra.mxu1 %v10275_v30  ;;  %7486 = vmatprep.subr.bf16.mxu0 %v10280_v2  ;;  %v10320_v30 = vld [vmem:[%s14222_s1 + $0xca8] ss:$16 sps:$4 sm:$0xff]  }
 0x2b8   : > { %7527 = vmatprep.subr.bf16.mxu1 %v10283_v8  ;;  %v10323_v2 = vld [vmem:[%s14222_s1 + $0xea8] ss:$16 sps:$4 sm:$0xff]  }
 0x2ba   : > { %7487 = vmatpush2.bf16.msra.mxu0 %v10278_v48 }
 0x2bb   : > { %7528 = vmatpush2.bf16.msra.mxu1 %v10281_v32  ;;  %7488 = vmatprep.subr.bf16.mxu0 %v10286_v33  ;;  %v10326_v32 = vld [vmem:[%s14222_s1 + $0xc88] ss:$16 sps:$4 sm:$0xff]  }
 0x2bc   : > { %7529 = vmatprep.subr.bf16.mxu1 %v10289_v20  ;;  %v10329_v33 = vld [vmem:[%s14222_s1 + $0xe88] ss:$16 sps:$4 sm:$0xff]   ;;  %v10334_v20 = vld [vmem:[%s14222_s1 + $0xc6c] ss:$16 sps:$4 sm:$0xff]  }
 0x2be   : > { %7489 = vmatpush2.bf16.msra.mxu0 %v10284_v34  ;;  %v10337_v34 = vld [vmem:[%s14222_s1 + $0xe6c] ss:$16 sps:$4 sm:$0xff]  }
 0x2bf   : > { %7530 = vmatpush2.bf16.msra.mxu1 %v10287_v40  ;;  %7490 = vmatprep.subr.bf16.mxu0 %v10292_v29  ;;  %v10332_v40 = vld [vmem:[%s14222_s1 + $0xc68] ss:$16 sps:$4 sm:$0xff]  }
 0x2c0   : > { %7531 = vmatprep.subr.bf16.mxu1 %v10295_v42  ;;  %v10335_v29 = vld [vmem:[%s14222_s1 + $0xe68] ss:$16 sps:$4 sm:$0xff]   ;;  %v10340_v42 = vld [vmem:[%s14222_s1 + $0xc4c] ss:$16 sps:$4 sm:$0xff]  }
 0x2c2   : > { %7491 = vmatpush2.bf16.msra.mxu0 %v10290_v46  ;;  %v10343_v46 = vld [vmem:[%s14222_s1 + $0xe4c] ss:$16 sps:$4 sm:$0xff]  }
 0x2c3   : > { %7532 = vmatpush2.bf16.msra.mxu1 %v10293_v47  ;;  %7492 = vmatprep.subr.bf16.mxu0 %v10298_v51  ;;  %v10338_v47 = vld [vmem:[%s14222_s1 + $0xc48] ss:$16 sps:$4 sm:$0xff]  }
 0x2c4   : > { %7533 = vmatprep.subr.bf16.mxu1 %v10301_v38  ;;  %v10341_v51 = vld [vmem:[%s14222_s1 + $0xe48] ss:$16 sps:$4 sm:$0xff]   ;;  %v10346_v38 = vld [vmem:[%s14222_s1 + $0xc2c] ss:$16 sps:$4 sm:$0xff]  }
 0x2c6   : > { %7493 = vmatpush2.bf16.msra.mxu0 %v10296_v52  ;;  %v10349_v52 = vld [vmem:[%s14222_s1 + $0xe2c] ss:$16 sps:$4 sm:$0xff]  }
 0x2c7   : > { %7534 = vmatpush2.bf16.msra.mxu1 %v10299_v57  ;;  %7494 = vmatprep.subr.bf16.mxu0 %v10304_v61  ;;  %v10344_v57 = vld [vmem:[%s14222_s1 + $0xc28] ss:$16 sps:$4 sm:$0xff]  }
 0x2c8   : > { %7535 = vmatprep.subr.bf16.mxu1 %v10307_v3  ;;  %v10347_v61 = vld [vmem:[%s14222_s1 + $0xe28] ss:$16 sps:$4 sm:$0xff]   ;;  %v10352_v3 = vld [vmem:[%s14222_s1 + $0xc0c] ss:$16 sps:$4 sm:$0xff]  }
 0x2ca   : > { %7495 = vmatpush2.bf16.msra.mxu0 %v10302_v13  ;;  %v10355_v13 = vld [vmem:[%s14222_s1 + $0xe0c] ss:$16 sps:$4 sm:$0xff]  }
 0x2cb   : > { %7536 = vmatpush2.bf16.msra.mxu1 %v10305_v50  ;;  %7546 = vmatprep.subr.bf16.mxu0 %v10310_v6  ;;  %v10350_v50 = vld [vmem:[%s14222_s1 + $0xc08] ss:$16 sps:$4 sm:$0xff]  }
 0x2cc   : > { %7587 = vmatprep.subr.bf16.mxu1 %v10313_v7  ;;  %v10353_v6 = vld [vmem:[%s14222_s1 + $0xe08] ss:$16 sps:$4 sm:$0xff]   ;;  %v10358_v7 = vld [vmem:[%s14222_s1 + $0xdec] ss:$16 sps:$4 sm:$0xff]  }
 0x2cd   : > { %v7252_v62 = vpop.f32.mrf.mxu0  ;;  %7497 = vmatmul.mubr.bf16.vlgmr.msra.gmra.mxu0 %v11308_v31  ;;  %v10322_v31 = vld [vmem:[%s14222_s1 + $0xcac] ss:$16 sps:$4 sm:$0xff]  }
 0x2ce   : > { %v7293_v11 = vpop.f32.mrf.mxu1  ;;  %7538 = vmatmul.mubr.bf16.vlgmr.msra.gmra.mxu1 %v11320_v35  ;;  %v7253_v12 = vadd.f32 %v7252_v62, %v13013_v63  ;;  %7547 = vmatpush1.bf16.msra.mxu0 %v10308_v9  ;;  %v10325_v35 = vld [vmem:[%s14222_s1 + $0xeac] ss:$16 sps:$4 sm:$0xff]  }
 0x2cf   : > { %7588 = vmatpush1.bf16.msra.mxu1 %v10311_v28  ;;  %v7254_v16 = vpop.f32.mrf.mxu0  ;;  %7548 = vmatprep.subr.bf16.mxu0 %v10316_v10  ;;  %v10361_v9 = vld [vmem:[%s14222_s1 + $0xfec] ss:$16 sps:$4 sm:$0xff]   ;;  %v10356_v28 = vld [vmem:[%s14222_s1 + $0xde8] ss:$16 sps:$4 sm:$0xff]  }
 0x2d0   : > { %v7295_v53 = vpop.f32.mrf.mxu1  ;;  %7589 = vmatprep.subr.bf16.mxu1 %v10319_v59  ;;  %v13215_v63 = vadd.f32 %v7293_v11, %v7253_v12  ;;  %v7255_v17 = vadd.f32 %v7254_v16, %v13018_v44  ;;  %7578 = vmatprep.mubr.bf16.mxu0 %v11526_v0  ;;  %v10328_v0 = vld [vmem:[%s14222_s1 + $0xc8c] ss:$16 sps:$4 sm:$0xff]   ;;  %v10359_v10 = vld [vmem:[%s14222_s1 + $0xfe8] ss:$16 sps:$4 sm:$0xff]  }
 0x2d1   : > { %7619 = vmatprep.mubr.bf16.mxu1 %v11530_v1  ;;  %v7256_v21 = vpop.f32.mrf.mxu0  ;;  %v10331_v1 = vld [vmem:[%s14222_s1 + $0xe8c] ss:$16 sps:$4 sm:$0xff]   ;;  %v10362_v11 = vld [vmem:[%s14222_s1 + $0xdc8] ss:$16 sps:$4 sm:$0xff]  }
 0x2d2   : > { %v7297_v39 = vpop.f32.mrf.mxu1  ;;  %v13220_v45 = vadd.f32 %v7295_v53, %v7255_v17  ;;  %7549 = vmatpush1.bf16.msra.mxu0 %v10314_v54  ;;  %v10364_v59 = vld [vmem:[%s14222_s1 + $0xdcc] ss:$16 sps:$4 sm:$0xff]   ;;  %v10365_v12 = vld [vmem:[%s14222_s1 + $0xfc8] ss:$16 sps:$4 sm:$0xff]  }
 0x2d3   : > { %7590 = vmatpush1.bf16.msra.mxu1 %v10317_v60  ;;  %v7257_v8 = vpop.f32.mrf.mxu0  ;;  %7550 = vmatprep.subr.bf16.mxu0 %v10322_v31  ;;  %v10367_v62 = vld [vmem:[%s14222_s1 + $0xfcc] ss:$16 sps:$4 sm:$0xff]   ;;  %v10368_v16 = vld [vmem:[%s14222_s1 + $0xda8] ss:$16 sps:$4 sm:$0xff]  }
 0x2d4   : > { %v7298_v44 = vpop.f32.mrf.mxu1  ;;  %7591 = vmatprep.subr.bf16.mxu1 %v10325_v35  ;;  %v7960_v48 = vcombine.low %v13215_v63, %v13220_v45  ;;  %v10370_v54 = vld [vmem:[%s14222_s1 + $0xdac] ss:$16 sps:$4 sm:$0xff]   ;;  %v10371_v53 = vld [vmem:[%s14222_s1 + $0xfa8] ss:$16 sps:$4 sm:$0xff]  }
 0x2d5   : > { %v10373_v60 = vld [vmem:[%s14222_s1 + $0xfac] ss:$16 sps:$4 sm:$0xff]   ;;  %v10374_v17 = vld [vmem:[%s14222_s1 + $0xd88] ss:$16 sps:$4 sm:$0xff]  }
 0x2d6   : > { %7551 = vmatpush1.bf16.msra.mxu0 %v10320_v30  ;;  %v10376_v31 = vld [vmem:[%s14222_s1 + $0xd8c] ss:$16 sps:$4 sm:$0xff]   ;;  %v10377_v21 = vld [vmem:[%s14222_s1 + $0xf88] ss:$16 sps:$4 sm:$0xff]  }
 0x2d7   : > { %7592 = vmatpush1.bf16.msra.mxu1 %v10323_v2  ;;  %7552 = vmatprep.subr.bf16.mxu0 %v10328_v0  ;;  %v10379_v35 = vld [vmem:[%s14222_s1 + $0xf8c] ss:$16 sps:$4 sm:$0xff]   ;;  %v10380_v2 = vld [vmem:[%s14222_s1 + $0xd68] ss:$16 sps:$4 sm:$0xff]  }
 0x2d8   : > { %7593 = vmatprep.subr.bf16.mxu1 %v10331_v1  ;;  %v10382_v39 = vld [vmem:[%s14222_s1 + $0xd6c] ss:$16 sps:$4 sm:$0xff]   ;;  %v10383_v8 = vld [vmem:[%s14222_s1 + $0xf68] ss:$16 sps:$4 sm:$0xff]  }
 0x2d9   : > { %v10385_v30 = vld [vmem:[%s14222_s1 + $0xf6c] ss:$16 sps:$4 sm:$0xff]   ;;  %v10386_v1 = vld [vmem:[%s14222_s1 + $0xd48] ss:$16 sps:$4 sm:$0xff]  }
 0x2da   : > { %7553 = vmatpush1.bf16.msra.mxu0 %v10326_v32  ;;  %v10388_v44 = vld [vmem:[%s14222_s1 + $0xd4c] ss:$16 sps:$4 sm:$0xff]   ;;  %v10389_v32 = vld [vmem:[%s14222_s1 + $0xf48] ss:$16 sps:$4 sm:$0xff]  }
 0x2db   : > { %7594 = vmatpush1.bf16.msra.mxu1 %v10329_v33  ;;  %7554 = vmatprep.subr.bf16.mxu0 %v10334_v20  ;;  %v10391_v0 = vld [vmem:[%s14222_s1 + $0xf4c] ss:$16 sps:$4 sm:$0xff]  }
 0x2dc   : > { %7595 = vmatprep.subr.bf16.mxu1 %v10337_v34  ;;  %v10394_v33 = vld [vmem:[%s14222_s1 + $0xd2c] ss:$16 sps:$4 sm:$0xff]   ;;  %v10392_v34 = vld [vmem:[%s14222_s1 + $0xd28] ss:$16 sps:$4 sm:$0xff]  }
 0x2dd   : > { %v10397_v20 = vld [vmem:[%s14222_s1 + $0xf2c] ss:$16 sps:$4 sm:$0xff]  }
 0x2de   : > { %7555 = vmatpush1.bf16.msra.mxu0 %v10332_v40  ;;  %v10395_v40 = vld [vmem:[%s14222_s1 + $0xf28] ss:$16 sps:$4 sm:$0xff]  }
 0x2df   : > { %7596 = vmatpush1.bf16.msra.mxu1 %v10335_v29  ;;  %7556 = vmatprep.subr.bf16.mxu0 %v10340_v42  ;;  %v10400_v29 = vld [vmem:[%s14222_s1 + $0xd0c] ss:$16 sps:$4 sm:$0xff]  }
 0x2e0   : > { %7597 = vmatprep.subr.bf16.mxu1 %v10343_v46  ;;  %v10403_v42 = vld [vmem:[%s14222_s1 + $0xf0c] ss:$16 sps:$4 sm:$0xff]   ;;  %v10398_v46 = vld [vmem:[%s14222_s1 + $0xd08] ss:$16 sps:$4 sm:$0xff]  }
 0x2e2   : > { %7557 = vmatpush1.bf16.msra.mxu0 %v10338_v47  ;;  %v10401_v47 = vld [vmem:[%s14222_s1 + $0xf08] ss:$16 sps:$4 sm:$0xff]  }
 0x2e3   : > { %7598 = vmatpush1.bf16.msra.mxu1 %v10341_v51  ;;  %7558 = vmatprep.subr.bf16.mxu0 %v10346_v38  ;;  %v10406_v51 = vld [vmem:[%s14222_s1 + $0x10ec] ss:$16 sps:$4 sm:$0xff]  }
 0x2e4   : > { %7599 = vmatprep.subr.bf16.mxu1 %v10349_v52  ;;  %v10409_v38 = vld [vmem:[%s14222_s1 + $0x12ec] ss:$16 sps:$4 sm:$0xff]   ;;  %v10404_v52 = vld [vmem:[%s14222_s1 + $0x10e8] ss:$16 sps:$4 sm:$0xff]  }
 0x2e6   : > { %7559 = vmatpush1.bf16.msra.mxu0 %v10344_v57  ;;  %v10407_v57 = vld [vmem:[%s14222_s1 + $0x12e8] ss:$16 sps:$4 sm:$0xff]  }
 0x2e7   : > { %7600 = vmatpush1.bf16.msra.mxu1 %v10347_v61  ;;  %7560 = vmatprep.subr.bf16.mxu0 %v10352_v3  ;;  %v10412_v61 = vld [vmem:[%s14222_s1 + $0x10cc] ss:$16 sps:$4 sm:$0xff]  }
 0x2e8   : > { %7601 = vmatprep.subr.bf16.mxu1 %v10355_v13  ;;  %v10415_v3 = vld [vmem:[%s14222_s1 + $0x12cc] ss:$16 sps:$4 sm:$0xff]  }
 0x2ea   : > { %7561 = vmatpush1.bf16.msra.mxu0 %v10350_v50 }
 0x2eb   : > { %7602 = vmatpush1.bf16.msra.mxu1 %v10353_v6  ;;  %7562 = vmatprep.subr.bf16.mxu0 %v10358_v7  ;;  %v10410_v7 = vld [vmem:[%s14222_s1 + $0x10c8] ss:$16 sps:$4 sm:$0xff]  }
 0x2ec   : > { %7603 = vmatprep.subr.bf16.mxu1 %v10361_v9  ;;  %v10413_v9 = vld [vmem:[%s14222_s1 + $0x12c8] ss:$16 sps:$4 sm:$0xff]  }
 0x2ee   : > { %7563 = vmatpush2.bf16.msra.mxu0 %v10356_v28 }
 0x2ef   : > { %7604 = vmatpush2.bf16.msra.mxu1 %v10359_v10  ;;  %7564 = vmatprep.subr.bf16.mxu0 %v10364_v59 }
 0x2f0   : > { %7605 = vmatprep.subr.bf16.mxu1 %v10367_v62 }
 0x2f2   : > { %7565 = vmatpush2.bf16.msra.mxu0 %v10362_v11 }
 0x2f3   : > { %7606 = vmatpush2.bf16.msra.mxu1 %v10365_v12  ;;  %7566 = vmatprep.subr.bf16.mxu0 %v10370_v54  ;;  %v10416_v12 = vld [vmem:[%s14222_s1 + $0x10a8] ss:$16 sps:$4 sm:$0xff]  }
 0x2f4   : > { %7607 = vmatprep.subr.bf16.mxu1 %v10373_v60  ;;  %v10419_v54 = vld [vmem:[%s14222_s1 + $0x12a8] ss:$16 sps:$4 sm:$0xff]  }
 0x2f6   : > { %7567 = vmatpush2.bf16.msra.mxu0 %v10368_v16 }
 0x2f7   : > { %7608 = vmatpush2.bf16.msra.mxu1 %v10371_v53  ;;  %7568 = vmatprep.subr.bf16.mxu0 %v10376_v31  ;;  %v10422_v53 = vld [vmem:[%s14222_s1 + $0x1088] ss:$16 sps:$4 sm:$0xff]  }
 0x2f8   : > { %7609 = vmatprep.subr.bf16.mxu1 %v10379_v35  ;;  %v10425_v31 = vld [vmem:[%s14222_s1 + $0x1288] ss:$16 sps:$4 sm:$0xff]   ;;  %v10430_v35 = vld [vmem:[%s14222_s1 + $0x106c] ss:$16 sps:$4 sm:$0xff]  }
 0x2fa   : > { %7569 = vmatpush2.bf16.msra.mxu0 %v10374_v17  ;;  %v10433_v17 = vld [vmem:[%s14222_s1 + $0x126c] ss:$16 sps:$4 sm:$0xff]  }
 0x2fb   : > { %7610 = vmatpush2.bf16.msra.mxu1 %v10377_v21  ;;  %7570 = vmatprep.subr.bf16.mxu0 %v10382_v39  ;;  %v10428_v21 = vld [vmem:[%s14222_s1 + $0x1068] ss:$16 sps:$4 sm:$0xff]  }
 0x2fc   : > { %7611 = vmatprep.subr.bf16.mxu1 %v10385_v30  ;;  %v10431_v39 = vld [vmem:[%s14222_s1 + $0x1268] ss:$16 sps:$4 sm:$0xff]   ;;  %v10436_v30 = vld [vmem:[%s14222_s1 + $0x104c] ss:$16 sps:$4 sm:$0xff]  }
 0x2fe   : > { %7571 = vmatpush2.bf16.msra.mxu0 %v10380_v2  ;;  %v10439_v2 = vld [vmem:[%s14222_s1 + $0x124c] ss:$16 sps:$4 sm:$0xff]  }
 0x2ff   : > { %7612 = vmatpush2.bf16.msra.mxu1 %v10383_v8  ;;  %7572 = vmatprep.subr.bf16.mxu0 %v10388_v44  ;;  %v10434_v8 = vld [vmem:[%s14222_s1 + $0x1048] ss:$16 sps:$4 sm:$0xff]  }
 0x300   : > { %7613 = vmatprep.subr.bf16.mxu1 %v10391_v0  ;;  %v10437_v44 = vld [vmem:[%s14222_s1 + $0x1248] ss:$16 sps:$4 sm:$0xff]   ;;  %v10442_v0 = vld [vmem:[%s14222_s1 + $0x102c] ss:$16 sps:$4 sm:$0xff]  }
 0x302   : > { %7573 = vmatpush2.bf16.msra.mxu0 %v10386_v1  ;;  %v10445_v1 = vld [vmem:[%s14222_s1 + $0x122c] ss:$16 sps:$4 sm:$0xff]  }
 0x303   : > { %7614 = vmatpush2.bf16.msra.mxu1 %v10389_v32  ;;  %7574 = vmatprep.subr.bf16.mxu0 %v10394_v33  ;;  %v10440_v32 = vld [vmem:[%s14222_s1 + $0x1028] ss:$16 sps:$4 sm:$0xff]  }
 0x304   : > { %7615 = vmatprep.subr.bf16.mxu1 %v10397_v20  ;;  %v10443_v33 = vld [vmem:[%s14222_s1 + $0x1228] ss:$16 sps:$4 sm:$0xff]   ;;  %v10448_v20 = vld [vmem:[%s14222_s1 + $0x100c] ss:$16 sps:$4 sm:$0xff]  }
 0x306   : > { %7575 = vmatpush2.bf16.msra.mxu0 %v10392_v34  ;;  %v10451_v34 = vld [vmem:[%s14222_s1 + $0x120c] ss:$16 sps:$4 sm:$0xff]  }
 0x307   : > { %7616 = vmatpush2.bf16.msra.mxu1 %v10395_v40  ;;  %7576 = vmatprep.subr.bf16.mxu0 %v10400_v29  ;;  %v10446_v40 = vld [vmem:[%s14222_s1 + $0x1008] ss:$16 sps:$4 sm:$0xff]  }
 0x308   : > { %7617 = vmatprep.subr.bf16.mxu1 %v10403_v42  ;;  %v10449_v29 = vld [vmem:[%s14222_s1 + $0x1208] ss:$16 sps:$4 sm:$0xff]   ;;  %v10454_v42 = vld [vmem:[%s14222_s1 + $0x11ec] ss:$16 sps:$4 sm:$0xff]  }
 0x30a   : > { %7577 = vmatpush2.bf16.msra.mxu0 %v10398_v46  ;;  %v10457_v46 = vld [vmem:[%s14222_s1 + $0x13ec] ss:$16 sps:$4 sm:$0xff]  }
 0x30b   : > { %7618 = vmatpush2.bf16.msra.mxu1 %v10401_v47  ;;  %7628 = vmatprep.subr.bf16.mxu0 %v10406_v51  ;;  %v10452_v47 = vld [vmem:[%s14222_s1 + $0x11e8] ss:$16 sps:$4 sm:$0xff]  }
 0x30c   : > { %7669 = vmatprep.subr.bf16.mxu1 %v10409_v38  ;;  %v10455_v51 = vld [vmem:[%s14222_s1 + $0x13e8] ss:$16 sps:$4 sm:$0xff]   ;;  %v10460_v38 = vld [vmem:[%s14222_s1 + $0x11cc] ss:$16 sps:$4 sm:$0xff]  }
 0x30d   : > { %v7334_v13 = vpop.f32.mrf.mxu0  ;;  %7579 = vmatmul.mubr.bf16.vlgmr.msra.gmra.mxu0 %v11507_v55  ;;  %v10418_v55 = vld [vmem:[%s14222_s1 + $0x10ac] ss:$16 sps:$4 sm:$0xff]  }
 0x30e   : > { %v7375_v50 = vpop.f32.mrf.mxu1  ;;  %7620 = vmatmul.mubr.bf16.vlgmr.msra.gmra.mxu1 %v11510_v56  ;;  %7629 = vmatpush1.bf16.msra.mxu0 %v10404_v52  ;;  %v10421_v56 = vld [vmem:[%s14222_s1 + $0x12ac] ss:$16 sps:$4 sm:$0xff]  }
 0x30f   : > { %v13406_v6 = vadd.f32 %v7375_v50, %v7334_v13  ;;  %7670 = vmatpush1.bf16.msra.mxu1 %v10407_v57  ;;  %v7336_v28 = vpop.f32.mrf.mxu0  ;;  %7630 = vmatprep.subr.bf16.mxu0 %v10412_v61  ;;  %v10463_v52 = vld [vmem:[%s14222_s1 + $0x13cc] ss:$16 sps:$4 sm:$0xff]   ;;  %v10458_v57 = vld [vmem:[%s14222_s1 + $0x11c8] ss:$16 sps:$4 sm:$0xff]  }
 0x310   : > { %v7377_v10 = vpop.f32.mrf.mxu1  ;;  %7671 = vmatprep.subr.bf16.mxu1 %v10415_v3  ;;  %7660 = vmatprep.mubr.bf16.mxu0 %v11737_v24  ;;  %v10424_v24 = vld [vmem:[%s14222_s1 + $0x108c] ss:$16 sps:$4 sm:$0xff]   ;;  %v10461_v61 = vld [vmem:[%s14222_s1 + $0x13c8] ss:$16 sps:$4 sm:$0xff]  }
 0x311   : > { %v13420_v59 = vadd.f32 %v7377_v10, %v7336_v28  ;;  %7701 = vmatprep.mubr.bf16.mxu1 %v11741_v25  ;;  %v7338_v62 = vpop.f32.mrf.mxu0  ;;  %v10427_v25 = vld [vmem:[%s14222_s1 + $0x128c] ss:$16 sps:$4 sm:$0xff]   ;;  %v10464_v50 = vld [vmem:[%s14222_s1 + $0x11a8] ss:$16 sps:$4 sm:$0xff]  }
 0x312   : > { %v7379_v11 = vpop.f32.mrf.mxu1  ;;  %7631 = vmatpush1.bf16.msra.mxu0 %v10410_v7  ;;  %v10466_v3 = vld [vmem:[%s14222_s1 + $0x11ac] ss:$16 sps:$4 sm:$0xff]   ;;  %v10467_v7 = vld [vmem:[%s14222_s1 + $0x13a8] ss:$16 sps:$4 sm:$0xff]  }
 0x313   : > { %7672 = vmatpush1.bf16.msra.mxu1 %v10413_v9  ;;  %v7339_v60 = vpop.f32.mrf.mxu0  ;;  %7632 = vmatprep.subr.bf16.mxu0 %v10418_v55  ;;  %v10469_v13 = vld [vmem:[%s14222_s1 + $0x13ac] ss:$16 sps:$4 sm:$0xff]   ;;  %v10470_v10 = vld [vmem:[%s14222_s1 + $0x1188] ss:$16 sps:$4 sm:$0xff]  }
 0x314   : > { %v7380_v16 = vpop.f32.mrf.mxu1  ;;  %7673 = vmatprep.subr.bf16.mxu1 %v10421_v56  ;;  %v10472_v9 = vld [vmem:[%s14222_s1 + $0x118c] ss:$16 sps:$4 sm:$0xff]   ;;  %v10473_v55 = vld [vmem:[%s14222_s1 + $0x1388] ss:$16 sps:$4 sm:$0xff]  }
 0x315   : > { %v10475_v28 = vld [vmem:[%s14222_s1 + $0x138c] ss:$16 sps:$4 sm:$0xff]   ;;  %v10476_v11 = vld [vmem:[%s14222_s1 + $0x1168] ss:$16 sps:$4 sm:$0xff]  }
 0x316   : > { %7633 = vmatpush1.bf16.msra.mxu0 %v10416_v12  ;;  %v10478_v56 = vld [vmem:[%s14222_s1 + $0x116c] ss:$16 sps:$4 sm:$0xff]   ;;  %v10479_v12 = vld [vmem:[%s14222_s1 + $0x1368] ss:$16 sps:$4 sm:$0xff]  }
 0x317   : > { %7674 = vmatpush1.bf16.msra.mxu1 %v10419_v54  ;;  %7634 = vmatprep.subr.bf16.mxu0 %v10424_v24  ;;  %v10481_v62 = vld [vmem:[%s14222_s1 + $0x136c] ss:$16 sps:$4 sm:$0xff]   ;;  %v10482_v16 = vld [vmem:[%s14222_s1 + $0x1148] ss:$16 sps:$4 sm:$0xff]  }
 0x318   : > { %7675 = vmatprep.subr.bf16.mxu1 %v10427_v25  ;;  %v10484_v54 = vld [vmem:[%s14222_s1 + $0x114c] ss:$16 sps:$4 sm:$0xff]   ;;  %v10485_v24 = vld [vmem:[%s14222_s1 + $0x1348] ss:$16 sps:$4 sm:$0xff]  }
 0x319   : > { %v10487_v60 = vld [vmem:[%s14222_s1 + $0x134c] ss:$16 sps:$4 sm:$0xff]  }
 0x31a   : > { %7635 = vmatpush1.bf16.msra.mxu0 %v10422_v53  ;;  %v10490_v25 = vld [vmem:[%s14222_s1 + $0x112c] ss:$16 sps:$4 sm:$0xff]  }
 0x31b   : > { %7676 = vmatpush1.bf16.msra.mxu1 %v10425_v31  ;;  %7636 = vmatprep.subr.bf16.mxu0 %v10430_v35  ;;  %v10493_v53 = vld [vmem:[%s14222_s1 + $0x132c] ss:$16 sps:$4 sm:$0xff]   ;;  %v10488_v31 = vld [vmem:[%s14222_s1 + $0x1128] ss:$16 sps:$4 sm:$0xff]  }
 0x31c   : > { %7677 = vmatprep.subr.bf16.mxu1 %v10433_v17  ;;  %v10491_v35 = vld [vmem:[%s14222_s1 + $0x1328] ss:$16 sps:$4 sm:$0xff]   ;;  %v10496_v17 = vld [vmem:[%s14222_s1 + $0x110c] ss:$16 sps:$4 sm:$0xff]  }
 0x31e   : > { %7637 = vmatpush1.bf16.msra.mxu0 %v10428_v21  ;;  %v10499_v21 = vld [vmem:[%s14222_s1 + $0x130c] ss:$16 sps:$4 sm:$0xff]  }
 0x31f   : > { %7678 = vmatpush1.bf16.msra.mxu1 %v10431_v39  ;;  %7638 = vmatprep.subr.bf16.mxu0 %v10436_v30  ;;  %v10494_v39 = vld [vmem:[%s14222_s1 + $0x1108] ss:$16 sps:$4 sm:$0xff]  }
 0x320   : > { %7679 = vmatprep.subr.bf16.mxu1 %v10439_v2  ;;  %v10497_v30 = vld [vmem:[%s14222_s1 + $0x1308] ss:$16 sps:$4 sm:$0xff]   ;;  %v10502_v2 = vld [vmem:[%s14222_s1 + $0x14ec] ss:$16 sps:$4 sm:$0xff]  }
 0x322   : > { %7639 = vmatpush1.bf16.msra.mxu0 %v10434_v8  ;;  %v10505_v8 = vld [vmem:[%s14222_s1 + $0x16ec] ss:$16 sps:$4 sm:$0xff]  }
 0x323   : > { %7680 = vmatpush1.bf16.msra.mxu1 %v10437_v44  ;;  %7640 = vmatprep.subr.bf16.mxu0 %v10442_v0  ;;  %v10500_v44 = vld [vmem:[%s14222_s1 + $0x14e8] ss:$16 sps:$4 sm:$0xff]  }
 0x324   : > { %7681 = vmatprep.subr.bf16.mxu1 %v10445_v1  ;;  %v10503_v0 = vld [vmem:[%s14222_s1 + $0x16e8] ss:$16 sps:$4 sm:$0xff]   ;;  %v10508_v1 = vld [vmem:[%s14222_s1 + $0x14cc] ss:$16 sps:$4 sm:$0xff]  }
 0x326   : > { %7641 = vmatpush1.bf16.msra.mxu0 %v10440_v32  ;;  %v10511_v32 = vld [vmem:[%s14222_s1 + $0x16cc] ss:$16 sps:$4 sm:$0xff]  }
 0x327   : > { %7682 = vmatpush1.bf16.msra.mxu1 %v10443_v33  ;;  %7642 = vmatprep.subr.bf16.mxu0 %v10448_v20 }
 0x328   : > { %7683 = vmatprep.subr.bf16.mxu1 %v10451_v34 }
 0x32a   : > { %7643 = vmatpush1.bf16.msra.mxu0 %v10446_v40  ;;  %v10506_v40 = vld [vmem:[%s14222_s1 + $0x14c8] ss:$16 sps:$4 sm:$0xff]  }
 0x32b   : > { %7684 = vmatpush1.bf16.msra.mxu1 %v10449_v29  ;;  %7644 = vmatprep.subr.bf16.mxu0 %v10454_v42  ;;  %v10509_v29 = vld [vmem:[%s14222_s1 + $0x16c8] ss:$16 sps:$4 sm:$0xff]  }
 0x32c   : > { %7685 = vmatprep.subr.bf16.mxu1 %v10457_v46 }
 0x32e   : > { %7645 = vmatpush2.bf16.msra.mxu0 %v10452_v47 }
 0x32f   : > { %7686 = vmatpush2.bf16.msra.mxu1 %v10455_v51  ;;  %7646 = vmatprep.subr.bf16.mxu0 %v10460_v38 }
 0x330   : > { %7687 = vmatprep.subr.bf16.mxu1 %v10463_v52 }
 0x332   : > { %7647 = vmatpush2.bf16.msra.mxu0 %v10458_v57  ;;  %v10512_v57 = vld [vmem:[%s14222_s1 + $0x14a8] ss:$16 sps:$4 sm:$0xff]  }
 0x333   : > { %7688 = vmatpush2.bf16.msra.mxu1 %v10461_v61  ;;  %7648 = vmatprep.subr.bf16.mxu0 %v10466_v3  ;;  %v10515_v61 = vld [vmem:[%s14222_s1 + $0x16a8] ss:$16 sps:$4 sm:$0xff]  }
 0x334   : > { %7689 = vmatprep.subr.bf16.mxu1 %v10469_v13  ;;  %v10518_v13 = vld [vmem:[%s14222_s1 + $0x1488] ss:$16 sps:$4 sm:$0xff]  }
 0x336   : > { %7649 = vmatpush2.bf16.msra.mxu0 %v10464_v50  ;;  %v10521_v50 = vld [vmem:[%s14222_s1 + $0x1688] ss:$16 sps:$4 sm:$0xff]  }
 0x337   : > { %7690 = vmatpush2.bf16.msra.mxu1 %v10467_v7  ;;  %7650 = vmatprep.subr.bf16.mxu0 %v10472_v9  ;;  %v10526_v7 = vld [vmem:[%s14222_s1 + $0x146c] ss:$16 sps:$4 sm:$0xff]  }
 0x338   : > { %7691 = vmatprep.subr.bf16.mxu1 %v10475_v28  ;;  %v10529_v9 = vld [vmem:[%s14222_s1 + $0x166c] ss:$16 sps:$4 sm:$0xff]   ;;  %v10524_v28 = vld [vmem:[%s14222_s1 + $0x1468] ss:$16 sps:$4 sm:$0xff]  }
 0x33a   : > { %7651 = vmatpush2.bf16.msra.mxu0 %v10470_v10  ;;  %v10527_v10 = vld [vmem:[%s14222_s1 + $0x1668] ss:$16 sps:$4 sm:$0xff]  }
 0x33b   : > { %7692 = vmatpush2.bf16.msra.mxu1 %v10473_v55  ;;  %7652 = vmatprep.subr.bf16.mxu0 %v10478_v56  ;;  %v10532_v55 = vld [vmem:[%s14222_s1 + $0x144c] ss:$16 sps:$4 sm:$0xff]  }
 0x33c   : > { %7693 = vmatprep.subr.bf16.mxu1 %v10481_v62  ;;  %v10535_v56 = vld [vmem:[%s14222_s1 + $0x164c] ss:$16 sps:$4 sm:$0xff]   ;;  %v10530_v62 = vld [vmem:[%s14222_s1 + $0x1448] ss:$16 sps:$4 sm:$0xff]  }
 0x33e   : > { %7653 = vmatpush2.bf16.msra.mxu0 %v10476_v11  ;;  %v10533_v11 = vld [vmem:[%s14222_s1 + $0x1648] ss:$16 sps:$4 sm:$0xff]  }
 0x33f   : > { %7694 = vmatpush2.bf16.msra.mxu1 %v10479_v12  ;;  %7654 = vmatprep.subr.bf16.mxu0 %v10484_v54  ;;  %v10538_v12 = vld [vmem:[%s14222_s1 + $0x142c] ss:$16 sps:$4 sm:$0xff]  }
 0x340   : > { %7695 = vmatprep.subr.bf16.mxu1 %v10487_v60  ;;  %v10541_v54 = vld [vmem:[%s14222_s1 + $0x162c] ss:$16 sps:$4 sm:$0xff]   ;;  %v10536_v60 = vld [vmem:[%s14222_s1 + $0x1428] ss:$16 sps:$4 sm:$0xff]  }
 0x342   : > { %7655 = vmatpush2.bf16.msra.mxu0 %v10482_v16  ;;  %v10539_v16 = vld [vmem:[%s14222_s1 + $0x1628] ss:$16 sps:$4 sm:$0xff]  }
 0x343   : > { %7696 = vmatpush2.bf16.msra.mxu1 %v10485_v24  ;;  %7656 = vmatprep.subr.bf16.mxu0 %v10490_v25  ;;  %v10544_v24 = vld [vmem:[%s14222_s1 + $0x140c] ss:$16 sps:$4 sm:$0xff]  }
 0x344   : > { %7697 = vmatprep.subr.bf16.mxu1 %v10493_v53  ;;  %v10547_v25 = vld [vmem:[%s14222_s1 + $0x160c] ss:$16 sps:$4 sm:$0xff]   ;;  %v10542_v53 = vld [vmem:[%s14222_s1 + $0x1408] ss:$16 sps:$4 sm:$0xff]  }
 0x346   : > { %7657 = vmatpush2.bf16.msra.mxu0 %v10488_v31  ;;  %v10545_v31 = vld [vmem:[%s14222_s1 + $0x1608] ss:$16 sps:$4 sm:$0xff]  }
 0x347   : > { %7698 = vmatpush2.bf16.msra.mxu1 %v10491_v35  ;;  %7658 = vmatprep.subr.bf16.mxu0 %v10496_v17  ;;  %v10550_v35 = vld [vmem:[%s14222_s1 + $0x15ec] ss:$16 sps:$4 sm:$0xff]  }
 0x348   : > { %7699 = vmatprep.subr.bf16.mxu1 %v10499_v21  ;;  %v10553_v17 = vld [vmem:[%s14222_s1 + $0x17ec] ss:$16 sps:$4 sm:$0xff]   ;;  %v10548_v21 = vld [vmem:[%s14222_s1 + $0x15e8] ss:$16 sps:$4 sm:$0xff]  }
 0x34a   : > { %7659 = vmatpush2.bf16.msra.mxu0 %v10494_v39  ;;  %v10551_v39 = vld [vmem:[%s14222_s1 + $0x17e8] ss:$16 sps:$4 sm:$0xff]  }
 0x34b   : > { %7700 = vmatpush2.bf16.msra.mxu1 %v10497_v30  ;;  %7710 = vmatprep.subr.bf16.mxu0 %v10502_v2  ;;  %v10556_v30 = vld [vmem:[%s14222_s1 + $0x15cc] ss:$16 sps:$4 sm:$0xff]  }
 0x34c   : > { %7751 = vmatprep.subr.bf16.mxu1 %v10505_v8  ;;  %v10559_v2 = vld [vmem:[%s14222_s1 + $0x17cc] ss:$16 sps:$4 sm:$0xff]   ;;  %v10554_v8 = vld [vmem:[%s14222_s1 + $0x15c8] ss:$16 sps:$4 sm:$0xff]  }
 0x34d   : > { %v7416_v33 = vpop.f32.mrf.mxu0  ;;  %7661 = vmatmul.mubr.bf16.vlgmr.msra.gmra.mxu0 %v11718_v18  ;;  %v10514_v18 = vld [vmem:[%s14222_s1 + $0x14ac] ss:$16 sps:$4 sm:$0xff]  }
 0x34e   : > { %v7457_v20 = vpop.f32.mrf.mxu1  ;;  %7702 = vmatmul.mubr.bf16.vlgmr.msra.gmra.mxu1 %v11721_v19  ;;  %v7417_v34 = vadd.f32 %v7416_v33, %v13406_v6  ;;  %7711 = vmatpush1.bf16.msra.mxu0 %v10500_v44  ;;  %v10517_v19 = vld [vmem:[%s14222_s1 + $0x16ac] ss:$16 sps:$4 sm:$0xff]   ;;  %v10557_v44 = vld [vmem:[%s14222_s1 + $0x17c8] ss:$16 sps:$4 sm:$0xff]  }
 0x34f   : > { %7752 = vmatpush1.bf16.msra.mxu1 %v10503_v0  ;;  %v7418_v42 = vpop.f32.mrf.mxu0  ;;  %7712 = vmatprep.subr.bf16.mxu0 %v10508_v1  ;;  %v10562_v0 = vld [vmem:[%s14222_s1 + $0x15ac] ss:$16 sps:$4 sm:$0xff]   ;;  %v10563_v33 = vld [vmem:[%s14222_s1 + $0x17a8] ss:$16 sps:$4 sm:$0xff]  }
 0x350   : > { %v7459_v46 = vpop.f32.mrf.mxu1  ;;  %7753 = vmatprep.subr.bf16.mxu1 %v10511_v32  ;;  %v13619_v6 = vadd.f32 %v7457_v20, %v7417_v34  ;;  %v7419_v47 = vadd.f32 %v7418_v42, %v13420_v59  ;;  %7742 = vmatprep.mubr.bf16.mxu0 %v11958_v22  ;;  %v10520_v22 = vld [vmem:[%s14222_s1 + $0x148c] ss:$16 sps:$4 sm:$0xff]   ;;  %v10560_v32 = vld [vmem:[%s14222_s1 + $0x15a8] ss:$16 sps:$4 sm:$0xff]  }
 0x351   : > { %7783 = vmatprep.mubr.bf16.mxu1 %v11962_v23  ;;  %v7420_v51 = vpop.f32.mrf.mxu0  ;;  %v10523_v23 = vld [vmem:[%s14222_s1 + $0x168c] ss:$16 sps:$4 sm:$0xff]  }
 0x352   : > { %v7461_v38 = vpop.f32.mrf.mxu1  ;;  %v13624_v52 = vadd.f32 %v7459_v46, %v7419_v47  ;;  %7713 = vmatpush1.bf16.msra.mxu0 %v10506_v40  ;;  %v10565_v1 = vld [vmem:[%s14222_s1 + $0x17ac] ss:$16 sps:$4 sm:$0xff]   ;;  %v10566_v40 = vld [vmem:[%s14222_s1 + $0x1588] ss:$16 sps:$4 sm:$0xff]  }
 0x353   : > { %7754 = vmatpush1.bf16.msra.mxu1 %v10509_v29  ;;  %v7421_v3 = vpop.f32.mrf.mxu0  ;;  %7714 = vmatprep.subr.bf16.mxu0 %v10514_v18  ;;  %v10568_v20 = vld [vmem:[%s14222_s1 + $0x158c] ss:$16 sps:$4 sm:$0xff]   ;;  %v10569_v29 = vld [vmem:[%s14222_s1 + $0x1788] ss:$16 sps:$4 sm:$0xff]  }
 0x354   : > { %v7462_v59 = vpop.f32.mrf.mxu1  ;;  %7755 = vmatprep.subr.bf16.mxu1 %v10517_v19  ;;  %v10571_v34 = vld [vmem:[%s14222_s1 + $0x178c] ss:$16 sps:$4 sm:$0xff]   ;;  %v10572_v18 = vld [vmem:[%s14222_s1 + $0x1568] ss:$16 sps:$4 sm:$0xff]  }
 0x355   : > { %v10574_v42 = vld [vmem:[%s14222_s1 + $0x156c] ss:$16 sps:$4 sm:$0xff]   ;;  %v10575_v19 = vld [vmem:[%s14222_s1 + $0x1768] ss:$16 sps:$4 sm:$0xff]  }
 0x356   : > { %7715 = vmatpush1.bf16.msra.mxu0 %v10512_v57  ;;  %v10577_v46 = vld [vmem:[%s14222_s1 + $0x176c] ss:$16 sps:$4 sm:$0xff]   ;;  %v10578_v38 = vld [vmem:[%s14222_s1 + $0x1548] ss:$16 sps:$4 sm:$0xff]  }
 0x357   : > { %7756 = vmatpush1.bf16.msra.mxu1 %v10515_v61  ;;  %7716 = vmatprep.subr.bf16.mxu0 %v10520_v22  ;;  %v10580_v47 = vld [vmem:[%s14222_s1 + $0x154c] ss:$16 sps:$4 sm:$0xff]   ;;  %v10581_v57 = vld [vmem:[%s14222_s1 + $0x1748] ss:$16 sps:$4 sm:$0xff]  }
 0x358   : > { %7757 = vmatprep.subr.bf16.mxu1 %v10523_v23  ;;  %v10583_v51 = vld [vmem:[%s14222_s1 + $0x174c] ss:$16 sps:$4 sm:$0xff]   ;;  %v10584_v59 = vld [vmem:[%s14222_s1 + $0x1528] ss:$16 sps:$4 sm:$0xff]  }
 0x359   : > { %v10586_v61 = vld [vmem:[%s14222_s1 + $0x152c] ss:$16 sps:$4 sm:$0xff]   ;;  %v10587_v22 = vld [vmem:[%s14222_s1 + $0x1728] ss:$16 sps:$4 sm:$0xff]  }
 0x35a   : > { %7717 = vmatpush1.bf16.msra.mxu0 %v10518_v13  ;;  %v10589_v3 = vld [vmem:[%s14222_s1 + $0x172c] ss:$16 sps:$4 sm:$0xff]  }
 0x35b   : > { %7758 = vmatpush1.bf16.msra.mxu1 %v10521_v50  ;;  %7718 = vmatprep.subr.bf16.mxu0 %v10526_v7  ;;  %v10592_v23 = vld [vmem:[%s14222_s1 + $0x150c] ss:$16 sps:$4 sm:$0xff]   ;;  %v10590_v50 = vld [vmem:[%s14222_s1 + $0x1508] ss:$16 sps:$4 sm:$0xff]  }
 0x35c   : > { %7759 = vmatprep.subr.bf16.mxu1 %v10529_v9  ;;  %v10595_v13 = vld [vmem:[%s14222_s1 + $0x170c] ss:$16 sps:$4 sm:$0xff]   ;;  %v10593_v7 = vld [vmem:[%s14222_s1 + $0x1708] ss:$16 sps:$4 sm:$0xff]  }
 0x35d   : > { %v10598_v9 = vld [vmem:[%s14222_s1 + $0x18ec] ss:$16 sps:$4 sm:$0xff]  }
 0x35e   : > { %7719 = vmatpush1.bf16.msra.mxu0 %v10524_v28  ;;  %v10601_v28 = vld [vmem:[%s14222_s1 + $0x1aec] ss:$16 sps:$4 sm:$0xff]  }
 0x35f   : > { %7760 = vmatpush1.bf16.msra.mxu1 %v10527_v10  ;;  %7720 = vmatprep.subr.bf16.mxu0 %v10532_v55  ;;  %v10596_v10 = vld [vmem:[%s14222_s1 + $0x18e8] ss:$16 sps:$4 sm:$0xff]  }
 0x360   : > { %7761 = vmatprep.subr.bf16.mxu1 %v10535_v56  ;;  %v10599_v55 = vld [vmem:[%s14222_s1 + $0x1ae8] ss:$16 sps:$4 sm:$0xff]   ;;  %v10604_v56 = vld [vmem:[%s14222_s1 + $0x18cc] ss:$16 sps:$4 sm:$0xff]  }
 0x362   : > { %7721 = vmatpush1.bf16.msra.mxu0 %v10530_v62  ;;  %v10607_v62 = vld [vmem:[%s14222_s1 + $0x1acc] ss:$16 sps:$4 sm:$0xff]  }
 0x363   : > { %7762 = vmatpush1.bf16.msra.mxu1 %v10533_v11  ;;  %7722 = vmatprep.subr.bf16.mxu0 %v10538_v12 }
 0x364   : > { %7763 = vmatprep.subr.bf16.mxu1 %v10541_v54 }
 0x366   : > { %7723 = vmatpush1.bf16.msra.mxu0 %v10536_v60  ;;  %v10602_v60 = vld [vmem:[%s14222_s1 + $0x18c8] ss:$16 sps:$4 sm:$0xff]  }
 0x367   : > { %7764 = vmatpush1.bf16.msra.mxu1 %v10539_v16  ;;  %7724 = vmatprep.subr.bf16.mxu0 %v10544_v24  ;;  %v10605_v16 = vld [vmem:[%s14222_s1 + $0x1ac8] ss:$16 sps:$4 sm:$0xff]  }
 0x368   : > { %7765 = vmatprep.subr.bf16.mxu1 %v10547_v25 }
 0x36a   : > { %7725 = vmatpush1.bf16.msra.mxu0 %v10542_v53 }
 0x36b   : > { %7766 = vmatpush1.bf16.msra.mxu1 %v10545_v31  ;;  %7726 = vmatprep.subr.bf16.mxu0 %v10550_v35 }
 0x36c   : > { %7767 = vmatprep.subr.bf16.mxu1 %v10553_v17 }
 0x36e   : > { %7727 = vmatpush2.bf16.msra.mxu0 %v10548_v21  ;;  %v10608_v21 = vld [vmem:[%s14222_s1 + $0x18a8] ss:$16 sps:$4 sm:$0xff]  }
 0x36f   : > { %7768 = vmatpush2.bf16.msra.mxu1 %v10551_v39  ;;  %7728 = vmatprep.subr.bf16.mxu0 %v10556_v30  ;;  %v10611_v39 = vld [vmem:[%s14222_s1 + $0x1aa8] ss:$16 sps:$4 sm:$0xff]  }
 0x370   : > { %7769 = vmatprep.subr.bf16.mxu1 %v10559_v2  ;;  %v10614_v2 = vld [vmem:[%s14222_s1 + $0x1888] ss:$16 sps:$4 sm:$0xff]  }
 0x372   : > { %7729 = vmatpush2.bf16.msra.mxu0 %v10554_v8  ;;  %v10617_v8 = vld [vmem:[%s14222_s1 + $0x1a88] ss:$16 sps:$4 sm:$0xff]  }
 0x373   : > { %7770 = vmatpush2.bf16.msra.mxu1 %v10557_v44  ;;  %7730 = vmatprep.subr.bf16.mxu0 %v10562_v0  ;;  %v10622_v44 = vld [vmem:[%s14222_s1 + $0x186c] ss:$16 sps:$4 sm:$0xff]  }
 0x374   : > { %7771 = vmatprep.subr.bf16.mxu1 %v10565_v1  ;;  %v10625_v0 = vld [vmem:[%s14222_s1 + $0x1a6c] ss:$16 sps:$4 sm:$0xff]   ;;  %v10620_v1 = vld [vmem:[%s14222_s1 + $0x1868] ss:$16 sps:$4 sm:$0xff]  }
 0x376   : > { %7731 = vmatpush2.bf16.msra.mxu0 %v10560_v32  ;;  %v10623_v32 = vld [vmem:[%s14222_s1 + $0x1a68] ss:$16 sps:$4 sm:$0xff]  }
 0x377   : > { %7772 = vmatpush2.bf16.msra.mxu1 %v10563_v33  ;;  %7732 = vmatprep.subr.bf16.mxu0 %v10568_v20  ;;  %v10628_v33 = vld [vmem:[%s14222_s1 + $0x184c] ss:$16 sps:$4 sm:$0xff]  }
 0x378   : > { %7773 = vmatprep.subr.bf16.mxu1 %v10571_v34  ;;  %v10631_v20 = vld [vmem:[%s14222_s1 + $0x1a4c] ss:$16 sps:$4 sm:$0xff]   ;;  %v10626_v34 = vld [vmem:[%s14222_s1 + $0x1848] ss:$16 sps:$4 sm:$0xff]  }
 0x37a   : > { %7733 = vmatpush2.bf16.msra.mxu0 %v10566_v40  ;;  %v10629_v40 = vld [vmem:[%s14222_s1 + $0x1a48] ss:$16 sps:$4 sm:$0xff]  }
 0x37b   : > { %7774 = vmatpush2.bf16.msra.mxu1 %v10569_v29  ;;  %7734 = vmatprep.subr.bf16.mxu0 %v10574_v42  ;;  %v10634_v29 = vld [vmem:[%s14222_s1 + $0x182c] ss:$16 sps:$4 sm:$0xff]  }
 0x37c   : > { %7775 = vmatprep.subr.bf16.mxu1 %v10577_v46  ;;  %v10637_v42 = vld [vmem:[%s14222_s1 + $0x1a2c] ss:$16 sps:$4 sm:$0xff]   ;;  %v10632_v46 = vld [vmem:[%s14222_s1 + $0x1828] ss:$16 sps:$4 sm:$0xff]  }
 0x37e   : > { %7735 = vmatpush2.bf16.msra.mxu0 %v10572_v18  ;;  %v10635_v18 = vld [vmem:[%s14222_s1 + $0x1a28] ss:$16 sps:$4 sm:$0xff]  }
 0x37f   : > { %7776 = vmatpush2.bf16.msra.mxu1 %v10575_v19  ;;  %7736 = vmatprep.subr.bf16.mxu0 %v10580_v47  ;;  %v10640_v19 = vld [vmem:[%s14222_s1 + $0x180c] ss:$16 sps:$4 sm:$0xff]  }
 0x380   : > { %7777 = vmatprep.subr.bf16.mxu1 %v10583_v51  ;;  %v10643_v47 = vld [vmem:[%s14222_s1 + $0x1a0c] ss:$16 sps:$4 sm:$0xff]   ;;  %v10638_v51 = vld [vmem:[%s14222_s1 + $0x1808] ss:$16 sps:$4 sm:$0xff]  }
 0x382   : > { %7737 = vmatpush2.bf16.msra.mxu0 %v10578_v38  ;;  %v10641_v38 = vld [vmem:[%s14222_s1 + $0x1a08] ss:$16 sps:$4 sm:$0xff]  }
 0x383   : > { %7778 = vmatpush2.bf16.msra.mxu1 %v10581_v57  ;;  %7738 = vmatprep.subr.bf16.mxu0 %v10586_v61  ;;  %v10646_v57 = vld [vmem:[%s14222_s1 + $0x19ec] ss:$16 sps:$4 sm:$0xff]  }
 0x384   : > { %7779 = vmatprep.subr.bf16.mxu1 %v10589_v3  ;;  %v10649_v61 = vld [vmem:[%s14222_s1 + $0x1bec] ss:$16 sps:$4 sm:$0xff]   ;;  %v10644_v3 = vld [vmem:[%s14222_s1 + $0x19e8] ss:$16 sps:$4 sm:$0xff]  }
 0x386   : > { %7739 = vmatpush2.bf16.msra.mxu0 %v10584_v59  ;;  %v10647_v59 = vld [vmem:[%s14222_s1 + $0x1be8] ss:$16 sps:$4 sm:$0xff]  }
 0x387   : > { %7780 = vmatpush2.bf16.msra.mxu1 %v10587_v22  ;;  %7740 = vmatprep.subr.bf16.mxu0 %v10592_v23  ;;  %v10652_v22 = vld [vmem:[%s14222_s1 + $0x19cc] ss:$16 sps:$4 sm:$0xff]  }
 0x388   : > { %7781 = vmatprep.subr.bf16.mxu1 %v10595_v13  ;;  %v10655_v23 = vld [vmem:[%s14222_s1 + $0x1bcc] ss:$16 sps:$4 sm:$0xff]   ;;  %v10650_v13 = vld [vmem:[%s14222_s1 + $0x19c8] ss:$16 sps:$4 sm:$0xff]  }
 0x38a   : > { %7741 = vmatpush2.bf16.msra.mxu0 %v10590_v50  ;;  %v10653_v50 = vld [vmem:[%s14222_s1 + $0x1bc8] ss:$16 sps:$4 sm:$0xff]  }
 0x38b   : > { %7782 = vmatpush2.bf16.msra.mxu1 %v10593_v7  ;;  %7792 = vmatprep.subr.bf16.mxu0 %v10598_v9  ;;  %v10658_v7 = vld [vmem:[%s14222_s1 + $0x19ac] ss:$16 sps:$4 sm:$0xff]  }
 0x38c   : > { %7833 = vmatprep.subr.bf16.mxu1 %v10601_v28  ;;  %v10661_v9 = vld [vmem:[%s14222_s1 + $0x1bac] ss:$16 sps:$4 sm:$0xff]   ;;  %v10656_v28 = vld [vmem:[%s14222_s1 + $0x19a8] ss:$16 sps:$4 sm:$0xff]  }
 0x38d   : > { %v7498_v11 = vpop.f32.mrf.mxu0  ;;  %7743 = vmatmul.mubr.bf16.vlgmr.msra.gmra.mxu0 %v11939_v14  ;;  %v10610_v14 = vld [vmem:[%s14222_s1 + $0x18ac] ss:$16 sps:$4 sm:$0xff]  }
 0x38e   : > { %v7539_v12 = vpop.f32.mrf.mxu1  ;;  %7784 = vmatmul.mubr.bf16.vlgmr.msra.gmra.mxu1 %v11942_v15  ;;  %v7499_v54 = vadd.f32 %v7498_v11, %v13619_v6  ;;  %7793 = vmatpush1.bf16.msra.mxu0 %v10596_v10  ;;  %v10613_v15 = vld [vmem:[%s14222_s1 + $0x1aac] ss:$16 sps:$4 sm:$0xff]   ;;  %v10659_v10 = vld [vmem:[%s14222_s1 + $0x1ba8] ss:$16 sps:$4 sm:$0xff]  }
 0x38f   : > { %7834 = vmatpush1.bf16.msra.mxu1 %v10599_v55  ;;  %v7500_v24 = vpop.f32.mrf.mxu0  ;;  %7794 = vmatprep.subr.bf16.mxu0 %v10604_v56  ;;  %v10664_v55 = vld [vmem:[%s14222_s1 + $0x198c] ss:$16 sps:$4 sm:$0xff]   ;;  %v10665_v11 = vld [vmem:[%s14222_s1 + $0x1b88] ss:$16 sps:$4 sm:$0xff]  }
 0x390   : > { %v7541_v25 = vpop.f32.mrf.mxu1  ;;  %7835 = vmatprep.subr.bf16.mxu1 %v10607_v62  ;;  %v13821_v6 = vadd.f32 %v7539_v12, %v7499_v54  ;;  %v7501_v53 = vadd.f32 %v7500_v24, %v13624_v52  ;;  %7824 = vmatprep.mubr.bf16.mxu0 %v12175_v36  ;;  %v10616_v36 = vld [vmem:[%s14222_s1 + $0x188c] ss:$16 sps:$4 sm:$0xff]   ;;  %v10662_v62 = vld [vmem:[%s14222_s1 + $0x1988] ss:$16 sps:$4 sm:$0xff]  }
 0x391   : > { %7865 = vmatprep.mubr.bf16.mxu1 %v12179_v41  ;;  %v7502_v31 = vpop.f32.mrf.mxu0  ;;  %v10619_v41 = vld [vmem:[%s14222_s1 + $0x1a8c] ss:$16 sps:$4 sm:$0xff]  }
 0x392   : > { %v7543_v35 = vpop.f32.mrf.mxu1  ;;  %v13826_v17 = vadd.f32 %v7541_v25, %v7501_v53  ;;  %7795 = vmatpush1.bf16.msra.mxu0 %v10602_v60  ;;  %v10667_v56 = vld [vmem:[%s14222_s1 + $0x1b8c] ss:$16 sps:$4 sm:$0xff]   ;;  %v10668_v60 = vld [vmem:[%s14222_s1 + $0x1968] ss:$16 sps:$4 sm:$0xff]  }
 0x393   : > { %7836 = vmatpush1.bf16.msra.mxu1 %v10605_v16  ;;  %v7503_v30 = vpop.f32.mrf.mxu0  ;;  %7796 = vmatprep.subr.bf16.mxu0 %v10610_v14  ;;  %v10670_v12 = vld [vmem:[%s14222_s1 + $0x196c] ss:$16 sps:$4 sm:$0xff]   ;;  %v10671_v16 = vld [vmem:[%s14222_s1 + $0x1b68] ss:$16 sps:$4 sm:$0xff]  }
 0x394   : > { %v7544_v52 = vpop.f32.mrf.mxu1  ;;  %7837 = vmatprep.subr.bf16.mxu1 %v10613_v15  ;;  %v10673_v54 = vld [vmem:[%s14222_s1 + $0x1b6c] ss:$16 sps:$4 sm:$0xff]   ;;  %v10674_v14 = vld [vmem:[%s14222_s1 + $0x1948] ss:$16 sps:$4 sm:$0xff]  }
 0x395   : > { %v10676_v24 = vld [vmem:[%s14222_s1 + $0x194c] ss:$16 sps:$4 sm:$0xff]   ;;  %v10677_v15 = vld [vmem:[%s14222_s1 + $0x1b48] ss:$16 sps:$4 sm:$0xff]  }
 0x396   : > { %7797 = vmatpush1.bf16.msra.mxu0 %v10608_v21  ;;  %v10679_v25 = vld [vmem:[%s14222_s1 + $0x1b4c] ss:$16 sps:$4 sm:$0xff]   ;;  %v10680_v35 = vld [vmem:[%s14222_s1 + $0x1928] ss:$16 sps:$4 sm:$0xff]  }
 0x397   : > { %7838 = vmatpush1.bf16.msra.mxu1 %v10611_v39  ;;  %7798 = vmatprep.subr.bf16.mxu0 %v10616_v36  ;;  %v10682_v53 = vld [vmem:[%s14222_s1 + $0x192c] ss:$16 sps:$4 sm:$0xff]   ;;  %v10683_v21 = vld [vmem:[%s14222_s1 + $0x1b28] ss:$16 sps:$4 sm:$0xff]  }
 0x398   : > { %7839 = vmatprep.subr.bf16.mxu1 %v10619_v41  ;;  %v10685_v31 = vld [vmem:[%s14222_s1 + $0x1b2c] ss:$16 sps:$4 sm:$0xff]   ;;  %v10686_v52 = vld [vmem:[%s14222_s1 + $0x1908] ss:$16 sps:$4 sm:$0xff]  }
 0x399   : > { %v10688_v39 = vld [vmem:[%s14222_s1 + $0x190c] ss:$16 sps:$4 sm:$0xff]   ;;  %v10689_v36 = vld [vmem:[%s14222_s1 + $0x1b08] ss:$16 sps:$4 sm:$0xff]  }
 0x39a   : > { %7799 = vmatpush1.bf16.msra.mxu0 %v10614_v2  ;;  %v10691_v30 = vld [vmem:[%s14222_s1 + $0x1b0c] ss:$16 sps:$4 sm:$0xff]  }
 0x39b   : > { %7840 = vmatpush1.bf16.msra.mxu1 %v10617_v8  ;;  %7800 = vmatprep.subr.bf16.mxu0 %v10622_v44  ;;  %v10694_v41 = vld [vmem:[%s14222_s1 + $0x1cec] ss:$16 sps:$4 sm:$0xff]   ;;  %v10692_v8 = vld [vmem:[%s14222_s1 + $0x1ce8] ss:$16 sps:$4 sm:$0xff]  }
 0x39c   : > { %7841 = vmatprep.subr.bf16.mxu1 %v10625_v0  ;;  %v10697_v2 = vld [vmem:[%s14222_s1 + $0x1eec] ss:$16 sps:$4 sm:$0xff]   ;;  %v10695_v44 = vld [vmem:[%s14222_s1 + $0x1ee8] ss:$16 sps:$4 sm:$0xff]  }
 0x39d   : > { %v10700_v0 = vld [vmem:[%s14222_s1 + $0x1ccc] ss:$16 sps:$4 sm:$0xff]  }
 0x39e   : > { %7801 = vmatpush1.bf16.msra.mxu0 %v10620_v1  ;;  %v10703_v1 = vld [vmem:[%s14222_s1 + $0x1ecc] ss:$16 sps:$4 sm:$0xff]  }
 0x39f   : > { %7842 = vmatpush1.bf16.msra.mxu1 %v10623_v32  ;;  %7802 = vmatprep.subr.bf16.mxu0 %v10628_v33 }
 0x3a0   : > { %7843 = vmatprep.subr.bf16.mxu1 %v10631_v20 }
 0x3a2   : > { %7803 = vmatpush1.bf16.msra.mxu0 %v10626_v34  ;;  %v10698_v34 = vld [vmem:[%s14222_s1 + $0x1cc8] ss:$16 sps:$4 sm:$0xff]  }
 0x3a3   : > { %7844 = vmatpush1.bf16.msra.mxu1 %v10629_v40  ;;  %7804 = vmatprep.subr.bf16.mxu0 %v10634_v29  ;;  %v10701_v40 = vld [vmem:[%s14222_s1 + $0x1ec8] ss:$16 sps:$4 sm:$0xff]  }
 0x3a4   : > { %7845 = vmatprep.subr.bf16.mxu1 %v10637_v42 }
 0x3a6   : > { %7805 = vmatpush1.bf16.msra.mxu0 %v10632_v46 }
 0x3a7   : > { %7846 = vmatpush1.bf16.msra.mxu1 %v10635_v18  ;;  %7806 = vmatprep.subr.bf16.mxu0 %v10640_v19 }
 0x3a8   : > { %7847 = vmatprep.subr.bf16.mxu1 %v10643_v47 }
 0x3aa   : > { %7807 = vmatpush1.bf16.msra.mxu0 %v10638_v51  ;;  %v10704_v51 = vld [vmem:[%s14222_s1 + $0x1ca8] ss:$16 sps:$4 sm:$0xff]  }
 0x3ab   : > { %7848 = vmatpush1.bf16.msra.mxu1 %v10641_v38  ;;  %7808 = vmatprep.subr.bf16.mxu0 %v10646_v57  ;;  %v10707_v38 = vld [vmem:[%s14222_s1 + $0x1ea8] ss:$16 sps:$4 sm:$0xff]  }
 0x3ac   : > { %7849 = vmatprep.subr.bf16.mxu1 %v10649_v61  ;;  %v10710_v61 = vld [vmem:[%s14222_s1 + $0x1c88] ss:$16 sps:$4 sm:$0xff]  }
 0x3ae   : > { %7809 = vmatpush2.bf16.msra.mxu0 %v10644_v3  ;;  %v10713_v3 = vld [vmem:[%s14222_s1 + $0x1e88] ss:$16 sps:$4 sm:$0xff]  }
 0x3af   : > { %7850 = vmatpush2.bf16.msra.mxu1 %v10647_v59  ;;  %7810 = vmatprep.subr.bf16.mxu0 %v10652_v22  ;;  %v10718_v59 = vld [vmem:[%s14222_s1 + $0x1c6c] ss:$16 sps:$4 sm:$0xff]  }
 0x3b0   : > { %7851 = vmatprep.subr.bf16.mxu1 %v10655_v23  ;;  %v10721_v22 = vld [vmem:[%s14222_s1 + $0x1e6c] ss:$16 sps:$4 sm:$0xff]   ;;  %v10716_v23 = vld [vmem:[%s14222_s1 + $0x1c68] ss:$16 sps:$4 sm:$0xff]  }
 0x3b2   : > { %7811 = vmatpush2.bf16.msra.mxu0 %v10650_v13  ;;  %v10719_v13 = vld [vmem:[%s14222_s1 + $0x1e68] ss:$16 sps:$4 sm:$0xff]  }
 0x3b3   : > { %7852 = vmatpush2.bf16.msra.mxu1 %v10653_v50  ;;  %7812 = vmatprep.subr.bf16.mxu0 %v10658_v7  ;;  %v10724_v50 = vld [vmem:[%s14222_s1 + $0x1c4c] ss:$16 sps:$4 sm:$0xff]  }
 0x3b4   : > { %7853 = vmatprep.subr.bf16.mxu1 %v10661_v9  ;;  %v10727_v7 = vld [vmem:[%s14222_s1 + $0x1e4c] ss:$16 sps:$4 sm:$0xff]   ;;  %v10722_v9 = vld [vmem:[%s14222_s1 + $0x1c48] ss:$16 sps:$4 sm:$0xff]  }
 0x3b6   : > { %7813 = vmatpush2.bf16.msra.mxu0 %v10656_v28  ;;  %v10725_v28 = vld [vmem:[%s14222_s1 + $0x1e48] ss:$16 sps:$4 sm:$0xff]  }
 0x3b7   : > { %7854 = vmatpush2.bf16.msra.mxu1 %v10659_v10  ;;  %7814 = vmatprep.subr.bf16.mxu0 %v10664_v55  ;;  %v10730_v10 = vld [vmem:[%s14222_s1 + $0x1c2c] ss:$16 sps:$4 sm:$0xff]  }
 0x3b8   : > { %7855 = vmatprep.subr.bf16.mxu1 %v10667_v56  ;;  %v10733_v55 = vld [vmem:[%s14222_s1 + $0x1e2c] ss:$16 sps:$4 sm:$0xff]   ;;  %v10728_v56 = vld [vmem:[%s14222_s1 + $0x1c28] ss:$16 sps:$4 sm:$0xff]  }
 0x3ba   : > { %7815 = vmatpush2.bf16.msra.mxu0 %v10662_v62  ;;  %v10731_v62 = vld [vmem:[%s14222_s1 + $0x1e28] ss:$16 sps:$4 sm:$0xff]  }
 0x3bb   : > { %7856 = vmatpush2.bf16.msra.mxu1 %v10665_v11  ;;  %7816 = vmatprep.subr.bf16.mxu0 %v10670_v12  ;;  %v10736_v11 = vld [vmem:[%s14222_s1 + $0x1c0c] ss:$16 sps:$4 sm:$0xff]  }
 0x3bc   : > { %7857 = vmatprep.subr.bf16.mxu1 %v10673_v54  ;;  %v10739_v12 = vld [vmem:[%s14222_s1 + $0x1e0c] ss:$16 sps:$4 sm:$0xff]   ;;  %v10734_v54 = vld [vmem:[%s14222_s1 + $0x1c08] ss:$16 sps:$4 sm:$0xff]  }
 0x3be   : > { %7817 = vmatpush2.bf16.msra.mxu0 %v10668_v60  ;;  %v10737_v60 = vld [vmem:[%s14222_s1 + $0x1e08] ss:$16 sps:$4 sm:$0xff]  }
 0x3bf   : > { %7858 = vmatpush2.bf16.msra.mxu1 %v10671_v16  ;;  %7818 = vmatprep.subr.bf16.mxu0 %v10676_v24  ;;  %v10742_v16 = vld [vmem:[%s14222_s1 + $0x1dec] ss:$16 sps:$4 sm:$0xff]  }
 0x3c0   : > { %7859 = vmatprep.subr.bf16.mxu1 %v10679_v25  ;;  %v10745_v24 = vld [vmem:[%s14222_s1 + $0x1fec] ss:$16 sps:$4 sm:$0xff]   ;;  %v10740_v25 = vld [vmem:[%s14222_s1 + $0x1de8] ss:$16 sps:$4 sm:$0xff]  }
 0x3c2   : > { %7819 = vmatpush2.bf16.msra.mxu0 %v10674_v14  ;;  %v10743_v14 = vld [vmem:[%s14222_s1 + $0x1fe8] ss:$16 sps:$4 sm:$0xff]  }
 0x3c3   : > { %7860 = vmatpush2.bf16.msra.mxu1 %v10677_v15  ;;  %7820 = vmatprep.subr.bf16.mxu0 %v10682_v53  ;;  %v10748_v15 = vld [vmem:[%s14222_s1 + $0x1dcc] ss:$16 sps:$4 sm:$0xff]  }
 0x3c4   : > { %7861 = vmatprep.subr.bf16.mxu1 %v10685_v31  ;;  %v10751_v53 = vld [vmem:[%s14222_s1 + $0x1fcc] ss:$16 sps:$4 sm:$0xff]   ;;  %v10746_v31 = vld [vmem:[%s14222_s1 + $0x1dc8] ss:$16 sps:$4 sm:$0xff]  }
 0x3c6   : > { %7821 = vmatpush2.bf16.msra.mxu0 %v10680_v35  ;;  %v10749_v35 = vld [vmem:[%s14222_s1 + $0x1fc8] ss:$16 sps:$4 sm:$0xff]  }
 0x3c7   : > { %7862 = vmatpush2.bf16.msra.mxu1 %v10683_v21  ;;  %7822 = vmatprep.subr.bf16.mxu0 %v10688_v39  ;;  %v10754_v21 = vld [vmem:[%s14222_s1 + $0x1dac] ss:$16 sps:$4 sm:$0xff]  }
 0x3c8   : > { %7863 = vmatprep.subr.bf16.mxu1 %v10691_v30  ;;  %v10757_v39 = vld [vmem:[%s14222_s1 + $0x1fac] ss:$16 sps:$4 sm:$0xff]   ;;  %v10752_v30 = vld [vmem:[%s14222_s1 + $0x1da8] ss:$16 sps:$4 sm:$0xff]  }
 0x3ca   : > { %7823 = vmatpush2.bf16.msra.mxu0 %v10686_v52  ;;  %v10755_v52 = vld [vmem:[%s14222_s1 + $0x1fa8] ss:$16 sps:$4 sm:$0xff]  }
 0x3cb   : > { %7864 = vmatpush2.bf16.msra.mxu1 %v10689_v36  ;;  %7874 = vmatprep.subr.bf16.mxu0 %v10694_v41  ;;  %v10760_v36 = vld [vmem:[%s14222_s1 + $0x1d8c] ss:$16 sps:$4 sm:$0xff]  }
 0x3cc   : > { %7915 = vmatprep.subr.bf16.mxu1 %v10697_v2  ;;  %v10763_v41 = vld [vmem:[%s14222_s1 + $0x1f8c] ss:$16 sps:$4 sm:$0xff]   ;;  %v10758_v2 = vld [vmem:[%s14222_s1 + $0x1d88] ss:$16 sps:$4 sm:$0xff]  }
 0x3cd   : > { %v7580_v32 = vpop.f32.mrf.mxu0  ;;  %7825 = vmatmul.mubr.bf16.vlgmr.msra.gmra.mxu0 %v12156_v26  ;;  %v10706_v26 = vld [vmem:[%s14222_s1 + $0x1cac] ss:$16 sps:$4 sm:$0xff]  }
 0x3ce   : > { %v7621_v33 = vpop.f32.mrf.mxu1  ;;  %7866 = vmatmul.mubr.bf16.vlgmr.msra.gmra.mxu1 %v12159_v27  ;;  %v7581_v20 = vadd.f32 %v7580_v32, %v13821_v6  ;;  %7875 = vmatpush1.bf16.msra.mxu0 %v10692_v8  ;;  %v10709_v27 = vld [vmem:[%s14222_s1 + $0x1eac] ss:$16 sps:$4 sm:$0xff]   ;;  %v10761_v8 = vld [vmem:[%s14222_s1 + $0x1f88] ss:$16 sps:$4 sm:$0xff]  }
 0x3cf   : > { %7916 = vmatpush1.bf16.msra.mxu1 %v10695_v44  ;;  %v7582_v29 = vpop.f32.mrf.mxu0  ;;  %7876 = vmatprep.subr.bf16.mxu0 %v10700_v0  ;;  %v10766_v44 = vld [vmem:[%s14222_s1 + $0x1d6c] ss:$16 sps:$4 sm:$0xff]   ;;  %v10767_v32 = vld [vmem:[%s14222_s1 + $0x1f68] ss:$16 sps:$4 sm:$0xff]  }
 0x3d0   : > { %v7623_v42 = vpop.f32.mrf.mxu1  ;;  %7917 = vmatprep.subr.bf16.mxu1 %v10703_v1  ;;  %v14023_v6 = vadd.f32 %v7621_v33, %v7581_v20  ;;  %v7583_v46 = vadd.f32 %v7582_v29, %v13826_v17  ;;  %7906 = vmatprep.mubr.bf16.mxu0 %v12392_v4  ;;  %v10712_v4 = vld [vmem:[%s14222_s1 + $0x1c8c] ss:$16 sps:$4 sm:$0xff]   ;;  %v10764_v1 = vld [vmem:[%s14222_s1 + $0x1d68] ss:$16 sps:$4 sm:$0xff]  }
 0x3d1   : > { %7947 = vmatprep.mubr.bf16.mxu1 %v12396_v5  ;;  %v7584_v18 = vpop.f32.mrf.mxu0  ;;  %v10715_v5 = vld [vmem:[%s14222_s1 + $0x1e8c] ss:$16 sps:$4 sm:$0xff]  }
 0x3d2   : > { %v7625_v19 = vpop.f32.mrf.mxu1  ;;  %v14028_v47 = vadd.f32 %v7623_v42, %v7583_v46  ;;  %7877 = vmatpush1.bf16.msra.mxu0 %v10698_v34  ;;  %v10769_v0 = vld [vmem:[%s14222_s1 + $0x1f6c] ss:$16 sps:$4 sm:$0xff]   ;;  %v10770_v34 = vld [vmem:[%s14222_s1 + $0x1d48] ss:$16 sps:$4 sm:$0xff]  }
 0x3d3   : > { %7918 = vmatpush1.bf16.msra.mxu1 %v10701_v40  ;;  %v7585_v57 = vpop.f32.mrf.mxu0  ;;  %7878 = vmatprep.subr.bf16.mxu0 %v10706_v26  ;;  %v10772_v33 = vld [vmem:[%s14222_s1 + $0x1d4c] ss:$16 sps:$4 sm:$0xff]   ;;  %v10773_v40 = vld [vmem:[%s14222_s1 + $0x1f48] ss:$16 sps:$4 sm:$0xff]  }
 0x3d4   : > { %v7626_v17 = vpop.f32.mrf.mxu1  ;;  %7919 = vmatprep.subr.bf16.mxu1 %v10709_v27  ;;  %v10775_v20 = vld [vmem:[%s14222_s1 + $0x1f4c] ss:$16 sps:$4 sm:$0xff]   ;;  %v10776_v26 = vld [vmem:[%s14222_s1 + $0x1d28] ss:$16 sps:$4 sm:$0xff]  }
 0x3d5   : > { %v10778_v29 = vld [vmem:[%s14222_s1 + $0x1d2c] ss:$16 sps:$4 sm:$0xff]   ;;  %v10779_v27 = vld [vmem:[%s14222_s1 + $0x1f28] ss:$16 sps:$4 sm:$0xff]  }
 0x3d6   : > { %7879 = vmatpush1.bf16.msra.mxu0 %v10704_v51  ;;  %v10781_v42 = vld [vmem:[%s14222_s1 + $0x1f2c] ss:$16 sps:$4 sm:$0xff]   ;;  %v10782_v19 = vld [vmem:[%s14222_s1 + $0x1d08] ss:$16 sps:$4 sm:$0xff]  }
 0x3d7   : > { %7920 = vmatpush1.bf16.msra.mxu1 %v10707_v38  ;;  %7880 = vmatprep.subr.bf16.mxu0 %v10712_v4  ;;  %v10784_v46 = vld [vmem:[%s14222_s1 + $0x1d0c] ss:$16 sps:$4 sm:$0xff]   ;;  %v10785_v51 = vld [vmem:[%s14222_s1 + $0x1f08] ss:$16 sps:$4 sm:$0xff]  }
 0x3d8   : > { %7921 = vmatprep.subr.bf16.mxu1 %v10715_v5  ;;  %v10787_v18 = vld [vmem:[%s14222_s1 + $0x1f0c] ss:$16 sps:$4 sm:$0xff]  }
 0x3da   : > { %7881 = vmatpush1.bf16.msra.mxu0 %v10710_v61 }
 0x3db   : > { %7922 = vmatpush1.bf16.msra.mxu1 %v10713_v3  ;;  %7882 = vmatprep.subr.bf16.mxu0 %v10718_v59 }
 0x3dc   : > { %7923 = vmatprep.subr.bf16.mxu1 %v10721_v22 }
 0x3de   : > { %7883 = vmatpush1.bf16.msra.mxu0 %v10716_v23 }
 0x3df   : > { %7924 = vmatpush1.bf16.msra.mxu1 %v10719_v13  ;;  %7884 = vmatprep.subr.bf16.mxu0 %v10724_v50 }
 0x3e0   : > { %7925 = vmatprep.subr.bf16.mxu1 %v10727_v7 }
 0x3e2   : > { %7885 = vmatpush1.bf16.msra.mxu0 %v10722_v9 }
 0x3e3   : > { %7926 = vmatpush1.bf16.msra.mxu1 %v10725_v28  ;;  %7886 = vmatprep.subr.bf16.mxu0 %v10730_v10 }
 0x3e4   : > { %7927 = vmatprep.subr.bf16.mxu1 %v10733_v55 }
 0x3e6   : > { %7887 = vmatpush1.bf16.msra.mxu0 %v10728_v56 }
 0x3e7   : > { %7928 = vmatpush1.bf16.msra.mxu1 %v10731_v62  ;;  %7888 = vmatprep.subr.bf16.mxu0 %v10736_v11 }
 0x3e8   : > { %7929 = vmatprep.subr.bf16.mxu1 %v10739_v12 }
 0x3ea   : > { %7889 = vmatpush1.bf16.msra.mxu0 %v10734_v54 }
 0x3eb   : > { %7930 = vmatpush1.bf16.msra.mxu1 %v10737_v60  ;;  %7890 = vmatprep.subr.bf16.mxu0 %v10742_v16 }
 0x3ec   : > { %7931 = vmatprep.subr.bf16.mxu1 %v10745_v24 }
 0x3ee   : > { %7891 = vmatpush2.bf16.msra.mxu0 %v10740_v25 }
 0x3ef   : > { %7932 = vmatpush2.bf16.msra.mxu1 %v10743_v14  ;;  %7892 = vmatprep.subr.bf16.mxu0 %v10748_v15 }
 0x3f0   : > { %7933 = vmatprep.subr.bf16.mxu1 %v10751_v53 }
 0x3f2   : > { %7893 = vmatpush2.bf16.msra.mxu0 %v10746_v31 }
 0x3f3   : > { %7934 = vmatpush2.bf16.msra.mxu1 %v10749_v35  ;;  %7894 = vmatprep.subr.bf16.mxu0 %v10754_v21  ;;  %v7977_v35 = vsub.s32 0, %v10974_v43  ;;  %v7981_v21 = vsub.s32 1, %v10974_v43 }
 0x3f4   : > { %7935 = vmatprep.subr.bf16.mxu1 %v10757_v39  ;;  %v7973_v39 = vld [vmem:[%s14223_s2] sm:$0xf] }
 0x3f6   : > { %7895 = vmatpush2.bf16.msra.mxu0 %v10752_v30  ;;  %v7978_v30 = vrot.slane %v7973_v39, %v7977_v35 }
 0x3f7   : > { %7936 = vmatpush2.bf16.msra.mxu1 %v10755_v52  ;;  %7896 = vmatprep.subr.bf16.mxu0 %v10760_v36  ;;  %v7982_v52 = vrot.slane %v7973_v39, %v7981_v21 }
 0x3f8   : > { %7937 = vmatprep.subr.bf16.mxu1 %v10763_v41  ;;  %v7985_v41 = vsub.s32 2, %v10974_v43 }
 0x3fa   : > { %7897 = vmatpush2.bf16.msra.mxu0 %v10758_v2  ;;  %v7989_v2 = vsub.s32 3, %v10974_v43 }
 0x3fb   : > { %7938 = vmatpush2.bf16.msra.mxu1 %v10761_v8  ;;  %7898 = vmatprep.subr.bf16.mxu0 %v10766_v44  ;;  %v7991_v8 = vcombine.low %v7978_v30, %v7982_v52 }
 0x3fc   : > { %7939 = vmatprep.subr.bf16.mxu1 %v10769_v0 }
 0x3fe   : > { %7899 = vmatpush2.bf16.msra.mxu0 %v10764_v1 }
 0x3ff   : > { %7940 = vmatpush2.bf16.msra.mxu1 %v10767_v32  ;;  %7900 = vmatprep.subr.bf16.mxu0 %v10772_v33  ;;  %v7986_v33 = vrot.slane %v7973_v39, %v7985_v41 }
 0x400   : > { %7941 = vmatprep.subr.bf16.mxu1 %v10775_v20  ;;  %v7990_v20 = vrot.slane %v7973_v39, %v7989_v2 }
 0x402   : > { %7901 = vmatpush2.bf16.msra.mxu0 %v10770_v34  ;;  %v7992_v43 = vcombine.low %v7986_v33, %v7990_v20 }
 0x403   : > { %7942 = vmatpush2.bf16.msra.mxu1 %v10773_v40  ;;  %7902 = vmatprep.subr.bf16.mxu0 %v10778_v29  ;;  %v7995_v29 = vadd.f32 %v7991_v8, %v7960_v48 }
 0x404   : > { %7943 = vmatprep.subr.bf16.mxu1 %v10781_v42 }
 0x406   : > { %7903 = vmatpush2.bf16.msra.mxu0 %v10776_v26 }
 0x407   : > { %7944 = vmatpush2.bf16.msra.mxu1 %v10779_v27  ;;  %7904 = vmatprep.subr.bf16.mxu0 %v10784_v46 }
 0x408   : > { %7945 = vmatprep.subr.bf16.mxu1 %v10787_v18 }
 0x40a   : > { %7905 = vmatpush2.bf16.msra.mxu0 %v10782_v19 }
 0x40b   : > { %7946 = vmatpush2.bf16.msra.mxu1 %v10785_v51 }
 0x40d   : > { %v7662_v38 = vpop.f32.mrf.mxu0  ;;  %7907 = vmatmul.mubr.bf16.vlgmr.msra.gmra.mxu0 %v12373_v37 }
 0x40e   : > { %v7703_v57 = vpop.f32.mrf.mxu1  ;;  %7948 = vmatmul.mubr.bf16.vlgmr.msra.gmra.mxu1 %v12376_v58  ;;  %v7663_v17 = vadd.f32 %v7662_v38, %v14023_v6  ;;  %v7999_v38 = vcombine.high %v7995_v29, %v7995_v29 }
 0x40f   : > { %v7664_v4 = vpop.f32.mrf.mxu0 }
 0x410   : > { %v7705_v5 = vpop.f32.mrf.mxu1  ;;  %v7704_v61 = vadd.f32 %v7703_v57, %v7663_v17  ;;  %v7665_v3 = vadd.f32 %v7664_v4, %v14028_v47  ;;  %v9213_v4 = vpack.c.bf16 %v7999_v38, %v7995_v29 }
 0x411   : > { %v7666_v59 = vpop.f32.mrf.mxu0 }
 0x412   : > { %v7707_v22 = vpop.f32.mrf.mxu1  ;;  %v7706_v23 = vadd.f32 %v7705_v5, %v7665_v3  ;;  %v8019_v3 = vrot.slane %v9213_v4, %v10998_v49 }
 0x413   : > { %v7667_v13 = vpop.f32.mrf.mxu0 }
 0x414   : > { %v7708_v50 = vpop.f32.mrf.mxu1 }
 0x44d   : > { %v7744_v7 = vpop.f32.mrf.mxu0 }
 0x44e   : > { %v7785_v9 = vpop.f32.mrf.mxu1  ;;  %v7745_v28 = vadd.f32 %v7744_v7, %v7704_v61 }
 0x44f   : > { %v7746_v10 = vpop.f32.mrf.mxu0 }
 0x450   : > { %v7787_v55 = vpop.f32.mrf.mxu1  ;;  %v7786_v37 = vadd.f32 %v7785_v9, %v7745_v28  ;;  %v7747_v56 = vadd.f32 %v7746_v10, %v7706_v23 }
 0x451   : > { %v7748_v58 = vpop.f32.mrf.mxu0 }
 0x452   : > { %v7789_v62 = vpop.f32.mrf.mxu1  ;;  %v7788_v6 = vadd.f32 %v7787_v55, %v7747_v56 }
 0x453   : > { %v7749_v11 = vpop.f32.mrf.mxu0 }
 0x454   : > { %v7790_v12 = vpop.f32.mrf.mxu1 }
 0x48d   : > { %v7826_v54 = vpop.f32.mrf.mxu0 }
 0x48e   : > { %v7867_v60 = vpop.f32.mrf.mxu1  ;;  %v7827_v47 = vadd.f32 %v7826_v54, %v7786_v37 }
 0x48f   : > { %v7828_v16 = vpop.f32.mrf.mxu0 }
 0x490   : > { %v7869_v24 = vpop.f32.mrf.mxu1  ;;  %v7868_v25 = vadd.f32 %v7867_v60, %v7827_v47  ;;  %v7829_v36 = vadd.f32 %v7828_v16, %v7788_v6 }
 0x491   : > { %v7830_v14 = vpop.f32.mrf.mxu0 }
 0x492   : > { %v7871_v15 = vpop.f32.mrf.mxu1  ;;  %v7870_v1 = vadd.f32 %v7869_v24, %v7829_v36 }
 0x493   : > { %v7831_v53 = vpop.f32.mrf.mxu0 }
 0x494   : > { %v7872_v31 = vpop.f32.mrf.mxu1 }
 0x4cd   : > { %v7908_v44 = vpop.f32.mrf.mxu0 }
 0x4ce   : > { %v7949_v0 = vpop.f32.mrf.mxu1  ;;  %v7909_v32 = vadd.f32 %v7908_v44, %v7868_v25 }
 0x4cf   : > { %v7910_v34 = vpop.f32.mrf.mxu0 }
 0x4d0   : > { %v7951_v40 = vpop.f32.mrf.mxu1  ;;  %v7911_v42 = vadd.f32 %v7910_v34, %v7870_v1  ;;  %v7950_v46 = vadd.f32 %v7949_v0, %v7909_v32 }
 0x4d1   : > { %v7912_v26 = vpop.f32.mrf.mxu0 }
 0x4d2   : > { %v7953_v27 = vpop.f32.mrf.mxu1  ;;  %v7952_v18 = vadd.f32 %v7951_v40, %v7911_v42 }
 0x4d3   : > { %v7913_v19 = vpop.f32.mrf.mxu0 }
 0x4d4   : > { %v7954_v51 = vpop.f32.mrf.mxu1  ;;  %v7961_v57 = vcombine.low %v7950_v46, %v7952_v18 }
 0x4d6   : > { %v7996_v17 = vadd.f32 %v7992_v43, %v7961_v57 }
 0x4d8   : > { %v8000_v5 = vcombine.high %v7996_v17, %v7996_v17 }
 0x4da   : > { %v9214_v61 = vpack.c.bf16 %v8000_v5, %v7996_v17 }
 0x4dc   : > { %v8026_v63 = vrot.slane %v9214_v61, %v10998_v49 }
 0x4de   : > { %v8027_v45 = vcombine.low %v8019_v3, %v8026_v63 }
 0x4e0   : > { %8029 = vst [vmem:[%s306_s16] sm:$0xff] %v8027_v45 }
 0x4e1 PF: > { %s13_s14 = sadd.s32 1, %s10810_s14   ;;  %s14225_s12 = smov %s10806_s13 }
 0x4e2   : > { %p10_p5 = scmp.ge.s32.totalorder %s13_s14, 4   ;;  %s14226_s13 = smov %s14228_s15 }
 0x4e4   :  { %12 = sbr.rel (!%p10_p5) target bundleno = 2 (0x2), region = 76 }

// kernel: dis_forward.15
= control target key start
LH: loop header
LB: loop body
LE: loop exit
PB: predicated region body
PF: predicated region fallthrough
CT: control target
= control target key end

     0   :  { %s8014_s12 = smov 0   ;;  %s8016_s13 = smov 0   ;;  %s9670_s0 = inlined_call_operand.vmem [shape: bf16[2,4,8192], index: 0, kind: input, shape index: {}]   ;;  %s9671_s1 = inlined_call_operand.vmem [shape: bf16[8192,128], index: 1, kind: input, shape index: {}]   ;;  %s9672_s2 = inlined_call_operand.vmem [shape: f32[1,128], index: 2, kind: input, shape index: {}]   ;;  %s9673_s3 = inlined_call_operand.vmem [shape: f32[2,4,128], index: 3, kind: output, shape index: {}]  }
   0x1   :  { %s8018_s14 = smov 0  }
   0x2 LB: > { %s39_s15 = sadd.s32 1, %s7986_s13  ;;  %p6190_p0 = scmp.ge.s32.totalorder %s7990_s14, 1  ;;  %s7990_s14 = sphi %s8018_s14, %s13_s14   ;;  %s7986_s13 = sphi %s8016_s13, %s9675_s13   ;;  %s7982_s12 = sphi %s8014_s12, %s9674_s12  }
   0x3   : > { %p41_p1 = scmp.ge.s32.totalorder %s39_s15, 2  ;;  %p204_p2 = scmp.lt.s32.totalorder %s7990_s14, 3 }
   0x5   : > { %s9677_s15 = smov (%p41_p1, %s39_s15), 0  ;;  %p205_p3 = pnand %p6190_p0, %p204_p2 }
   0x6   : > { %p253_p4 = scmp.lt.s32.totalorder (!%p205_p3), %s7982_s12, 1 }
   0x7   : > { %208 = sbr.rel (%p205_p3) target bundleno = 740 (0x2e4), region = 32 }
   0xc   : > { %v7440_v0 = vld [vmem:[%s9671_s1 + $0x78] sm:$0xff]   ;;  %v7444_v4 = vld [vmem:[%s9671_s1 + $0x70] sm:$0xff]   ;;  %v7448_v8 = vld [vmem:[%s9671_s1 + $0x68] sm:$0xff]   ;;  %s9679_s12 = smov (!%p253_p4, %s7982_s12), 1  ;;  %v1355_v28 = vlaneseq  ;;  %v7992_v36 = vmov 1983009808  }
   0xd   : > { %v7441_v1 = vld [vmem:[%s9671_s1 + $0xf8] sm:$0xff]   ;;  %6710 = vmatprep.subr.bf16.mxu0 %v7440_v0  ;;  %v7445_v5 = vld [vmem:[%s9671_s1 + $0xf0] sm:$0xff]   ;;  %v7449_v9 = vld [vmem:[%s9671_s1 + $0xe8] sm:$0xff]   ;;  %s6709_s24 = sshll.u32 %s9679_s12, 7  ;;  %v1353_v37 = vunpack.c.l.s4 %v7992_v36 }
   0xe   : > { %v7442_v2 = vld [vmem:[%s9671_s1 + $0x38] sm:$0xff]   ;;  %6732 = vmatprep.subr.bf16.mxu1 %v7441_v1  ;;  %v7446_v6 = vld [vmem:[%s9671_s1 + $0x30] sm:$0xff]   ;;  %v7450_v10 = vld [vmem:[%s9671_s1 + $0x28] sm:$0xff]   ;;  %s8132_s6 = scalar_lea.vmem %s9670_s0, %s6709_s24  ;;  %v1356_v33 = vshrl.u32 %v1355_v28, 7 }
   0xf   : > { %v7443_v3 = vld [vmem:[%s9671_s1 + $0xb8] sm:$0xff]   ;;  %6711 = vmatpush3.bf16.msra.mxu0 %v7442_v2  ;;  %v7447_v7 = vld [vmem:[%s9671_s1 + $0xb0] sm:$0xff]   ;;  %v7451_v11 = vld [vmem:[%s9671_s1 + $0xa8] sm:$0xff]   ;;  %v1354_v39 = vunpack.c.0.s8 %v1353_v37 }
  0x10   : > { %6733 = vmatpush3.bf16.msra.mxu1 %v7443_v3  ;;  %6712 = vmatprep.subr.bf16.mxu0 %v7444_v4  ;;  %v7452_v12 = vld [vmem:[%s9671_s1 + $0x60] sm:$0xff]   ;;  %v7456_v16 = vld [vmem:[%s9671_s1 + $0x58] sm:$0xff]   ;;  %v7460_v20 = vld [vmem:[%s9671_s1 + $0x50] sm:$0xff]  }
  0x11   : > { %6734 = vmatprep.subr.bf16.mxu1 %v7445_v5  ;;  %v7453_v13 = vld [vmem:[%s9671_s1 + $0xe0] sm:$0xff]   ;;  %v7457_v17 = vld [vmem:[%s9671_s1 + $0xd8] sm:$0xff]   ;;  %v7461_v21 = vld [vmem:[%s9671_s1 + $0xd0] sm:$0xff]   ;;  %v8147_v41 = vsub.s32 %v1354_v39, %v1356_v33 }
  0x12   : > { %v7454_v14 = vld [vmem:[%s9671_s1 + $0x20] sm:$0xff]   ;;  %v7458_v18 = vld [vmem:[%s9671_s1 + $0x18] sm:$0xff]   ;;  %v7462_v22 = vld [vmem:[%s9671_s1 + $0x10] sm:$0xff]  }
  0x13   : > { %6713 = vmatpush3.bf16.msra.mxu0 %v7446_v6  ;;  %v7455_v15 = vld [vmem:[%s9671_s1 + $0xa0] sm:$0xff]   ;;  %v7459_v19 = vld [vmem:[%s9671_s1 + $0x98] sm:$0xff]   ;;  %v7463_v23 = vld [vmem:[%s9671_s1 + $0x90] sm:$0xff]  }
  0x14   : > { %6735 = vmatpush3.bf16.msra.mxu1 %v7447_v7  ;;  %6714 = vmatprep.subr.bf16.mxu0 %v7448_v8  ;;  %v7464_v24 = vld [vmem:[%s9671_s1 + $0x48] sm:$0xff]   ;;  %v7468_v29 = vld [vmem:[%s9671_s1 + $0x40] sm:$0xff]   ;;  %v7473_v35 = vld [vmem:[%s9671_s1 + $0x178] sm:$0xff]  }
  0x15   : > { %6736 = vmatprep.subr.bf16.mxu1 %v7449_v9  ;;  %v7465_v25 = vld [vmem:[%s9671_s1 + $0xc8] sm:$0xff]   ;;  %v7469_v30 = vld [vmem:[%s9671_s1 + $0xc0] sm:$0xff]   ;;  %v7474_v38 = vld [vmem:[%s9671_s1 + $0x1f8] sm:$0xff]  }
  0x16   : > { %v7466_v26 = vld [vmem:[%s9671_s1 + $0x8] sm:$0xff]   ;;  %v7470_v31 = vld [vmem:[%s9671_s1] sm:$0xff]   ;;  %v7475_v44 = vld [vmem:[%s9671_s1 + $0x138] sm:$0xff]  }
  0x17   : > { %6715 = vmatpush3.bf16.msra.mxu0 %v7450_v10  ;;  %v7467_v27 = vld [vmem:[%s9671_s1 + $0x88] sm:$0xff]   ;;  %v7471_v32 = vld [vmem:[%s9671_s1 + $0x80] sm:$0xff]   ;;  %v7476_v45 = vld [vmem:[%s9671_s1 + $0x1b8] sm:$0xff]  }
  0x18   : > { %6737 = vmatpush3.bf16.msra.mxu1 %v7451_v11  ;;  %6716 = vmatprep.subr.bf16.mxu0 %v7452_v12  ;;  %v295_v34 = vld [vmem:[%s8132_s6] sm:$0xff]  ;;  %v7477_v48 = vld [vmem:[%s9671_s1 + $0x170] sm:$0xff]   ;;  %v7481_v52 = vld [vmem:[%s9671_s1 + $0x168] sm:$0xff]  }
  0x19   : > { %6738 = vmatprep.subr.bf16.mxu1 %v7453_v13  ;;  %v1351_v40 = vcombine.high %v295_v34, %v295_v34  ;;  %v1358_v42 = vrot.slane %v295_v34, %v8147_v41  ;;  %v7478_v49 = vld [vmem:[%s9671_s1 + $0x1f0] sm:$0xff]   ;;  %v7482_v53 = vld [vmem:[%s9671_s1 + $0x1e8] sm:$0xff]   ;;  %v7485_v56 = vld [vmem:[%s9671_s1 + $0x160] sm:$0xff]  }
  0x1a   : > { %v7479_v50 = vld [vmem:[%s9671_s1 + $0x130] sm:$0xff]   ;;  %v7483_v54 = vld [vmem:[%s9671_s1 + $0x128] sm:$0xff]   ;;  %v7486_v57 = vld [vmem:[%s9671_s1 + $0x1e0] sm:$0xff]  }
  0x1b   : > { %6717 = vmatpush3.bf16.msra.mxu0 %v7454_v14  ;;  %v1365_v43 = vrot.slane %v1351_v40, %v8147_v41  ;;  %v1366_v46 = vcombine.high %v1358_v42, %v1358_v42  ;;  %v7480_v51 = vld [vmem:[%s9671_s1 + $0x1b0] sm:$0xff]   ;;  %v7484_v55 = vld [vmem:[%s9671_s1 + $0x1a8] sm:$0xff]   ;;  %v7487_v58 = vld [vmem:[%s9671_s1 + $0x120] sm:$0xff]  }
  0x1c   : > { %6739 = vmatpush3.bf16.msra.mxu1 %v7455_v15  ;;  %6718 = vmatprep.subr.bf16.mxu0 %v7456_v16  ;;  %v7488_v59 = vld [vmem:[%s9671_s1 + $0x1a0] sm:$0xff]   ;;  %v7489_v60 = vld [vmem:[%s9671_s1 + $0x158] sm:$0xff]   ;;  %v7493_v0 = vld [vmem:[%s9671_s1 + $0x150] sm:$0xff]  }
  0x1d   : > { %6740 = vmatprep.subr.bf16.mxu1 %v7457_v17  ;;  %v1367_v47 = vcombine.high %v1365_v43, %v1365_v43  ;;  %4791 = vmatprep.mubr.bf16.mxu0 %v1366_v46  ;;  %v7490_v61 = vld [vmem:[%s9671_s1 + $0x1d8] sm:$0xff]   ;;  %v7494_v1 = vld [vmem:[%s9671_s1 + $0x1d0] sm:$0xff]   ;;  %v7497_v4 = vld [vmem:[%s9671_s1 + $0x148] sm:$0xff]  }
  0x1e   : > { %v7491_v62 = vld [vmem:[%s9671_s1 + $0x118] sm:$0xff]   ;;  %v7495_v2 = vld [vmem:[%s9671_s1 + $0x110] sm:$0xff]   ;;  %v7498_v5 = vld [vmem:[%s9671_s1 + $0x1c8] sm:$0xff]  }
  0x1f   : > { %6719 = vmatpush3.bf16.msra.mxu0 %v7458_v18  ;;  %4831 = vmatprep.mubr.bf16.mxu1 %v1367_v47  ;;  %v7492_v63 = vld [vmem:[%s9671_s1 + $0x198] sm:$0xff]   ;;  %v7496_v3 = vld [vmem:[%s9671_s1 + $0x190] sm:$0xff]   ;;  %v7499_v6 = vld [vmem:[%s9671_s1 + $0x108] sm:$0xff]  }
  0x20   : > { %6741 = vmatpush3.bf16.msra.mxu1 %v7459_v19  ;;  %6720 = vmatprep.subr.bf16.mxu0 %v7460_v20  ;;  %v7500_v7 = vld [vmem:[%s9671_s1 + $0x188] sm:$0xff]   ;;  %v7501_v9 = vld [vmem:[%s9671_s1 + $0x140] sm:$0xff]   ;;  %v7506_v18 = vld [vmem:[%s9671_s1 + $0x278] sm:$0xff]  }
  0x21   : > { %6742 = vmatprep.subr.bf16.mxu1 %v7461_v21  ;;  %v296_v8 = vld [vmem:[%s8132_s6 + $0x8] sm:$0xff]  ;;  %v7502_v12 = vld [vmem:[%s9671_s1 + $0x1c0] sm:$0xff]   ;;  %v7507_v19 = vld [vmem:[%s9671_s1 + $0x2f8] sm:$0xff]  }
  0x22   : > { %v1375_v10 = vrot.slane %v296_v8, %v8147_v41  ;;  %v1368_v11 = vcombine.high %v296_v8, %v296_v8  ;;  %v7503_v13 = vld [vmem:[%s9671_s1 + $0x100] sm:$0xff]   ;;  %v7508_v20 = vld [vmem:[%s9671_s1 + $0x238] sm:$0xff]   ;;  %v7516_v28 = vld [vmem:[%s9671_s1 + $0x228] sm:$0xff]  }
  0x23   : > { %6721 = vmatpush3.bf16.msra.mxu0 %v7462_v22  ;;  %v7504_v16 = vld [vmem:[%s9671_s1 + $0x180] sm:$0xff]   ;;  %v7509_v21 = vld [vmem:[%s9671_s1 + $0x2b8] sm:$0xff]   ;;  %v7510_v22 = vld [vmem:[%s9671_s1 + $0x270] sm:$0xff]  }
  0x24   : > { %6743 = vmatpush3.bf16.msra.mxu1 %v7463_v23  ;;  %6722 = vmatprep.subr.bf16.mxu0 %v7464_v24  ;;  %v1383_v14 = vcombine.high %v1375_v10, %v1375_v10  ;;  %v1382_v15 = vrot.slane %v1368_v11, %v8147_v41  ;;  %v7511_v23 = vld [vmem:[%s9671_s1 + $0x2f0] sm:$0xff]   ;;  %v7521_v33 = vld [vmem:[%s9671_s1 + $0x2a0] sm:$0xff]   ;;  %v7522_v34 = vld [vmem:[%s9671_s1 + $0x258] sm:$0xff]  }
  0x25   : > { %6744 = vmatprep.subr.bf16.mxu1 %v7465_v25  ;;  %v7512_v24 = vld [vmem:[%s9671_s1 + $0x230] sm:$0xff]   ;;  %v7524_v36 = vld [vmem:[%s9671_s1 + $0x218] sm:$0xff]   ;;  %v7533_v46 = vld [vmem:[%s9671_s1 + $0x288] sm:$0xff]  }
  0x26   : > { %v1384_v17 = vcombine.high %v1382_v15, %v1382_v15  ;;  %v7513_v25 = vld [vmem:[%s9671_s1 + $0x2b0] sm:$0xff]   ;;  %v7525_v37 = vld [vmem:[%s9671_s1 + $0x298] sm:$0xff]   ;;  %v7554_v8 = vld [vmem:[%s9671_s1 + $0x3a0] sm:$0xff]  }
  0x27   : > { %6723 = vmatpush3.bf16.msra.mxu0 %v7466_v26  ;;  %v7514_v26 = vld [vmem:[%s9671_s1 + $0x268] sm:$0xff]   ;;  %v7527_v39 = vld [vmem:[%s9671_s1 + $0x2d0] sm:$0xff]   ;;  %v7557_v11 = vld [vmem:[%s9671_s1 + $0x318] sm:$0xff]  }
  0x28   : > { %6745 = vmatpush3.bf16.msra.mxu1 %v7467_v27  ;;  %6724 = vmatprep.subr.bf16.mxu0 %v7468_v29  ;;  %v7515_v27 = vld [vmem:[%s9671_s1 + $0x2e8] sm:$0xff]   ;;  %v7528_v40 = vld [vmem:[%s9671_s1 + $0x210] sm:$0xff]  }
  0x29   : > { %6746 = vmatprep.subr.bf16.mxu1 %v7469_v30  ;;  %v7517_v29 = vld [vmem:[%s9671_s1 + $0x2a8] sm:$0xff]   ;;  %v7518_v30 = vld [vmem:[%s9671_s1 + $0x260] sm:$0xff]   ;;  %v297_v47 = vld [vmem:[%s8132_s6 + $0x10] sm:$0xff] }
  0x2b   : > { %6725 = vmatpush3.bf16.msra.mxu0 %v7470_v31  ;;  %v7519_v31 = vld [vmem:[%s9671_s1 + $0x2e0] sm:$0xff]  }
  0x2c   : > { %6747 = vmatpush3.bf16.msra.mxu1 %v7471_v32  ;;  %6754 = vmatprep.subr.bf16.mxu0 %v7473_v35  ;;  %v7520_v32 = vld [vmem:[%s9671_s1 + $0x220] sm:$0xff]   ;;  %v7523_v35 = vld [vmem:[%s9671_s1 + $0x2d8] sm:$0xff]  }
  0x2d   : > { %6776 = vmatprep.subr.bf16.mxu1 %v7474_v38  ;;  %v7526_v38 = vld [vmem:[%s9671_s1 + $0x250] sm:$0xff]  }
  0x2e   : > { %4792 = vmatmul.mubr.bf16.vlgmr.msra.gmra.mxu0 %v1358_v42  ;;  %v7529_v42 = vld [vmem:[%s9671_s1 + $0x290] sm:$0xff]  }
  0x2f   : > { %4832 = vmatmul.mubr.bf16.vlgmr.msra.gmra.mxu1 %v1365_v43  ;;  %6755 = vmatpush3.bf16.msra.mxu0 %v7475_v44  ;;  %v7530_v43 = vld [vmem:[%s9671_s1 + $0x248] sm:$0xff]  }
  0x30   : > { %6777 = vmatpush3.bf16.msra.mxu1 %v7476_v45  ;;  %6756 = vmatprep.subr.bf16.mxu0 %v7477_v48  ;;  %v7531_v44 = vld [vmem:[%s9671_s1 + $0x2c8] sm:$0xff]   ;;  %v7534_v48 = vld [vmem:[%s9671_s1 + $0x240] sm:$0xff]  }
  0x31   : > { %6778 = vmatprep.subr.bf16.mxu1 %v7478_v49  ;;  %4871 = vmatprep.mubr.bf16.mxu0 %v1383_v14  ;;  %v7532_v45 = vld [vmem:[%s9671_s1 + $0x208] sm:$0xff]   ;;  %v1392_v49 = vrot.slane %v297_v47, %v8147_v41  ;;  %v7560_v14 = vld [vmem:[%s9671_s1 + $0x3d0] sm:$0xff]  }
  0x32   : > { %4911 = vmatprep.mubr.bf16.mxu1 %v1384_v17  ;;  %v7563_v17 = vld [vmem:[%s9671_s1 + $0x348] sm:$0xff]  }
  0x33   : > { %6757 = vmatpush3.bf16.msra.mxu0 %v7479_v50  ;;  %v1385_v50 = vcombine.high %v297_v47, %v297_v47  ;;  %v7587_v47 = vld [vmem:[%s9671_s1 + $0x4a0] sm:$0xff]  }
  0x34   : > { %6779 = vmatpush3.bf16.msra.mxu1 %v7480_v51  ;;  %6758 = vmatprep.subr.bf16.mxu0 %v7481_v52  ;;  %v7535_v51 = vld [vmem:[%s9671_s1 + $0x2c0] sm:$0xff]  }
  0x35   : > { %6780 = vmatprep.subr.bf16.mxu1 %v7482_v53  ;;  %v7536_v52 = vld [vmem:[%s9671_s1 + $0x200] sm:$0xff]   ;;  %v1400_v53 = vcombine.high %v1392_v49, %v1392_v49 }
  0x37   : > { %6759 = vmatpush3.bf16.msra.mxu0 %v7483_v54  ;;  %v1399_v54 = vrot.slane %v1385_v50, %v8147_v41  ;;  %v7590_v50 = vld [vmem:[%s9671_s1 + $0x418] sm:$0xff]  }
  0x38   : > { %6781 = vmatpush3.bf16.msra.mxu1 %v7484_v55  ;;  %6760 = vmatprep.subr.bf16.mxu0 %v7485_v56  ;;  %v7537_v55 = vld [vmem:[%s9671_s1 + $0x280] sm:$0xff]  }
  0x39   : > { %6782 = vmatprep.subr.bf16.mxu1 %v7486_v57  ;;  %v1401_v56 = vcombine.high %v1399_v54, %v1399_v54  ;;  %v7539_v57 = vld [vmem:[%s9671_s1 + $0x378] sm:$0xff]  }
  0x3b   : > { %6761 = vmatpush3.bf16.msra.mxu0 %v7487_v58  ;;  %v7540_v58 = vld [vmem:[%s9671_s1 + $0x3f8] sm:$0xff]  }
  0x3c   : > { %6783 = vmatpush3.bf16.msra.mxu1 %v7488_v59  ;;  %6762 = vmatprep.subr.bf16.mxu0 %v7489_v60  ;;  %v7541_v59 = vld [vmem:[%s9671_s1 + $0x338] sm:$0xff]  }
  0x3d   : > { %6784 = vmatprep.subr.bf16.mxu1 %v7490_v61  ;;  %v7542_v60 = vld [vmem:[%s9671_s1 + $0x3b8] sm:$0xff]   ;;  %v7543_v61 = vld [vmem:[%s9671_s1 + $0x370] sm:$0xff]  }
  0x3f   : > { %6763 = vmatpush3.bf16.msra.mxu0 %v7491_v62  ;;  %v7544_v62 = vld [vmem:[%s9671_s1 + $0x3f0] sm:$0xff]  }
  0x40   : > { %6785 = vmatpush3.bf16.msra.mxu1 %v7492_v63  ;;  %6764 = vmatprep.subr.bf16.mxu0 %v7493_v0  ;;  %v7545_v63 = vld [vmem:[%s9671_s1 + $0x330] sm:$0xff]  }
  0x41   : > { %6786 = vmatprep.subr.bf16.mxu1 %v7494_v1  ;;  %v7546_v0 = vld [vmem:[%s9671_s1 + $0x3b0] sm:$0xff]   ;;  %v7547_v1 = vld [vmem:[%s9671_s1 + $0x368] sm:$0xff]  }
  0x43   : > { %6765 = vmatpush3.bf16.msra.mxu0 %v7495_v2  ;;  %v7548_v2 = vld [vmem:[%s9671_s1 + $0x3e8] sm:$0xff]  }
  0x44   : > { %6787 = vmatpush3.bf16.msra.mxu1 %v7496_v3  ;;  %6766 = vmatprep.subr.bf16.mxu0 %v7497_v4  ;;  %v7549_v3 = vld [vmem:[%s9671_s1 + $0x328] sm:$0xff]  }
  0x45   : > { %6788 = vmatprep.subr.bf16.mxu1 %v7498_v5  ;;  %v7550_v4 = vld [vmem:[%s9671_s1 + $0x3a8] sm:$0xff]   ;;  %v7551_v5 = vld [vmem:[%s9671_s1 + $0x360] sm:$0xff]  }
  0x47   : > { %6767 = vmatpush3.bf16.msra.mxu0 %v7499_v6  ;;  %v7552_v6 = vld [vmem:[%s9671_s1 + $0x3e0] sm:$0xff]  }
  0x48   : > { %6789 = vmatpush3.bf16.msra.mxu1 %v7500_v7  ;;  %6768 = vmatprep.subr.bf16.mxu0 %v7501_v9  ;;  %v7553_v7 = vld [vmem:[%s9671_s1 + $0x320] sm:$0xff]   ;;  %v7555_v9 = vld [vmem:[%s9671_s1 + $0x358] sm:$0xff]  }
  0x49   : > { %6790 = vmatprep.subr.bf16.mxu1 %v7502_v12  ;;  %v7558_v12 = vld [vmem:[%s9671_s1 + $0x398] sm:$0xff]  }
  0x4b   : > { %6769 = vmatpush3.bf16.msra.mxu0 %v7503_v13  ;;  %v7559_v13 = vld [vmem:[%s9671_s1 + $0x350] sm:$0xff]  }
  0x4c   : > { %6791 = vmatpush3.bf16.msra.mxu1 %v7504_v16  ;;  %6798 = vmatprep.subr.bf16.mxu0 %v7506_v18  ;;  %v7562_v16 = vld [vmem:[%s9671_s1 + $0x390] sm:$0xff]   ;;  %v7564_v18 = vld [vmem:[%s9671_s1 + $0x3c8] sm:$0xff]  }
  0x4d   : > { %6820 = vmatprep.subr.bf16.mxu1 %v7507_v19  ;;  %v7565_v19 = vld [vmem:[%s9671_s1 + $0x308] sm:$0xff]  }
  0x4e   : > { %4872 = vmatmul.mubr.bf16.vlgmr.msra.gmra.mxu0 %v1375_v10  ;;  %v7556_v10 = vld [vmem:[%s9671_s1 + $0x3d8] sm:$0xff]  }
  0x4f   : > { %4912 = vmatmul.mubr.bf16.vlgmr.msra.gmra.mxu1 %v1382_v15  ;;  %6799 = vmatpush3.bf16.msra.mxu0 %v7508_v20  ;;  %v7561_v15 = vld [vmem:[%s9671_s1 + $0x310] sm:$0xff]   ;;  %v7566_v20 = vld [vmem:[%s9671_s1 + $0x388] sm:$0xff]  }
  0x50   : > { %6821 = vmatpush3.bf16.msra.mxu1 %v7509_v21  ;;  %6800 = vmatprep.subr.bf16.mxu0 %v7510_v22  ;;  %v7567_v21 = vld [vmem:[%s9671_s1 + $0x340] sm:$0xff]   ;;  %v298_v22 = vld [vmem:[%s8132_s6 + $0x18] sm:$0xff] }
  0x51   : > { %6822 = vmatprep.subr.bf16.mxu1 %v7511_v23  ;;  %4951 = vmatprep.mubr.bf16.mxu0 %v1400_v53  ;;  %v7568_v23 = vld [vmem:[%s9671_s1 + $0x3c0] sm:$0xff]   ;;  %v7593_v53 = vld [vmem:[%s9671_s1 + $0x4d0] sm:$0xff]  }
  0x52   : > { %4991 = vmatprep.mubr.bf16.mxu1 %v1401_v56  ;;  %v7596_v56 = vld [vmem:[%s9671_s1 + $0x448] sm:$0xff]  }
  0x53   : > { %6801 = vmatpush3.bf16.msra.mxu0 %v7512_v24  ;;  %v1409_v24 = vrot.slane %v298_v22, %v8147_v41 }
  0x54   : > { %6823 = vmatpush3.bf16.msra.mxu1 %v7513_v25  ;;  %6802 = vmatprep.subr.bf16.mxu0 %v7514_v26  ;;  %v1402_v25 = vcombine.high %v298_v22, %v298_v22  ;;  %v7569_v26 = vld [vmem:[%s9671_s1 + $0x300] sm:$0xff]   ;;  %v7621_v22 = vld [vmem:[%s9671_s1 + $0x558] sm:$0xff]  }
  0x55   : > { %6824 = vmatprep.subr.bf16.mxu1 %v7515_v27  ;;  %v7570_v27 = vld [vmem:[%s9671_s1 + $0x380] sm:$0xff]  }
  0x57   : > { %6803 = vmatpush3.bf16.msra.mxu0 %v7516_v28  ;;  %v1417_v28 = vcombine.high %v1409_v24, %v1409_v24 }
  0x58   : > { %6825 = vmatpush3.bf16.msra.mxu1 %v7517_v29  ;;  %6804 = vmatprep.subr.bf16.mxu0 %v7518_v30  ;;  %v1416_v29 = vrot.slane %v1402_v25, %v8147_v41  ;;  %v7572_v30 = vld [vmem:[%s9671_s1 + $0x478] sm:$0xff]  }
  0x59   : > { %6826 = vmatprep.subr.bf16.mxu1 %v7519_v31  ;;  %v7624_v25 = vld [vmem:[%s9671_s1 + $0x598] sm:$0xff]  }
  0x5a   : > { %v1418_v31 = vcombine.high %v1416_v29, %v1416_v29 }
  0x5b   : > { %6805 = vmatpush3.bf16.msra.mxu0 %v7520_v32  ;;  %v7573_v32 = vld [vmem:[%s9671_s1 + $0x4f8] sm:$0xff]  }
  0x5c   : > { %6827 = vmatpush3.bf16.msra.mxu1 %v7521_v33  ;;  %6806 = vmatprep.subr.bf16.mxu0 %v7522_v34  ;;  %v7574_v33 = vld [vmem:[%s9671_s1 + $0x438] sm:$0xff]  }
  0x5d   : > { %6828 = vmatprep.subr.bf16.mxu1 %v7523_v35  ;;  %v7575_v34 = vld [vmem:[%s9671_s1 + $0x4b8] sm:$0xff]   ;;  %v7576_v35 = vld [vmem:[%s9671_s1 + $0x470] sm:$0xff]  }
  0x5f   : > { %6807 = vmatpush3.bf16.msra.mxu0 %v7524_v36  ;;  %v7577_v36 = vld [vmem:[%s9671_s1 + $0x4f0] sm:$0xff]  }
  0x60   : > { %6829 = vmatpush3.bf16.msra.mxu1 %v7525_v37  ;;  %6808 = vmatprep.subr.bf16.mxu0 %v7526_v38  ;;  %v7578_v37 = vld [vmem:[%s9671_s1 + $0x430] sm:$0xff]  }
  0x61   : > { %6830 = vmatprep.subr.bf16.mxu1 %v7527_v39  ;;  %v7579_v38 = vld [vmem:[%s9671_s1 + $0x4b0] sm:$0xff]   ;;  %v7580_v39 = vld [vmem:[%s9671_s1 + $0x468] sm:$0xff]  }
  0x63   : > { %6809 = vmatpush3.bf16.msra.mxu0 %v7528_v40  ;;  %v7581_v40 = vld [vmem:[%s9671_s1 + $0x4e8] sm:$0xff]  }
  0x64   : > { %6831 = vmatpush3.bf16.msra.mxu1 %v7529_v42  ;;  %6810 = vmatprep.subr.bf16.mxu0 %v7530_v43  ;;  %v7582_v42 = vld [vmem:[%s9671_s1 + $0x428] sm:$0xff]  }
  0x65   : > { %6832 = vmatprep.subr.bf16.mxu1 %v7531_v44  ;;  %v7583_v43 = vld [vmem:[%s9671_s1 + $0x4a8] sm:$0xff]   ;;  %v7584_v44 = vld [vmem:[%s9671_s1 + $0x460] sm:$0xff]  }
  0x67   : > { %6811 = vmatpush3.bf16.msra.mxu0 %v7532_v45  ;;  %v7585_v45 = vld [vmem:[%s9671_s1 + $0x4e0] sm:$0xff]  }
  0x68   : > { %6833 = vmatpush3.bf16.msra.mxu1 %v7533_v46  ;;  %6812 = vmatprep.subr.bf16.mxu0 %v7534_v48  ;;  %v7586_v46 = vld [vmem:[%s9671_s1 + $0x420] sm:$0xff]   ;;  %v7588_v48 = vld [vmem:[%s9671_s1 + $0x458] sm:$0xff]  }
  0x69   : > { %6834 = vmatprep.subr.bf16.mxu1 %v7535_v51  ;;  %v7591_v51 = vld [vmem:[%s9671_s1 + $0x498] sm:$0xff]  }
  0x6b   : > { %6813 = vmatpush3.bf16.msra.mxu0 %v7536_v52  ;;  %v7592_v52 = vld [vmem:[%s9671_s1 + $0x450] sm:$0xff]  }
  0x6c   : > { %6835 = vmatpush3.bf16.msra.mxu1 %v7537_v55  ;;  %6842 = vmatprep.subr.bf16.mxu0 %v7539_v57  ;;  %v7595_v55 = vld [vmem:[%s9671_s1 + $0x490] sm:$0xff]   ;;  %v7597_v57 = vld [vmem:[%s9671_s1 + $0x4c8] sm:$0xff]  }
  0x6d   : > { %6864 = vmatprep.subr.bf16.mxu1 %v7540_v58  ;;  %v7598_v58 = vld [vmem:[%s9671_s1 + $0x408] sm:$0xff]  }
  0x6e   : > { %4952 = vmatmul.mubr.bf16.vlgmr.msra.gmra.mxu0 %v1392_v49  ;;  %v7589_v49 = vld [vmem:[%s9671_s1 + $0x4d8] sm:$0xff]  }
  0x6f   : > { %4992 = vmatmul.mubr.bf16.vlgmr.msra.gmra.mxu1 %v1399_v54  ;;  %6843 = vmatpush3.bf16.msra.mxu0 %v7541_v59  ;;  %v7594_v54 = vld [vmem:[%s9671_s1 + $0x410] sm:$0xff]   ;;  %v7599_v59 = vld [vmem:[%s9671_s1 + $0x488] sm:$0xff]  }
  0x70   : > { %6865 = vmatpush3.bf16.msra.mxu1 %v7542_v60  ;;  %6844 = vmatprep.subr.bf16.mxu0 %v7543_v61  ;;  %v7600_v60 = vld [vmem:[%s9671_s1 + $0x440] sm:$0xff]  }
  0x71   : > { %6866 = vmatprep.subr.bf16.mxu1 %v7544_v62  ;;  %5031 = vmatprep.mubr.bf16.mxu0 %v1417_v28  ;;  %v299_v61 = vld [vmem:[%s8132_s6 + $0x20] sm:$0xff]  ;;  %v7627_v28 = vld [vmem:[%s9671_s1 + $0x510] sm:$0xff]  }
  0x72   : > { %5071 = vmatprep.mubr.bf16.mxu1 %v1418_v31  ;;  %v7601_v62 = vld [vmem:[%s9671_s1 + $0x4c0] sm:$0xff]   ;;  %v7630_v31 = vld [vmem:[%s9671_s1 + $0x5c8] sm:$0xff]  }
  0x73   : > { %6845 = vmatpush3.bf16.msra.mxu0 %v7545_v63  ;;  %v1426_v63 = vrot.slane %v299_v61, %v8147_v41 }
  0x74   : > { %6867 = vmatpush3.bf16.msra.mxu1 %v7546_v0  ;;  %6846 = vmatprep.subr.bf16.mxu0 %v7547_v1  ;;  %v1419_v0 = vcombine.high %v299_v61, %v299_v61  ;;  %v7602_v1 = vld [vmem:[%s9671_s1 + $0x400] sm:$0xff]   ;;  %v7654_v61 = vld [vmem:[%s9671_s1 + $0x658] sm:$0xff]  }
  0x75   : > { %6868 = vmatprep.subr.bf16.mxu1 %v7548_v2  ;;  %v7603_v2 = vld [vmem:[%s9671_s1 + $0x480] sm:$0xff]  }
  0x77   : > { %6847 = vmatpush3.bf16.msra.mxu0 %v7549_v3  ;;  %v1434_v3 = vcombine.high %v1426_v63, %v1426_v63 }
  0x78   : > { %6869 = vmatpush3.bf16.msra.mxu1 %v7550_v4  ;;  %6848 = vmatprep.subr.bf16.mxu0 %v7551_v5  ;;  %v1433_v4 = vrot.slane %v1419_v0, %v8147_v41  ;;  %v7605_v5 = vld [vmem:[%s9671_s1 + $0x578] sm:$0xff]  }
  0x79   : > { %6870 = vmatprep.subr.bf16.mxu1 %v7552_v6  ;;  %v7657_v0 = vld [vmem:[%s9671_s1 + $0x698] sm:$0xff]  }
  0x7a   : > { %v1435_v6 = vcombine.high %v1433_v4, %v1433_v4 }
  0x7b   : > { %6849 = vmatpush3.bf16.msra.mxu0 %v7553_v7  ;;  %v7606_v7 = vld [vmem:[%s9671_s1 + $0x5f8] sm:$0xff]  }
  0x7c   : > { %6871 = vmatpush3.bf16.msra.mxu1 %v7554_v8  ;;  %6850 = vmatprep.subr.bf16.mxu0 %v7555_v9  ;;  %v7607_v8 = vld [vmem:[%s9671_s1 + $0x538] sm:$0xff]  }
  0x7d   : > { %6872 = vmatprep.subr.bf16.mxu1 %v7556_v10  ;;  %v7608_v9 = vld [vmem:[%s9671_s1 + $0x5b8] sm:$0xff]   ;;  %v7609_v10 = vld [vmem:[%s9671_s1 + $0x570] sm:$0xff]  }
  0x7f   : > { %6851 = vmatpush3.bf16.msra.mxu0 %v7557_v11  ;;  %v7610_v11 = vld [vmem:[%s9671_s1 + $0x5f0] sm:$0xff]  }
  0x80   : > { %6873 = vmatpush3.bf16.msra.mxu1 %v7558_v12  ;;  %6852 = vmatprep.subr.bf16.mxu0 %v7559_v13  ;;  %v7611_v12 = vld [vmem:[%s9671_s1 + $0x530] sm:$0xff]  }
  0x81   : > { %6874 = vmatprep.subr.bf16.mxu1 %v7560_v14  ;;  %v7612_v13 = vld [vmem:[%s9671_s1 + $0x5b0] sm:$0xff]   ;;  %v7613_v14 = vld [vmem:[%s9671_s1 + $0x568] sm:$0xff]  }
  0x83   : > { %6853 = vmatpush3.bf16.msra.mxu0 %v7561_v15  ;;  %v7614_v15 = vld [vmem:[%s9671_s1 + $0x5e8] sm:$0xff]  }
  0x84   : > { %6875 = vmatpush3.bf16.msra.mxu1 %v7562_v16  ;;  %6854 = vmatprep.subr.bf16.mxu0 %v7563_v17  ;;  %v7615_v16 = vld [vmem:[%s9671_s1 + $0x528] sm:$0xff]  }
  0x85   : > { %6876 = vmatprep.subr.bf16.mxu1 %v7564_v18  ;;  %v7616_v17 = vld [vmem:[%s9671_s1 + $0x5a8] sm:$0xff]   ;;  %v7617_v18 = vld [vmem:[%s9671_s1 + $0x560] sm:$0xff]  }
  0x87   : > { %6855 = vmatpush3.bf16.msra.mxu0 %v7565_v19  ;;  %v7618_v19 = vld [vmem:[%s9671_s1 + $0x5e0] sm:$0xff]  }
  0x88   : > { %6877 = vmatpush3.bf16.msra.mxu1 %v7566_v20  ;;  %6856 = vmatprep.subr.bf16.mxu0 %v7567_v21  ;;  %v7619_v20 = vld [vmem:[%s9671_s1 + $0x520] sm:$0xff]  }
  0x89   : > { %6878 = vmatprep.subr.bf16.mxu1 %v7568_v23  ;;  %v7620_v21 = vld [vmem:[%s9671_s1 + $0x5a0] sm:$0xff]   ;;  %v7622_v23 = vld [vmem:[%s9671_s1 + $0x5d8] sm:$0xff]  }
  0x8b   : > { %6857 = vmatpush3.bf16.msra.mxu0 %v7569_v26  ;;  %v7625_v26 = vld [vmem:[%s9671_s1 + $0x550] sm:$0xff]  }
  0x8c   : > { %6879 = vmatpush3.bf16.msra.mxu1 %v7570_v27  ;;  %6886 = vmatprep.subr.bf16.mxu0 %v7572_v30  ;;  %v7626_v27 = vld [vmem:[%s9671_s1 + $0x5d0] sm:$0xff]   ;;  %v7629_v30 = vld [vmem:[%s9671_s1 + $0x548] sm:$0xff]  }
  0x8d   : > { %6908 = vmatprep.subr.bf16.mxu1 %v7573_v32  ;;  %v7631_v32 = vld [vmem:[%s9671_s1 + $0x508] sm:$0xff]  }
  0x8e   : > { %5032 = vmatmul.mubr.bf16.vlgmr.msra.gmra.mxu0 %v1409_v24  ;;  %v7623_v24 = vld [vmem:[%s9671_s1 + $0x518] sm:$0xff]  }
  0x8f   : > { %5072 = vmatmul.mubr.bf16.vlgmr.msra.gmra.mxu1 %v1416_v29  ;;  %6887 = vmatpush3.bf16.msra.mxu0 %v7574_v33  ;;  %v7628_v29 = vld [vmem:[%s9671_s1 + $0x590] sm:$0xff]   ;;  %v7632_v33 = vld [vmem:[%s9671_s1 + $0x588] sm:$0xff]  }
  0x90   : > { %6909 = vmatpush3.bf16.msra.mxu1 %v7575_v34  ;;  %6888 = vmatprep.subr.bf16.mxu0 %v7576_v35  ;;  %v7633_v34 = vld [vmem:[%s9671_s1 + $0x540] sm:$0xff]   ;;  %v300_v35 = vld [vmem:[%s8132_s6 + $0x28] sm:$0xff] }
  0x91   : > { %6910 = vmatprep.subr.bf16.mxu1 %v7577_v36  ;;  %5111 = vmatprep.mubr.bf16.mxu0 %v1434_v3  ;;  %v7634_v36 = vld [vmem:[%s9671_s1 + $0x5c0] sm:$0xff]   ;;  %v7660_v3 = vld [vmem:[%s9671_s1 + $0x610] sm:$0xff]  }
  0x92   : > { %5151 = vmatprep.mubr.bf16.mxu1 %v1435_v6  ;;  %v7663_v6 = vld [vmem:[%s9671_s1 + $0x6c8] sm:$0xff]  }
  0x93   : > { %6889 = vmatpush3.bf16.msra.mxu0 %v7578_v37  ;;  %v1443_v37 = vrot.slane %v300_v35, %v8147_v41 }
  0x94   : > { %6911 = vmatpush3.bf16.msra.mxu1 %v7579_v38  ;;  %6890 = vmatprep.subr.bf16.mxu0 %v7580_v39  ;;  %v1436_v38 = vcombine.high %v300_v35, %v300_v35  ;;  %v7635_v39 = vld [vmem:[%s9671_s1 + $0x500] sm:$0xff]   ;;  %v7681_v35 = vld [vmem:[%s9671_s1 + $0x728] sm:$0xff]  }
  0x95   : > { %6912 = vmatprep.subr.bf16.mxu1 %v7581_v40  ;;  %v7636_v40 = vld [vmem:[%s9671_s1 + $0x580] sm:$0xff]  }
  0x97   : > { %6891 = vmatpush3.bf16.msra.mxu0 %v7582_v42  ;;  %v1451_v42 = vcombine.high %v1443_v37, %v1443_v37 }
  0x98   : > { %6913 = vmatpush3.bf16.msra.mxu1 %v7583_v43  ;;  %6892 = vmatprep.subr.bf16.mxu0 %v7584_v44  ;;  %v1450_v43 = vrot.slane %v1436_v38, %v8147_v41  ;;  %v7638_v44 = vld [vmem:[%s9671_s1 + $0x678] sm:$0xff]   ;;  %v7682_v38 = vld [vmem:[%s9671_s1 + $0x7a8] sm:$0xff]  }
  0x99   : > { %6914 = vmatprep.subr.bf16.mxu1 %v7585_v45 }
  0x9a   : > { %v1452_v45 = vcombine.high %v1450_v43, %v1450_v43 }
  0x9b   : > { %6893 = vmatpush3.bf16.msra.mxu0 %v7586_v46  ;;  %v7639_v46 = vld [vmem:[%s9671_s1 + $0x6f8] sm:$0xff]  }
  0x9c   : > { %6915 = vmatpush3.bf16.msra.mxu1 %v7587_v47  ;;  %6894 = vmatprep.subr.bf16.mxu0 %v7588_v48  ;;  %v7640_v47 = vld [vmem:[%s9671_s1 + $0x638] sm:$0xff]  }
  0x9d   : > { %6916 = vmatprep.subr.bf16.mxu1 %v7589_v49  ;;  %v7641_v48 = vld [vmem:[%s9671_s1 + $0x6b8] sm:$0xff]   ;;  %v7642_v49 = vld [vmem:[%s9671_s1 + $0x670] sm:$0xff]  }
  0x9f   : > { %6895 = vmatpush3.bf16.msra.mxu0 %v7590_v50  ;;  %v7643_v50 = vld [vmem:[%s9671_s1 + $0x6f0] sm:$0xff]  }
  0xa0   : > { %6917 = vmatpush3.bf16.msra.mxu1 %v7591_v51  ;;  %6896 = vmatprep.subr.bf16.mxu0 %v7592_v52  ;;  %v7644_v51 = vld [vmem:[%s9671_s1 + $0x630] sm:$0xff]  }
  0xa1   : > { %6918 = vmatprep.subr.bf16.mxu1 %v7593_v53  ;;  %v7645_v52 = vld [vmem:[%s9671_s1 + $0x6b0] sm:$0xff]   ;;  %v7646_v53 = vld [vmem:[%s9671_s1 + $0x668] sm:$0xff]  }
  0xa3   : > { %6897 = vmatpush3.bf16.msra.mxu0 %v7594_v54  ;;  %v7647_v54 = vld [vmem:[%s9671_s1 + $0x6e8] sm:$0xff]  }
  0xa4   : > { %6919 = vmatpush3.bf16.msra.mxu1 %v7595_v55  ;;  %6898 = vmatprep.subr.bf16.mxu0 %v7596_v56  ;;  %v7648_v55 = vld [vmem:[%s9671_s1 + $0x628] sm:$0xff]  }
  0xa5   : > { %6920 = vmatprep.subr.bf16.mxu1 %v7597_v57  ;;  %v7649_v56 = vld [vmem:[%s9671_s1 + $0x6a8] sm:$0xff]   ;;  %v7650_v57 = vld [vmem:[%s9671_s1 + $0x660] sm:$0xff]  }
  0xa7   : > { %6899 = vmatpush3.bf16.msra.mxu0 %v7598_v58  ;;  %v7651_v58 = vld [vmem:[%s9671_s1 + $0x6e0] sm:$0xff]  }
  0xa8   : > { %6921 = vmatpush3.bf16.msra.mxu1 %v7599_v59  ;;  %6900 = vmatprep.subr.bf16.mxu0 %v7600_v60  ;;  %v7652_v59 = vld [vmem:[%s9671_s1 + $0x620] sm:$0xff]  }
  0xa9   : > { %6922 = vmatprep.subr.bf16.mxu1 %v7601_v62  ;;  %v7653_v60 = vld [vmem:[%s9671_s1 + $0x6a0] sm:$0xff]   ;;  %v7655_v62 = vld [vmem:[%s9671_s1 + $0x6d8] sm:$0xff]  }
  0xab   : > { %6901 = vmatpush3.bf16.msra.mxu0 %v7602_v1  ;;  %v7658_v1 = vld [vmem:[%s9671_s1 + $0x650] sm:$0xff]  }
  0xac   : > { %6923 = vmatpush3.bf16.msra.mxu1 %v7603_v2  ;;  %6930 = vmatprep.subr.bf16.mxu0 %v7605_v5  ;;  %v7659_v2 = vld [vmem:[%s9671_s1 + $0x6d0] sm:$0xff]   ;;  %v7662_v5 = vld [vmem:[%s9671_s1 + $0x648] sm:$0xff]  }
  0xad   : > { %6952 = vmatprep.subr.bf16.mxu1 %v7606_v7  ;;  %v7664_v7 = vld [vmem:[%s9671_s1 + $0x608] sm:$0xff]  }
  0xae   : > { %5112 = vmatmul.mubr.bf16.vlgmr.msra.gmra.mxu0 %v1426_v63  ;;  %v7656_v63 = vld [vmem:[%s9671_s1 + $0x618] sm:$0xff]  }
  0xaf   : > { %5152 = vmatmul.mubr.bf16.vlgmr.msra.gmra.mxu1 %v1433_v4  ;;  %6931 = vmatpush3.bf16.msra.mxu0 %v7607_v8  ;;  %v7661_v4 = vld [vmem:[%s9671_s1 + $0x690] sm:$0xff]   ;;  %v7665_v8 = vld [vmem:[%s9671_s1 + $0x688] sm:$0xff]  }
  0xb0   : > { %6953 = vmatpush3.bf16.msra.mxu1 %v7608_v9  ;;  %6932 = vmatprep.subr.bf16.mxu0 %v7609_v10  ;;  %v7666_v9 = vld [vmem:[%s9671_s1 + $0x640] sm:$0xff]  }
  0xb1   : > { %6954 = vmatprep.subr.bf16.mxu1 %v7610_v11  ;;  %5191 = vmatprep.mubr.bf16.mxu0 %v1451_v42  ;;  %v7667_v10 = vld [vmem:[%s9671_s1 + $0x6c0] sm:$0xff]   ;;  %v301_v11 = vld [vmem:[%s8132_s6 + $0x30] sm:$0xff] }
  0xb2   : > { %5231 = vmatprep.mubr.bf16.mxu1 %v1452_v45  ;;  %v7685_v45 = vld [vmem:[%s9671_s1 + $0x720] sm:$0xff]  }
  0xb3   : > { %6933 = vmatpush3.bf16.msra.mxu0 %v7611_v12  ;;  %v7668_v12 = vld [vmem:[%s9671_s1 + $0x600] sm:$0xff]  }
  0xb4   : > { %6955 = vmatpush3.bf16.msra.mxu1 %v7612_v13  ;;  %6934 = vmatprep.subr.bf16.mxu0 %v7613_v14  ;;  %v1460_v13 = vrot.slane %v301_v11, %v8147_v41  ;;  %v1453_v14 = vcombine.high %v301_v11, %v301_v11  ;;  %v7710_v11 = vld [vmem:[%s9671_s1 + $0x830] sm:$0xff]  }
  0xb5   : > { %6956 = vmatprep.subr.bf16.mxu1 %v7614_v15  ;;  %v7669_v15 = vld [vmem:[%s9671_s1 + $0x680] sm:$0xff]  }
  0xb7   : > { %6935 = vmatpush3.bf16.msra.mxu0 %v7615_v16  ;;  %v1468_v16 = vcombine.high %v1460_v13, %v1460_v13 }
  0xb8   : > { %6957 = vmatpush3.bf16.msra.mxu1 %v7616_v17  ;;  %6936 = vmatprep.subr.bf16.mxu0 %v7617_v18  ;;  %v1467_v17 = vrot.slane %v1453_v14, %v8147_v41  ;;  %v7671_v18 = vld [vmem:[%s9671_s1 + $0x778] sm:$0xff]   ;;  %v7711_v14 = vld [vmem:[%s9671_s1 + $0x8b0] sm:$0xff]  }
  0xb9   : > { %6958 = vmatprep.subr.bf16.mxu1 %v7618_v19  ;;  %v7672_v19 = vld [vmem:[%s9671_s1 + $0x7f8] sm:$0xff]  }
  0xbb   : > { %6937 = vmatpush3.bf16.msra.mxu0 %v7619_v20  ;;  %v1469_v20 = vcombine.high %v1467_v17, %v1467_v17 }
  0xbc   : > { %6959 = vmatpush3.bf16.msra.mxu1 %v7620_v21  ;;  %6938 = vmatprep.subr.bf16.mxu0 %v7621_v22  ;;  %v7673_v21 = vld [vmem:[%s9671_s1 + $0x738] sm:$0xff]  }
  0xbd   : > { %6960 = vmatprep.subr.bf16.mxu1 %v7622_v23  ;;  %v7674_v22 = vld [vmem:[%s9671_s1 + $0x7b8] sm:$0xff]   ;;  %v7675_v23 = vld [vmem:[%s9671_s1 + $0x770] sm:$0xff]  }
  0xbf   : > { %6939 = vmatpush3.bf16.msra.mxu0 %v7623_v24  ;;  %v7676_v24 = vld [vmem:[%s9671_s1 + $0x7f0] sm:$0xff]  }
  0xc0   : > { %6961 = vmatpush3.bf16.msra.mxu1 %v7624_v25  ;;  %6940 = vmatprep.subr.bf16.mxu0 %v7625_v26  ;;  %v7677_v25 = vld [vmem:[%s9671_s1 + $0x730] sm:$0xff]  }
  0xc1   : > { %6962 = vmatprep.subr.bf16.mxu1 %v7626_v27 }
  0xc3   : > { %6941 = vmatpush3.bf16.msra.mxu0 %v7627_v28  ;;  %v7678_v28 = vld [vmem:[%s9671_s1 + $0x7b0] sm:$0xff]  }
  0xc4   : > { %6963 = vmatpush3.bf16.msra.mxu1 %v7628_v29  ;;  %6942 = vmatprep.subr.bf16.mxu0 %v7629_v30  ;;  %v7679_v29 = vld [vmem:[%s9671_s1 + $0x768] sm:$0xff]  }
  0xc5   : > { %6964 = vmatprep.subr.bf16.mxu1 %v7630_v31 }
  0xc7   : > { %6943 = vmatpush3.bf16.msra.mxu0 %v7631_v32  ;;  %v7680_v32 = vld [vmem:[%s9671_s1 + $0x7e8] sm:$0xff]  }
  0xc8   : > { %6965 = vmatpush3.bf16.msra.mxu1 %v7632_v33  ;;  %6944 = vmatprep.subr.bf16.mxu0 %v7633_v34 }
  0xc9   : > { %6966 = vmatprep.subr.bf16.mxu1 %v7634_v36 }
  0xcb   : > { %6945 = vmatpush3.bf16.msra.mxu0 %v7635_v39 }
  0xcc   : > { %6967 = vmatpush3.bf16.msra.mxu1 %v7636_v40  ;;  %6974 = vmatprep.subr.bf16.mxu0 %v7638_v44  ;;  %v7683_v40 = vld [vmem:[%s9671_s1 + $0x760] sm:$0xff]  }
  0xcd   : > { %6996 = vmatprep.subr.bf16.mxu1 %v7639_v46  ;;  %v7684_v44 = vld [vmem:[%s9671_s1 + $0x7e0] sm:$0xff]  }
  0xce   : > { %5192 = vmatmul.mubr.bf16.vlgmr.msra.gmra.mxu0 %v1443_v37  ;;  %v7686_v46 = vld [vmem:[%s9671_s1 + $0x7a0] sm:$0xff]  }
  0xcf   : > { %5232 = vmatmul.mubr.bf16.vlgmr.msra.gmra.mxu1 %v1450_v43  ;;  %6975 = vmatpush3.bf16.msra.mxu0 %v7640_v47  ;;  %v7687_v47 = vld [vmem:[%s9671_s1 + $0x758] sm:$0xff]  }
  0xd0   : > { %6997 = vmatpush3.bf16.msra.mxu1 %v7641_v48  ;;  %6976 = vmatprep.subr.bf16.mxu0 %v7642_v49  ;;  %v7688_v48 = vld [vmem:[%s9671_s1 + $0x7d8] sm:$0xff]  }
  0xd1   : > { %6998 = vmatprep.subr.bf16.mxu1 %v7643_v50  ;;  %5271 = vmatprep.mubr.bf16.mxu0 %v1468_v16  ;;  %v7689_v49 = vld [vmem:[%s9671_s1 + $0x718] sm:$0xff]  }
  0xd2   : > { %5311 = vmatprep.mubr.bf16.mxu1 %v1469_v20  ;;  %v7690_v50 = vld [vmem:[%s9671_s1 + $0x798] sm:$0xff]  }
  0xd3   : > { %6977 = vmatpush3.bf16.msra.mxu0 %v7644_v51  ;;  %v7691_v51 = vld [vmem:[%s9671_s1 + $0x750] sm:$0xff]  }
  0xd4   : > { %6999 = vmatpush3.bf16.msra.mxu1 %v7645_v52  ;;  %6978 = vmatprep.subr.bf16.mxu0 %v7646_v53  ;;  %v7692_v52 = vld [vmem:[%s9671_s1 + $0x7d0] sm:$0xff]  }
  0xd5   : > { %7000 = vmatprep.subr.bf16.mxu1 %v7647_v54  ;;  %v7693_v53 = vld [vmem:[%s9671_s1 + $0x710] sm:$0xff]  }
  0xd6   : > { %v7694_v54 = vld [vmem:[%s9671_s1 + $0x790] sm:$0xff]  }
  0xd7   : > { %6979 = vmatpush3.bf16.msra.mxu0 %v7648_v55  ;;  %v7695_v55 = vld [vmem:[%s9671_s1 + $0x748] sm:$0xff]  }
  0xd8   : > { %7001 = vmatpush3.bf16.msra.mxu1 %v7649_v56  ;;  %6980 = vmatprep.subr.bf16.mxu0 %v7650_v57  ;;  %v7696_v56 = vld [vmem:[%s9671_s1 + $0x7c8] sm:$0xff]  }
  0xd9   : > { %7002 = vmatprep.subr.bf16.mxu1 %v7651_v58  ;;  %v7697_v57 = vld [vmem:[%s9671_s1 + $0x708] sm:$0xff]  }
  0xda   : > { %v7698_v58 = vld [vmem:[%s9671_s1 + $0x788] sm:$0xff]  }
  0xdb   : > { %6981 = vmatpush3.bf16.msra.mxu0 %v7652_v59  ;;  %v7699_v59 = vld [vmem:[%s9671_s1 + $0x740] sm:$0xff]  }
  0xdc   : > { %7003 = vmatpush3.bf16.msra.mxu1 %v7653_v60  ;;  %6982 = vmatprep.subr.bf16.mxu0 %v7654_v61  ;;  %v7700_v60 = vld [vmem:[%s9671_s1 + $0x7c0] sm:$0xff]   ;;  %v302_v61 = vld [vmem:[%s8132_s6 + $0x38] sm:$0xff] }
  0xdd   : > { %7004 = vmatprep.subr.bf16.mxu1 %v7655_v62  ;;  %v7701_v62 = vld [vmem:[%s9671_s1 + $0x700] sm:$0xff]  }
  0xdf   : > { %6983 = vmatpush3.bf16.msra.mxu0 %v7656_v63  ;;  %v1477_v63 = vrot.slane %v302_v61, %v8147_v41 }
  0xe0   : > { %7005 = vmatpush3.bf16.msra.mxu1 %v7657_v0  ;;  %6984 = vmatprep.subr.bf16.mxu0 %v7658_v1  ;;  %v1470_v0 = vcombine.high %v302_v61, %v302_v61  ;;  %v7702_v1 = vld [vmem:[%s9671_s1 + $0x780] sm:$0xff]   ;;  %v7742_v61 = vld [vmem:[%s9671_s1 + $0x9f0] sm:$0xff]  }
  0xe1   : > { %7006 = vmatprep.subr.bf16.mxu1 %v7659_v2  ;;  %v1485_v2 = vcombine.high %v1477_v63, %v1477_v63 }
  0xe3   : > { %6985 = vmatpush3.bf16.msra.mxu0 %v7660_v3  ;;  %v1484_v3 = vrot.slane %v1470_v0, %v8147_v41 }
  0xe4   : > { %7007 = vmatpush3.bf16.msra.mxu1 %v7661_v4  ;;  %6986 = vmatprep.subr.bf16.mxu0 %v7662_v5  ;;  %v7704_v4 = vld [vmem:[%s9671_s1 + $0x878] sm:$0xff]  }
  0xe5   : > { %7008 = vmatprep.subr.bf16.mxu1 %v7663_v6  ;;  %v7705_v5 = vld [vmem:[%s9671_s1 + $0x8f8] sm:$0xff]   ;;  %v1486_v6 = vcombine.high %v1484_v3, %v1484_v3 }
  0xe7   : > { %6987 = vmatpush3.bf16.msra.mxu0 %v7664_v7  ;;  %v7706_v7 = vld [vmem:[%s9671_s1 + $0x838] sm:$0xff]  }
  0xe8   : > { %7009 = vmatpush3.bf16.msra.mxu1 %v7665_v8  ;;  %6988 = vmatprep.subr.bf16.mxu0 %v7666_v9  ;;  %v7707_v8 = vld [vmem:[%s9671_s1 + $0x8b8] sm:$0xff]   ;;  %v7708_v9 = vld [vmem:[%s9671_s1 + $0x870] sm:$0xff]  }
  0xe9   : > { %7010 = vmatprep.subr.bf16.mxu1 %v7667_v10  ;;  %v7709_v10 = vld [vmem:[%s9671_s1 + $0x8f0] sm:$0xff]  }
  0xeb   : > { %6989 = vmatpush3.bf16.msra.mxu0 %v7668_v12 }
  0xec   : > { %7011 = vmatpush3.bf16.msra.mxu1 %v7669_v15  ;;  %7018 = vmatprep.subr.bf16.mxu0 %v7671_v18  ;;  %v7712_v15 = vld [vmem:[%s9671_s1 + $0x868] sm:$0xff]  }
  0xed   : > { %7040 = vmatprep.subr.bf16.mxu1 %v7672_v19  ;;  %v7713_v18 = vld [vmem:[%s9671_s1 + $0x8e8] sm:$0xff]  }
  0xee   : > { %v6726_v26 = vpop.f32.mrf.mxu0  ;;  %5272 = vmatmul.mubr.bf16.vlgmr.msra.gmra.mxu0 %v1460_v13 }
  0xef   : > { %v6748_v27 = vpop.f32.mrf.mxu1  ;;  %5312 = vmatmul.mubr.bf16.vlgmr.msra.gmra.mxu1 %v1467_v17  ;;  %7019 = vmatpush3.bf16.msra.mxu0 %v7673_v21  ;;  %v7714_v21 = vld [vmem:[%s9671_s1 + $0x828] sm:$0xff]  }
  0xf0   : > { %7041 = vmatpush3.bf16.msra.mxu1 %v7674_v22  ;;  %v6727_v30 = vpop.f32.mrf.mxu0  ;;  %7020 = vmatprep.subr.bf16.mxu0 %v7675_v23 }
  0xf1   : > { %v6749_v31 = vpop.f32.mrf.mxu1  ;;  %7042 = vmatprep.subr.bf16.mxu1 %v7676_v24  ;;  %v6728_v33 = vadd.f32 %v6727_v30, %v6726_v26  ;;  %5351 = vmatprep.mubr.bf16.mxu0 %v1485_v2  ;;  %v7715_v24 = vld [vmem:[%s9671_s1 + $0x8a8] sm:$0xff]   ;;  %v7716_v26 = vld [vmem:[%s9671_s1 + $0x860] sm:$0xff]  }
  0xf2   : > { %v6750_v34 = vadd.f32 %v6749_v31, %v6748_v27  ;;  %v6729_v36 = vpop.f32.mrf.mxu0  ;;  %5391 = vmatprep.mubr.bf16.mxu1 %v1486_v6  ;;  %v7718_v31 = vld [vmem:[%s9671_s1 + $0x820] sm:$0xff]   ;;  %v7745_v2 = vld [vmem:[%s9671_s1 + $0x968] sm:$0xff]  }
  0xf3   : > { %v6751_v37 = vpop.f32.mrf.mxu1  ;;  %7021 = vmatpush3.bf16.msra.mxu0 %v7677_v25  ;;  %v7723_v36 = vld [vmem:[%s9671_s1 + $0x898] sm:$0xff]  }
  0xf4   : > { %v8775_v39 = vadd.f32 %v6750_v34, %v6728_v33  ;;  %7043 = vmatpush3.bf16.msra.mxu1 %v7678_v28  ;;  %v6730_v42 = vpop.f32.mrf.mxu0  ;;  %7022 = vmatprep.subr.bf16.mxu0 %v7679_v29  ;;  %v7717_v29 = vld [vmem:[%s9671_s1 + $0x8e0] sm:$0xff]   ;;  %v7720_v33 = vld [vmem:[%s9671_s1 + $0x858] sm:$0xff]   ;;  %v7724_v37 = vld [vmem:[%s9671_s1 + $0x850] sm:$0xff]  }
  0xf5   : > { %v6752_v43 = vpop.f32.mrf.mxu1  ;;  %7044 = vmatprep.subr.bf16.mxu1 %v7680_v32  ;;  %v7719_v32 = vld [vmem:[%s9671_s1 + $0x8a0] sm:$0xff]   ;;  %v7721_v34 = vld [vmem:[%s9671_s1 + $0x8d8] sm:$0xff]   ;;  %v7728_v42 = vld [vmem:[%s9671_s1 + $0x848] sm:$0xff]  }
  0xf6   : > { %v7729_v43 = vld [vmem:[%s9671_s1 + $0x8c8] sm:$0xff]  }
  0xf7   : > { %7023 = vmatpush3.bf16.msra.mxu0 %v7681_v35  ;;  %v7722_v35 = vld [vmem:[%s9671_s1 + $0x818] sm:$0xff]  }
  0xf8   : > { %7045 = vmatpush3.bf16.msra.mxu1 %v7682_v38  ;;  %7024 = vmatprep.subr.bf16.mxu0 %v7683_v40  ;;  %v7725_v38 = vld [vmem:[%s9671_s1 + $0x8d0] sm:$0xff]  }
  0xf9   : > { %7046 = vmatprep.subr.bf16.mxu1 %v7684_v44  ;;  %v7727_v40 = vld [vmem:[%s9671_s1 + $0x890] sm:$0xff]   ;;  %v7730_v44 = vld [vmem:[%s9671_s1 + $0x808] sm:$0xff]  }
  0xfb   : > { %7025 = vmatpush3.bf16.msra.mxu0 %v7685_v45  ;;  %v7731_v45 = vld [vmem:[%s9671_s1 + $0x888] sm:$0xff]  }
  0xfc   : > { %7047 = vmatpush3.bf16.msra.mxu1 %v7686_v46  ;;  %7026 = vmatprep.subr.bf16.mxu0 %v7687_v47  ;;  %v7732_v46 = vld [vmem:[%s9671_s1 + $0x840] sm:$0xff]  }
  0xfd   : > { %7048 = vmatprep.subr.bf16.mxu1 %v7688_v48  ;;  %v7733_v47 = vld [vmem:[%s9671_s1 + $0x8c0] sm:$0xff]  }
  0xfe   : > { %v303_v48 = vld [vmem:[%s8132_s6 + $0x40] sm:$0xff] }
  0xff   : > { %7027 = vmatpush3.bf16.msra.mxu0 %v7689_v49  ;;  %v7734_v49 = vld [vmem:[%s9671_s1 + $0x800] sm:$0xff]  }
 0x100   : > { %7049 = vmatpush3.bf16.msra.mxu1 %v7690_v50  ;;  %7028 = vmatprep.subr.bf16.mxu0 %v7691_v51  ;;  %v1494_v50 = vrot.slane %v303_v48, %v8147_v41  ;;  %v1487_v51 = vcombine.high %v303_v48, %v303_v48  ;;  %v7775_v48 = vld [vmem:[%s9671_s1 + $0xaf0] sm:$0xff]  }
 0x101   : > { %7050 = vmatprep.subr.bf16.mxu1 %v7692_v52  ;;  %v7735_v52 = vld [vmem:[%s9671_s1 + $0x880] sm:$0xff]  }
 0x103   : > { %7029 = vmatpush3.bf16.msra.mxu0 %v7693_v53  ;;  %v1502_v53 = vcombine.high %v1494_v50, %v1494_v50 }
 0x104   : > { %7051 = vmatpush3.bf16.msra.mxu1 %v7694_v54  ;;  %7030 = vmatprep.subr.bf16.mxu0 %v7695_v55  ;;  %v1501_v54 = vrot.slane %v1487_v51, %v8147_v41  ;;  %v7737_v55 = vld [vmem:[%s9671_s1 + $0x978] sm:$0xff]  }
 0x105   : > { %7052 = vmatprep.subr.bf16.mxu1 %v7696_v56  ;;  %v7738_v56 = vld [vmem:[%s9671_s1 + $0x9f8] sm:$0xff]  }
 0x107   : > { %7031 = vmatpush3.bf16.msra.mxu0 %v7697_v57  ;;  %v1503_v57 = vcombine.high %v1501_v54, %v1501_v54 }
 0x108   : > { %7053 = vmatpush3.bf16.msra.mxu1 %v7698_v58  ;;  %7032 = vmatprep.subr.bf16.mxu0 %v7699_v59  ;;  %v7739_v58 = vld [vmem:[%s9671_s1 + $0x938] sm:$0xff]  }
 0x109   : > { %7054 = vmatprep.subr.bf16.mxu1 %v7700_v60  ;;  %v7740_v59 = vld [vmem:[%s9671_s1 + $0x9b8] sm:$0xff]   ;;  %v7741_v60 = vld [vmem:[%s9671_s1 + $0x970] sm:$0xff]  }
 0x10b   : > { %7033 = vmatpush3.bf16.msra.mxu0 %v7701_v62  ;;  %v7743_v62 = vld [vmem:[%s9671_s1 + $0x930] sm:$0xff]  }
 0x10c   : > { %7055 = vmatpush3.bf16.msra.mxu1 %v7702_v1  ;;  %7062 = vmatprep.subr.bf16.mxu0 %v7704_v4  ;;  %v7744_v1 = vld [vmem:[%s9671_s1 + $0x9b0] sm:$0xff]  }
 0x10d   : > { %7084 = vmatprep.subr.bf16.mxu1 %v7705_v5  ;;  %v7746_v5 = vld [vmem:[%s9671_s1 + $0x9e8] sm:$0xff]  }
 0x10e   : > { %v6770_v12 = vpop.f32.mrf.mxu0  ;;  %5352 = vmatmul.mubr.bf16.vlgmr.msra.gmra.mxu0 %v1477_v63 }
 0x10f   : > { %v6792_v13 = vpop.f32.mrf.mxu1  ;;  %5392 = vmatmul.mubr.bf16.vlgmr.msra.gmra.mxu1 %v1484_v3  ;;  %7063 = vmatpush3.bf16.msra.mxu0 %v7706_v7 }
 0x110   : > { %7085 = vmatpush3.bf16.msra.mxu1 %v7707_v8  ;;  %v6771_v16 = vpop.f32.mrf.mxu0  ;;  %7064 = vmatprep.subr.bf16.mxu0 %v7708_v9  ;;  %v7747_v8 = vld [vmem:[%s9671_s1 + $0x928] sm:$0xff]  }
 0x111   : > { %v6793_v17 = vpop.f32.mrf.mxu1  ;;  %7086 = vmatprep.subr.bf16.mxu1 %v7709_v10  ;;  %v6772_v19 = vadd.f32 %v6771_v16, %v6770_v12  ;;  %5431 = vmatprep.mubr.bf16.mxu0 %v1502_v53  ;;  %v7750_v16 = vld [vmem:[%s9671_s1 + $0x9e0] sm:$0xff]   ;;  %v7778_v53 = vld [vmem:[%s9671_s1 + $0xa68] sm:$0xff]  }
 0x112   : > { %v6794_v20 = vadd.f32 %v6793_v17, %v6792_v13  ;;  %v6773_v22 = vpop.f32.mrf.mxu0  ;;  %5471 = vmatprep.mubr.bf16.mxu1 %v1503_v57  ;;  %v7749_v13 = vld [vmem:[%s9671_s1 + $0x960] sm:$0xff]  }
 0x113   : > { %v6795_v23 = vpop.f32.mrf.mxu1  ;;  %v4874_v25 = vadd.f32 %v6772_v19, %v8775_v39  ;;  %7065 = vmatpush3.bf16.msra.mxu0 %v7710_v11  ;;  %v7726_v39 = vld [vmem:[%s9671_s1 + $0x810] sm:$0xff]   ;;  %v7748_v11 = vld [vmem:[%s9671_s1 + $0x9a8] sm:$0xff]   ;;  %v7752_v19 = vld [vmem:[%s9671_s1 + $0x9a0] sm:$0xff]  }
 0x114   : > { %7087 = vmatpush3.bf16.msra.mxu1 %v7711_v14  ;;  %v6774_v27 = vpop.f32.mrf.mxu0  ;;  %7066 = vmatprep.subr.bf16.mxu0 %v7712_v15  ;;  %v7755_v22 = vld [vmem:[%s9671_s1 + $0x918] sm:$0xff]  }
 0x115   : > { %v6796_v28 = vpop.f32.mrf.mxu1  ;;  %7088 = vmatprep.subr.bf16.mxu1 %v7713_v18  ;;  %v8883_v30 = vadd.f32 %v6794_v20, %v4874_v25  ;;  %v7751_v18 = vld [vmem:[%s9671_s1 + $0x920] sm:$0xff]   ;;  %v7753_v20 = vld [vmem:[%s9671_s1 + $0x958] sm:$0xff]   ;;  %v7758_v25 = vld [vmem:[%s9671_s1 + $0x9d0] sm:$0xff]  }
 0x116   : > { %v7756_v23 = vld [vmem:[%s9671_s1 + $0x998] sm:$0xff]   ;;  %v7760_v27 = vld [vmem:[%s9671_s1 + $0x990] sm:$0xff]   ;;  %v7761_v28 = vld [vmem:[%s9671_s1 + $0x948] sm:$0xff]  }
 0x117   : > { %7067 = vmatpush3.bf16.msra.mxu0 %v7714_v21  ;;  %v7754_v21 = vld [vmem:[%s9671_s1 + $0x9d8] sm:$0xff]  }
 0x118   : > { %7089 = vmatpush3.bf16.msra.mxu1 %v7715_v24  ;;  %7068 = vmatprep.subr.bf16.mxu0 %v7716_v26  ;;  %v7757_v24 = vld [vmem:[%s9671_s1 + $0x950] sm:$0xff]  }
 0x119   : > { %7090 = vmatprep.subr.bf16.mxu1 %v7717_v29  ;;  %v7759_v26 = vld [vmem:[%s9671_s1 + $0x910] sm:$0xff]   ;;  %v7762_v29 = vld [vmem:[%s9671_s1 + $0x9c8] sm:$0xff]  }
 0x11b   : > { %7069 = vmatpush3.bf16.msra.mxu0 %v7718_v31  ;;  %v7764_v31 = vld [vmem:[%s9671_s1 + $0x988] sm:$0xff]  }
 0x11c   : > { %7091 = vmatpush3.bf16.msra.mxu1 %v7719_v32  ;;  %7070 = vmatprep.subr.bf16.mxu0 %v7720_v33  ;;  %v7765_v32 = vld [vmem:[%s9671_s1 + $0x940] sm:$0xff]  }
 0x11d   : > { %7092 = vmatprep.subr.bf16.mxu1 %v7721_v34  ;;  %v7766_v33 = vld [vmem:[%s9671_s1 + $0x9c0] sm:$0xff]  }
 0x11e   : > { %v7767_v34 = vld [vmem:[%s9671_s1 + $0x900] sm:$0xff]  }
 0x11f   : > { %7071 = vmatpush3.bf16.msra.mxu0 %v7722_v35  ;;  %v304_v35 = vld [vmem:[%s8132_s6 + $0x48] sm:$0xff] }
 0x120   : > { %7093 = vmatpush3.bf16.msra.mxu1 %v7723_v36  ;;  %7072 = vmatprep.subr.bf16.mxu0 %v7724_v37  ;;  %v7768_v36 = vld [vmem:[%s9671_s1 + $0x980] sm:$0xff]   ;;  %v1511_v37 = vrot.slane %v304_v35, %v8147_v41 }
 0x121   : > { %7094 = vmatprep.subr.bf16.mxu1 %v7725_v38  ;;  %v1504_v38 = vcombine.high %v304_v35, %v304_v35  ;;  %v7809_v35 = vld [vmem:[%s9671_s1 + $0xb30] sm:$0xff]  }
 0x123   : > { %7073 = vmatpush3.bf16.msra.mxu0 %v7726_v39  ;;  %v7770_v39 = vld [vmem:[%s9671_s1 + $0xa78] sm:$0xff]  }
 0x124   : > { %7095 = vmatpush3.bf16.msra.mxu1 %v7727_v40  ;;  %7074 = vmatprep.subr.bf16.mxu0 %v7728_v42  ;;  %v1519_v40 = vcombine.high %v1511_v37, %v1511_v37  ;;  %v1518_v42 = vrot.slane %v1504_v38, %v8147_v41  ;;  %v7810_v38 = vld [vmem:[%s9671_s1 + $0xbb0] sm:$0xff]  }
 0x125   : > { %7096 = vmatprep.subr.bf16.mxu1 %v7729_v43  ;;  %v7771_v43 = vld [vmem:[%s9671_s1 + $0xaf8] sm:$0xff]  }
 0x127   : > { %7075 = vmatpush3.bf16.msra.mxu0 %v7730_v44  ;;  %v7772_v44 = vld [vmem:[%s9671_s1 + $0xa38] sm:$0xff]  }
 0x128   : > { %7097 = vmatpush3.bf16.msra.mxu1 %v7731_v45  ;;  %7076 = vmatprep.subr.bf16.mxu0 %v7732_v46  ;;  %v1520_v45 = vcombine.high %v1518_v42, %v1518_v42  ;;  %v7773_v46 = vld [vmem:[%s9671_s1 + $0xab8] sm:$0xff]  }
 0x129   : > { %7098 = vmatprep.subr.bf16.mxu1 %v7733_v47  ;;  %v7774_v47 = vld [vmem:[%s9671_s1 + $0xa70] sm:$0xff]  }
 0x12b   : > { %7077 = vmatpush3.bf16.msra.mxu0 %v7734_v49  ;;  %v7776_v49 = vld [vmem:[%s9671_s1 + $0xa30] sm:$0xff]  }
 0x12c   : > { %7099 = vmatpush3.bf16.msra.mxu1 %v7735_v52  ;;  %7106 = vmatprep.subr.bf16.mxu0 %v7737_v55  ;;  %v7777_v52 = vld [vmem:[%s9671_s1 + $0xab0] sm:$0xff]  }
 0x12d   : > { %7128 = vmatprep.subr.bf16.mxu1 %v7738_v56  ;;  %v7779_v56 = vld [vmem:[%s9671_s1 + $0xae8] sm:$0xff]  }
 0x12e   : > { %v6814_v63 = vpop.f32.mrf.mxu0  ;;  %5432 = vmatmul.mubr.bf16.vlgmr.msra.gmra.mxu0 %v1494_v50 }
 0x12f   : > { %v6836_v0 = vpop.f32.mrf.mxu1  ;;  %5472 = vmatmul.mubr.bf16.vlgmr.msra.gmra.mxu1 %v1501_v54  ;;  %7107 = vmatpush3.bf16.msra.mxu0 %v7739_v58 }
 0x130   : > { %7129 = vmatpush3.bf16.msra.mxu1 %v7740_v59  ;;  %v6815_v3 = vpop.f32.mrf.mxu0  ;;  %7108 = vmatprep.subr.bf16.mxu0 %v7741_v60  ;;  %v7780_v59 = vld [vmem:[%s9671_s1 + $0xa28] sm:$0xff]  }
 0x131   : > { %v6837_v4 = vpop.f32.mrf.mxu1  ;;  %7130 = vmatprep.subr.bf16.mxu1 %v7742_v61  ;;  %v6816_v6 = vadd.f32 %v6815_v3, %v6814_v63  ;;  %5511 = vmatprep.mubr.bf16.mxu0 %v1519_v40  ;;  %v7783_v3 = vld [vmem:[%s9671_s1 + $0xae0] sm:$0xff]  }
 0x132   : > { %v6838_v7 = vadd.f32 %v6837_v4, %v6836_v0  ;;  %v6817_v9 = vpop.f32.mrf.mxu0  ;;  %5551 = vmatprep.mubr.bf16.mxu1 %v1520_v45  ;;  %v7782_v0 = vld [vmem:[%s9671_s1 + $0xa60] sm:$0xff]  }
 0x133   : > { %v6839_v10 = vpop.f32.mrf.mxu1  ;;  %v4954_v12 = vadd.f32 %v6816_v6, %v8883_v30  ;;  %7109 = vmatpush3.bf16.msra.mxu0 %v7743_v62  ;;  %v7763_v30 = vld [vmem:[%s9671_s1 + $0x908] sm:$0xff]   ;;  %v7785_v6 = vld [vmem:[%s9671_s1 + $0xaa0] sm:$0xff]   ;;  %v7788_v9 = vld [vmem:[%s9671_s1 + $0xa18] sm:$0xff]  }
 0x134   : > { %7131 = vmatpush3.bf16.msra.mxu1 %v7744_v1  ;;  %v6818_v14 = vpop.f32.mrf.mxu0  ;;  %7110 = vmatprep.subr.bf16.mxu0 %v7745_v2  ;;  %v7781_v62 = vld [vmem:[%s9671_s1 + $0xaa8] sm:$0xff]   ;;  %v7789_v10 = vld [vmem:[%s9671_s1 + $0xa98] sm:$0xff]  }
 0x135   : > { %v6840_v15 = vpop.f32.mrf.mxu1  ;;  %7132 = vmatprep.subr.bf16.mxu1 %v7746_v5  ;;  %v8985_v17 = vadd.f32 %v6838_v7, %v4954_v12  ;;  %v7784_v5 = vld [vmem:[%s9671_s1 + $0xa20] sm:$0xff]   ;;  %v7786_v7 = vld [vmem:[%s9671_s1 + $0xa58] sm:$0xff]   ;;  %v7791_v12 = vld [vmem:[%s9671_s1 + $0xad0] sm:$0xff]  }
 0x136   : > { %v7793_v14 = vld [vmem:[%s9671_s1 + $0xa90] sm:$0xff]   ;;  %v7794_v15 = vld [vmem:[%s9671_s1 + $0xa48] sm:$0xff]  }
 0x137   : > { %7111 = vmatpush3.bf16.msra.mxu0 %v7747_v8  ;;  %v7787_v8 = vld [vmem:[%s9671_s1 + $0xad8] sm:$0xff]  }
 0x138   : > { %7133 = vmatpush3.bf16.msra.mxu1 %v7748_v11  ;;  %7112 = vmatprep.subr.bf16.mxu0 %v7749_v13  ;;  %v7790_v11 = vld [vmem:[%s9671_s1 + $0xa50] sm:$0xff]  }
 0x139   : > { %7134 = vmatprep.subr.bf16.mxu1 %v7750_v16  ;;  %v7792_v13 = vld [vmem:[%s9671_s1 + $0xa10] sm:$0xff]   ;;  %v7795_v16 = vld [vmem:[%s9671_s1 + $0xac8] sm:$0xff]  }
 0x13b   : > { %7113 = vmatpush3.bf16.msra.mxu0 %v7751_v18  ;;  %v7797_v18 = vld [vmem:[%s9671_s1 + $0xa88] sm:$0xff]  }
 0x13c   : > { %7135 = vmatpush3.bf16.msra.mxu1 %v7752_v19  ;;  %7114 = vmatprep.subr.bf16.mxu0 %v7753_v20  ;;  %v7798_v19 = vld [vmem:[%s9671_s1 + $0xa40] sm:$0xff]  }
 0x13d   : > { %7136 = vmatprep.subr.bf16.mxu1 %v7754_v21  ;;  %v7799_v20 = vld [vmem:[%s9671_s1 + $0xac0] sm:$0xff]  }
 0x13e   : > { %v7800_v21 = vld [vmem:[%s9671_s1 + $0xa00] sm:$0xff]  }
 0x13f   : > { %7115 = vmatpush3.bf16.msra.mxu0 %v7755_v22  ;;  %v305_v22 = vld [vmem:[%s8132_s6 + $0x50] sm:$0xff] }
 0x140   : > { %7137 = vmatpush3.bf16.msra.mxu1 %v7756_v23  ;;  %7116 = vmatprep.subr.bf16.mxu0 %v7757_v24  ;;  %v7801_v23 = vld [vmem:[%s9671_s1 + $0xa80] sm:$0xff]   ;;  %v1528_v24 = vrot.slane %v305_v22, %v8147_v41 }
 0x141   : > { %7138 = vmatprep.subr.bf16.mxu1 %v7758_v25  ;;  %v1521_v25 = vcombine.high %v305_v22, %v305_v22  ;;  %v7842_v22 = vld [vmem:[%s9671_s1 + $0xc30] sm:$0xff]  }
 0x143   : > { %7117 = vmatpush3.bf16.msra.mxu0 %v7759_v26  ;;  %v7803_v26 = vld [vmem:[%s9671_s1 + $0xb78] sm:$0xff]  }
 0x144   : > { %7139 = vmatpush3.bf16.msra.mxu1 %v7760_v27  ;;  %7118 = vmatprep.subr.bf16.mxu0 %v7761_v28  ;;  %v1536_v27 = vcombine.high %v1528_v24, %v1528_v24  ;;  %v1535_v28 = vrot.slane %v1521_v25, %v8147_v41  ;;  %v7843_v25 = vld [vmem:[%s9671_s1 + $0xcb0] sm:$0xff]  }
 0x145   : > { %7140 = vmatprep.subr.bf16.mxu1 %v7762_v29  ;;  %v7804_v29 = vld [vmem:[%s9671_s1 + $0xbf8] sm:$0xff]  }
 0x147   : > { %7119 = vmatpush3.bf16.msra.mxu0 %v7763_v30  ;;  %v7805_v30 = vld [vmem:[%s9671_s1 + $0xb38] sm:$0xff]  }
 0x148   : > { %7141 = vmatpush3.bf16.msra.mxu1 %v7764_v31  ;;  %7120 = vmatprep.subr.bf16.mxu0 %v7765_v32  ;;  %v1537_v31 = vcombine.high %v1535_v28, %v1535_v28  ;;  %v7806_v32 = vld [vmem:[%s9671_s1 + $0xbb8] sm:$0xff]  }
 0x149   : > { %7142 = vmatprep.subr.bf16.mxu1 %v7766_v33  ;;  %v7807_v33 = vld [vmem:[%s9671_s1 + $0xb70] sm:$0xff]  }
 0x14b   : > { %7121 = vmatpush3.bf16.msra.mxu0 %v7767_v34  ;;  %v7808_v34 = vld [vmem:[%s9671_s1 + $0xbf0] sm:$0xff]  }
 0x14c   : > { %7143 = vmatpush3.bf16.msra.mxu1 %v7768_v36  ;;  %7150 = vmatprep.subr.bf16.mxu0 %v7770_v39  ;;  %v7811_v39 = vld [vmem:[%s9671_s1 + $0xb68] sm:$0xff]  }
 0x14d   : > { %7172 = vmatprep.subr.bf16.mxu1 %v7771_v43  ;;  %v7812_v43 = vld [vmem:[%s9671_s1 + $0xbe8] sm:$0xff]  }
 0x14e   : > { %v6858_v50 = vpop.f32.mrf.mxu0  ;;  %5512 = vmatmul.mubr.bf16.vlgmr.msra.gmra.mxu0 %v1511_v37 }
 0x14f   : > { %v6880_v51 = vpop.f32.mrf.mxu1  ;;  %5552 = vmatmul.mubr.bf16.vlgmr.msra.gmra.mxu1 %v1518_v42  ;;  %7151 = vmatpush3.bf16.msra.mxu0 %v7772_v44 }
 0x150   : > { %7173 = vmatpush3.bf16.msra.mxu1 %v7773_v46  ;;  %v6859_v54 = vpop.f32.mrf.mxu0  ;;  %7152 = vmatprep.subr.bf16.mxu0 %v7774_v47  ;;  %v7813_v46 = vld [vmem:[%s9671_s1 + $0xb28] sm:$0xff]  }
 0x151   : > { %v6881_v55 = vpop.f32.mrf.mxu1  ;;  %7174 = vmatprep.subr.bf16.mxu1 %v7775_v48  ;;  %v6860_v57 = vadd.f32 %v6859_v54, %v6858_v50  ;;  %5591 = vmatprep.mubr.bf16.mxu0 %v1536_v27  ;;  %v7816_v54 = vld [vmem:[%s9671_s1 + $0xbe0] sm:$0xff]  }
 0x152   : > { %v6882_v58 = vadd.f32 %v6881_v55, %v6880_v51  ;;  %v6861_v60 = vpop.f32.mrf.mxu0  ;;  %5631 = vmatprep.mubr.bf16.mxu1 %v1537_v31  ;;  %v7815_v51 = vld [vmem:[%s9671_s1 + $0xb60] sm:$0xff]  }
 0x153   : > { %v6883_v61 = vpop.f32.mrf.mxu1  ;;  %v5034_v63 = vadd.f32 %v6860_v57, %v8985_v17  ;;  %7153 = vmatpush3.bf16.msra.mxu0 %v7776_v49  ;;  %v7796_v17 = vld [vmem:[%s9671_s1 + $0xa08] sm:$0xff]   ;;  %v7818_v57 = vld [vmem:[%s9671_s1 + $0xba0] sm:$0xff]   ;;  %v7821_v60 = vld [vmem:[%s9671_s1 + $0xb18] sm:$0xff]  }
 0x154   : > { %7175 = vmatpush3.bf16.msra.mxu1 %v7777_v52  ;;  %v6862_v1 = vpop.f32.mrf.mxu0  ;;  %7154 = vmatprep.subr.bf16.mxu0 %v7778_v53  ;;  %v7814_v49 = vld [vmem:[%s9671_s1 + $0xba8] sm:$0xff]   ;;  %v7822_v61 = vld [vmem:[%s9671_s1 + $0xb98] sm:$0xff]  }
 0x155   : > { %v6884_v2 = vpop.f32.mrf.mxu1  ;;  %7176 = vmatprep.subr.bf16.mxu1 %v7779_v56  ;;  %v9087_v4 = vadd.f32 %v6882_v58, %v5034_v63  ;;  %v7817_v56 = vld [vmem:[%s9671_s1 + $0xb20] sm:$0xff]   ;;  %v7819_v58 = vld [vmem:[%s9671_s1 + $0xb58] sm:$0xff]   ;;  %v7824_v63 = vld [vmem:[%s9671_s1 + $0xbd0] sm:$0xff]  }
 0x156   : > { %v7826_v1 = vld [vmem:[%s9671_s1 + $0xb90] sm:$0xff]   ;;  %v7827_v2 = vld [vmem:[%s9671_s1 + $0xb48] sm:$0xff]  }
 0x157   : > { %7155 = vmatpush3.bf16.msra.mxu0 %v7780_v59  ;;  %v7820_v59 = vld [vmem:[%s9671_s1 + $0xbd8] sm:$0xff]  }
 0x158   : > { %7177 = vmatpush3.bf16.msra.mxu1 %v7781_v62  ;;  %7156 = vmatprep.subr.bf16.mxu0 %v7782_v0  ;;  %v7823_v62 = vld [vmem:[%s9671_s1 + $0xb50] sm:$0xff]  }
 0x159   : > { %7178 = vmatprep.subr.bf16.mxu1 %v7783_v3  ;;  %v7825_v0 = vld [vmem:[%s9671_s1 + $0xb10] sm:$0xff]   ;;  %v7828_v3 = vld [vmem:[%s9671_s1 + $0xbc8] sm:$0xff]  }
 0x15b   : > { %7157 = vmatpush3.bf16.msra.mxu0 %v7784_v5  ;;  %v7830_v5 = vld [vmem:[%s9671_s1 + $0xb88] sm:$0xff]  }
 0x15c   : > { %7179 = vmatpush3.bf16.msra.mxu1 %v7785_v6  ;;  %7158 = vmatprep.subr.bf16.mxu0 %v7786_v7  ;;  %v7831_v6 = vld [vmem:[%s9671_s1 + $0xb40] sm:$0xff]  }
 0x15d   : > { %7180 = vmatprep.subr.bf16.mxu1 %v7787_v8  ;;  %v7832_v7 = vld [vmem:[%s9671_s1 + $0xbc0] sm:$0xff]  }
 0x15e   : > { %v7833_v8 = vld [vmem:[%s9671_s1 + $0xb00] sm:$0xff]  }
 0x15f   : > { %7159 = vmatpush3.bf16.msra.mxu0 %v7788_v9  ;;  %v306_v9 = vld [vmem:[%s8132_s6 + $0x58] sm:$0xff] }
 0x160   : > { %7181 = vmatpush3.bf16.msra.mxu1 %v7789_v10  ;;  %7160 = vmatprep.subr.bf16.mxu0 %v7790_v11  ;;  %v7834_v10 = vld [vmem:[%s9671_s1 + $0xb80] sm:$0xff]   ;;  %v1545_v11 = vrot.slane %v306_v9, %v8147_v41 }
 0x161   : > { %7182 = vmatprep.subr.bf16.mxu1 %v7791_v12  ;;  %v1538_v12 = vcombine.high %v306_v9, %v306_v9  ;;  %v7875_v9 = vld [vmem:[%s9671_s1 + $0xd30] sm:$0xff]  }
 0x163   : > { %7161 = vmatpush3.bf16.msra.mxu0 %v7792_v13  ;;  %v7836_v13 = vld [vmem:[%s9671_s1 + $0xc78] sm:$0xff]  }
 0x164   : > { %7183 = vmatpush3.bf16.msra.mxu1 %v7793_v14  ;;  %7162 = vmatprep.subr.bf16.mxu0 %v7794_v15  ;;  %v1553_v14 = vcombine.high %v1545_v11, %v1545_v11  ;;  %v1552_v15 = vrot.slane %v1538_v12, %v8147_v41  ;;  %v7876_v12 = vld [vmem:[%s9671_s1 + $0xdb0] sm:$0xff]  }
 0x165   : > { %7184 = vmatprep.subr.bf16.mxu1 %v7795_v16  ;;  %v7837_v16 = vld [vmem:[%s9671_s1 + $0xcf8] sm:$0xff]  }
 0x167   : > { %7163 = vmatpush3.bf16.msra.mxu0 %v7796_v17  ;;  %v7838_v17 = vld [vmem:[%s9671_s1 + $0xc38] sm:$0xff]  }
 0x168   : > { %7185 = vmatpush3.bf16.msra.mxu1 %v7797_v18  ;;  %7164 = vmatprep.subr.bf16.mxu0 %v7798_v19  ;;  %v1554_v18 = vcombine.high %v1552_v15, %v1552_v15  ;;  %v7839_v19 = vld [vmem:[%s9671_s1 + $0xcb8] sm:$0xff]  }
 0x169   : > { %7186 = vmatprep.subr.bf16.mxu1 %v7799_v20  ;;  %v7840_v20 = vld [vmem:[%s9671_s1 + $0xc70] sm:$0xff]  }
 0x16b   : > { %7165 = vmatpush3.bf16.msra.mxu0 %v7800_v21  ;;  %v7841_v21 = vld [vmem:[%s9671_s1 + $0xcf0] sm:$0xff]  }
 0x16c   : > { %7187 = vmatpush3.bf16.msra.mxu1 %v7801_v23  ;;  %7194 = vmatprep.subr.bf16.mxu0 %v7803_v26  ;;  %v7844_v26 = vld [vmem:[%s9671_s1 + $0xc68] sm:$0xff]  }
 0x16d   : > { %7216 = vmatprep.subr.bf16.mxu1 %v7804_v29  ;;  %v7845_v29 = vld [vmem:[%s9671_s1 + $0xce8] sm:$0xff]  }
 0x16e   : > { %v6902_v36 = vpop.f32.mrf.mxu0  ;;  %5592 = vmatmul.mubr.bf16.vlgmr.msra.gmra.mxu0 %v1528_v24 }
 0x16f   : > { %v6924_v37 = vpop.f32.mrf.mxu1  ;;  %5632 = vmatmul.mubr.bf16.vlgmr.msra.gmra.mxu1 %v1535_v28  ;;  %7195 = vmatpush3.bf16.msra.mxu0 %v7805_v30 }
 0x170   : > { %7217 = vmatpush3.bf16.msra.mxu1 %v7806_v32  ;;  %v6903_v40 = vpop.f32.mrf.mxu0  ;;  %7196 = vmatprep.subr.bf16.mxu0 %v7807_v33  ;;  %v7846_v32 = vld [vmem:[%s9671_s1 + $0xc28] sm:$0xff]  }
 0x171   : > { %v6925_v42 = vpop.f32.mrf.mxu1  ;;  %7218 = vmatprep.subr.bf16.mxu1 %v7808_v34  ;;  %v6904_v44 = vadd.f32 %v6903_v40, %v6902_v36  ;;  %5671 = vmatprep.mubr.bf16.mxu0 %v1553_v14  ;;  %v7849_v40 = vld [vmem:[%s9671_s1 + $0xce0] sm:$0xff]  }
 0x172   : > { %v6926_v45 = vadd.f32 %v6925_v42, %v6924_v37  ;;  %v6905_v47 = vpop.f32.mrf.mxu0  ;;  %5711 = vmatprep.mubr.bf16.mxu1 %v1554_v18  ;;  %v7848_v37 = vld [vmem:[%s9671_s1 + $0xc60] sm:$0xff]  }
 0x173   : > { %v6927_v48 = vpop.f32.mrf.mxu1  ;;  %v5114_v50 = vadd.f32 %v6904_v44, %v9087_v4  ;;  %7197 = vmatpush3.bf16.msra.mxu0 %v7809_v35  ;;  %v7829_v4 = vld [vmem:[%s9671_s1 + $0xb08] sm:$0xff]   ;;  %v7851_v44 = vld [vmem:[%s9671_s1 + $0xca0] sm:$0xff]   ;;  %v7854_v47 = vld [vmem:[%s9671_s1 + $0xc18] sm:$0xff]  }
 0x174   : > { %7219 = vmatpush3.bf16.msra.mxu1 %v7810_v38  ;;  %v6906_v52 = vpop.f32.mrf.mxu0  ;;  %7198 = vmatprep.subr.bf16.mxu0 %v7811_v39  ;;  %v7847_v35 = vld [vmem:[%s9671_s1 + $0xca8] sm:$0xff]   ;;  %v7855_v48 = vld [vmem:[%s9671_s1 + $0xc98] sm:$0xff]  }
 0x175   : > { %v6928_v53 = vpop.f32.mrf.mxu1  ;;  %7220 = vmatprep.subr.bf16.mxu1 %v7812_v43  ;;  %v9189_v55 = vadd.f32 %v6926_v45, %v5114_v50  ;;  %v7850_v43 = vld [vmem:[%s9671_s1 + $0xc20] sm:$0xff]   ;;  %v7852_v45 = vld [vmem:[%s9671_s1 + $0xc58] sm:$0xff]   ;;  %v7857_v50 = vld [vmem:[%s9671_s1 + $0xcd0] sm:$0xff]  }
 0x176   : > { %v7859_v52 = vld [vmem:[%s9671_s1 + $0xc90] sm:$0xff]   ;;  %v7860_v53 = vld [vmem:[%s9671_s1 + $0xc48] sm:$0xff]  }
 0x177   : > { %7199 = vmatpush3.bf16.msra.mxu0 %v7813_v46  ;;  %v7853_v46 = vld [vmem:[%s9671_s1 + $0xcd8] sm:$0xff]  }
 0x178   : > { %7221 = vmatpush3.bf16.msra.mxu1 %v7814_v49  ;;  %7200 = vmatprep.subr.bf16.mxu0 %v7815_v51  ;;  %v7856_v49 = vld [vmem:[%s9671_s1 + $0xc50] sm:$0xff]  }
 0x179   : > { %7222 = vmatprep.subr.bf16.mxu1 %v7816_v54  ;;  %v7858_v51 = vld [vmem:[%s9671_s1 + $0xc10] sm:$0xff]   ;;  %v7861_v54 = vld [vmem:[%s9671_s1 + $0xcc8] sm:$0xff]  }
 0x17b   : > { %7201 = vmatpush3.bf16.msra.mxu0 %v7817_v56  ;;  %v7863_v56 = vld [vmem:[%s9671_s1 + $0xc88] sm:$0xff]  }
 0x17c   : > { %7223 = vmatpush3.bf16.msra.mxu1 %v7818_v57  ;;  %7202 = vmatprep.subr.bf16.mxu0 %v7819_v58  ;;  %v7864_v57 = vld [vmem:[%s9671_s1 + $0xc40] sm:$0xff]  }
 0x17d   : > { %7224 = vmatprep.subr.bf16.mxu1 %v7820_v59  ;;  %v7865_v58 = vld [vmem:[%s9671_s1 + $0xcc0] sm:$0xff]  }
 0x17e   : > { %v7866_v59 = vld [vmem:[%s9671_s1 + $0xc00] sm:$0xff]  }
 0x17f   : > { %7203 = vmatpush3.bf16.msra.mxu0 %v7821_v60  ;;  %v7867_v60 = vld [vmem:[%s9671_s1 + $0xc80] sm:$0xff]  }
 0x180   : > { %7225 = vmatpush3.bf16.msra.mxu1 %v7822_v61  ;;  %7204 = vmatprep.subr.bf16.mxu0 %v7823_v62  ;;  %v307_v61 = vld [vmem:[%s8132_s6 + $0x60] sm:$0xff] }
 0x181   : > { %7226 = vmatprep.subr.bf16.mxu1 %v7824_v63  ;;  %v1562_v62 = vrot.slane %v307_v61, %v8147_v41  ;;  %v1555_v63 = vcombine.high %v307_v61, %v307_v61 }
 0x183   : > { %7205 = vmatpush3.bf16.msra.mxu0 %v7825_v0  ;;  %v7869_v0 = vld [vmem:[%s9671_s1 + $0xd78] sm:$0xff]  }
 0x184   : > { %7227 = vmatpush3.bf16.msra.mxu1 %v7826_v1  ;;  %7206 = vmatprep.subr.bf16.mxu0 %v7827_v2  ;;  %v7870_v1 = vld [vmem:[%s9671_s1 + $0xdf8] sm:$0xff]   ;;  %v1570_v2 = vcombine.high %v1562_v62, %v1562_v62 }
 0x185   : > { %7228 = vmatprep.subr.bf16.mxu1 %v7828_v3  ;;  %v1569_v3 = vrot.slane %v1555_v63, %v8147_v41  ;;  %v7909_v63 = vld [vmem:[%s9671_s1 + $0xeb0] sm:$0xff]  }
 0x187   : > { %7207 = vmatpush3.bf16.msra.mxu0 %v7829_v4  ;;  %v7871_v4 = vld [vmem:[%s9671_s1 + $0xd38] sm:$0xff]  }
 0x188   : > { %7229 = vmatpush3.bf16.msra.mxu1 %v7830_v5  ;;  %7208 = vmatprep.subr.bf16.mxu0 %v7831_v6  ;;  %v7872_v5 = vld [vmem:[%s9671_s1 + $0xdb8] sm:$0xff]   ;;  %v1571_v6 = vcombine.high %v1569_v3, %v1569_v3 }
 0x189   : > { %7230 = vmatprep.subr.bf16.mxu1 %v7832_v7  ;;  %v7873_v7 = vld [vmem:[%s9671_s1 + $0xd70] sm:$0xff]  }
 0x18b   : > { %7209 = vmatpush3.bf16.msra.mxu0 %v7833_v8  ;;  %v7874_v8 = vld [vmem:[%s9671_s1 + $0xdf0] sm:$0xff]  }
 0x18c   : > { %7231 = vmatpush3.bf16.msra.mxu1 %v7834_v10  ;;  %7238 = vmatprep.subr.bf16.mxu0 %v7836_v13  ;;  %v7877_v13 = vld [vmem:[%s9671_s1 + $0xd68] sm:$0xff]  }
 0x18d   : > { %7260 = vmatprep.subr.bf16.mxu1 %v7837_v16  ;;  %v7878_v16 = vld [vmem:[%s9671_s1 + $0xde8] sm:$0xff]  }
 0x18e   : > { %v6946_v23 = vpop.f32.mrf.mxu0  ;;  %5672 = vmatmul.mubr.bf16.vlgmr.msra.gmra.mxu0 %v1545_v11 }
 0x18f   : > { %v6968_v24 = vpop.f32.mrf.mxu1  ;;  %5712 = vmatmul.mubr.bf16.vlgmr.msra.gmra.mxu1 %v1552_v15  ;;  %7239 = vmatpush3.bf16.msra.mxu0 %v7838_v17 }
 0x190   : > { %7261 = vmatpush3.bf16.msra.mxu1 %v7839_v19  ;;  %v6947_v27 = vpop.f32.mrf.mxu0  ;;  %7240 = vmatprep.subr.bf16.mxu0 %v7840_v20  ;;  %v7879_v19 = vld [vmem:[%s9671_s1 + $0xd28] sm:$0xff]  }
 0x191   : > { %v6969_v28 = vpop.f32.mrf.mxu1  ;;  %7262 = vmatprep.subr.bf16.mxu1 %v7841_v21  ;;  %v6948_v30 = vadd.f32 %v6947_v27, %v6946_v23  ;;  %5751 = vmatprep.mubr.bf16.mxu0 %v1570_v2  ;;  %v7882_v27 = vld [vmem:[%s9671_s1 + $0xde0] sm:$0xff]  }
 0x192   : > { %v6970_v31 = vadd.f32 %v6969_v28, %v6968_v24  ;;  %v6949_v33 = vpop.f32.mrf.mxu0  ;;  %5791 = vmatprep.mubr.bf16.mxu1 %v1571_v6  ;;  %v7881_v24 = vld [vmem:[%s9671_s1 + $0xd60] sm:$0xff]   ;;  %v7912_v6 = vld [vmem:[%s9671_s1 + $0xe28] sm:$0xff]  }
 0x193   : > { %v6971_v34 = vpop.f32.mrf.mxu1  ;;  %v5194_v36 = vadd.f32 %v6948_v30, %v9189_v55  ;;  %7241 = vmatpush3.bf16.msra.mxu0 %v7842_v22  ;;  %v7862_v55 = vld [vmem:[%s9671_s1 + $0xc08] sm:$0xff]   ;;  %v7884_v30 = vld [vmem:[%s9671_s1 + $0xda0] sm:$0xff]   ;;  %v7887_v33 = vld [vmem:[%s9671_s1 + $0xd18] sm:$0xff]  }
 0x194   : > { %7263 = vmatpush3.bf16.msra.mxu1 %v7843_v25  ;;  %v6950_v38 = vpop.f32.mrf.mxu0  ;;  %7242 = vmatprep.subr.bf16.mxu0 %v7844_v26  ;;  %v7880_v22 = vld [vmem:[%s9671_s1 + $0xda8] sm:$0xff]   ;;  %v7888_v34 = vld [vmem:[%s9671_s1 + $0xd98] sm:$0xff]  }
 0x195   : > { %v6972_v39 = vpop.f32.mrf.mxu1  ;;  %7264 = vmatprep.subr.bf16.mxu1 %v7845_v29  ;;  %v9291_v42 = vadd.f32 %v6970_v31, %v5194_v36  ;;  %v7883_v29 = vld [vmem:[%s9671_s1 + $0xd20] sm:$0xff]   ;;  %v7885_v31 = vld [vmem:[%s9671_s1 + $0xd58] sm:$0xff]   ;;  %v7890_v36 = vld [vmem:[%s9671_s1 + $0xdd0] sm:$0xff]  }
 0x196   : > { %v7892_v38 = vld [vmem:[%s9671_s1 + $0xd90] sm:$0xff]   ;;  %v7893_v39 = vld [vmem:[%s9671_s1 + $0xd48] sm:$0xff]  }
 0x197   : > { %7243 = vmatpush3.bf16.msra.mxu0 %v7846_v32  ;;  %v7886_v32 = vld [vmem:[%s9671_s1 + $0xdd8] sm:$0xff]  }
 0x198   : > { %7265 = vmatpush3.bf16.msra.mxu1 %v7847_v35  ;;  %7244 = vmatprep.subr.bf16.mxu0 %v7848_v37  ;;  %v7889_v35 = vld [vmem:[%s9671_s1 + $0xd50] sm:$0xff]  }
 0x199   : > { %7266 = vmatprep.subr.bf16.mxu1 %v7849_v40  ;;  %v7891_v37 = vld [vmem:[%s9671_s1 + $0xd10] sm:$0xff]   ;;  %v7894_v40 = vld [vmem:[%s9671_s1 + $0xdc8] sm:$0xff]  }
 0x19b   : > { %7245 = vmatpush3.bf16.msra.mxu0 %v7850_v43  ;;  %v7896_v43 = vld [vmem:[%s9671_s1 + $0xd88] sm:$0xff]  }
 0x19c   : > { %7267 = vmatpush3.bf16.msra.mxu1 %v7851_v44  ;;  %7246 = vmatprep.subr.bf16.mxu0 %v7852_v45  ;;  %v7897_v44 = vld [vmem:[%s9671_s1 + $0xd40] sm:$0xff]  }
 0x19d   : > { %7268 = vmatprep.subr.bf16.mxu1 %v7853_v46  ;;  %v7898_v45 = vld [vmem:[%s9671_s1 + $0xdc0] sm:$0xff]  }
 0x19e   : > { %v7899_v46 = vld [vmem:[%s9671_s1 + $0xd00] sm:$0xff]  }
 0x19f   : > { %7247 = vmatpush3.bf16.msra.mxu0 %v7854_v47  ;;  %v7900_v47 = vld [vmem:[%s9671_s1 + $0xd80] sm:$0xff]  }
 0x1a0   : > { %7269 = vmatpush3.bf16.msra.mxu1 %v7855_v48  ;;  %7248 = vmatprep.subr.bf16.mxu0 %v7856_v49  ;;  %v308_v48 = vld [vmem:[%s8132_s6 + $0x68] sm:$0xff] }
 0x1a1   : > { %7270 = vmatprep.subr.bf16.mxu1 %v7857_v50  ;;  %v1579_v49 = vrot.slane %v308_v48, %v8147_v41  ;;  %v1572_v50 = vcombine.high %v308_v48, %v308_v48 }
 0x1a3   : > { %7249 = vmatpush3.bf16.msra.mxu0 %v7858_v51  ;;  %v7902_v51 = vld [vmem:[%s9671_s1 + $0xe78] sm:$0xff]  }
 0x1a4   : > { %7271 = vmatpush3.bf16.msra.mxu1 %v7859_v52  ;;  %7250 = vmatprep.subr.bf16.mxu0 %v7860_v53  ;;  %v7903_v52 = vld [vmem:[%s9671_s1 + $0xef8] sm:$0xff]   ;;  %v1587_v53 = vcombine.high %v1579_v49, %v1579_v49 }
 0x1a5   : > { %7272 = vmatprep.subr.bf16.mxu1 %v7861_v54  ;;  %v1586_v54 = vrot.slane %v1572_v50, %v8147_v41  ;;  %v7942_v50 = vld [vmem:[%s9671_s1 + $0xfb0] sm:$0xff]  }
 0x1a7   : > { %7251 = vmatpush3.bf16.msra.mxu0 %v7862_v55  ;;  %v7904_v55 = vld [vmem:[%s9671_s1 + $0xe38] sm:$0xff]  }
 0x1a8   : > { %7273 = vmatpush3.bf16.msra.mxu1 %v7863_v56  ;;  %7252 = vmatprep.subr.bf16.mxu0 %v7864_v57  ;;  %v7905_v56 = vld [vmem:[%s9671_s1 + $0xeb8] sm:$0xff]   ;;  %v1588_v57 = vcombine.high %v1586_v54, %v1586_v54 }
 0x1a9   : > { %7274 = vmatprep.subr.bf16.mxu1 %v7865_v58  ;;  %v7906_v58 = vld [vmem:[%s9671_s1 + $0xe70] sm:$0xff]  }
 0x1ab   : > { %7253 = vmatpush3.bf16.msra.mxu0 %v7866_v59  ;;  %v7907_v59 = vld [vmem:[%s9671_s1 + $0xef0] sm:$0xff]  }
 0x1ac   : > { %7275 = vmatpush3.bf16.msra.mxu1 %v7867_v60  ;;  %7282 = vmatprep.subr.bf16.mxu0 %v7869_v0  ;;  %v7908_v60 = vld [vmem:[%s9671_s1 + $0xe30] sm:$0xff]   ;;  %v7910_v0 = vld [vmem:[%s9671_s1 + $0xe68] sm:$0xff]  }
 0x1ad   : > { %7304 = vmatprep.subr.bf16.mxu1 %v7870_v1 }
 0x1ae   : > { %v6990_v10 = vpop.f32.mrf.mxu0  ;;  %5752 = vmatmul.mubr.bf16.vlgmr.msra.gmra.mxu0 %v1562_v62 }
 0x1af   : > { %v7012_v11 = vpop.f32.mrf.mxu1  ;;  %5792 = vmatmul.mubr.bf16.vlgmr.msra.gmra.mxu1 %v1569_v3  ;;  %7283 = vmatpush3.bf16.msra.mxu0 %v7871_v4  ;;  %v7911_v3 = vld [vmem:[%s9671_s1 + $0xee8] sm:$0xff]  }
 0x1b0   : > { %7305 = vmatpush3.bf16.msra.mxu1 %v7872_v5  ;;  %v6991_v14 = vpop.f32.mrf.mxu0  ;;  %7284 = vmatprep.subr.bf16.mxu0 %v7873_v7 }
 0x1b1   : > { %v7013_v15 = vpop.f32.mrf.mxu1  ;;  %7306 = vmatprep.subr.bf16.mxu1 %v7874_v8  ;;  %v6992_v17 = vadd.f32 %v6991_v14, %v6990_v10  ;;  %5831 = vmatprep.mubr.bf16.mxu0 %v1587_v53  ;;  %v7915_v14 = vld [vmem:[%s9671_s1 + $0xee0] sm:$0xff]  }
 0x1b2   : > { %v7014_v18 = vadd.f32 %v7013_v15, %v7012_v11  ;;  %v6993_v20 = vpop.f32.mrf.mxu0  ;;  %5871 = vmatprep.mubr.bf16.mxu1 %v1588_v57  ;;  %v7914_v11 = vld [vmem:[%s9671_s1 + $0xe60] sm:$0xff]   ;;  %v7945_v57 = vld [vmem:[%s9671_s1 + $0xf28] sm:$0xff]  }
 0x1b3   : > { %v7015_v21 = vpop.f32.mrf.mxu1  ;;  %v5274_v23 = vadd.f32 %v6992_v17, %v9291_v42  ;;  %7285 = vmatpush3.bf16.msra.mxu0 %v7875_v9  ;;  %v7895_v42 = vld [vmem:[%s9671_s1 + $0xd08] sm:$0xff]   ;;  %v7917_v17 = vld [vmem:[%s9671_s1 + $0xea0] sm:$0xff]   ;;  %v7920_v20 = vld [vmem:[%s9671_s1 + $0xe18] sm:$0xff]  }
 0x1b4   : > { %7307 = vmatpush3.bf16.msra.mxu1 %v7876_v12  ;;  %v6994_v25 = vpop.f32.mrf.mxu0  ;;  %7286 = vmatprep.subr.bf16.mxu0 %v7877_v13  ;;  %v7913_v9 = vld [vmem:[%s9671_s1 + $0xea8] sm:$0xff]   ;;  %v7921_v21 = vld [vmem:[%s9671_s1 + $0xe98] sm:$0xff]  }
 0x1b5   : > { %v7016_v26 = vpop.f32.mrf.mxu1  ;;  %7308 = vmatprep.subr.bf16.mxu1 %v7878_v16  ;;  %v9393_v28 = vadd.f32 %v7014_v18, %v5274_v23  ;;  %v7916_v16 = vld [vmem:[%s9671_s1 + $0xe20] sm:$0xff]   ;;  %v7918_v18 = vld [vmem:[%s9671_s1 + $0xe58] sm:$0xff]   ;;  %v7923_v23 = vld [vmem:[%s9671_s1 + $0xed0] sm:$0xff]  }
 0x1b6   : > { %v7925_v25 = vld [vmem:[%s9671_s1 + $0xe90] sm:$0xff]   ;;  %v7926_v26 = vld [vmem:[%s9671_s1 + $0xe48] sm:$0xff]  }
 0x1b7   : > { %7287 = vmatpush3.bf16.msra.mxu0 %v7879_v19  ;;  %v7919_v19 = vld [vmem:[%s9671_s1 + $0xed8] sm:$0xff]  }
 0x1b8   : > { %7309 = vmatpush3.bf16.msra.mxu1 %v7880_v22  ;;  %7288 = vmatprep.subr.bf16.mxu0 %v7881_v24  ;;  %v7922_v22 = vld [vmem:[%s9671_s1 + $0xe50] sm:$0xff]  }
 0x1b9   : > { %7310 = vmatprep.subr.bf16.mxu1 %v7882_v27  ;;  %v7924_v24 = vld [vmem:[%s9671_s1 + $0xe10] sm:$0xff]   ;;  %v7927_v27 = vld [vmem:[%s9671_s1 + $0xec8] sm:$0xff]  }
 0x1bb   : > { %7289 = vmatpush3.bf16.msra.mxu0 %v7883_v29  ;;  %v7929_v29 = vld [vmem:[%s9671_s1 + $0xe88] sm:$0xff]  }
 0x1bc   : > { %7311 = vmatpush3.bf16.msra.mxu1 %v7884_v30  ;;  %7290 = vmatprep.subr.bf16.mxu0 %v7885_v31  ;;  %v7930_v30 = vld [vmem:[%s9671_s1 + $0xe40] sm:$0xff]  }
 0x1bd   : > { %7312 = vmatprep.subr.bf16.mxu1 %v7886_v32  ;;  %v7931_v31 = vld [vmem:[%s9671_s1 + $0xec0] sm:$0xff]  }
 0x1be   : > { %v7932_v32 = vld [vmem:[%s9671_s1 + $0xe00] sm:$0xff]  }
 0x1bf   : > { %7291 = vmatpush3.bf16.msra.mxu0 %v7887_v33  ;;  %v7933_v33 = vld [vmem:[%s9671_s1 + $0xe80] sm:$0xff]  }
 0x1c0   : > { %7313 = vmatpush3.bf16.msra.mxu1 %v7888_v34  ;;  %7292 = vmatprep.subr.bf16.mxu0 %v7889_v35  ;;  %v309_v34 = vld [vmem:[%s8132_s6 + $0x70] sm:$0xff] }
 0x1c1   : > { %7314 = vmatprep.subr.bf16.mxu1 %v7890_v36  ;;  %v1596_v35 = vrot.slane %v309_v34, %v8147_v41  ;;  %v1589_v36 = vcombine.high %v309_v34, %v309_v34 }
 0x1c3   : > { %7293 = vmatpush3.bf16.msra.mxu0 %v7891_v37  ;;  %v7935_v37 = vld [vmem:[%s9671_s1 + $0xf78] sm:$0xff]  }
 0x1c4   : > { %7315 = vmatpush3.bf16.msra.mxu1 %v7892_v38  ;;  %7294 = vmatprep.subr.bf16.mxu0 %v7893_v39  ;;  %v7936_v38 = vld [vmem:[%s9671_s1 + $0xff8] sm:$0xff]   ;;  %v1604_v39 = vcombine.high %v1596_v35, %v1596_v35 }
 0x1c5   : > { %7316 = vmatprep.subr.bf16.mxu1 %v7894_v40  ;;  %v1603_v40 = vrot.slane %v1589_v36, %v8147_v41 }
 0x1c7   : > { %7295 = vmatpush3.bf16.msra.mxu0 %v7895_v42  ;;  %v7937_v42 = vld [vmem:[%s9671_s1 + $0xf38] sm:$0xff]  }
 0x1c8   : > { %7317 = vmatpush3.bf16.msra.mxu1 %v7896_v43  ;;  %7296 = vmatprep.subr.bf16.mxu0 %v7897_v44  ;;  %v7938_v43 = vld [vmem:[%s9671_s1 + $0xfb8] sm:$0xff]   ;;  %v1605_v44 = vcombine.high %v1603_v40, %v1603_v40 }
 0x1c9   : > { %7318 = vmatprep.subr.bf16.mxu1 %v7898_v45  ;;  %v7939_v45 = vld [vmem:[%s9671_s1 + $0xf70] sm:$0xff]  }
 0x1cb   : > { %7297 = vmatpush3.bf16.msra.mxu0 %v7899_v46  ;;  %v7940_v46 = vld [vmem:[%s9671_s1 + $0xff0] sm:$0xff]  }
 0x1cc   : > { %7319 = vmatpush3.bf16.msra.mxu1 %v7900_v47  ;;  %7326 = vmatprep.subr.bf16.mxu0 %v7902_v51  ;;  %v7941_v47 = vld [vmem:[%s9671_s1 + $0xf30] sm:$0xff]   ;;  %v7943_v51 = vld [vmem:[%s9671_s1 + $0xf68] sm:$0xff]  }
 0x1cd   : > { %7348 = vmatprep.subr.bf16.mxu1 %v7903_v52 }
 0x1ce   : > { %v7034_v61 = vpop.f32.mrf.mxu0  ;;  %5832 = vmatmul.mubr.bf16.vlgmr.msra.gmra.mxu0 %v1579_v49 }
 0x1cf   : > { %v7056_v62 = vpop.f32.mrf.mxu1  ;;  %5872 = vmatmul.mubr.bf16.vlgmr.msra.gmra.mxu1 %v1586_v54  ;;  %7327 = vmatpush3.bf16.msra.mxu0 %v7904_v55  ;;  %v7944_v54 = vld [vmem:[%s9671_s1 + $0xfe8] sm:$0xff]  }
 0x1d0   : > { %7349 = vmatpush3.bf16.msra.mxu1 %v7905_v56  ;;  %v7035_v1 = vpop.f32.mrf.mxu0  ;;  %7328 = vmatprep.subr.bf16.mxu0 %v7906_v58 }
 0x1d1   : > { %v7057_v2 = vpop.f32.mrf.mxu1  ;;  %7350 = vmatprep.subr.bf16.mxu1 %v7907_v59  ;;  %v7036_v4 = vadd.f32 %v7035_v1, %v7034_v61  ;;  %5911 = vmatprep.mubr.bf16.mxu0 %v1604_v39  ;;  %v7948_v1 = vld [vmem:[%s9671_s1 + $0xfe0] sm:$0xff]  }
 0x1d2   : > { %v7058_v5 = vadd.f32 %v7057_v2, %v7056_v62  ;;  %v7037_v7 = vpop.f32.mrf.mxu0  ;;  %5951 = vmatprep.mubr.bf16.mxu1 %v1605_v44  ;;  %v7947_v62 = vld [vmem:[%s9671_s1 + $0xf60] sm:$0xff]  }
 0x1d3   : > { %v7059_v8 = vpop.f32.mrf.mxu1  ;;  %v5354_v10 = vadd.f32 %v7036_v4, %v9393_v28  ;;  %7329 = vmatpush3.bf16.msra.mxu0 %v7908_v60  ;;  %v7928_v28 = vld [vmem:[%s9671_s1 + $0xe08] sm:$0xff]   ;;  %v7950_v4 = vld [vmem:[%s9671_s1 + $0xfa0] sm:$0xff]   ;;  %v7953_v7 = vld [vmem:[%s9671_s1 + $0xf18] sm:$0xff]  }
 0x1d4   : > { %7351 = vmatpush3.bf16.msra.mxu1 %v7909_v63  ;;  %v7038_v12 = vpop.f32.mrf.mxu0  ;;  %7330 = vmatprep.subr.bf16.mxu0 %v7910_v0  ;;  %v7946_v60 = vld [vmem:[%s9671_s1 + $0xfa8] sm:$0xff]   ;;  %v7954_v8 = vld [vmem:[%s9671_s1 + $0xf98] sm:$0xff]  }
 0x1d5   : > { %v7060_v13 = vpop.f32.mrf.mxu1  ;;  %7352 = vmatprep.subr.bf16.mxu1 %v7911_v3  ;;  %v9495_v15 = vadd.f32 %v7058_v5, %v5354_v10  ;;  %v7949_v3 = vld [vmem:[%s9671_s1 + $0xf20] sm:$0xff]   ;;  %v7951_v5 = vld [vmem:[%s9671_s1 + $0xf58] sm:$0xff]   ;;  %v7956_v10 = vld [vmem:[%s9671_s1 + $0xfd0] sm:$0xff]  }
 0x1d6   : > { %v7958_v12 = vld [vmem:[%s9671_s1 + $0xf90] sm:$0xff]   ;;  %v7959_v13 = vld [vmem:[%s9671_s1 + $0xf48] sm:$0xff]  }
 0x1d7   : > { %7331 = vmatpush3.bf16.msra.mxu0 %v7912_v6  ;;  %v7952_v6 = vld [vmem:[%s9671_s1 + $0xfd8] sm:$0xff]  }
 0x1d8   : > { %7353 = vmatpush3.bf16.msra.mxu1 %v7913_v9  ;;  %7332 = vmatprep.subr.bf16.mxu0 %v7914_v11  ;;  %v7955_v9 = vld [vmem:[%s9671_s1 + $0xf50] sm:$0xff]  }
 0x1d9   : > { %7354 = vmatprep.subr.bf16.mxu1 %v7915_v14  ;;  %v7957_v11 = vld [vmem:[%s9671_s1 + $0xf10] sm:$0xff]   ;;  %v7960_v14 = vld [vmem:[%s9671_s1 + $0xfc8] sm:$0xff]  }
 0x1db   : > { %7333 = vmatpush3.bf16.msra.mxu0 %v7916_v16  ;;  %v7962_v16 = vld [vmem:[%s9671_s1 + $0xf88] sm:$0xff]  }
 0x1dc   : > { %7355 = vmatpush3.bf16.msra.mxu1 %v7917_v17  ;;  %7334 = vmatprep.subr.bf16.mxu0 %v7918_v18  ;;  %v7963_v17 = vld [vmem:[%s9671_s1 + $0xf40] sm:$0xff]  }
 0x1dd   : > { %7356 = vmatprep.subr.bf16.mxu1 %v7919_v19  ;;  %v7964_v18 = vld [vmem:[%s9671_s1 + $0xfc0] sm:$0xff]  }
 0x1de   : > { %v7965_v19 = vld [vmem:[%s9671_s1 + $0xf00] sm:$0xff]  }
 0x1df   : > { %7335 = vmatpush3.bf16.msra.mxu0 %v7920_v20  ;;  %v7966_v20 = vld [vmem:[%s9671_s1 + $0xf80] sm:$0xff]  }
 0x1e0   : > { %7357 = vmatpush3.bf16.msra.mxu1 %v7921_v21  ;;  %7336 = vmatprep.subr.bf16.mxu0 %v7922_v22  ;;  %v310_v21 = vld [vmem:[%s8132_s6 + $0x78] sm:$0xff]  ;;  %s6193_s6 = sshll.u32 %s9679_s12, 2 }
 0x1e1   : > { %7358 = vmatprep.subr.bf16.mxu1 %v7923_v23  ;;  %v1613_v22 = vrot.slane %v310_v21, %v8147_v41  ;;  %v1606_v23 = vcombine.high %v310_v21, %v310_v21  ;;  %s287_s7 = scalar_lea.vmem %s9673_s3, %s6193_s6 }
 0x1e3   : > { %7337 = vmatpush3.bf16.msra.mxu0 %v7924_v24  ;;  %v1621_v24 = vcombine.high %v1613_v22, %v1613_v22 }
 0x1e4   : > { %7359 = vmatpush3.bf16.msra.mxu1 %v7925_v25  ;;  %7338 = vmatprep.subr.bf16.mxu0 %v7926_v26  ;;  %v1620_v25 = vrot.slane %v1606_v23, %v8147_v41 }
 0x1e5   : > { %7360 = vmatprep.subr.bf16.mxu1 %v7927_v27 }
 0x1e6   : > { %v1622_v26 = vcombine.high %v1620_v25, %v1620_v25 }
 0x1e7   : > { %7339 = vmatpush3.bf16.msra.mxu0 %v7928_v28 }
 0x1e8   : > { %7361 = vmatpush3.bf16.msra.mxu1 %v7929_v29  ;;  %7340 = vmatprep.subr.bf16.mxu0 %v7930_v30 }
 0x1e9   : > { %7362 = vmatprep.subr.bf16.mxu1 %v7931_v31 }
 0x1eb   : > { %7341 = vmatpush3.bf16.msra.mxu0 %v7932_v32 }
 0x1ec   : > { %7363 = vmatpush3.bf16.msra.mxu1 %v7933_v33  ;;  %7370 = vmatprep.subr.bf16.mxu0 %v7935_v37 }
 0x1ed   : > { %7392 = vmatprep.subr.bf16.mxu1 %v7936_v38 }
 0x1ee   : > { %v7078_v48 = vpop.f32.mrf.mxu0  ;;  %5912 = vmatmul.mubr.bf16.vlgmr.msra.gmra.mxu0 %v1596_v35 }
 0x1ef   : > { %v7100_v49 = vpop.f32.mrf.mxu1  ;;  %5952 = vmatmul.mubr.bf16.vlgmr.msra.gmra.mxu1 %v1603_v40  ;;  %7371 = vmatpush3.bf16.msra.mxu0 %v7937_v42 }
 0x1f0   : > { %7393 = vmatpush3.bf16.msra.mxu1 %v7938_v43  ;;  %v7079_v52 = vpop.f32.mrf.mxu0  ;;  %7372 = vmatprep.subr.bf16.mxu0 %v7939_v45 }
 0x1f1   : > { %v7101_v53 = vpop.f32.mrf.mxu1  ;;  %7394 = vmatprep.subr.bf16.mxu1 %v7940_v46  ;;  %v7080_v55 = vadd.f32 %v7079_v52, %v7078_v48  ;;  %5991 = vmatprep.mubr.bf16.mxu0 %v1621_v24 }
 0x1f2   : > { %v7102_v56 = vadd.f32 %v7101_v53, %v7100_v49  ;;  %v7081_v58 = vpop.f32.mrf.mxu0  ;;  %6031 = vmatprep.mubr.bf16.mxu1 %v1622_v26 }
 0x1f3   : > { %v7103_v59 = vpop.f32.mrf.mxu1  ;;  %v5434_v61 = vadd.f32 %v7080_v55, %v9495_v15  ;;  %7373 = vmatpush3.bf16.msra.mxu0 %v7941_v47  ;;  %v7961_v15 = vld [vmem:[%s9671_s1 + $0xf08] sm:$0xff]   ;;  %v7993_v55 = vmov 0.0  }
 0x1f4   : > { %7395 = vmatpush3.bf16.msra.mxu1 %v7942_v50  ;;  %v7082_v63 = vpop.f32.mrf.mxu0  ;;  %7374 = vmatprep.subr.bf16.mxu0 %v7943_v51  ;;  %293 = vst [vmem:[#allocation2] sm:$0xf] %v7993_v55 }
 0x1f5   : > { %v7104_v0 = vpop.f32.mrf.mxu1  ;;  %7396 = vmatprep.subr.bf16.mxu1 %v7944_v54  ;;  %v5474_v2 = vadd.f32 %v7102_v56, %v5434_v61 }
 0x1f7   : > { %7375 = vmatpush3.bf16.msra.mxu0 %v7945_v57 }
 0x1f8   : > { %7397 = vmatpush3.bf16.msra.mxu1 %v7946_v60  ;;  %7376 = vmatprep.subr.bf16.mxu0 %v7947_v62 }
 0x1f9   : > { %7398 = vmatprep.subr.bf16.mxu1 %v7948_v1 }
 0x1fb   : > { %7377 = vmatpush3.bf16.msra.mxu0 %v7949_v3 }
 0x1fc   : > { %7399 = vmatpush3.bf16.msra.mxu1 %v7950_v4  ;;  %7378 = vmatprep.subr.bf16.mxu0 %v7951_v5 }
 0x1fd   : > { %7400 = vmatprep.subr.bf16.mxu1 %v7952_v6 }
 0x1ff   : > { %7379 = vmatpush3.bf16.msra.mxu0 %v7953_v7 }
 0x200   : > { %7401 = vmatpush3.bf16.msra.mxu1 %v7954_v8  ;;  %7380 = vmatprep.subr.bf16.mxu0 %v7955_v9 }
 0x201   : > { %7402 = vmatprep.subr.bf16.mxu1 %v7956_v10 }
 0x203   : > { %7381 = vmatpush3.bf16.msra.mxu0 %v7957_v11 }
 0x204   : > { %7403 = vmatpush3.bf16.msra.mxu1 %v7958_v12  ;;  %7382 = vmatprep.subr.bf16.mxu0 %v7959_v13 }
 0x205   : > { %7404 = vmatprep.subr.bf16.mxu1 %v7960_v14 }
 0x207   : > { %7383 = vmatpush3.bf16.msra.mxu0 %v7961_v15 }
 0x208   : > { %7405 = vmatpush3.bf16.msra.mxu1 %v7962_v16  ;;  %7384 = vmatprep.subr.bf16.mxu0 %v7963_v17 }
 0x209   : > { %7406 = vmatprep.subr.bf16.mxu1 %v7964_v18 }
 0x20b   : > { %7385 = vmatpush3.bf16.msra.mxu0 %v7965_v19 }
 0x20c   : > { %7407 = vmatpush3.bf16.msra.mxu1 %v7966_v20 }
 0x20e   : > { %v7122_v27 = vpop.f32.mrf.mxu0  ;;  %5992 = vmatmul.mubr.bf16.vlgmr.msra.gmra.mxu0 %v1613_v22 }
 0x20f   : > { %v7144_v28 = vpop.f32.mrf.mxu1  ;;  %6032 = vmatmul.mubr.bf16.vlgmr.msra.gmra.mxu1 %v1620_v25 }
 0x210   : > { %v7123_v29 = vpop.f32.mrf.mxu0 }
 0x211   : > { %v7145_v30 = vpop.f32.mrf.mxu1  ;;  %v7124_v31 = vadd.f32 %v7123_v29, %v7122_v27 }
 0x212   : > { %v7146_v32 = vadd.f32 %v7145_v30, %v7144_v28  ;;  %v7125_v33 = vpop.f32.mrf.mxu0 }
 0x213   : > { %v7147_v34 = vpop.f32.mrf.mxu1  ;;  %v5514_v35 = vadd.f32 %v7124_v31, %v5474_v2 }
 0x214   : > { %v7126_v36 = vpop.f32.mrf.mxu0 }
 0x215   : > { %v7148_v37 = vpop.f32.mrf.mxu1  ;;  %v5554_v38 = vadd.f32 %v7146_v32, %v5514_v35 }
 0x22e   : > { %v7166_v41 = vpop.f32.mrf.mxu0 }
 0x22f   : > { %v7188_v39 = vpop.f32.mrf.mxu1 }
 0x230   : > { %v7167_v40 = vpop.f32.mrf.mxu0 }
 0x231   : > { %v7189_v42 = vpop.f32.mrf.mxu1  ;;  %v7168_v43 = vadd.f32 %v7167_v40, %v7166_v41 }
 0x232   : > { %v7190_v44 = vadd.f32 %v7189_v42, %v7188_v39  ;;  %v7169_v45 = vpop.f32.mrf.mxu0 }
 0x233   : > { %v7191_v46 = vpop.f32.mrf.mxu1  ;;  %v5594_v47 = vadd.f32 %v7168_v43, %v5554_v38  ;;  %v294_v45 = vld [vmem:[#allocation2] sm:$0xf] }
 0x234   : > { %v7170_v48 = vpop.f32.mrf.mxu0 }
 0x235   : > { %v7192_v49 = vpop.f32.mrf.mxu1  ;;  %v5634_v50 = vadd.f32 %v7190_v44, %v5594_v47 }
 0x24e   : > { %v7210_v51 = vpop.f32.mrf.mxu0 }
 0x24f   : > { %v7232_v52 = vpop.f32.mrf.mxu1 }
 0x250   : > { %v7211_v53 = vpop.f32.mrf.mxu0 }
 0x251   : > { %v7233_v54 = vpop.f32.mrf.mxu1  ;;  %v7212_v56 = vadd.f32 %v7211_v53, %v7210_v51 }
 0x252   : > { %v7234_v57 = vadd.f32 %v7233_v54, %v7232_v52  ;;  %v7213_v58 = vpop.f32.mrf.mxu0 }
 0x253   : > { %v7235_v59 = vpop.f32.mrf.mxu1  ;;  %v5674_v60 = vadd.f32 %v7212_v56, %v5634_v50  ;;  %v6706_v50 = vld [vmem:[%s9672_s2] ss:$0 sm:$0xff] }
 0x254   : > { %v7214_v61 = vpop.f32.mrf.mxu0 }
 0x255   : > { %v7236_v62 = vpop.f32.mrf.mxu1  ;;  %v5714_v63 = vadd.f32 %v7234_v57, %v5674_v60 }
 0x26e   : > { %v7254_v0 = vpop.f32.mrf.mxu0 }
 0x26f   : > { %v7276_v1 = vpop.f32.mrf.mxu1 }
 0x270   : > { %v7255_v2 = vpop.f32.mrf.mxu0 }
 0x271   : > { %v7277_v3 = vpop.f32.mrf.mxu1  ;;  %v7256_v4 = vadd.f32 %v7255_v2, %v7254_v0 }
 0x272   : > { %v7278_v5 = vadd.f32 %v7277_v3, %v7276_v1  ;;  %v7257_v6 = vpop.f32.mrf.mxu0 }
 0x273   : > { %v7279_v7 = vpop.f32.mrf.mxu1  ;;  %v5754_v8 = vadd.f32 %v7256_v4, %v5714_v63 }
 0x274   : > { %v7258_v9 = vpop.f32.mrf.mxu0 }
 0x275   : > { %v7280_v10 = vpop.f32.mrf.mxu1  ;;  %v5794_v11 = vadd.f32 %v7278_v5, %v5754_v8 }
 0x28e   : > { %v7298_v12 = vpop.f32.mrf.mxu0 }
 0x28f   : > { %v7320_v13 = vpop.f32.mrf.mxu1 }
 0x290   : > { %v7299_v14 = vpop.f32.mrf.mxu0 }
 0x291   : > { %v7321_v15 = vpop.f32.mrf.mxu1  ;;  %v7300_v28 = vadd.f32 %v7299_v14, %v7298_v12 }
 0x292   : > { %v7301_v16 = vpop.f32.mrf.mxu0  ;;  %v7322_v30 = vadd.f32 %v7321_v15, %v7320_v13 }
 0x293   : > { %v7323_v17 = vpop.f32.mrf.mxu1  ;;  %v5834_v29 = vadd.f32 %v7300_v28, %v5794_v11 }
 0x294   : > { %v7302_v18 = vpop.f32.mrf.mxu0 }
 0x295   : > { %v7324_v19 = vpop.f32.mrf.mxu1  ;;  %v5874_v32 = vadd.f32 %v7322_v30, %v5834_v29 }
 0x2ae   : > { %v7342_v20 = vpop.f32.mrf.mxu0 }
 0x2af   : > { %v7364_v21 = vpop.f32.mrf.mxu1 }
 0x2b0   : > { %v7343_v22 = vpop.f32.mrf.mxu0 }
 0x2b1   : > { %v7365_v23 = vpop.f32.mrf.mxu1  ;;  %v7344_v31 = vadd.f32 %v7343_v22, %v7342_v20 }
 0x2b2   : > { %v7345_v24 = vpop.f32.mrf.mxu0  ;;  %v7366_v34 = vadd.f32 %v7365_v23, %v7364_v21 }
 0x2b3   : > { %v7367_v25 = vpop.f32.mrf.mxu1  ;;  %v5914_v33 = vadd.f32 %v7344_v31, %v5874_v32 }
 0x2b4   : > { %v7346_v26 = vpop.f32.mrf.mxu0 }
 0x2b5   : > { %v7368_v27 = vpop.f32.mrf.mxu1  ;;  %v5954_v38 = vadd.f32 %v7366_v34, %v5914_v33 }
 0x2ce   : > { %v7386_v35 = vpop.f32.mrf.mxu0 }
 0x2cf   : > { %v7408_v36 = vpop.f32.mrf.mxu1 }
 0x2d0   : > { %v7387_v37 = vpop.f32.mrf.mxu0 }
 0x2d1   : > { %v7388_v41 = vadd.f32 %v7387_v37, %v7386_v35  ;;  %v7409_v39 = vpop.f32.mrf.mxu1 }
 0x2d2   : > { %v7389_v40 = vpop.f32.mrf.mxu0  ;;  %v7410_v43 = vadd.f32 %v7409_v39, %v7408_v36 }
 0x2d3   : > { %v5994_v42 = vadd.f32 %v7388_v41, %v5954_v38  ;;  %v7411_v44 = vpop.f32.mrf.mxu1 }
 0x2d4   : > { %v7390_v46 = vpop.f32.mrf.mxu0 }
 0x2d5   : > { %v6034_v47 = vadd.f32 %v7410_v43, %v5994_v42  ;;  %v7412_v48 = vpop.f32.mrf.mxu1 }
 0x2d7   : > { %v6039_v49 = vadd.f32 %v6034_v47, %v294_v45 }
 0x2d9   : > { %6040 = vst [vmem:[#allocation2] sm:$0xf] %v6039_v49 }
 0x2e0   : > { %v6044_v51 = vld [vmem:[#allocation2] sm:$0xf] }
 0x2e1   : > { %v6052_v52 = vadd.f32 %v6706_v50, %v6044_v51 }
 0x2e3   : > { %6053 = vst [vmem:[%s287_s7] sm:$0xf] %v6052_v52 }
 0x2e4 PF: > { %s13_s14 = sadd.s32 1, %s7990_s14   ;;  %s9674_s12 = smov %s7986_s13 }
 0x2e5   : > { %p10_p5 = scmp.ge.s32.totalorder %s13_s14, 4   ;;  %s9675_s13 = smov %s9677_s15 }
 0x2e7   :  { %12 = sbr.rel (!%p10_p5) target bundleno = 2 (0x2), region = 76 }

</bundles_post_ra>
